<compile_context>
chip_gen: v7x
topology: tpu7x:2x2x1
jax: 0.10.0
libtpu: 0.0.40
codegen_flags: <defaults>
</compile_context>

<pallas_src>
import math

import jax
import jax.numpy as jnp
from jax.experimental import pallas as pl
from jax.experimental.pallas import tpu as pltpu

EPS = 1e-5
_LANE = 128


# ----------------------------------------------------------------------------
# small helpers
# ----------------------------------------------------------------------------
def _cdiv(a, b):
    return (a + b - 1) // b


def _round_up(a, m):
    return _cdiv(a, m) * m


def _bf16_vmem(*dims):
    """Layout-padded VMEM bytes of a bf16 array ((16,128) trailing-dim tiling)."""
    *lead, a, b = dims
    return math.prod(lead) * _round_up(a, 16) * _round_up(b, _LANE) * 2


def _f32_vmem(*dims):
    """Layout-padded VMEM bytes of an f32 array ((8,128) trailing-dim tiling)."""
    *lead, a, b = dims
    return math.prod(lead) * _round_up(a, 8) * _round_up(b, _LANE) * 4


def _vmem_budget():
    """(per-kernel working-set target, vmem_limit_bytes), generation-aware."""
    cap = 64 * 1024 * 1024
    try:
        info = pltpu.get_tpu_info()
        cap = int(getattr(info, "vmem_capacity_bytes", cap) or cap)
    except Exception:
        pass
    if cap >= 100 * 1024 * 1024:                 # v5e / v6e: 128 MiB physical VMEM
        return 32 * 1024 * 1024, 100 * 1024 * 1024
    return 16 * 1024 * 1024, 56 * 1024 * 1024    # v7x: 64 MiB physical VMEM


def _pick_frame_tile(nt, hp, wp, cin, ho, wo, cp1, khkw, workset):
    """Frames per spatial-kernel grid step (must divide nt; no frame padding)."""
    sp = ho * wo
    k_dim = khkw * cin
    best = 1
    for ft in range(1, nt + 1):
        if nt % ft:
            continue
        rows = ft * sp
        est = (2 * _bf16_vmem(ft, hp, wp, cin)        # double-buffered input block
               + 2 * _bf16_vmem(ft, sp, cp1)          # double-buffered output block
               + _bf16_vmem(rows, k_dim)              # im2col LHS temporary
               + khkw * _bf16_vmem(ft, ho, wo, cin)   # tap-slice temporaries (upper bound)
               + _f32_vmem(rows, cp1)                 # f32 matmul result
               + _bf16_vmem(k_dim, cp1)               # resident weights
               + 2 * _f32_vmem(2, cp1))               # stats blocks
        if est <= workset and rows <= 16384:
            best = ft
    return best


def _pick_spatial_tile(sp, t, pt, to, kt, cp1, cp2, workset):
    """Spatial rows per temporal-kernel grid step."""
    tp = t + 2 * pt

    def est(stile):
        rows = to * stile
        return (2 * _bf16_vmem(1, t, stile, cp1)      # double-buffered input block
                + _bf16_vmem(tp, stile, cp1)          # xbn scratch (BN1+ReLU + halo)
                + _f32_vmem(t, stile, cp1)            # f32 BN temporaries
                + _bf16_vmem(rows, kt * cp1)          # im2col LHS temporary
                + _f32_vmem(rows, cp2)                # f32 matmul result
                + 2 * _bf16_vmem(1, to, stile, cp2)   # double-buffered output block
                + _bf16_vmem(kt * cp1, cp2))          # resident weights

    if sp <= 8 or est(sp) <= workset:
        return sp                                     # whole spatial extent per step
    best, m = 8, 16
    while m <= sp and est(m) <= workset:
        best, m = m, m + 8
    return best


# ----------------------------------------------------------------------------
# Pallas kernels
# ----------------------------------------------------------------------------
def _make_spatial_kernel(kh, kw, sh, sw, ho, wo, ft, cin):
    rows = ft * ho * wo
    k_dim = kh * kw * cin
    strided = (sh != 1) or (sw != 1)

    def kernel(x_ref, w_ref, y_ref, stats_ref):
        # In-kernel im2col: gather the kh*kw taps into one (rows, K) bf16 LHS
        # and contract them in a single MXU matmul with f32 accumulation.
        xv = x_ref[...] if strided else None
        taps = []
        for di in range(kh):
            for dj in range(kw):
                if strided:
                    # TODO(synk): stride>1 slices a loaded value (demo uses stride 1).
                    taps.append(jax.lax.slice(
                        xv, (0, di, dj, 0),
                        (ft, di + (ho - 1) * sh + 1, dj + (wo - 1) * sw + 1, cin),
                        (1, sh, sw, 1)))
                else:
                    taps.append(x_ref[:, di:di + ho, dj:dj + wo, :])
        lhs = jnp.concatenate(taps, axis=-1).reshape(rows, k_dim)
        acc = jnp.dot(lhs, w_ref[...], preferred_element_type=jnp.float32)
        y_ref[...] = acc.reshape(y_ref.shape).astype(y_ref.dtype)
        # Per-tile BN partial statistics (host-reduced), written as two
        # sub-slice stores (no concatenate / relayout temporary).
        stats_ref[:, 0:1, :] = jnp.sum(acc, axis=0, keepdims=True).reshape(1, 1, -1)
        stats_ref[:, 1:2, :] = jnp.sum(acc * acc, axis=0, keepdims=True).reshape(1, 1, -1)

    return kernel


def _make_temporal_kernel(kt, st, to, t, pt, sp, sp_tile, cp1, cp2):
    tp = t + 2 * pt
    rows = to * sp_tile

    def kernel(x_ref, w_ref, scale_ref, shift_ref, y_ref, stats_ref, xbn_ref):
        s_idx = pl.program_id(1)

        # Fused BN1 + ReLU on the (bf16) spatial-conv output tile.
        xb = x_ref[0].astype(jnp.float32)                       # (t, sp_tile, cp1)
        xbn = jnp.maximum(xb * scale_ref[...] + shift_ref[...], 0.0)

        # Zero rows past the real spatial extent (a partial last tile reads
        # garbage): in-kernel iota compare + select, no HBM mask stream.
        col = jax.lax.broadcasted_iota(jnp.int32, (1, sp_tile, 1), 1)
        xbn = jnp.where(s_idx * sp_tile + col < sp, xbn, 0.0)

        # Temporal zero-padding halo lives only in the VMEM scratch.
        if pt > 0:
            halo = jnp.zeros((pt, sp_tile, cp1), jnp.bfloat16)
            xbn_ref[0:pt] = halo
            xbn_ref[pt + t:tp] = halo
        xbn_ref[pt:pt + t] = xbn.astype(jnp.bfloat16)

        # Single im2col matmul over the kt temporal taps (K = kt*cp1).
        taps = []
        for dt in range(kt):
            if st == 1:
                taps.append(xbn_ref[dt:dt + to])
            else:
                # TODO(synk): temporal stride>1 falls back to a strided value slice.
                taps.append(jax.lax.slice(
                    xbn_ref[...], (dt, 0, 0),
                    (dt + (to - 1) * st + 1, sp_tile, cp1), (st, 1, 1)))
        lhs = jnp.concatenate(taps, axis=-1).reshape(rows, kt * cp1)
        acc = jnp.dot(lhs, w_ref[...], preferred_element_type=jnp.float32)
        y_ref[...] = acc.reshape(y_ref.shape).astype(y_ref.dtype)
        stats_ref[:, :, 0:1, :] = jnp.sum(acc, axis=0, keepdims=True).reshape(1, 1, 1, -1)
        stats_ref[:, :, 1:2, :] = jnp.sum(acc * acc, axis=0, keepdims=True).reshape(1, 1, 1, -1)

    return kernel


# ----------------------------------------------------------------------------
# pallas_call wrappers
# ----------------------------------------------------------------------------
def _spatial_conv(xp, w1, *, kh, kw, sh, sw, ho, wo, ft, vmem_limit,
                  out_dtype=jnp.bfloat16):
    """xp: (N*T, Hp, Wp, Cin) bf16; w1: (kh*kw*Cin, Cp1) bf16."""
    ntf, hp, wp, cin = xp.shape
    k_dim, cp1 = w1.shape
    g = ntf // ft
    sp = ho * wo
    kernel = _make_spatial_kernel(kh, kw, sh, sw, ho, wo, ft, cin)
    # TODO(synk): on v5e/v6e the activation input could use pipeline_mode=
    # pl.Buffered(3) to hide DMA start latency once tuned per generation.
    return pl.pallas_call(
        kernel,
        out_shape=(
            jax.ShapeDtypeStruct((ntf, sp, cp1), out_dtype),
            jax.ShapeDtypeStruct((g, 2, cp1), jnp.float32),
        ),
        grid_spec=pltpu.PrefetchScalarGridSpec(
            num_scalar_prefetch=0,
            grid=(g,),
            in_specs=[
                pl.BlockSpec((ft, hp, wp, cin), lambda i: (i, 0, 0, 0)),
                pl.BlockSpec((k_dim, cp1), lambda i: (0, 0)),
            ],
            out_specs=(
                pl.BlockSpec((ft, sp, cp1), lambda i: (i, 0, 0)),
                pl.BlockSpec((1, 2, cp1), lambda i: (i, 0, 0)),
            ),
        ),
        compiler_params=pltpu.CompilerParams(
            dimension_semantics=("parallel",),
            vmem_limit_bytes=vmem_limit,
        ),
    )(xp, w1)


def _temporal_conv(h, w2, scale1, shift1, *, kt, st, to, t, pt, sp, sp_tile,
                   vmem_limit, out_dtype=jnp.bfloat16):
    """h: (N, T, Sp, Cp1) bf16; w2: (kt*Cp1, Cp2) bf16; scale/shift: (1,1,Cp1) f32."""
    n = h.shape[0]
    cp1 = h.shape[3]
    cp2 = w2.shape[1]
    nst = _cdiv(sp, sp_tile)
    kernel = _make_temporal_kernel(kt, st, to, t, pt, sp, sp_tile, cp1, cp2)
    return pl.pallas_call(
        kernel,
        out_shape=(
            jax.ShapeDtypeStruct((n, to, sp, cp2), out_dtype),
            jax.ShapeDtypeStruct((n, nst, 2, cp2), jnp.float32),
        ),
        grid_spec=pltpu.PrefetchScalarGridSpec(
            num_scalar_prefetch=0,
            grid=(n, nst),
            in_specs=[
                pl.BlockSpec((1, t, sp_tile, cp1), lambda b, s: (b, 0, s, 0)),
                pl.BlockSpec((kt * cp1, cp2), lambda b, s: (0, 0)),
                pl.BlockSpec((1, 1, cp1), lambda b, s: (0, 0, 0)),
                pl.BlockSpec((1, 1, cp1), lambda b, s: (0, 0, 0)),
            ],
            out_specs=(
                pl.BlockSpec((1, to, sp_tile, cp2), lambda b, s: (b, 0, s, 0)),
                pl.BlockSpec((1, 1, 2, cp2), lambda b, s: (b, s, 0, 0)),
            ),
            scratch_shapes=[pltpu.VMEM((t + 2 * pt, sp_tile, cp1), jnp.bfloat16)],
        ),
        compiler_params=pltpu.CompilerParams(
            dimension_semantics=("parallel", "parallel"),
            vmem_limit_bytes=vmem_limit,
        ),
    )(h, w2, scale1, shift1)


# ----------------------------------------------------------------------------
# SpatioTemporalConv module (parameters + forward)
# ----------------------------------------------------------------------------
def _triple(v):
    return (v, v, v) if isinstance(v, int) else tuple(v)


def init_spatio_temporal_conv(key, in_channels, out_channels, kernel_size,
                              stride, padding):
    k = _triple(kernel_size)
    s = _triple(stride)
    p = _triple(padding)
    kt, kh, kw = k
    intermed = int(math.floor(
        kt * kh * kw * in_channels * out_channels
        / (kh * kw * in_channels + kt * out_channels)))
    k1, k2 = jax.random.split(key)
    # PyTorch Conv3d default init: U(-1/sqrt(fan_in), 1/sqrt(fan_in)).
    # Conv biases are omitted: a bias added before training-mode BatchNorm is
    # exactly cancelled by the mean subtraction, so the forward is identical.
    b1 = 1.0 / math.sqrt(in_channels * kh * kw)
    w_sp = jax.random.uniform(k1, (kh, kw, in_channels, intermed),
                              jnp.float32, -b1, b1)
    b2 = 1.0 / math.sqrt(intermed * kt)
    w_tm = jax.random.uniform(k2, (kt, intermed, out_channels),
                              jnp.float32, -b2, b2)
    params = dict(
        w_sp=w_sp, w_tm=w_tm,
        gamma_sp=jnp.ones((intermed,), jnp.float32),
        beta_sp=jnp.zeros((intermed,), jnp.float32),
        gamma_tm=jnp.ones((out_channels,), jnp.float32),
        beta_tm=jnp.zeros((out_channels,), jnp.float32),
    )
    cfg = dict(k=k, s=s, p=p, intermed=intermed, out_channels=out_channels)
    return params, cfg


def spatio_temporal_conv_forward(params, cfg, x_ncthw):
    """x_ncthw: (N, C_in, T, H, W) f32 -> (N, C_out, To, Ho, Wo) f32."""
    kt, kh, kw = cfg["k"]
    st, sh, sw = cfg["s"]
    pt, ph, pw = cfg["p"]
    cmid, cout = cfg["intermed"], cfg["out_channels"]
    n, cin, t, hh, ww = x_ncthw.shape
    ho = (hh + 2 * ph - kh) // sh + 1
    wo = (ww + 2 * pw - kw) // sw + 1
    to = (t + 2 * pt - kt) // st + 1
    sp = ho * wo
    cp1 = _round_up(cmid, _LANE)
    cp2 = _round_up(cout, _LANE)
    # TODO(synk): on v6e/v7x (2x256^2 MXUs) rounding K/N to 256 when the real
    # channel counts warrant it is left to per-generation tuning.
    workset, vmem_limit = _vmem_budget()

    # ------------ spatial 1 x kh x kw conv (+ BN1 partial statistics) ------------
    # bf16 activation in HBM: the MXU operands are bf16 anyway, halves traffic.
    x = jnp.transpose(x_ncthw, (0, 2, 3, 4, 1)).astype(jnp.bfloat16)
    xp = jnp.pad(x, ((0, 0), (0, 0), (ph, ph), (pw, pw), (0, 0)))
    hp_, wp_ = hh + 2 * ph, ww + 2 * pw
    xp = xp.reshape(n * t, hp_, wp_, cin)

    ft = _pick_frame_tile(n * t, hp_, wp_, cin, ho, wo, cp1, kh * kw, workset)

    # im2col weight layout: row (di*kw + dj)*cin + c  ->  K = kh*kw*cin.
    w1 = jnp.pad(params["w_sp"], ((0, 0), (0, 0), (0, 0), (0, cp1 - cmid)))
    w1 = w1.reshape(kh * kw * cin, cp1).astype(jnp.bfloat16)

    y1, stats1 = _spatial_conv(xp, w1, kh=kh, kw=kw, sh=sh, sw=sw, ho=ho, wo=wo,
                               ft=ft, vmem_limit=vmem_limit)

    # BN1 scale/shift from batch statistics (training mode, biased variance).
    # TODO(synk): E[x^2]-E[x]^2 in f32 can cancel for extreme |mean|/std.
    m1 = n * t * sp
    tot1 = jnp.sum(stats1, axis=0)                   # (2, Cp1)
    mean1 = tot1[0] / m1
    var1 = jnp.maximum(tot1[1] / m1 - mean1 * mean1, 0.0)
    g1 = jnp.pad(params["gamma_sp"], (0, cp1 - cmid), constant_values=1.0)
    be1 = jnp.pad(params["beta_sp"], (0, cp1 - cmid))
    sc1 = g1 * jax.lax.rsqrt(var1 + EPS)
    scale1 = sc1.reshape(1, 1, cp1)
    shift1 = (be1 - mean1 * sc1).reshape(1, 1, cp1)

    # -------- temporal kt x 1 x 1 conv (BN1 + ReLU fused on the input read) --------
    h = y1.reshape(n, t, sp, cp1)                    # free reshape, no copy
    sp_tile = _pick_spatial_tile(sp, t, pt, to, kt, cp1, cp2, workset)

    w2 = jnp.pad(params["w_tm"], ((0, 0), (0, cp1 - cmid), (0, cp2 - cout)))
    w2 = w2.reshape(kt * cp1, cp2).astype(jnp.bfloat16)

    y2, stats2 = _temporal_conv(h, w2, scale1, shift1, kt=kt, st=st, to=to,
                                t=t, pt=pt, sp=sp, sp_tile=sp_tile,
                                vmem_limit=vmem_limit)

    # -------- BN2 + ReLU + channel crop + transpose: plain jnp (XLA fuses) --------
    m2 = n * to * sp
    tot2 = jnp.sum(stats2, axis=(0, 1))              # (2, Cp2)
    mean2 = tot2[0, :cout] / m2
    var2 = jnp.maximum(tot2[1, :cout] / m2 - mean2 * mean2, 0.0)
    sc2 = params["gamma_tm"] * jax.lax.rsqrt(var2 + EPS)
    sh2 = params["beta_tm"] - mean2 * sc2
    o = jnp.maximum(y2[..., :cout].astype(jnp.float32) * sc2 + sh2, 0.0)
    o = o.reshape(n, to, ho, wo, cout)
    return jnp.transpose(o, (0, 4, 1, 2, 3))


# ----------------------------------------------------------------------------
# Pure-jnp reference (no Pallas) for a sanity check.  It uses the same bf16
# matmul operands / bf16 intermediate-storage rounding points as the Pallas
# path so the comparison can use a tight tolerance; everything else is f32.
# ----------------------------------------------------------------------------
def reference_forward(params, cfg, x_ncthw):
    kt, kh, kw = cfg["k"]
    st, sh, sw = cfg["s"]
    pt, ph, pw = cfg["p"]
    cmid, cout = cfg["intermed"], cfg["out_channels"]
    n, cin, t, hgt, wid = x_ncthw.shape
    ho = (hgt + 2 * ph - kh) // sh + 1
    wo = (wid + 2 * pw - kw) // sw + 1
    to = (t + 2 * pt - kt) // st + 1

    x = jnp.transpose(x_ncthw, (0, 2, 3, 4, 1)).astype(jnp.float32)
    xp = jnp.pad(x, ((0, 0), (0, 0), (ph, ph), (pw, pw), (0, 0)))

    cols = []
    for di in range(kh):
        for dj in range(kw):
            cols.append(xp[:, :, di:di + (ho - 1) * sh + 1:sh,
                           dj:dj + (wo - 1) * sw + 1:sw, :])
    lhs = jnp.concatenate(cols, axis=-1).reshape(-1, kh * kw * cin)
    w1 = params["w_sp"].reshape(kh * kw * cin, cmid)
    y = jnp.dot(lhs.astype(jnp.bfloat16), w1.astype(jnp.bfloat16),
                preferred_element_type=jnp.float32)
    mean1, var1 = y.mean(0), y.var(0)
    yf = y.astype(jnp.bfloat16).astype(jnp.float32)     # emulate bf16 intermediate
    h = jnp.maximum((yf - mean1) / jnp.sqrt(var1 + EPS) * params["gamma_sp"]
                    + params["beta_sp"], 0.0).reshape(n, t, ho, wo, cmid)

    hp = jnp.pad(h, ((0, 0), (pt, pt), (0, 0), (0, 0), (0, 0)))
    taps = []
    for dt in range(kt):
        taps.append(hp[:, dt:dt + (to - 1) * st + 1:st])
    lhs2 = jnp.concatenate(taps, axis=-1).reshape(-1, kt * cmid)
    w2 = params["w_tm"].reshape(kt * cmid, cout)
    z = jnp.dot(lhs2.astype(jnp.bfloat16), w2.astype(jnp.bfloat16),
                preferred_element_type=jnp.float32)
    mean2, var2 = z.mean(0), z.var(0)
    zf = z.astype(jnp.bfloat16).astype(jnp.float32)     # emulate bf16 intermediate
    o = jnp.maximum((zf - mean2) / jnp.sqrt(var2 + EPS) * params["gamma_tm"]
                    + params["beta_tm"], 0.0).reshape(n, to, ho, wo, cout)
    return jnp.transpose(o, (0, 4, 1, 2, 3))


# ----------------------------------------------------------------------------
if __name__ == "__main__":
    key = jax.random.PRNGKey(0)
    k_param, k_x = jax.random.split(key)

    # Small shapes: batch=2, in_channels=4, out_channels=8, T=4, H=W=8,
    # kernel=3, stride=1, padding=1  =>  intermed_channels = 14.
    n, cin, t, hgt, wid = 2, 4, 4, 8, 8
    cout, ksz, stride, pad = 8, 3, 1, 1

    params, cfg = init_spatio_temporal_conv(k_param, cin, cout, ksz, stride, pad)
    x = jax.random.normal(k_x, (n, cin, t, hgt, wid), jnp.float32)

    fwd = jax.jit(lambda xx: spatio_temporal_conv_forward(params, cfg, xx))
    out = fwd(x)
    jax.block_until_ready(out)

    expected_shape = (n, cout, t, hgt, wid)   # stride 1, "same"-style padding
    assert out.shape == expected_shape, (out.shape, expected_shape)

    ref = reference_forward(params, cfg, x)
    max_err = float(jnp.max(jnp.abs(out - ref)))
    mean_err = float(jnp.mean(jnp.abs(out - ref)))
    assert max_err < 5e-2 and mean_err < 1e-2, (max_err, mean_err)

    print("KERNEL_OK")
</pallas_src>

<mosaic_0001>
module attributes {stable_mosaic.version = 11 : i64} {
  func.func @kernel(%arg0: i32, %arg1: memref<8x10x10x4xbf16, #tpu.memory_space<vmem>>, %arg2: memref<36x128xbf16, #tpu.memory_space<vmem>>, %arg3: memref<8x64x128xbf16, #tpu.memory_space<vmem>>, %arg4: memref<1x2x128xf32, #tpu.memory_space<vmem>>) attributes {dimension_semantics = [#tpu.dimension_semantics<parallel>], iteration_bounds = array<i64: 1>, scalar_prefetch = 0 : i64, scratch_operands = 0 : i64, tpu.core_type = #tpu.core_type<tc>, window_params = [{transform_indices = @transform_0, window_bounds = array<i64: 8, 10, 10, 4>}, {pipeline_mode = #tpu.pipeline_mode<synchronous>, transform_indices = @transform_1, window_bounds = array<i64: 36, 128>}, {transform_indices = @transform_2, window_bounds = array<i64: 8, 64, 128>}, {transform_indices = @transform_3, window_bounds = array<i64: 1, 2, 128>}]} {
    %c0 = arith.constant 0 : index
    %c0_0 = arith.constant 0 : index
    %c0_1 = arith.constant 0 : index
    %c0_2 = arith.constant 0 : index
    %0 = vector.load %arg1[%c0, %c0_0, %c0_1, %c0_2] : memref<8x10x10x4xbf16, #tpu.memory_space<vmem>>, vector<8x8x8x4xbf16>
    %c0_3 = arith.constant 0 : index
    %c0_4 = arith.constant 0 : index
    %c1 = arith.constant 1 : index
    %c0_5 = arith.constant 0 : index
    %1 = vector.load %arg1[%c0_3, %c0_4, %c1, %c0_5] : memref<8x10x10x4xbf16, #tpu.memory_space<vmem>>, vector<8x8x8x4xbf16>
    %c0_6 = arith.constant 0 : index
    %c0_7 = arith.constant 0 : index
    %c2 = arith.constant 2 : index
    %c0_8 = arith.constant 0 : index
    %2 = vector.load %arg1[%c0_6, %c0_7, %c2, %c0_8] : memref<8x10x10x4xbf16, #tpu.memory_space<vmem>>, vector<8x8x8x4xbf16>
    %c0_9 = arith.constant 0 : index
    %c1_10 = arith.constant 1 : index
    %c0_11 = arith.constant 0 : index
    %c0_12 = arith.constant 0 : index
    %3 = vector.load %arg1[%c0_9, %c1_10, %c0_11, %c0_12] : memref<8x10x10x4xbf16, #tpu.memory_space<vmem>>, vector<8x8x8x4xbf16>
    %c0_13 = arith.constant 0 : index
    %c1_14 = arith.constant 1 : index
    %c1_15 = arith.constant 1 : index
    %c0_16 = arith.constant 0 : index
    %4 = vector.load %arg1[%c0_13, %c1_14, %c1_15, %c0_16] : memref<8x10x10x4xbf16, #tpu.memory_space<vmem>>, vector<8x8x8x4xbf16>
    %c0_17 = arith.constant 0 : index
    %c1_18 = arith.constant 1 : index
    %c2_19 = arith.constant 2 : index
    %c0_20 = arith.constant 0 : index
    %5 = vector.load %arg1[%c0_17, %c1_18, %c2_19, %c0_20] : memref<8x10x10x4xbf16, #tpu.memory_space<vmem>>, vector<8x8x8x4xbf16>
    %c0_21 = arith.constant 0 : index
    %c2_22 = arith.constant 2 : index
    %c0_23 = arith.constant 0 : index
    %c0_24 = arith.constant 0 : index
    %6 = vector.load %arg1[%c0_21, %c2_22, %c0_23, %c0_24] : memref<8x10x10x4xbf16, #tpu.memory_space<vmem>>, vector<8x8x8x4xbf16>
    %c0_25 = arith.constant 0 : index
    %c2_26 = arith.constant 2 : index
    %c1_27 = arith.constant 1 : index
    %c0_28 = arith.constant 0 : index
    %7 = vector.load %arg1[%c0_25, %c2_26, %c1_27, %c0_28] : memref<8x10x10x4xbf16, #tpu.memory_space<vmem>>, vector<8x8x8x4xbf16>
    %c0_29 = arith.constant 0 : index
    %c2_30 = arith.constant 2 : index
    %c2_31 = arith.constant 2 : index
    %c0_32 = arith.constant 0 : index
    %8 = vector.load %arg1[%c0_29, %c2_30, %c2_31, %c0_32] : memref<8x10x10x4xbf16, #tpu.memory_space<vmem>>, vector<8x8x8x4xbf16>
    %9 = tpu.concatenate %0, %1, %2, %3, %4, %5, %6, %7, %8 in 3 : vector<8x8x8x4xbf16>, vector<8x8x8x4xbf16>, vector<8x8x8x4xbf16>, vector<8x8x8x4xbf16>, vector<8x8x8x4xbf16>, vector<8x8x8x4xbf16>, vector<8x8x8x4xbf16>, vector<8x8x8x4xbf16>, vector<8x8x8x4xbf16> -> vector<8x8x8x36xbf16>
    %10 = vector.shape_cast %9 : vector<8x8x8x36xbf16> to vector<512x36xbf16>
    %c0_33 = arith.constant 0 : index
    %c0_34 = arith.constant 0 : index
    %11 = vector.load %arg2[%c0_33, %c0_34] : memref<36x128xbf16, #tpu.memory_space<vmem>>, vector<36x128xbf16>
    %cst = arith.constant dense<0.000000e+00> : vector<512x128xf32>
    %12 = tpu.matmul %10, %11, %cst {dimension_numbers = #tpu.dot_dimension_numbers<[1], [0], [0], [1], [0, 0, 1, 1], [], []>} : vector<512x36xbf16>, vector<36x128xbf16>, vector<512x128xf32> -> vector<512x128xf32>
    %13 = vector.shape_cast %12 : vector<512x128xf32> to vector<8x64x128xf32>
    %14 = arith.truncf %13 : vector<8x64x128xf32> to vector<8x64x128xbf16>
    %c0_35 = arith.constant 0 : index
    %c0_36 = arith.constant 0 : index
    %c0_37 = arith.constant 0 : index
    %15 = vector.load %arg3[%c0_35, %c0_36, %c0_37] : memref<8x64x128xbf16, #tpu.memory_space<vmem>>, vector<8x64x128xbf16>
    tpu.vector_store %arg3[%c0_35, %c0_36, %c0_37], %14 {strides = array<i32>} : memref<8x64x128xbf16, #tpu.memory_space<vmem>>, vector<8x64x128xbf16>,
    %cst_38 = arith.constant dense<0.000000e+00> : vector<128xf32>
    %16 = vector.multi_reduction <add>, %12, %cst_38 [0] : vector<512x128xf32> to vector<128xf32>
    %17 = vector.shape_cast %16 : vector<128xf32> to vector<1x128xf32>
    %18 = vector.shape_cast %17 : vector<1x128xf32> to vector<1x1x128xf32>
    %c0_39 = arith.constant 0 : index
    %c0_40 = arith.constant 0 : index
    %c0_41 = arith.constant 0 : index
    %19 = vector.load %arg4[%c0_39, %c0_40, %c0_41] : memref<1x2x128xf32, #tpu.memory_space<vmem>>, vector<1x1x128xf32>
    tpu.vector_store %arg4[%c0_39, %c0_40, %c0_41], %18 {strides = array<i32>} : memref<1x2x128xf32, #tpu.memory_space<vmem>>, vector<1x1x128xf32>,
    %20 = arith.mulf %12, %12 : vector<512x128xf32>
    %cst_42 = arith.constant dense<0.000000e+00> : vector<128xf32>
    %21 = vector.multi_reduction <add>, %20, %cst_42 [0] : vector<512x128xf32> to vector<128xf32>
    %22 = vector.shape_cast %21 : vector<128xf32> to vector<1x128xf32>
    %23 = vector.shape_cast %22 : vector<1x128xf32> to vector<1x1x128xf32>
    %c0_43 = arith.constant 0 : index
    %c1_44 = arith.constant 1 : index
    %c0_45 = arith.constant 0 : index
    %24 = vector.load %arg4[%c0_43, %c1_44, %c0_45] : memref<1x2x128xf32, #tpu.memory_space<vmem>>, vector<1x1x128xf32>
    tpu.vector_store %arg4[%c0_43, %c1_44, %c0_45], %23 {strides = array<i32>} : memref<1x2x128xf32, #tpu.memory_space<vmem>>, vector<1x1x128xf32>,
    return
  }
  func.func @transform_0(%arg0: i32) -> (i32, i32, i32, i32) {
    %c0_i32 = arith.constant 0 : i32
    %c0_i32_0 = arith.constant 0 : i32
    %c0_i32_1 = arith.constant 0 : i32
    %c0_i32_2 = arith.constant 0 : i32
    return %arg0, %c0_i32, %c0_i32_0, %c0_i32_1 : i32, i32, i32, i32
  }
  func.func @transform_1(%arg0: i32) -> (i32, i32) {
    %c0_i32 = arith.constant 0 : i32
    %c0_i32_0 = arith.constant 0 : i32
    %c0_i32_1 = arith.constant 0 : i32
    return %c0_i32, %c0_i32_0 : i32, i32
  }
  func.func @transform_2(%arg0: i32) -> (i32, i32, i32) {
    %c0_i32 = arith.constant 0 : i32
    %c0_i32_0 = arith.constant 0 : i32
    %c0_i32_1 = arith.constant 0 : i32
    return %arg0, %c0_i32, %c0_i32_0 : i32, i32, i32
  }
  func.func @transform_3(%arg0: i32) -> (i32, i32, i32) {
    %c0_i32 = arith.constant 0 : i32
    %c0_i32_0 = arith.constant 0 : i32
    %c0_i32_1 = arith.constant 0 : i32
    return %arg0, %c0_i32, %c0_i32_0 : i32, i32, i32
  }
}

module attributes {stable_mosaic.version = 11 : i64} {
  func.func @kernel(%arg0: i32, %arg1: i32, %arg2: memref<1x4x64x128xbf16, #tpu.memory_space<vmem>>, %arg3: memref<384x128xbf16, #tpu.memory_space<vmem>>, %arg4: memref<1x1x128xf32, #tpu.memory_space<vmem>>, %arg5: memref<1x1x128xf32, #tpu.memory_space<vmem>>, %arg6: memref<1x4x64x128xbf16, #tpu.memory_space<vmem>>, %arg7: memref<1x1x2x128xf32, #tpu.memory_space<vmem>>, %arg8: memref<6x64x128xbf16, #tpu.memory_space<vmem>>) attributes {dimension_semantics = [#tpu.dimension_semantics<parallel>, #tpu.dimension_semantics<parallel>], iteration_bounds = array<i64: 2, 1>, scalar_prefetch = 0 : i64, scratch_operands = 1 : i64, tpu.core_type = #tpu.core_type<tc>, window_params = [{transform_indices = @transform_0, window_bounds = array<i64: 1, 4, 64, 128>}, {pipeline_mode = #tpu.pipeline_mode<synchronous>, transform_indices = @transform_1, window_bounds = array<i64: 384, 128>}, {pipeline_mode = #tpu.pipeline_mode<synchronous>, transform_indices = @transform_2, window_bounds = array<i64: 1, 1, 128>}, {pipeline_mode = #tpu.pipeline_mode<synchronous>, transform_indices = @transform_3, window_bounds = array<i64: 1, 1, 128>}, {transform_indices = @transform_4, window_bounds = array<i64: 1, 4, 64, 128>}, {transform_indices = @transform_5, window_bounds = array<i64: 1, 1, 2, 128>}]} {
    %c0 = arith.constant 0 : index
    %c0_0 = arith.constant 0 : index
    %c0_1 = arith.constant 0 : index
    %c0_2 = arith.constant 0 : index
    %0 = vector.load %arg2[%c0, %c0_0, %c0_1, %c0_2] : memref<1x4x64x128xbf16, #tpu.memory_space<vmem>>, vector<1x4x64x128xbf16>
    %1 = vector.shape_cast %0 : vector<1x4x64x128xbf16> to vector<4x64x128xbf16>
    %2 = arith.extf %1 : vector<4x64x128xbf16> to vector<4x64x128xf32>
    %c0_3 = arith.constant 0 : index
    %c0_4 = arith.constant 0 : index
    %c0_5 = arith.constant 0 : index
    %3 = vector.load %arg4[%c0_3, %c0_4, %c0_5] : memref<1x1x128xf32, #tpu.memory_space<vmem>>, vector<1x1x128xf32>
    %4 = vector.broadcast %3 : vector<1x1x128xf32> to vector<4x64x128xf32>
    %5 = arith.mulf %2, %4 : vector<4x64x128xf32>
    %c0_6 = arith.constant 0 : index
    %c0_7 = arith.constant 0 : index
    %c0_8 = arith.constant 0 : index
    %6 = vector.load %arg5[%c0_6, %c0_7, %c0_8] : memref<1x1x128xf32, #tpu.memory_space<vmem>>, vector<1x1x128xf32>
    %7 = vector.broadcast %6 : vector<1x1x128xf32> to vector<4x64x128xf32>
    %8 = arith.addf %5, %7 : vector<4x64x128xf32>
    %cst = arith.constant 0.000000e+00 : f32
    %9 = vector.broadcast %cst : f32 to vector<4x64x128xf32>
    %10 = arith.maximumf %8, %9 : vector<4x64x128xf32>
    %11 = tpu.iota {dimensions = array<i32: 1>} : vector<1x64x1xi32>
    %c64_i32 = arith.constant 64 : i32
    %12 = arith.muli %arg1, %c64_i32 : i32
    %13 = vector.broadcast %12 : i32 to vector<1x64x1xi32>
    %14 = arith.addi %13, %11 : vector<1x64x1xi32>
    %c64_i32_9 = arith.constant 64 : i32
    %15 = vector.broadcast %c64_i32_9 : i32 to vector<1x64x1xi32>
    %16 = arith.cmpi slt, %14, %15 : vector<1x64x1xi32>
    %cst_10 = arith.constant 0.000000e+00 : f32
    %17 = vector.shape_cast %16 : vector<1x64x1xi1> to vector<1x64x1xi1>
    %18 = vector.broadcast %17 : vector<1x64x1xi1> to vector<4x64x128xi1>
    %19 = vector.broadcast %cst_10 : f32 to vector<4x64x128xf32>
    %20 = arith.select %18, %10, %19 : vector<4x64x128xi1>, vector<4x64x128xf32>
    %cst_11 = arith.constant 0.000000e+00 : bf16
    %21 = vector.broadcast %cst_11 : bf16 to vector<1x64x128xbf16>
    %c0_12 = arith.constant 0 : index
    %c0_13 = arith.constant 0 : index
    %c0_14 = arith.constant 0 : index
    %22 = vector.load %arg8[%c0_12, %c0_13, %c0_14] : memref<6x64x128xbf16, #tpu.memory_space<vmem>>, vector<1x64x128xbf16>
    tpu.vector_store %arg8[%c0_12, %c0_13, %c0_14], %21 {strides = array<i32>} : memref<6x64x128xbf16, #tpu.memory_space<vmem>>, vector<1x64x128xbf16>,
    %c5 = arith.constant 5 : index
    %c0_15 = arith.constant 0 : index
    %c0_16 = arith.constant 0 : index
    %23 = vector.load %arg8[%c5, %c0_15, %c0_16] : memref<6x64x128xbf16, #tpu.memory_space<vmem>>, vector<1x64x128xbf16>
    tpu.vector_store %arg8[%c5, %c0_15, %c0_16], %21 {strides = array<i32>} : memref<6x64x128xbf16, #tpu.memory_space<vmem>>, vector<1x64x128xbf16>,
    %24 = arith.truncf %20 : vector<4x64x128xf32> to vector<4x64x128xbf16>
    %c1 = arith.constant 1 : index
    %c0_17 = arith.constant 0 : index
    %c0_18 = arith.constant 0 : index
    %25 = vector.load %arg8[%c1, %c0_17, %c0_18] : memref<6x64x128xbf16, #tpu.memory_space<vmem>>, vector<4x64x128xbf16>
    tpu.vector_store %arg8[%c1, %c0_17, %c0_18], %24 {strides = array<i32>} : memref<6x64x128xbf16, #tpu.memory_space<vmem>>, vector<4x64x128xbf16>,
    %c0_19 = arith.constant 0 : index
    %c0_20 = arith.constant 0 : index
    %c0_21 = arith.constant 0 : index
    %26 = vector.load %arg8[%c0_19, %c0_20, %c0_21] : memref<6x64x128xbf16, #tpu.memory_space<vmem>>, vector<4x64x128xbf16>
    %c1_22 = arith.constant 1 : index
    %c0_23 = arith.constant 0 : index
    %c0_24 = arith.constant 0 : index
    %27 = vector.load %arg8[%c1_22, %c0_23, %c0_24] : memref<6x64x128xbf16, #tpu.memory_space<vmem>>, vector<4x64x128xbf16>
    %c2 = arith.constant 2 : index
    %c0_25 = arith.constant 0 : index
    %c0_26 = arith.constant 0 : index
    %28 = vector.load %arg8[%c2, %c0_25, %c0_26] : memref<6x64x128xbf16, #tpu.memory_space<vmem>>, vector<4x64x128xbf16>
    %29 = tpu.concatenate %26, %27, %28 in 2 : vector<4x64x128xbf16>, vector<4x64x128xbf16>, vector<4x64x128xbf16> -> vector<4x64x384xbf16>
    %30 = vector.shape_cast %29 : vector<4x64x384xbf16> to vector<256x384xbf16>
    %c0_27 = arith.constant 0 : index
    %c0_28 = arith.constant 0 : index
    %31 = vector.load %arg3[%c0_27, %c0_28] : memref<384x128xbf16, #tpu.memory_space<vmem>>, vector<384x128xbf16>
    %cst_29 = arith.constant dense<0.000000e+00> : vector<256x128xf32>
    %32 = tpu.matmul %30, %31, %cst_29 {dimension_numbers = #tpu.dot_dimension_numbers<[1], [0], [0], [1], [0, 0, 1, 1], [], []>} : vector<256x384xbf16>, vector<384x128xbf16>, vector<256x128xf32> -> vector<256x128xf32>
    %33 = vector.shape_cast %32 : vector<256x128xf32> to vector<1x4x64x128xf32>
    %34 = arith.truncf %33 : vector<1x4x64x128xf32> to vector<1x4x64x128xbf16>
    %c0_30 = arith.constant 0 : index
    %c0_31 = arith.constant 0 : index
    %c0_32 = arith.constant 0 : index
    %c0_33 = arith.constant 0 : index
    %35 = vector.load %arg6[%c0_30, %c0_31, %c0_32, %c0_33] : memref<1x4x64x128xbf16, #tpu.memory_space<vmem>>, vector<1x4x64x128xbf16>
    tpu.vector_store %arg6[%c0_30, %c0_31, %c0_32, %c0_33], %34 {strides = array<i32>} : memref<1x4x64x128xbf16, #tpu.memory_space<vmem>>, vector<1x4x64x128xbf16>,
    %cst_34 = arith.constant dense<0.000000e+00> : vector<128xf32>
    %36 = vector.multi_reduction <add>, %32, %cst_34 [0] : vector<256x128xf32> to vector<128xf32>
    %37 = vector.shape_cast %36 : vector<128xf32> to vector<1x128xf32>
    %38 = vector.shape_cast %37 : vector<1x128xf32> to vector<1x1x1x128xf32>
    %c0_35 = arith.constant 0 : index
    %c0_36 = arith.constant 0 : index
    %c0_37 = arith.constant 0 : index
    %c0_38 = arith.constant 0 : index
    %39 = vector.load %arg7[%c0_35, %c0_36, %c0_37, %c0_38] : memref<1x1x2x128xf32, #tpu.memory_space<vmem>>, vector<1x1x1x128xf32>
    tpu.vector_store %arg7[%c0_35, %c0_36, %c0_37, %c0_38], %38 {strides = array<i32>} : memref<1x1x2x128xf32, #tpu.memory_space<vmem>>, vector<1x1x1x128xf32>,
    %40 = arith.mulf %32, %32 : vector<256x128xf32>
    %cst_39 = arith.constant dense<0.000000e+00> : vector<128xf32>
    %41 = vector.multi_reduction <add>, %40, %cst_39 [0] : vector<256x128xf32> to vector<128xf32>
    %42 = vector.shape_cast %41 : vector<128xf32> to vector<1x128xf32>
    %43 = vector.shape_cast %42 : vector<1x128xf32> to vector<1x1x1x128xf32>
    %c0_40 = arith.constant 0 : index
    %c0_41 = arith.constant 0 : index
    %c1_42 = arith.constant 1 : index
    %c0_43 = arith.constant 0 : index
    %44 = vector.load %arg7[%c0_40, %c0_41, %c1_42, %c0_43] : memref<1x1x2x128xf32, #tpu.memory_space<vmem>>, vector<1x1x1x128xf32>
    tpu.vector_store %arg7[%c0_40, %c0_41, %c1_42, %c0_43], %43 {strides = array<i32>} : memref<1x1x2x128xf32, #tpu.memory_space<vmem>>, vector<1x1x1x128xf32>,
    return
  }
  func.func @transform_0(%arg0: i32, %arg1: i32) -> (i32, i32, i32, i32) {
    %c0_i32 = arith.constant 0 : i32
    %c0_i32_0 = arith.constant 0 : i32
    %c0_i32_1 = arith.constant 0 : i32
    return %arg0, %c0_i32, %arg1, %c0_i32_0 : i32, i32, i32, i32
  }
  func.func @transform_1(%arg0: i32, %arg1: i32) -> (i32, i32) {
    %c0_i32 = arith.constant 0 : i32
    %c0_i32_0 = arith.constant 0 : i32
    %c0_i32_1 = arith.constant 0 : i32
    return %c0_i32, %c0_i32_0 : i32, i32
  }
  func.func @transform_2(%arg0: i32, %arg1: i32) -> (i32, i32, i32) {
    %c0_i32 = arith.constant 0 : i32
    %c0_i32_0 = arith.constant 0 : i32
    %c0_i32_1 = arith.constant 0 : i32
    %c0_i32_2 = arith.constant 0 : i32
    return %c0_i32, %c0_i32_0, %c0_i32_1 : i32, i32, i32
  }
  func.func @transform_3(%arg0: i32, %arg1: i32) -> (i32, i32, i32) {
    %c0_i32 = arith.constant 0 : i32
    %c0_i32_0 = arith.constant 0 : i32
    %c0_i32_1 = arith.constant 0 : i32
    %c0_i32_2 = arith.constant 0 : i32
    return %c0_i32, %c0_i32_0, %c0_i32_1 : i32, i32, i32
  }
  func.func @transform_4(%arg0: i32, %arg1: i32) -> (i32, i32, i32, i32) {
    %c0_i32 = arith.constant 0 : i32
    %c0_i32_0 = arith.constant 0 : i32
    %c0_i32_1 = arith.constant 0 : i32
    return %arg0, %c0_i32, %arg1, %c0_i32_0 : i32, i32, i32, i32
  }
  func.func @transform_5(%arg0: i32, %arg1: i32) -> (i32, i32, i32, i32) {
    %c0_i32 = arith.constant 0 : i32
    %c0_i32_0 = arith.constant 0 : i32
    %c0_i32_1 = arith.constant 0 : i32
    return %arg0, %arg1, %c0_i32, %c0_i32_0 : i32, i32, i32, i32
  }
}

</mosaic_0001>

<bundles_post_ra>
// kernel: _lambda_.3
= control target key start
LH: loop header
LB: loop body
LE: loop exit
PB: predicated region body
PF: predicated region fallthrough
CT: control target
= control target key end

     0   :  { %s2116_s18 = smov 0   ;;  %s2118_s19 = smov 0   ;;  %s2427_s0 = inlined_call_operand.vmem [shape: bf16[2,4,64,128], index: 0, kind: input, shape index: {}]   ;;  %s2428_s1 = inlined_call_operand.vmem [shape: bf16[384,128], index: 1, kind: input, shape index: {}]   ;;  %s2429_s2 = inlined_call_operand.vmem [shape: f32[1,1,128], index: 2, kind: input, shape index: {}]   ;;  %s2430_s3 = inlined_call_operand.vmem [shape: f32[1,1,128], index: 3, kind: input, shape index: {}]   ;;  %s2431_s4 = inlined_call_operand.vmem [shape: bf16[2,4,64,128], index: 4, kind: output, shape index: {0}]   ;;  %s2432_s5 = inlined_call_operand.vmem [shape: f32[2,1,2,128], index: 5, kind: output, shape index: {1}]  }
   0x1   :  { %s2120_s20 = smov 0  }
   0x2 LB: > { %s28_s21 = sadd.s32 1, %s2079_s19  ;;  %p1538_p0 = scmp.ge.s32.totalorder %s2083_s20, 1  ;;  %s2083_s20 = sphi %s2120_s20, %s16_s20   ;;  %s2079_s19 = sphi %s2118_s19, %s2434_s19   ;;  %s2075_s18 = sphi %s2116_s18, %s2433_s18  }
   0x3   : > { %p30_p1 = scmp.ge.s32.totalorder %s28_s21, 2  ;;  %p213_p2 = scmp.lt.s32.totalorder %s2083_s20, 3 }
   0x5   : > { %s2436_s21 = smov (%p30_p1, %s28_s21), 0  ;;  %p214_p3 = pnand %p1538_p0, %p213_p2 }
   0x6   : > { %v2037_v0 = vld [vmem:[%s2428_s1 + $0x40] sm:$0xff] (!%p214_p3)   ;;  %v2039_v2 = vld [vmem:[%s2428_s1 + $0x48] sm:$0xff] (!%p214_p3)   ;;  %p257_p4 = scmp.lt.s32.totalorder (!%p214_p3), %s2075_s18, 1  ;;  %v2041_v4 = vld [vmem:[%s2428_s1 + $0x50] sm:$0xff] (!%p214_p3)  }
   0x7   : > { %217 = sbr.rel (%p214_p3) target bundleno = 379 (0x17b), region = 36  ;;  %v2038_v1 = vld [vmem:[%s2428_s1] sm:$0xff] (!%p214_p3)   ;;  %1812 = vmatprep.subr.bf16.mxu0 (!%p214_p3), %v2037_v0  ;;  %1996 = vmatprep.subr.bf16.mxu1 (!%p214_p3), %v2037_v0  ;;  %v2040_v3 = vld [vmem:[%s2428_s1 + $0x8] sm:$0xff] (!%p214_p3)   ;;  %v2042_v5 = vld [vmem:[%s2428_s1 + $0x10] sm:$0xff] (!%p214_p3)  }
   0x8   : > { %1813 = vmatpush3.bf16.msra.mxu0 (!%p214_p3), %v2038_v1  ;;  %2004 = vmatpush3.bf16.msra.mxu1 (!%p214_p3), %v2038_v1  ;;  %v2043_v6 = vld [vmem:[%s2428_s1 + $0x58] sm:$0xff] (!%p214_p3)   ;;  %v2045_v8 = vld [vmem:[%s2428_s1 + $0x60] sm:$0xff] (!%p214_p3)   ;;  %v2047_v10 = vld [vmem:[%s2428_s1 + $0x68] sm:$0xff] (!%p214_p3)  }
   0x9   : > { %1814 = vmatprep.subr.bf16.mxu0 (!%p214_p3), %v2039_v2  ;;  %1997 = vmatprep.subr.bf16.mxu1 (!%p214_p3), %v2039_v2  ;;  %v2044_v7 = vld [vmem:[%s2428_s1 + $0x18] sm:$0xff] (!%p214_p3)   ;;  %v2046_v9 = vld [vmem:[%s2428_s1 + $0x20] sm:$0xff] (!%p214_p3)   ;;  %v2048_v22 = vld [vmem:[%s2428_s1 + $0x28] sm:$0xff] (!%p214_p3)  }
   0xa   : > { %v2181_v12 = vld [vmem:[%s2429_s2] ss:$0 sm:$0xff] (!%p214_p3)  ;;  %v2049_v26 = vld [vmem:[%s2428_s1 + $0x70] sm:$0xff] (!%p214_p3)   ;;  %v2051_v46 = vld [vmem:[%s2428_s1 + $0x78] sm:$0xff] (!%p214_p3)  }
   0xb   : > { %v2188_v17 = vld [vmem:[%s2430_s3] ss:$0 sm:$0xff] (!%p214_p3)  ;;  %v2050_v40 = vld [vmem:[%s2428_s1 + $0x30] sm:$0xff] (!%p214_p3)   ;;  %v2052_v61 = vld [vmem:[%s2428_s1 + $0x38] sm:$0xff] (!%p214_p3)  }
   0xc   : > { %1815 = vmatpush3.bf16.msra.mxu0 (!%p214_p3), %v2040_v3  ;;  %2005 = vmatpush3.bf16.msra.mxu1 (!%p214_p3), %v2040_v3  ;;  %v2053_v2 = vld [vmem:[%s2428_s1 + $0x80] sm:$0xff] (!%p214_p3)  }
   0xd   : > { %1816 = vmatprep.subr.bf16.mxu0 (!%p214_p3), %v2041_v4  ;;  %1998 = vmatprep.subr.bf16.mxu1 (!%p214_p3), %v2041_v4 }
   0xe   : > { %s2438_s18 = smov (!%p257_p4, %s2075_s18), 1 }
   0xf   : > { %s1604_s11 = sshll.u32 %s2438_s18, 7 }
  0x10   : > { %1817 = vmatpush3.bf16.msra.mxu0 %v2042_v5  ;;  %2006 = vmatpush3.bf16.msra.mxu1 %v2042_v5  ;;  %s2169_s22 = scalar_lea.vmem %s2427_s0, %s1604_s11  ;;  %s2382_s15 = scalar_lea.vmem %s2431_s4, %s1604_s11 }
  0x11   : > { %1818 = vmatprep.subr.bf16.mxu0 %v2043_v6  ;;  %1999 = vmatprep.subr.bf16.mxu1 %v2043_v6  ;;  %v1639_v11 = vld [vmem:[%s2169_s22] sm:$0xff]   ;;  %v1782_v25 = vld [vmem:[%s2169_s22 + $0x8] sm:$0xff]   ;;  %v1783_v55 = vld [vmem:[%s2169_s22 + $0x10] sm:$0xff]   ;;  %s1543_s11 = sshll.u32 %s2438_s18, 1 }
  0x12   : > { %v1640_v13 = vunpack.c.l.bf16 %v1639_v11  ;;  %v1641_v14 = vunpack.c.h.bf16 %v1639_v11  ;;  %v1793_v15 = vld [vmem:[%s2169_s22 + $0x60] sm:$0xff]   ;;  %v1644_v30 = vunpack.c.l.bf16 %v1782_v25  ;;  %v1645_v34 = vunpack.c.h.bf16 %v1782_v25  ;;  %v1794_v39 = vld [vmem:[%s2169_s22 + $0x68] sm:$0xff]   ;;  %v1795_v60 = vld [vmem:[%s2169_s22 + $0x70] sm:$0xff]   ;;  %s282_s23 = scalar_lea.vmem %s2432_s5, %s1543_s11 }
  0x13   : > { %v1789_v16 = vld [vmem:[%s2169_s22 + $0x40] sm:$0xff]   ;;  %v1688_v18 = vunpack.c.l.bf16 %v1793_v15  ;;  %v1689_v19 = vunpack.c.h.bf16 %v1793_v15  ;;  %v1790_v45 = vld [vmem:[%s2169_s22 + $0x48] sm:$0xff]   ;;  %v1692_v54 = vunpack.c.l.bf16 %v1794_v39  ;;  %v1693_v58 = vunpack.c.h.bf16 %v1794_v39 }
  0x14   : > { %1819 = vmatpush3.bf16.msra.mxu0 %v2044_v7  ;;  %2007 = vmatpush3.bf16.msra.mxu1 %v2044_v7  ;;  %v1672_v20 = vunpack.c.l.bf16 %v1789_v16  ;;  %v1673_v21 = vunpack.c.h.bf16 %v1789_v16  ;;  %v355_v23 = vmul.f32 %v1640_v13, %v2181_v12  ;;  %v356_v24 = vmul.f32 %v1641_v14, %v2181_v12  ;;  %v1791_v16 = vld [vmem:[%s2169_s22 + $0x50] sm:$0xff]  }
  0x15   : > { %1820 = vmatprep.subr.bf16.mxu0 %v2045_v8  ;;  %2000 = vmatprep.subr.bf16.mxu1 %v2045_v8  ;;  %v379_v27 = vmul.f32 %v1688_v18, %v2181_v12  ;;  %v380_v28 = vmul.f32 %v1689_v19, %v2181_v12  ;;  %v357_v38 = vmul.f32 %v1644_v30, %v2181_v12  ;;  %v1676_v59 = vunpack.c.l.bf16 %v1790_v45 }
  0x16   : > { %v371_v29 = vmul.f32 %v1672_v20, %v2181_v12  ;;  %v394_v31 = vadd.f32 %v2188_v17, %v355_v23  ;;  %v395_v32 = vadd.f32 %v2188_v17, %v356_v24  ;;  %v372_v33 = vmul.f32 %v1673_v21, %v2181_v12 }
  0x17   : > { %v418_v35 = vadd.f32 %v2188_v17, %v379_v27  ;;  %v419_v36 = vadd.f32 %v2188_v17, %v380_v28  ;;  %v358_v44 = vmul.f32 %v1645_v34, %v2181_v12  ;;  %v396_v50 = vadd.f32 %v2188_v17, %v357_v38 }
  0x18   : > { %1821 = vmatpush3.bf16.msra.mxu0 %v2046_v9  ;;  %2008 = vmatpush3.bf16.msra.mxu1 %v2046_v9  ;;  %v410_v37 = vadd.f32 %v2188_v17, %v371_v29  ;;  %v426_v41 = vmax.f32 %v394_v31, 0.0  ;;  %v427_v42 = vmax.f32 %v395_v32, 0.0  ;;  %v411_v43 = vadd.f32 %v2188_v17, %v372_v33  ;;  %v1784_v31 = vld [vmem:[%s2169_s22 + $0x18] sm:$0xff]  }
  0x19   : > { %1822 = vmatprep.subr.bf16.mxu0 %v2047_v10  ;;  %2001 = vmatprep.subr.bf16.mxu1 %v2047_v10  ;;  %v450_v47 = vmax.f32 %v418_v35, 0.0  ;;  %v451_v48 = vmax.f32 %v419_v36, 0.0  ;;  %v397_v53 = vadd.f32 %v2188_v17, %v358_v44  ;;  %v428_v57 = vmax.f32 %v396_v50, 0.0 }
  0x1a   : > { %v442_v49 = vmax.f32 %v410_v37, 0.0  ;;  %v2220_v51 = vpack.c.bf16 %v427_v42, %v426_v41  ;;  %v443_v52 = vmax.f32 %v411_v43, 0.0  ;;  %v381_v0 = vmul.f32 %v1692_v54, %v2181_v12  ;;  %v1796_v37 = vld [vmem:[%s2169_s22 + $0x78] sm:$0xff]   ;;  %v2055_v43 = vld [vmem:[%s2428_s1 + $0x90] sm:$0xff]  }
  0x1b   : > { %v2224_v56 = vpack.c.bf16 %v451_v48, %v450_v47  ;;  %v429_v63 = vmax.f32 %v397_v53, 0.0  ;;  %v1677_v1 = vunpack.c.h.bf16 %v1790_v45  ;;  %v382_v3 = vmul.f32 %v1693_v58, %v2181_v12  ;;  %v1792_v42 = vld [vmem:[%s2169_s22 + $0x58] sm:$0xff]   ;;  %v1785_v58 = vld [vmem:[%s2169_s22 + $0x20] sm:$0xff]  }
  0x1c   : > { %1823 = vmatpush3.bf16.msra.mxu0 %v2048_v22  ;;  %2009 = vmatpush3.bf16.msra.mxu1 %v2048_v22  ;;  %v2230_v62 = vpack.c.bf16 %v443_v52, %v442_v49  ;;  %v373_v4 = vmul.f32 %v1676_v59, %v2181_v12  ;;  %v1648_v5 = vunpack.c.l.bf16 %v1783_v55  ;;  %v1649_v6 = vunpack.c.h.bf16 %v1783_v55  ;;  %v2054_v22 = vld [vmem:[%s2428_s1 + $0x88] sm:$0xff]  }
  0x1d   : > { %1824 = vmatprep.subr.bf16.mxu0 %v2049_v26  ;;  %2002 = vmatprep.subr.bf16.mxu1 %v2049_v26  ;;  %v2240_v7 = vpack.c.bf16 %v429_v63, %v428_v57  ;;  %v420_v8 = vadd.f32 %v2188_v17, %v381_v0  ;;  %v374_v9 = vmul.f32 %v1677_v1, %v2181_v12  ;;  %v1696_v10 = vunpack.c.l.bf16 %v1795_v60  ;;  %v2056_v0 = vld [vmem:[%s2428_s1 + $0x98] sm:$0xff]  }
  0x1e   : > { %848 = vmatprep.mubr.bf16.mxu0 %v2220_v51  ;;  %944 = vmatprep.mubr.bf16.mxu1 %v2224_v56  ;;  %v421_v11 = vadd.f32 %v2188_v17, %v382_v3  ;;  %v412_v13 = vadd.f32 %v2188_v17, %v373_v4  ;;  %v359_v14 = vmul.f32 %v1648_v5, %v2181_v12  ;;  %v1697_v20 = vunpack.c.h.bf16 %v1795_v60 }
  0x1f   : > { %v360_v15 = vmul.f32 %v1649_v6, %v2181_v12  ;;  %v452_v18 = vmax.f32 %v420_v8, 0.0  ;;  %v413_v19 = vadd.f32 %v2188_v17, %v374_v9  ;;  %v383_v21 = vmul.f32 %v1696_v10, %v2181_v12 }
  0x20   : > { %1825 = vmatpush3.bf16.msra.mxu0 %v2050_v40  ;;  %2010 = vmatpush3.bf16.msra.mxu1 %v2050_v40  ;;  %v453_v23 = vmax.f32 %v421_v11, 0.0  ;;  %v444_v24 = vmax.f32 %v412_v13, 0.0  ;;  %v398_v25 = vadd.f32 %v2188_v17, %v359_v14  ;;  %v384_v28 = vmul.f32 %v1697_v20, %v2181_v12 }
  0x21   : > { %1826 = vmatprep.subr.bf16.mxu0 %v2051_v46  ;;  %2003 = vmatprep.subr.bf16.mxu1 %v2051_v46  ;;  %v399_v26 = vadd.f32 %v2188_v17, %v360_v15  ;;  %v445_v27 = vmax.f32 %v413_v19, 0.0  ;;  %v422_v29 = vadd.f32 %v2188_v17, %v383_v21  ;;  %v1680_v30 = vunpack.c.l.bf16 %v1791_v16  ;;  %v1786_v15 = vld [vmem:[%s2169_s22 + $0x28] sm:$0xff]   ;;  %v1787_v21 = vld [vmem:[%s2169_s22 + $0x30] sm:$0xff]  }
  0x22   : > { %v2085_v32 = vmov 0   ;;  %v2261_v33 = vpack.c.bf16 %v453_v23, %v452_v18  ;;  %v430_v34 = vmax.f32 %v398_v25, 0.0  ;;  %v1681_v36 = vunpack.c.h.bf16 %v1791_v16  ;;  %v2057_v16 = vld [vmem:[%s2428_s1 + $0xa0] sm:$0xff]  }
  0x23   : > { %v431_v35 = vmax.f32 %v399_v26, 0.0  ;;  %v2265_v38 = vpack.c.bf16 %v445_v27, %v444_v24  ;;  %v423_v39 = vadd.f32 %v2188_v17, %v384_v28  ;;  %v454_v40 = vmax.f32 %v422_v29, 0.0 }
  0x24   : > { %1827 = vmatpush3.bf16.msra.mxu0 %v2052_v61  ;;  %2011 = vmatpush3.bf16.msra.mxu1 %v2052_v61  ;;  %v375_v41 = vmul.f32 %v1680_v30, %v2181_v12  ;;  %v376_v45 = vmul.f32 %v1681_v36, %v2181_v12  ;;  %v1652_v46 = vunpack.c.l.bf16 %v1784_v31  ;;  %v1653_v47 = vunpack.c.h.bf16 %v1784_v31 }
  0x25   : > { %1948 = vmatprep.subr.bf16.mxu1 %v2053_v2  ;;  %v2274_v44 = vpack.c.bf16 %v431_v35, %v430_v34  ;;  %v455_v48 = vmax.f32 %v423_v39, 0.0  ;;  %v1700_v50 = vunpack.c.l.bf16 %v1796_v37  ;;  %v1701_v52 = vunpack.c.h.bf16 %v1796_v37  ;;  %v2058_v35 = vld [vmem:[%s2428_s1 + $0xa8] sm:$0xff]  }
  0x26   : > { %v414_v49 = vadd.f32 %v2188_v17, %v375_v41  ;;  %v415_v53 = vadd.f32 %v2188_v17, %v376_v45  ;;  %v361_v54 = vmul.f32 %v1652_v46, %v2181_v12  ;;  %v362_v55 = vmul.f32 %v1653_v47, %v2181_v12 }
  0x27   : > { %849 = vmatmul.mubr.bf16.vlgmr.msra.gmra.mrb[0].mxu0 %v2085_v32  ;;  %945 = vmatmul.mubr.bf16.vlgmr.msra.gmra.mrb[0].mxu1 %v2230_v62  ;;  %v1684_v57 = vunpack.c.l.bf16 %v1792_v42  ;;  %v2282_v59 = vpack.c.bf16 %v455_v48, %v454_v40  ;;  %v385_v61 = vmul.f32 %v1700_v50, %v2181_v12  ;;  %v386_v63 = vmul.f32 %v1701_v52, %v2181_v12  ;;  %v2059_v48 = vld [vmem:[%s2428_s1 + $0xb0] sm:$0xff]  }
  0x28   : > { %1949 = vmatpush3.bf16.msra.mxu1 %v2053_v2  ;;  %856 = vmatprep.mubr.bf16.mxu0 %v2240_v7  ;;  %v446_v60 = vmax.f32 %v414_v49, 0.0  ;;  %v447_v1 = vmax.f32 %v415_v53, 0.0  ;;  %v400_v2 = vadd.f32 %v2188_v17, %v361_v54  ;;  %v401_v3 = vadd.f32 %v2188_v17, %v362_v55 }
  0x29   : > { %1950 = vmatprep.subr.bf16.mxu1 %v2054_v22  ;;  %952 = vmatprep.mubr.bf16.mxu1 %v2261_v33  ;;  %v1685_v4 = vunpack.c.h.bf16 %v1792_v42  ;;  %v424_v5 = vadd.f32 %v2188_v17, %v385_v61  ;;  %v425_v6 = vadd.f32 %v2188_v17, %v386_v63  ;;  %v377_v8 = vmul.f32 %v1684_v57, %v2181_v12  ;;  %v1788_v42 = vld [vmem:[%s2169_s22 + $0x38] sm:$0xff]  }
  0x2a   : > { %v1656_v9 = vunpack.c.l.bf16 %v1785_v58  ;;  %v432_v10 = vmax.f32 %v400_v2, 0.0  ;;  %v433_v11 = vmax.f32 %v401_v3, 0.0  ;;  %v1657_v14 = vunpack.c.h.bf16 %v1785_v58 }
  0x2b   : > { %v378_v13 = vmul.f32 %v1685_v4, %v2181_v12  ;;  %v456_v18 = vmax.f32 %v424_v5, 0.0  ;;  %v457_v19 = vmax.f32 %v425_v6, 0.0  ;;  %v416_v23 = vadd.f32 %v2188_v17, %v377_v8 }
  0x2c   : > { %1951 = vmatpush3.bf16.msra.mxu1 %v2054_v22  ;;  %v363_v20 = vmul.f32 %v1656_v9, %v2181_v12  ;;  %v2305_v22 = vpack.c.bf16 %v447_v1, %v446_v60  ;;  %v364_v24 = vmul.f32 %v1657_v14, %v2181_v12  ;;  %v2309_v25 = vpack.c.bf16 %v433_v11, %v432_v10  ;;  %v2060_v60 = vld [vmem:[%s2428_s1 + $0xb8] sm:$0xff]  }
  0x2d   : > { %1952 = vmatprep.subr.bf16.mxu1 %v2055_v43  ;;  %v417_v26 = vadd.f32 %v2188_v17, %v378_v13  ;;  %v1660_v27 = vunpack.c.l.bf16 %v1786_v15  ;;  %v1661_v28 = vunpack.c.h.bf16 %v1786_v15  ;;  %v1664_v31 = vunpack.c.l.bf16 %v1787_v21 }
  0x2e   : > { %v402_v29 = vadd.f32 %v2188_v17, %v363_v20  ;;  %v403_v30 = vadd.f32 %v2188_v17, %v364_v24  ;;  %v1665_v34 = vunpack.c.h.bf16 %v1787_v21  ;;  %v2317_v36 = vpack.c.bf16 %v457_v19, %v456_v18 }
  0x2f   : > { %857 = vmatmul.mubr.bf16.gmra.mrb[4].mxu0 %v2085_v32  ;;  %953 = vmatmul.mubr.bf16.gmra.mrb[4].mxu1 %v2265_v38  ;;  %v448_v37 = vmax.f32 %v416_v23, 0.0  ;;  %v449_v39 = vmax.f32 %v417_v26, 0.0  ;;  %v365_v40 = vmul.f32 %v1660_v27, %v2181_v12  ;;  %v366_v41 = vmul.f32 %v1661_v28, %v2181_v12 }
  0x30   : > { %1953 = vmatpush3.bf16.msra.mxu1 %v2055_v43  ;;  %864 = vmatprep.mubr.bf16.mxu0 %v2274_v44  ;;  %v434_v43 = vmax.f32 %v402_v29, 0.0  ;;  %v435_v45 = vmax.f32 %v403_v30, 0.0  ;;  %v367_v46 = vmul.f32 %v1664_v31, %v2181_v12  ;;  %v368_v47 = vmul.f32 %v1665_v34, %v2181_v12 }
  0x31   : > { %1954 = vmatprep.subr.bf16.mxu1 %v2056_v0  ;;  %960 = vmatprep.mubr.bf16.mxu1 %v2282_v59  ;;  %v1668_v49 = vunpack.c.l.bf16 %v1788_v42  ;;  %v553_v50 = vpack.c.bf16 %v449_v39, %v448_v37  ;;  %v404_v52 = vadd.f32 %v2188_v17, %v365_v40  ;;  %v405_v53 = vadd.f32 %v2188_v17, %v366_v41 }
  0x32   : > { %v1669_v54 = vunpack.c.h.bf16 %v1788_v42  ;;  %v546_v55 = vpack.c.bf16 %v435_v45, %v434_v43  ;;  %v406_v57 = vadd.f32 %v2188_v17, %v367_v46  ;;  %v407_v58 = vadd.f32 %v2188_v17, %v368_v47 }
  0x33   : > { %v436_v61 = vmax.f32 %v404_v52, 0.0  ;;  %v437_v63 = vmax.f32 %v405_v53, 0.0 }
  0x34   : > { %1955 = vmatpush3.bf16.msra.mxu1 %v2056_v0  ;;  %v369_v0 = vmul.f32 %v1668_v49, %v2181_v12  ;;  %v370_v1 = vmul.f32 %v1669_v54, %v2181_v12  ;;  %v438_v2 = vmax.f32 %v406_v57, 0.0  ;;  %v439_v3 = vmax.f32 %v407_v58, 0.0 }
  0x35   : > { %1956 = vmatprep.subr.bf16.mxu1 %v2057_v16  ;;  %v547_v4 = vpack.c.bf16 %v437_v63, %v436_v61 }
  0x36   : > { %v408_v5 = vadd.f32 %v2188_v17, %v369_v0  ;;  %v409_v6 = vadd.f32 %v2188_v17, %v370_v1  ;;  %v548_v8 = vpack.c.bf16 %v439_v3, %v438_v2 }
  0x37   : > { %865 = vmatmul.mubr.bf16.gmra.mrb[8].mxu0 %v2085_v32  ;;  %961 = vmatmul.mubr.bf16.gmra.mrb[8].mxu1 %v2305_v22 }
  0x38   : > { %1957 = vmatpush3.bf16.msra.mxu1 %v2057_v16  ;;  %872 = vmatprep.mubr.bf16.mxu0 %v2309_v25  ;;  %v440_v9 = vmax.f32 %v408_v5, 0.0  ;;  %v441_v10 = vmax.f32 %v409_v6, 0.0 }
  0x39   : > { %1958 = vmatprep.subr.bf16.mxu1 %v2058_v35  ;;  %968 = vmatprep.mubr.bf16.mxu1 %v2317_v36 }
  0x3a   : > { %v549_v12 = vpack.c.bf16 %v441_v10, %v440_v9 }
  0x3c   : > { %1959 = vmatpush3.bf16.msra.mxu1 %v2058_v35 }
  0x3d   : > { %1960 = vmatprep.subr.bf16.mxu1 %v2059_v48 }
  0x3f   : > { %873 = vmatmul.mubr.bf16.gmra.mrb[12].mxu0 %v2085_v32  ;;  %969 = vmatmul.mubr.bf16.gmra.mrb[12].mxu1 %v553_v50 }
  0x40   : > { %1961 = vmatpush3.bf16.msra.mxu1 %v2059_v48  ;;  %880 = vmatprep.mubr.bf16.mxu0 %v546_v55 }
  0x41   : > { %1962 = vmatprep.subr.bf16.mxu1 %v2060_v60  ;;  %1964 = vmatprep.mubr.bf16.mxu1 %v546_v55 }
  0x44   : > { %1963 = vmatpush3.bf16.msra.mxu1 %v2060_v60 }
  0x47   : > { %881 = vmatmul.mubr.bf16.gmra.mrb[16].mxu0 %v2220_v51  ;;  %1965 = vmatmul.mubr.bf16.vlgmr.msra.gmra.mrb[16].mxu1 %v547_v4 }
  0x48   : > { %888 = vmatprep.mubr.bf16.mxu0 %v547_v4  ;;  %1968 = vmatprep.mubr.bf16.mxu1 %v548_v8 }
  0x4f   : > { %889 = vmatmul.mubr.bf16.gmra.mrb[20].mxu0 %v2240_v7  ;;  %1969 = vmatmul.mubr.bf16.gmra.mrb[20].mxu1 %v549_v12 }
  0x50   : > { %896 = vmatprep.mubr.bf16.mxu0 %v548_v8  ;;  %1972 = vmatprep.mubr.bf16.mxu1 %v2230_v62 }
  0x57   : > { %897 = vmatmul.mubr.bf16.gmra.mrb[24].mxu0 %v2274_v44  ;;  %1973 = vmatmul.mubr.bf16.gmra.mrb[24].mxu1 %v2265_v38 }
  0x58   : > { %904 = vmatprep.mubr.bf16.mxu0 %v549_v12  ;;  %1976 = vmatprep.mubr.bf16.mxu1 %v2305_v22 }
  0x5f   : > { %905 = vmatmul.mubr.bf16.gmra.mrb[28].mxu0 %v2309_v25  ;;  %1977 = vmatmul.mubr.bf16.gmra.mrb[28].mxu1 %v553_v50 }
  0x60   : > { %912 = vmatprep.mubr.bf16.mxu0 %v2230_v62  ;;  %1980 = vmatprep.mubr.bf16.mxu1 %v2224_v56 }
  0x67   : > { %913 = vmatmul.mubr.bf16.gmra.mrb[32].mxu0 %v546_v55  ;;  %1981 = vmatmul.mubr.bf16.gmra.mrb[32].mxu1 %v2261_v33 }
  0x68   : > { %920 = vmatprep.mubr.bf16.mxu0 %v2265_v38  ;;  %1984 = vmatprep.mubr.bf16.mxu1 %v2282_v59 }
  0x6f   : > { %921 = vmatmul.mubr.bf16.gmra.mrb[36].mxu0 %v547_v4  ;;  %1985 = vmatmul.mubr.bf16.gmra.mrb[36].mxu1 %v2317_v36 }
  0x70   : > { %928 = vmatprep.mubr.bf16.mxu0 %v2305_v22  ;;  %1988 = vmatprep.mubr.bf16.mxu1 %v2085_v32 }
  0x77   : > { %929 = vmatmul.mubr.bf16.gmra.mrb[40].mxu0 %v548_v8  ;;  %1989 = vmatmul.mubr.bf16.gmra.mrb[40].mxu1 %v2085_v32 }
  0x78   : > { %936 = vmatprep.mubr.bf16.mxu0 %v553_v50  ;;  %1992 = vmatprep.mubr.bf16.mxu1 %v2085_v32 }
  0x7f   : > { %937 = vmatmul.mubr.bf16.gmra.mrb[44].mxu0 %v549_v12  ;;  %1993 = vmatmul.mubr.bf16.gmra.mrb[44].mxu1 %v2085_v32 }
  0xfa   : > { %v1828_v17 = vpop.f32.mrb[0].mxu0  ;;  %v1900_v51 = vpop.f32.mrb[0].mxu1 }
  0xfb   : > { %v1829_v56 = vpop.f32.mrb[1].mxu0  ;;  %v1901_v62 = vpop.f32.mrb[1].mxu1 }
  0xfc   : > { %v1830_v7 = vadd.f32 %v1829_v56, %v1828_v17  ;;  %v1831_v33 = vpop.f32.mrb[2].mxu0  ;;  %v2361_v38 = vadd.f32 %v1901_v62, %v1900_v51  ;;  %v1903_v44 = vpop.f32.mrb[2].mxu1 }
  0xfd   : > { %v1832_v59 = vpop.f32.mrb[3].mxu0  ;;  %v1904_v11 = vpop.f32.mrb[3].mxu1 }
  0xfe   : > { %v1833_v13 = vadd.f32 %v1832_v59, %v1831_v33  ;;  %v2363_v14 = vadd.f32 %v1904_v11, %v1903_v44 }
 0x102   : > { %v1834_v15 = vpop.f32.mrb[4].mxu0  ;;  %v1906_v16 = vpop.f32.mrb[4].mxu1 }
 0x103   : > { %v1835_v18 = vpop.f32.mrb[5].mxu0  ;;  %v1907_v19 = vpop.f32.mrb[5].mxu1 }
 0x104   : > { %v1836_v20 = vadd.f32 %v1835_v18, %v1834_v15  ;;  %v1837_v32 = vpop.f32.mrb[6].mxu0  ;;  %v2365_v21 = vadd.f32 %v1907_v19, %v1906_v16  ;;  %v1909_v22 = vpop.f32.mrb[6].mxu1 }
 0x105   : > { %v1838_v23 = vpop.f32.mrb[7].mxu0  ;;  %v1910_v24 = vpop.f32.mrb[7].mxu1 }
 0x106   : > { %v1839_v25 = vadd.f32 %v1838_v23, %v1837_v32  ;;  %v2367_v26 = vadd.f32 %v1910_v24, %v1909_v22 }
 0x10a   : > { %v1840_v27 = vpop.f32.mrb[8].mxu0  ;;  %v1912_v28 = vpop.f32.mrb[8].mxu1 }
 0x10b   : > { %v1841_v29 = vpop.f32.mrb[9].mxu0  ;;  %v1913_v30 = vpop.f32.mrb[9].mxu1 }
 0x10c   : > { %v1842_v31 = vadd.f32 %v1841_v29, %v1840_v27  ;;  %v1843_v34 = vpop.f32.mrb[10].mxu0  ;;  %v2369_v35 = vadd.f32 %v1913_v30, %v1912_v28  ;;  %v1915_v36 = vpop.f32.mrb[10].mxu1 }
 0x10d   : > { %v1844_v37 = vpop.f32.mrb[11].mxu0  ;;  %v1916_v39 = vpop.f32.mrb[11].mxu1 }
 0x10e   : > { %v1845_v40 = vadd.f32 %v1844_v37, %v1843_v34  ;;  %v2371_v41 = vadd.f32 %v1916_v39, %v1915_v36 }
 0x112   : > { %v1846_v42 = vpop.f32.mrb[12].mxu0  ;;  %v1918_v43 = vpop.f32.mrb[12].mxu1 }
 0x113   : > { %v1847_v45 = vpop.f32.mrb[13].mxu0  ;;  %v1919_v46 = vpop.f32.mrb[13].mxu1 }
 0x114   : > { %v1848_v47 = vadd.f32 %v1847_v45, %v1846_v42  ;;  %v1849_v48 = vpop.f32.mrb[14].mxu0  ;;  %v2373_v49 = vadd.f32 %v1919_v46, %v1918_v43  ;;  %v1921_v50 = vpop.f32.mrb[14].mxu1 }
 0x115   : > { %v1850_v52 = vpop.f32.mrb[15].mxu0  ;;  %v1922_v53 = vpop.f32.mrb[15].mxu1 }
 0x116   : > { %v1851_v54 = vadd.f32 %v1850_v52, %v1849_v48  ;;  %v2375_v55 = vadd.f32 %v1922_v53, %v1921_v50 }
 0x11a   : > { %v1852_v57 = vpop.f32.mrb[16].mxu0  ;;  %v1966_v58 = vpop.f32.mrb[16].mxu1 }
 0x11b   : > { %v1020_v60 = vadd.f32 %v1966_v58, %v1836_v20  ;;  %v1853_v61 = vpop.f32.mrb[17].mxu0  ;;  %v1011_v63 = vpop.f32.mrb[17].mxu1 }
 0x11c   : > { %v1854_v0 = vadd.f32 %v1853_v61, %v1852_v57  ;;  %v1012_v1 = vadd.f32 %v1830_v7, %v1011_v63  ;;  %v1855_v2 = vpop.f32.mrb[18].mxu0  ;;  %v1967_v3 = vpop.f32.mrb[18].mxu1 }
 0x11d   : > { %v1023_v4 = vadd.f32 %v1967_v3, %v1839_v25  ;;  %v1856_v5 = vpop.f32.mrb[19].mxu0  ;;  %v1014_v6 = vpop.f32.mrb[19].mxu1  ;;  %v1338_v62 = vmul.f32 %v1020_v60, %v1020_v60 }
 0x11e   : > { %v1857_v8 = vadd.f32 %v1856_v5, %v1855_v2  ;;  %v1015_v9 = vadd.f32 %v1833_v13, %v1014_v6  ;;  %v1336_v12 = vmul.f32 %v1012_v1, %v1012_v1 }
 0x11f   : > { %v1710_v10 = vpack.c.bf16 %v1023_v4, %v1020_v60  ;;  %v1339_v11 = vmul.f32 %v1023_v4, %v1023_v4 }
 0x120   : > { %v1705_v17 = vpack.c.bf16 %v1015_v9, %v1012_v1  ;;  %v1298_v51 = vadd.f32 %v1015_v9, %v1012_v1  ;;  %v1337_v56 = vmul.f32 %v1015_v9, %v1015_v9 }
 0x121   : > { %1797 = vst [vmem:[%s2382_s15 + $0x8] sm:$0xff] %v1710_v10  }
 0x122   : > { %1706 = vst [vmem:[%s2382_s15] sm:$0xff] %v1705_v17   ;;  %v1299_v7 = vadd.f32 %v1298_v51, %v1020_v60  ;;  %v1368_v33 = vadd.f32 %v1337_v56, %v1336_v12  ;;  %v1858_v44 = vpop.f32.mrb[20].mxu0  ;;  %v1970_v59 = vpop.f32.mrb[20].mxu1 }
 0x123   : > { %v1036_v15 = vadd.f32 %v1970_v59, %v1848_v47  ;;  %v1859_v16 = vpop.f32.mrb[21].mxu0  ;;  %v1027_v18 = vpop.f32.mrb[21].mxu1 }
 0x124   : > { %v1369_v19 = vadd.f32 %v1368_v33, %v1338_v62  ;;  %v1860_v20 = vadd.f32 %v1859_v16, %v1858_v44  ;;  %v1028_v13 = vadd.f32 %v1842_v31, %v1027_v18  ;;  %v1300_v32 = vadd.f32 %v1299_v7, %v1023_v4  ;;  %v1861_v22 = vpop.f32.mrb[22].mxu0  ;;  %v1971_v23 = vpop.f32.mrb[22].mxu1 }
 0x125   : > { %v1039_v24 = vadd.f32 %v1971_v23, %v1851_v54  ;;  %v1862_v25 = vpop.f32.mrb[23].mxu0  ;;  %v1030_v27 = vpop.f32.mrb[23].mxu1  ;;  %v1342_v47 = vmul.f32 %v1036_v15, %v1036_v15 }
 0x126   : > { %v1301_v28 = vadd.f32 %v1300_v32, %v1028_v13  ;;  %v1340_v29 = vmul.f32 %v1028_v13, %v1028_v13  ;;  %v1370_v30 = vadd.f32 %v1369_v19, %v1339_v11  ;;  %v1863_v34 = vadd.f32 %v1862_v25, %v1861_v22 }
 0x127   : > { %v1720_v36 = vpack.c.bf16 %v1039_v24, %v1036_v15  ;;  %v1031_v37 = vadd.f32 %v1845_v40, %v1030_v27  ;;  %v1343_v40 = vmul.f32 %v1039_v24, %v1039_v24 }
 0x128   : > { %v1371_v39 = vadd.f32 %v1370_v30, %v1340_v29 }
 0x129   : > { %1799 = vst [vmem:[%s2382_s15 + $0x18] sm:$0xff] %v1720_v36   ;;  %v1715_v42 = vpack.c.bf16 %v1031_v37, %v1028_v13  ;;  %v1302_v43 = vadd.f32 %v1301_v28, %v1031_v37  ;;  %v1341_v45 = vmul.f32 %v1031_v37, %v1031_v37 }
 0x12a   : > { %v1864_v46 = vpop.f32.mrb[24].mxu0  ;;  %v1974_v31 = vpop.f32.mrb[24].mxu1 }
 0x12b   : > { %1798 = vst [vmem:[%s2382_s15 + $0x10] sm:$0xff] %v1715_v42   ;;  %v1303_v48 = vadd.f32 %v1302_v43, %v1036_v15  ;;  %v1372_v50 = vadd.f32 %v1371_v39, %v1341_v45  ;;  %v1052_v52 = vadd.f32 %v1974_v31, %v1860_v20  ;;  %v1865_v53 = vpop.f32.mrb[25].mxu0  ;;  %v1043_v54 = vpop.f32.mrb[25].mxu1 }
 0x12c   : > { %v1866_v57 = vadd.f32 %v1865_v53, %v1864_v46  ;;  %v1044_v58 = vadd.f32 %v1854_v0, %v1043_v54  ;;  %v1867_v60 = vpop.f32.mrb[26].mxu0  ;;  %v1975_v61 = vpop.f32.mrb[26].mxu1 }
 0x12d   : > { %v1373_v63 = vadd.f32 %v1372_v50, %v1342_v47  ;;  %v1304_v1 = vadd.f32 %v1303_v48, %v1039_v24  ;;  %v1055_v2 = vadd.f32 %v1975_v61, %v1863_v34  ;;  %v1868_v3 = vpop.f32.mrb[27].mxu0  ;;  %v1046_v4 = vpop.f32.mrb[27].mxu1  ;;  %v1346_v44 = vmul.f32 %v1052_v52, %v1052_v52 }
 0x12e   : > { %v1344_v5 = vmul.f32 %v1044_v58, %v1044_v58  ;;  %v1869_v6 = vadd.f32 %v1868_v3, %v1867_v60  ;;  %v1047_v9 = vadd.f32 %v1857_v8, %v1046_v4 }
 0x12f   : > { %v1305_v10 = vadd.f32 %v1304_v1, %v1044_v58  ;;  %v1374_v12 = vadd.f32 %v1373_v63, %v1343_v40  ;;  %v1730_v17 = vpack.c.bf16 %v1055_v2, %v1052_v52  ;;  %v1347_v13 = vmul.f32 %v1055_v2, %v1055_v2 }
 0x130   : > { %v1725_v51 = vpack.c.bf16 %v1047_v9, %v1044_v58  ;;  %v1345_v56 = vmul.f32 %v1047_v9, %v1047_v9 }
 0x131   : > { %v1375_v62 = vadd.f32 %v1374_v12, %v1344_v5  ;;  %1801 = vst [vmem:[%s2382_s15 + $0x28] sm:$0xff] %v1730_v17   ;;  %v1306_v0 = vadd.f32 %v1305_v10, %v1047_v9 }
 0x132   : > { %1800 = vst [vmem:[%s2382_s15 + $0x20] sm:$0xff] %v1725_v51   ;;  %v1870_v7 = vpop.f32.mrb[28].mxu0  ;;  %v1978_v33 = vpop.f32.mrb[28].mxu1 }
 0x133   : > { %v1307_v59 = vadd.f32 %v1306_v0, %v1052_v52  ;;  %v1376_v11 = vadd.f32 %v1375_v62, %v1345_v56  ;;  %v1871_v15 = vpop.f32.mrb[29].mxu0  ;;  %v1059_v16 = vpop.f32.mrb[29].mxu1 }
 0x134   : > { %v1872_v18 = vadd.f32 %v1871_v15, %v1870_v7  ;;  %v1060_v19 = vadd.f32 %v1866_v57, %v1059_v16  ;;  %v1873_v20 = vpop.f32.mrb[30].mxu0  ;;  %v1979_v8 = vpop.f32.mrb[30].mxu1 }
 0x135   : > { %v1377_v32 = vadd.f32 %v1376_v11, %v1346_v44  ;;  %v1308_v22 = vadd.f32 %v1307_v59, %v1055_v2  ;;  %v1874_v23 = vpop.f32.mrb[31].mxu0  ;;  %v1062_v24 = vpop.f32.mrb[31].mxu1 }
 0x136   : > { %v1068_v25 = vadd.f32 %v1978_v33, %v1872_v18  ;;  %v1348_v27 = vmul.f32 %v1060_v19, %v1060_v19  ;;  %v1875_v28 = vadd.f32 %v1874_v23, %v1873_v20  ;;  %v1063_v29 = vadd.f32 %v1869_v6, %v1062_v24 }
 0x137   : > { %v1309_v30 = vadd.f32 %v1308_v22, %v1060_v19  ;;  %v1378_v34 = vadd.f32 %v1377_v32, %v1347_v13 }
 0x138   : > { %v1071_v36 = vadd.f32 %v1979_v8, %v1875_v28  ;;  %v1735_v37 = vpack.c.bf16 %v1063_v29, %v1060_v19  ;;  %v1349_v39 = vmul.f32 %v1063_v29, %v1063_v29  ;;  %v1350_v47 = vmul.f32 %v1068_v25, %v1068_v25 }
 0x139   : > { %v1379_v42 = vadd.f32 %v1378_v34, %v1348_v27  ;;  %v1310_v43 = vadd.f32 %v1309_v30, %v1063_v29 }
 0x13a   : > { %v1740_v45 = vpack.c.bf16 %v1071_v36, %v1068_v25  ;;  %1802 = vst [vmem:[%s2382_s15 + $0x30] sm:$0xff] %v1735_v37   ;;  %v1876_v46 = vpop.f32.mrb[32].mxu0  ;;  %v1982_v31 = vpop.f32.mrb[32].mxu1  ;;  %v1351_v60 = vmul.f32 %v1071_v36, %v1071_v36 }
 0x13b   : > { %v1311_v48 = vadd.f32 %v1310_v43, %v1068_v25  ;;  %v1380_v50 = vadd.f32 %v1379_v42, %v1349_v39  ;;  %v1877_v52 = vpop.f32.mrb[33].mxu0  ;;  %v1075_v53 = vpop.f32.mrb[33].mxu1 }
 0x13c   : > { %1803 = vst [vmem:[%s2382_s15 + $0x38] sm:$0xff] %v1740_v45   ;;  %v1878_v54 = vadd.f32 %v1877_v52, %v1876_v46  ;;  %v1879_v57 = vpop.f32.mrb[34].mxu0  ;;  %v1983_v58 = vpop.f32.mrb[34].mxu1 }
 0x13d   : > { %v1381_v61 = vadd.f32 %v1380_v50, %v1350_v47  ;;  %v1880_v40 = vpop.f32.mrb[35].mxu0  ;;  %v1312_v63 = vadd.f32 %v1311_v48, %v1071_v36  ;;  %v1078_v1 = vpop.f32.mrb[35].mxu1 }
 0x13e   : > { %v1881_v2 = vadd.f32 %v1880_v40, %v1879_v57  ;;  %v1076_v3 = vadd.f32 %v1878_v54, %v1075_v53 }
 0x13f   : > { %v1382_v4 = vadd.f32 %v1381_v61, %v1351_v60 }
 0x140   : > { %v1313_v5 = vadd.f32 %v1312_v63, %v1076_v3  ;;  %v1352_v6 = vmul.f32 %v1076_v3, %v1076_v3  ;;  %v1079_v9 = vadd.f32 %v1881_v2, %v1078_v1 }
 0x142   : > { %v1383_v10 = vadd.f32 %v1382_v4, %v1352_v6  ;;  %v1745_v12 = vpack.c.bf16 %v1079_v9, %v1076_v3  ;;  %v1314_v17 = vadd.f32 %v1313_v5, %v1079_v9  ;;  %v1353_v51 = vmul.f32 %v1079_v9, %v1079_v9  ;;  %v1882_v56 = vpop.f32.mrb[36].mxu0  ;;  %v1986_v62 = vpop.f32.mrb[36].mxu1 }
 0x143   : > { %v1883_v0 = vpop.f32.mrb[37].mxu0  ;;  %v1091_v7 = vpop.f32.mrb[37].mxu1 }
 0x144   : > { %1804 = vst [vmem:[%s2382_s15 + $0x40] sm:$0xff] %v1745_v12   ;;  %v1384_v33 = vadd.f32 %v1383_v10, %v1353_v51  ;;  %v1884_v44 = vadd.f32 %v1883_v0, %v1882_v56  ;;  %v1885_v59 = vpop.f32.mrb[38].mxu0  ;;  %v1987_v11 = vpop.f32.mrb[38].mxu1 }
 0x145   : > { %v1886_v15 = vpop.f32.mrb[39].mxu0  ;;  %v1094_v16 = vpop.f32.mrb[39].mxu1 }
 0x146   : > { %v1084_v18 = vadd.f32 %v1982_v31, %v1884_v44  ;;  %v1887_v19 = vadd.f32 %v1886_v15, %v1885_v59 }
 0x148   : > { %v1315_v20 = vadd.f32 %v1314_v17, %v1084_v18  ;;  %v1354_v8 = vmul.f32 %v1084_v18, %v1084_v18  ;;  %v1087_v13 = vadd.f32 %v1983_v58, %v1887_v19 }
 0x14a   : > { %v1385_v32 = vadd.f32 %v1384_v33, %v1354_v8  ;;  %v1750_v22 = vpack.c.bf16 %v1087_v13, %v1084_v18  ;;  %v1316_v23 = vadd.f32 %v1315_v20, %v1087_v13  ;;  %v1355_v24 = vmul.f32 %v1087_v13, %v1087_v13  ;;  %v1888_v25 = vpop.f32.mrb[40].mxu0  ;;  %v1990_v27 = vpop.f32.mrb[40].mxu1 }
 0x14b   : > { %v2394_v28 = vadd.f32 %v1990_v27, %v2365_v21  ;;  %v1889_v29 = vpop.f32.mrb[41].mxu0  ;;  %v1107_v30 = vpop.f32.mrb[41].mxu1 }
 0x14c   : > { %1805 = vst [vmem:[%s2382_s15 + $0x48] sm:$0xff] %v1750_v22   ;;  %v1386_v34 = vadd.f32 %v1385_v32, %v1355_v24  ;;  %v1890_v36 = vadd.f32 %v1889_v29, %v1888_v25  ;;  %v1108_v37 = vadd.f32 %v2361_v38, %v1107_v30  ;;  %v1891_v39 = vpop.f32.mrb[42].mxu0  ;;  %v1991_v42 = vpop.f32.mrb[42].mxu1 }
 0x14d   : > { %v1119_v43 = vadd.f32 %v1991_v42, %v2367_v26  ;;  %v1892_v45 = vpop.f32.mrb[43].mxu0  ;;  %v1110_v46 = vpop.f32.mrb[43].mxu1 }
 0x14e   : > { %v1092_v31 = vadd.f32 %v1890_v36, %v1091_v7  ;;  %v1893_v47 = vadd.f32 %v1892_v45, %v1891_v39  ;;  %v1111_v21 = vadd.f32 %v2363_v14, %v1110_v46 }
 0x14f   : > { %v1770_v48 = vpack.c.bf16 %v1119_v43, %v2394_v28  ;;  %v1363_v13 = vmul.f32 %v1119_v43, %v1119_v43 }
 0x150   : > { %v1317_v50 = vadd.f32 %v1316_v23, %v1092_v31  ;;  %v1356_v52 = vmul.f32 %v1092_v31, %v1092_v31  ;;  %v1095_v53 = vadd.f32 %v1893_v47, %v1094_v16  ;;  %v1765_v54 = vpack.c.bf16 %v1111_v21, %v1108_v37 }
 0x151   : > { %1809 = vst [vmem:[%s2382_s15 + $0x68] sm:$0xff] %v1770_v48   ;;  %v1361_v19 = vmul.f32 %v1111_v21, %v1111_v21 }
 0x152   : > { %v1387_v38 = vadd.f32 %v1386_v34, %v1356_v52  ;;  %v1755_v57 = vpack.c.bf16 %v1095_v53, %v1092_v31  ;;  %v1318_v58 = vadd.f32 %v1317_v50, %v1095_v53  ;;  %v1357_v60 = vmul.f32 %v1095_v53, %v1095_v53  ;;  %1808 = vst [vmem:[%s2382_s15 + $0x60] sm:$0xff] %v1765_v54   ;;  %v1894_v26 = vpop.f32.mrb[44].mxu0  ;;  %v1994_v61 = vpop.f32.mrb[44].mxu1 }
 0x153   : > { %v1132_v40 = vadd.f32 %v1994_v61, %v2373_v49  ;;  %v1895_v63 = vpop.f32.mrb[45].mxu0  ;;  %v1123_v1 = vpop.f32.mrb[45].mxu1 }
 0x154   : > { %1806 = vst [vmem:[%s2382_s15 + $0x50] sm:$0xff] %v1755_v57   ;;  %v1388_v14 = vadd.f32 %v1387_v38, %v1357_v60  ;;  %v1896_v2 = vadd.f32 %v1895_v63, %v1894_v26  ;;  %v1124_v3 = vadd.f32 %v2369_v35, %v1123_v1  ;;  %v1897_v4 = vpop.f32.mrb[46].mxu0  ;;  %v1995_v5 = vpop.f32.mrb[46].mxu1 }
 0x155   : > { %v1135_v6 = vadd.f32 %v1995_v5, %v2375_v55  ;;  %v1898_v9 = vpop.f32.mrb[47].mxu0  ;;  %v1126_v10 = vpop.f32.mrb[47].mxu1  ;;  %v1360_v55 = vmul.f32 %v1108_v37, %v1108_v37  ;;  %v1366_v34 = vmul.f32 %v1132_v40, %v1132_v40 }
 0x156   : > { %v1100_v12 = vadd.f32 %v1986_v62, %v1896_v2  ;;  %v1899_v17 = vadd.f32 %v1898_v9, %v1897_v4  ;;  %v1127_v49 = vadd.f32 %v2371_v41, %v1126_v10  ;;  %v1362_v41 = vmul.f32 %v2394_v28, %v2394_v28 }
 0x157   : > { %v1780_v51 = vpack.c.bf16 %v1135_v6, %v1132_v40  ;;  %v1364_v23 = vmul.f32 %v1124_v3, %v1124_v3  ;;  %v1367_v39 = vmul.f32 %v1135_v6, %v1135_v6 }
 0x158   : > { %v1319_v56 = vadd.f32 %v1318_v58, %v1100_v12  ;;  %v1358_v0 = vmul.f32 %v1100_v12, %v1100_v12  ;;  %v1103_v7 = vadd.f32 %v1987_v11, %v1899_v17  ;;  %v1775_v33 = vpack.c.bf16 %v1127_v49, %v1124_v3 }
 0x159   : > { %1811 = vst [vmem:[%s2382_s15 + $0x78] sm:$0xff] %v1780_v51   ;;  %v1365_v29 = vmul.f32 %v1127_v49, %v1127_v49 }
 0x15a   : > { %v1389_v44 = vadd.f32 %v1388_v14, %v1358_v0  ;;  %v1760_v35 = vpack.c.bf16 %v1103_v7, %v1100_v12  ;;  %v1320_v59 = vadd.f32 %v1319_v56, %v1103_v7  ;;  %v1359_v15 = vmul.f32 %v1103_v7, %v1103_v7  ;;  %1810 = vst [vmem:[%s2382_s15 + $0x70] sm:$0xff] %v1775_v33  }
 0x15c   : > { %1807 = vst [vmem:[%s2382_s15 + $0x58] sm:$0xff] %v1760_v35   ;;  %v1321_v16 = vadd.f32 %v1320_v59, %v1108_v37  ;;  %v1390_v18 = vadd.f32 %v1389_v44, %v1359_v15 }
 0x15e   : > { %v1322_v62 = vadd.f32 %v1321_v16, %v1111_v21  ;;  %v1391_v20 = vadd.f32 %v1390_v18, %v1360_v55 }
 0x160   : > { %v1392_v8 = vadd.f32 %v1391_v20, %v1361_v19  ;;  %v1323_v11 = vadd.f32 %v1322_v62, %v2394_v28 }
 0x162   : > { %v1324_v32 = vadd.f32 %v1323_v11, %v1119_v43  ;;  %v1393_v22 = vadd.f32 %v1392_v8, %v1362_v41 }
 0x164   : > { %v1325_v24 = vadd.f32 %v1324_v32, %v1124_v3  ;;  %v1394_v25 = vadd.f32 %v1393_v22, %v1363_v13 }
 0x166   : > { %v1326_v27 = vadd.f32 %v1325_v24, %v1127_v49  ;;  %v1395_v30 = vadd.f32 %v1394_v25, %v1364_v23 }
 0x168   : > { %v1327_v36 = vadd.f32 %v1326_v27, %v1132_v40  ;;  %v1396_v37 = vadd.f32 %v1395_v30, %v1365_v29 }
 0x16a   : > { %v1328_v42 = vadd.f32 %v1327_v36, %v1135_v6  ;;  %v1397_v45 = vadd.f32 %v1396_v37, %v1366_v34 }
 0x16c   : > { %v1329_v46 = vrot.slane %v1328_v42, 4  ;;  %v1398_v31 = vadd.f32 %v1397_v45, %v1367_v39 }
 0x16e   : > { %v1330_v47 = vadd.f32 %v1329_v46, %v1328_v42  ;;  %v1399_v28 = vrot.slane %v1398_v31, 4 }
 0x170   : > { %v1331_v21 = vrot.slane %v1330_v47, 2  ;;  %v1400_v43 = vadd.f32 %v1399_v28, %v1398_v31 }
 0x172   : > { %v1332_v48 = vadd.f32 %v1331_v21, %v1330_v47  ;;  %v1401_v50 = vrot.slane %v1400_v43, 2 }
 0x174   : > { %v1333_v52 = vrot.slane %v1332_v48, 1  ;;  %v1402_v53 = vadd.f32 %v1401_v50, %v1400_v43 }
 0x176   : > { %v1334_v54 = vadd.f32 %v1333_v52, %v1332_v48  ;;  %v1403_v38 = vrot.slane %v1402_v53, 1 }
 0x178   : > { %1335 = vst [vmem:[%s282_s23] sm:$0x1] %v1334_v54  ;;  %v1404_v57 = vadd.f32 %v1403_v38, %v1402_v53 }
 0x17a   : > { %1405 = vst [vmem:[%s282_s23 + $0x1] sm:$0x1] %v1404_v57 }
 0x17b PF: > { %s16_s20 = sadd.s32 1, %s2083_s20   ;;  %s2433_s18 = smov %s2079_s19 }
 0x17c   : > { %p13_p5 = scmp.ge.s32.totalorder %s16_s20, 4   ;;  %s2434_s19 = smov %s2436_s21 }
 0x17e   :  { %15 = sbr.rel (!%p13_p5) target bundleno = 2 (0x2), region = 81 }

// kernel: _lambda_.2
= control target key start
LH: loop header
LB: loop body
LE: loop exit
PB: predicated region body
PF: predicated region fallthrough
CT: control target
= control target key end

     0   :  { %s9035_s21 = smov 4   ;;  %s9036_s26 = smov 8   ;;  %vm6189_vm0 = vcmask 1041408   ;;  %vm4816_vm1 = vcmask 31744   ;;  %vm5009_vm2 = vcmask 64512   ;;  %vm5138_vm3 = vcmask 97280   ;;  %s14333_s0 = inlined_call_operand.vmem [shape: bf16[8,10,10,4], index: 0, kind: input, shape index: {}]   ;;  %s14334_s1 = inlined_call_operand.vmem [shape: bf16[36,128], index: 1, kind: input, shape index: {}]   ;;  %s14335_s2 = inlined_call_operand.vmem [shape: bf16[8,64,128], index: 2, kind: output, shape index: {0}]   ;;  %s14336_s3 = inlined_call_operand.vmem [shape: f32[1,2,128], index: 3, kind: output, shape index: {1}]  }
   0x1   :  { %v16_v0 = vld [vmem:[%s14333_s0 + $0x10] sm:$0xf]  ;;  %v80_v1 = vld [vmem:[%s14333_s0 + $0x14] sm:$0x1]  ;;  %v14_v2 = vld [vmem:[%s14333_s0] sm:$0xf] }
   0x2   :  { %v7400_v3 = vcombine.low %v16_v0, %v80_v1  ;;  %v78_v4 = vld [vmem:[%s14333_s0 + $0x4] sm:$0x1]  ;;  %v17_v5 = vld [vmem:[%s14333_s0 + $0x18] sm:$0xf]  ;;  %v81_v6 = vld [vmem:[%s14333_s0 + $0x1c] sm:$0x1] }
   0x3   :  { %v7398_v7 = vcombine.low %v14_v2, %v78_v4  ;;  %v7401_v8 = vcombine.low %v17_v5, %v81_v6  ;;  %v15_v9 = vld [vmem:[%s14333_s0 + $0x8] sm:$0xf]  ;;  %v9087_v10 = vld [vmem:[%s14333_s0 + $0xc] sm:$0x1]  ;;  %v18_v16 = vld [vmem:[%s14333_s0 + $0x20] sm:$0xf] }
   0x4   :  { %v19_v11 = vld [vmem:[%s14333_s0 + $0x28] sm:$0xf]  ;;  %v927_v12 = vshrl.u32 %v7400_v3, 16  ;;  %v929_v13 = vshll.u32 %v7400_v3, 16  ;;  %v7399_v14 = vcombine.low %v15_v9, %v9087_v10  ;;  %v83_v15 = vld [vmem:[%s14333_s0 + $0x2c] sm:$0x1] }
   0x5   :  { %v913_v17 = vshrl.u32 %v7398_v7, 16  ;;  %v915_v18 = vshll.u32 %v7398_v7, 16  ;;  %v934_v19 = vshrl.u32 %v7401_v8, 16  ;;  %v936_v20 = vshll.u32 %v7401_v8, 16  ;;  %v82_v21 = vld [vmem:[%s14333_s0 + $0x24] sm:$0x1] }
   0x6   :  { %v931_v22 = vrot.slane %v929_v13, 1  ;;  %v920_v23 = vshrl.u32 %v7399_v14, 16  ;;  %v922_v24 = vshll.u32 %v7399_v14, 16  ;;  %v7403_v25 = vcombine.low %v19_v11, %v83_v15  ;;  %v21_v26 = vld [vmem:[%s14333_s0 + $0x38] sm:$0xf]  ;;  %s9037_s30 = smov 12  }
   0x7   :  { %v917_v27 = vrot.slane %v915_v18, 1  ;;  %v938_v28 = vrot.slane %v936_v20, 1  ;;  %v7402_v29 = vcombine.low %v18_v16, %v82_v21  ;;  %v85_v30 = vld [vmem:[%s14333_s0 + $0x3c] sm:$0x1]  ;;  %v20_v31 = vld [vmem:[%s14333_s0 + $0x30] sm:$0xf] }
   0x8   :  { %v932_v32 = vor.u32 %v931_v22, %v927_v12  ;;  %v924_v33 = vrot.slane %v922_v24, 1  ;;  %v950_v34 = vshll.u32 %v7403_v25, 16  ;;  %v84_v35 = vld [vmem:[%s14333_s0 + $0x34] sm:$0x1]  ;;  %v948_v38 = vshrl.u32 %v7403_v25, 16  ;;  %s9039_s11 = smov 20  }
   0x9   :  { %v918_v36 = vor.u32 %v917_v27, %v913_v17  ;;  %v939_v37 = vor.u32 %v938_v28, %v934_v19  ;;  %v943_v39 = vshll.u32 %v7402_v29, 16  ;;  %v23_v40 = vld [vmem:[%s14333_s0 + $0x58] sm:$0xf]  ;;  %v87_v41 = vld [vmem:[%s14333_s0 + $0x5c] sm:$0x1]  ;;  %v941_v43 = vshrl.u32 %v7402_v29, 16 }
   0xa   :  { %1364 = vrot.lane.b32.xlu1 %v932_v32, %s9035_s21  ;;  %v952_v42 = vrot.slane %v950_v34, 1  ;;  %v7405_v44 = vcombine.low %v21_v26, %v85_v30  ;;  %v7404_v45 = vcombine.low %v20_v31, %v84_v35  ;;  %v22_v46 = vld [vmem:[%s14333_s0 + $0x50] sm:$0xf]  ;;  %v9127_v47 = vld [vmem:[%s14333_s0 + $0x54] sm:$0x1]  ;;  %v925_v48 = vor.u32 %v924_v33, %v920_v23  ;;  %s9041_s6 = smov 28  }
   0xb   :  { %1360 = vrot.lane.b32.xlu0 %v918_v36, %s9035_s21  ;;  %v945_v49 = vrot.slane %v943_v39, 1  ;;  %v7407_v50 = vcombine.low %v23_v40, %v87_v41  ;;  %v7406_v51 = vcombine.low %v22_v46, %v9127_v47  ;;  %v25_v52 = vld [vmem:[%s14333_s0 + $0x68] sm:$0xf]  ;;  %v9137_v53 = vld [vmem:[%s14333_s0 + $0x6c] sm:$0x1]  ;;  %s9042_s18 = smov 32  }
   0xc   :  { %v964_v54 = vshll.u32 %v7405_v44, 16  ;;  %v24_v55 = vld [vmem:[%s14333_s0 + $0x60] sm:$0xf]  ;;  %v953_v56 = vor.u32 %v952_v42, %v948_v38  ;;  %v962_v57 = vshrl.u32 %v7405_v44, 16  ;;  %v957_v58 = vshll.u32 %v7404_v45, 16 }
   0xd   :  { %v9145_v59 = vld [vmem:[%s14333_s0 + $0x64] sm:$0x1]  ;;  %v955_v61 = vshrl.u32 %v7404_v45, 16  ;;  %v978_v62 = vshll.u32 %v7407_v50, 16  ;;  %v7409_v63 = vcombine.low %v25_v52, %v9137_v53  ;;  %v946_v0 = vor.u32 %v945_v49, %v941_v43  ;;  %v27_v4 = vld [vmem:[%s14333_s0 + $0x78] sm:$0xf] }
   0xe   :  { %1366 = vrot.lane.b32.xlu1 %v939_v37, %s9035_s21  ;;  %v966_v60 = vrot.slane %v964_v54, 1  ;;  %v959_v1 = vrot.slane %v957_v58, 1  ;;  %v971_v2 = vshll.u32 %v7406_v51, 16  ;;  %v7408_v3 = vcombine.low %v24_v55, %v9145_v59  ;;  %v9157_v5 = vld [vmem:[%s14333_s0 + $0x7c] sm:$0x1] }
   0xf   :  { %1362 = vrot.lane.b32.xlu0 %v925_v48, %s9035_s21  ;;  %v26_v6 = vld [vmem:[%s14333_s0 + $0x70] sm:$0xf]  ;;  %v9165_v7 = vld [vmem:[%s14333_s0 + $0x74] sm:$0x1]  ;;  %v976_v8 = vshrl.u32 %v7407_v50, 16  ;;  %v992_v9 = vshll.u32 %v7409_v63, 16  ;;  %v7411_v14 = vcombine.low %v27_v4, %v9157_v5 }
  0x10   :  { %v967_v11 = vor.u32 %v966_v60, %v962_v57  ;;  %v980_v12 = vrot.slane %v978_v62, 1  ;;  %v969_v13 = vshrl.u32 %v7406_v51, 16  ;;  %v960_v15 = vor.u32 %v959_v1, %v955_v61  ;;  %v29_v19 = vld [vmem:[%s14333_s0 + $0x88] sm:$0xf]  ;;  %v9177_v20 = vld [vmem:[%s14333_s0 + $0x8c] sm:$0x1] }
  0x11   :  { %v973_v16 = vrot.slane %v971_v2, 1  ;;  %v985_v17 = vshll.u32 %v7408_v3, 16  ;;  %v7410_v18 = vcombine.low %v26_v6, %v9165_v7  ;;  %v28_v21 = vld [vmem:[%s14333_s0 + $0x80] sm:$0xf]  ;;  %v9185_v22 = vld [vmem:[%s14333_s0 + $0x84] sm:$0x1]  ;;  %v7413_v28 = vcombine.low %v29_v19, %v9177_v20 }
  0x12   :  { %1370 = vrot.lane.b32.xlu1 %v953_v56, %s9035_s21  ;;  %v990_v23 = vshrl.u32 %v7409_v63, 16  ;;  %v994_v24 = vrot.slane %v992_v9, 1  ;;  %v981_v25 = vor.u32 %v980_v12, %v976_v8  ;;  %v983_v26 = vshrl.u32 %v7408_v3, 16  ;;  %v31_v29 = vld [vmem:[%s14333_s0 + $0xa8] sm:$0xf] }
  0x13   :  { %1368 = vrot.lane.b32.xlu0 %v946_v0, %s9035_s21  ;;  %v1006_v27 = vshll.u32 %v7411_v14, 16  ;;  %v9195_v30 = vld [vmem:[%s14333_s0 + $0xac] sm:$0x1]  ;;  %v974_v31 = vor.u32 %v973_v16, %v969_v13  ;;  %v987_v32 = vrot.slane %v985_v17, 1  ;;  %v999_v33 = vshll.u32 %v7410_v18, 16 }
  0x14   :  { %v7412_v34 = vcombine.low %v28_v21, %v9185_v22  ;;  %v30_v35 = vld [vmem:[%s14333_s0 + $0xa0] sm:$0xf]  ;;  %v9205_v36 = vld [vmem:[%s14333_s0 + $0xa4] sm:$0x1]  ;;  %v995_v37 = vor.u32 %v994_v24, %v990_v23  ;;  %v7415_v38 = vcombine.low %v31_v29, %v9195_v30  ;;  %v1004_v39 = vshrl.u32 %v7411_v14, 16 }
  0x15   :  { %v1008_v40 = vrot.slane %v1006_v27, 1  ;;  %v997_v41 = vshrl.u32 %v7410_v18, 16  ;;  %v1020_v42 = vshll.u32 %v7413_v28, 16  ;;  %v988_v43 = vor.u32 %v987_v32, %v983_v26  ;;  %v33_v48 = vld [vmem:[%s14333_s0 + $0xb8] sm:$0xf] }
  0x16   :  { %1374 = vrot.lane.b32.xlu1 %v967_v11, %s9035_s21  ;;  %v1001_v44 = vrot.slane %v999_v33, 1  ;;  %v1013_v45 = vshll.u32 %v7412_v34, 16  ;;  %v7414_v46 = vcombine.low %v30_v35, %v9205_v36  ;;  %v9217_v49 = vld [vmem:[%s14333_s0 + $0xbc] sm:$0x1]  ;;  %v32_v50 = vld [vmem:[%s14333_s0 + $0xb0] sm:$0xf] }
  0x17   :  { %1372 = vrot.lane.b32.xlu0 %v960_v15, %s9035_s21  ;;  %v9225_v51 = vld [vmem:[%s14333_s0 + $0xb4] sm:$0x1]  ;;  %v1018_v52 = vshrl.u32 %v7413_v28, 16  ;;  %v1034_v54 = vshll.u32 %v7415_v38, 16  ;;  %v1009_v55 = vor.u32 %v1008_v40, %v1004_v39  ;;  %v1022_v56 = vrot.slane %v1020_v42, 1 }
  0x18   :  { %v1011_v57 = vshrl.u32 %v7412_v34, 16  ;;  %v7417_v58 = vcombine.low %v33_v48, %v9217_v49  ;;  %v1002_v60 = vor.u32 %v1001_v44, %v997_v41  ;;  %v1015_v61 = vrot.slane %v1013_v45, 1  ;;  %v35_v0 = vld [vmem:[%s14333_s0 + $0xc8] sm:$0xf]  ;;  %v9237_v1 = vld [vmem:[%s14333_s0 + $0xcc] sm:$0x1] }
  0x19   :  { %v1027_v62 = vshll.u32 %v7414_v46, 16  ;;  %v7416_v63 = vcombine.low %v32_v50, %v9225_v51  ;;  %v34_v2 = vld [vmem:[%s14333_s0 + $0xc0] sm:$0xf]  ;;  %v9245_v3 = vld [vmem:[%s14333_s0 + $0xc4] sm:$0x1]  ;;  %v1032_v4 = vshrl.u32 %v7415_v38, 16  ;;  %v1023_v8 = vor.u32 %v1022_v56, %v1018_v52 }
  0x1a   :  { %1378 = vrot.lane.b32.xlu1 %v981_v25, %s9035_s21  ;;  %v1036_v6 = vrot.slane %v1034_v54, 1  ;;  %v1025_v9 = vshrl.u32 %v7414_v46, 16  ;;  %v1048_v11 = vshll.u32 %v7417_v58, 16  ;;  %v7419_v12 = vcombine.low %v35_v0, %v9237_v1  ;;  %v37_v13 = vld [vmem:[%s14333_s0 + $0xd8] sm:$0xf] }
  0x1b   :  { %1376 = vrot.lane.b32.xlu0 %v974_v31, %s9035_s21  ;;  %v9255_v14 = vld [vmem:[%s14333_s0 + $0xdc] sm:$0x1]  ;;  %v1016_v15 = vor.u32 %v1015_v61, %v1011_v57  ;;  %v1029_v16 = vrot.slane %v1027_v62, 1  ;;  %v1041_v17 = vshll.u32 %v7416_v63, 16  ;;  %v7418_v18 = vcombine.low %v34_v2, %v9245_v3  ;;  %v36_v19 = vld [vmem:[%s14333_s0 + $0xd0] sm:$0xf] }
  0x1c   :  { %v9265_v21 = vld [vmem:[%s14333_s0 + $0xd4] sm:$0x1]  ;;  %v1037_v23 = vor.u32 %v1036_v6, %v1032_v4  ;;  %v7421_v24 = vcombine.low %v37_v13, %v9255_v14  ;;  %v1046_v25 = vshrl.u32 %v7417_v58, 16  ;;  %v1050_v26 = vrot.slane %v1048_v11, 1  ;;  %v39_v34 = vld [vmem:[%s14333_s0 + $0xf8] sm:$0xf] }
  0x1d   :  { %v1039_v27 = vshrl.u32 %v7416_v63, 16  ;;  %v1062_v28 = vshll.u32 %v7419_v12, 16  ;;  %v1030_v29 = vor.u32 %v1029_v16, %v1025_v9  ;;  %v1043_v31 = vrot.slane %v1041_v17, 1  ;;  %v9277_v35 = vld [vmem:[%s14333_s0 + $0xfc] sm:$0x1] }
  0x1e   :  { %1382 = vrot.lane.b32.xlu1 %v995_v37, %s9035_s21  ;;  %v1055_v32 = vshll.u32 %v7418_v18, 16  ;;  %v7420_v33 = vcombine.low %v36_v19, %v9265_v21  ;;  %v38_v37 = vld [vmem:[%s14333_s0 + $0xf0] sm:$0xf]  ;;  %v9285_v38 = vld [vmem:[%s14333_s0 + $0xf4] sm:$0x1]  ;;  %v1060_v39 = vshrl.u32 %v7419_v12, 16  ;;  %v1051_v41 = vor.u32 %v1050_v26, %v1046_v25 }
  0x1f   :  { %1380 = vrot.lane.b32.xlu0 %v988_v43, %s9035_s21  ;;  %v1076_v40 = vshll.u32 %v7421_v24, 16  ;;  %v1064_v42 = vrot.slane %v1062_v28, 1  ;;  %v1053_v43 = vshrl.u32 %v7418_v18, 16  ;;  %v7423_v44 = vcombine.low %v39_v34, %v9277_v35  ;;  %v41_v52 = vld [vmem:[%s14333_s0 + $0x108] sm:$0xf] }
  0x20   :  { %v1044_v45 = vor.u32 %v1043_v31, %v1039_v27  ;;  %v1057_v46 = vrot.slane %v1055_v32, 1  ;;  %v1069_v48 = vshll.u32 %v7420_v33, 16  ;;  %v7422_v50 = vcombine.low %v38_v37, %v9285_v38  ;;  %v9297_v54 = vld [vmem:[%s14333_s0 + $0x10c] sm:$0x1]  ;;  %v9305_v56 = vld [vmem:[%s14333_s0 + $0x104] sm:$0x1] }
  0x21   :  { %v1074_v57 = vshrl.u32 %v7421_v24, 16  ;;  %v1078_v58 = vrot.slane %v1076_v40, 1  ;;  %v1067_v61 = vshrl.u32 %v7420_v33, 16  ;;  %v1090_v62 = vshll.u32 %v7423_v44, 16  ;;  %v43_v0 = vld [vmem:[%s14333_s0 + $0x118] sm:$0xf] }
  0x22   :  { %1386 = vrot.lane.b32.xlu1 %v1009_v55, %s9035_s21  ;;  %v40_v55 = vld [vmem:[%s14333_s0 + $0x100] sm:$0xf]  ;;  %v7425_v63 = vcombine.low %v41_v52, %v9297_v54  ;;  %v9315_v2 = vld [vmem:[%s14333_s0 + $0x11c] sm:$0x1]  ;;  %v1058_v4 = vor.u32 %v1057_v46, %v1053_v43  ;;  %v1071_v6 = vrot.slane %v1069_v48, 1  ;;  %v1088_v16 = vshrl.u32 %v7423_v44, 16 }
  0x23   :  { %1384 = vrot.lane.b32.xlu0 %v1002_v60, %s9035_s21  ;;  %v1065_v60 = vor.u32 %v1064_v42, %v1060_v39  ;;  %v7424_v9 = vcombine.low %v40_v55, %v9305_v56  ;;  %v42_v11 = vld [vmem:[%s14333_s0 + $0x110] sm:$0xf]  ;;  %v9325_v12 = vld [vmem:[%s14333_s0 + $0x114] sm:$0x1]  ;;  %v1079_v13 = vor.u32 %v1078_v58, %v1074_v57  ;;  %v1092_v17 = vrot.slane %v1090_v62, 1 }
  0x24   :  { %v1081_v18 = vshrl.u32 %v7422_v50, 16  ;;  %v1104_v19 = vshll.u32 %v7425_v63, 16  ;;  %v7426_v26 = vcombine.low %v42_v11, %v9325_v12  ;;  %v45_v27 = vld [vmem:[%s14333_s0 + $0x128] sm:$0xf]  ;;  %v9337_v28 = vld [vmem:[%s14333_s0 + $0x12c] sm:$0x1] }
  0x25   :  { %v1097_v25 = vshll.u32 %v7424_v9, 16  ;;  %v9345_v31 = vld [vmem:[%s14333_s0 + $0x124] sm:$0x1]  ;;  %v1102_v32 = vshrl.u32 %v7425_v63, 16  ;;  %v1093_v34 = vor.u32 %v1092_v17, %v1088_v16  ;;  %v1095_v39 = vshrl.u32 %v7424_v9, 16 }
  0x26   :  { %1390 = vrot.lane.b32.xlu1 %v1023_v8, %s9035_s21  ;;  %v1083_v8 = vshll.u32 %v7422_v50, 16  ;;  %v1106_v37 = vrot.slane %v1104_v19, 1  ;;  %v7429_v40 = vcombine.low %v45_v27, %v9337_v28  ;;  %v1111_v43 = vshll.u32 %v7426_v26, 16  ;;  %v9357_v46 = vld [vmem:[%s14333_s0 + $0x14c] sm:$0x1] }
  0x27   :  { %1388 = vrot.lane.b32.xlu0 %v1016_v15, %s9035_s21  ;;  %v7427_v15 = vcombine.low %v43_v0, %v9315_v2  ;;  %v1099_v42 = vrot.slane %v1097_v25, 1  ;;  %v46_v48 = vld [vmem:[%s14333_s0 + $0x140] sm:$0xf]  ;;  %v9365_v50 = vld [vmem:[%s14333_s0 + $0x144] sm:$0x1]  ;;  %v1109_v58 = vshrl.u32 %v7426_v26, 16 }
  0x28   :  { %v1085_v24 = vrot.slane %v1083_v8, 1  ;;  %v1107_v57 = vor.u32 %v1106_v37, %v1102_v32  ;;  %v49_v62 = vld [vmem:[%s14333_s0 + $0x158] sm:$0xf]  ;;  %v9375_v63 = vld [vmem:[%s14333_s0 + $0x15c] sm:$0x1]  ;;  %v7430_v8 = vcombine.low %v46_v48, %v9365_v50  ;;  %v1130_v16 = vshrl.u32 %v7429_v40, 16 }
  0x29   :  { %v1118_v33 = vshll.u32 %v7427_v15, 16  ;;  %v1116_v52 = vshrl.u32 %v7427_v15, 16  ;;  %v1100_v0 = vor.u32 %v1099_v42, %v1095_v39  ;;  %v48_v9 = vld [vmem:[%s14333_s0 + $0x150] sm:$0xf]  ;;  %v9385_v11 = vld [vmem:[%s14333_s0 + $0x154] sm:$0x1]  ;;  %v7433_v15 = vcombine.low %v49_v62, %v9375_v63 }
  0x2a   :  { %1394 = vrot.lane.b32.xlu1 %v1037_v23, %s9035_s21  ;;  %v1072_v23 = vor.u32 %v1071_v6, %v1067_v61  ;;  %v1139_v25 = vshll.u32 %v7430_v8, 16  ;;  %v7432_v26 = vcombine.low %v48_v9, %v9385_v11  ;;  %v51_v27 = vld [vmem:[%s14333_s0 + $0x168] sm:$0xf]  ;;  %v50_v32 = vld [vmem:[%s14333_s0 + $0x160] sm:$0xf]  ;;  %vm5267_vm4 = vcmask 130048  }
  0x2b   :  { %1392 = vrot.lane.b32.xlu0 %v1030_v29, %s9035_s21  ;;  %v44_v29 = vld [vmem:[%s14333_s0 + $0x120] sm:$0xf]  ;;  %v1120_v55 = vrot.slane %v1118_v33, 1  ;;  %v9405_v33 = vld [vmem:[%s14333_s0 + $0x164] sm:$0x1]  ;;  %v1160_v37 = vshll.u32 %v7433_v15, 16 }
  0x2c   :  { %v7428_v44 = vcombine.low %v44_v29, %v9345_v31  ;;  %v9397_v29 = vld [vmem:[%s14333_s0 + $0x16c] sm:$0x1]  ;;  %v7434_v48 = vcombine.low %v50_v32, %v9405_v33  ;;  %v9435_v9 = vld [vmem:[%s14333_s0 + $0x19c] sm:$0x1]  ;;  %vm5396_vm5 = vcmask 162816   ;;  %vm5525_vm6 = vcmask 195584  }
  0x2d   :  { %v7435_v42 = vcombine.low %v51_v27, %v9397_v29  ;;  %vm5654_vm7 = vcmask 228352   ;;  %vm5783_vm8 = vcmask 261120   ;;  %vm6092_vm9 = vcmask 293888  }
  0x2e   :  { %1398 = vrot.lane.b32.xlu1 %v1051_v41, %s9035_s21  ;;  %v1086_v41 = vor.u32 %v1085_v24, %v1081_v18  ;;  %v1125_v6 = vshll.u32 %v7428_v44, 16  ;;  %v1123_v18 = vshrl.u32 %v7428_v44, 16  ;;  %v1141_v44 = vrot.slane %v1139_v25, 1 }
  0x2f   :  { %1396 = vrot.lane.b32.xlu0 %v1044_v45, %s9035_s21  ;;  %v47_v45 = vld [vmem:[%s14333_s0 + $0x148] sm:$0xf]  ;;  %v1172_v25 = vshrl.u32 %v7435_v42, 16  ;;  %v1165_v27 = vshrl.u32 %v7434_v48, 16 }
  0x30   :  { %v7431_v61 = vcombine.low %v47_v45, %v9357_v46  ;;  %v1127_v24 = vrot.slane %v1125_v6, 1  ;;  %v1153_v45 = vshll.u32 %v7432_v26, 16 }
  0x32   :  { %1402 = vrot.lane.b32.xlu1 %v1065_v60, %s9035_s21  ;;  %v1132_v60 = vshll.u32 %v7429_v40, 16  ;;  %v1146_v19 = vshll.u32 %v7431_v61, 16 }
  0x33   :  { %1400 = vrot.lane.b32.xlu0 %v1058_v4, %s9035_s21  ;;  %v1113_v4 = vrot.slane %v1111_v43, 1  ;;  %v1128_v43 = vor.u32 %v1127_v24, %v1123_v18  ;;  %v54_v18 = vld [vmem:[%s14333_s0 + $0x190] sm:$0xf] }
  0x34   :  { %v1134_v17 = vrot.slane %v1132_v60, 1  ;;  %v1148_v40 = vrot.slane %v1146_v19, 1  ;;  %v1158_v60 = vshrl.u32 %v7433_v15, 16  ;;  %v1155_v15 = vrot.slane %v1153_v45, 1  ;;  %v9445_v19 = vld [vmem:[%s14333_s0 + $0x194] sm:$0x1] }
  0x36   :  { %1406 = vrot.lane.b32.xlu1 %v1079_v13, %s9035_s21  ;;  %v1121_v13 = vor.u32 %v1120_v55, %v1116_v52  ;;  %v1135_v39 = vor.u32 %v1134_v17, %v1130_v16  ;;  %v53_v52 = vld [vmem:[%s14333_s0 + $0x178] sm:$0xf]  ;;  %v9417_v55 = vld [vmem:[%s14333_s0 + $0x17c] sm:$0x1]  ;;  %v1167_v16 = vshll.u32 %v7434_v48, 16 }
  0x37   :  { %1404 = vrot.lane.b32.xlu0 %v1072_v23, %s9035_s21  ;;  %v1114_v23 = vor.u32 %v1113_v4, %v1109_v58  ;;  %v9425_v58 = vld [vmem:[%s14333_s0 + $0x174] sm:$0x1]  ;;  %v1174_v4 = vshll.u32 %v7435_v42, 16  ;;  %v7437_v6 = vcombine.low %v53_v52, %v9417_v55  ;;  %v56_v42 = vld [vmem:[%s14333_s0 + $0x1a0] sm:$0xf] }
  0x39   :  { %v1188_v32 = vshll.u32 %v7437_v6, 16  ;;  %v1186_v45 = vshrl.u32 %v7437_v6, 16  ;;  %v9477_v6 = vld [vmem:[%s14333_s0 + $0x1bc] sm:$0x1] }
  0x3a   :  { %1410 = vrot.lane.b32.xlu1 %v1093_v34, %s9035_s21  ;;  %v1144_v34 = vshrl.u32 %v7431_v61, 16  ;;  %v1162_v61 = vrot.slane %v1160_v37, 1  ;;  %v1169_v37 = vrot.slane %v1167_v16, 1  ;;  %14374 = vst [vmem:[#allocation2_spill] sm:$0xff] %v9477_v6  ;;  %v9485_v16 = vld [vmem:[%s14333_s0 + $0x1b4] sm:$0x1] }
  0x3b   :  { %1408 = vrot.lane.b32.xlu0 %v1086_v41, %s9035_s21  ;;  %v1137_v41 = vshrl.u32 %v7430_v8, 16  ;;  %v55_v8 = vld [vmem:[%s14333_s0 + $0x198] sm:$0xf]  ;;  %14375 = vst [vmem:[#allocation3_spill] sm:$0xff] %v9485_v16 }
  0x3c   :  { %v1149_v62 = vor.u32 %v1148_v40, %v1144_v34  ;;  %v7439_v24 = vcombine.low %v55_v8, %v9435_v9  ;;  %v7438_v40 = vcombine.low %v54_v18, %v9445_v19 }
  0x3e   :  { %1414 = vrot.lane.b32.xlu1 %v1107_v57, %s9035_s21  ;;  %v52_v57 = vld [vmem:[%s14333_s0 + $0x170] sm:$0xf]  ;;  %v1202_v48 = vshll.u32 %v7439_v24, 16 }
  0x3f   :  { %1412 = vrot.lane.b32.xlu0 %v1100_v0, %s9035_s21  ;;  %v1151_v0 = vshrl.u32 %v7432_v26, 16  ;;  %v7436_v17 = vcombine.low %v52_v57, %v9425_v58  ;;  %v1176_v26 = vrot.slane %v1174_v4, 1  ;;  %v1190_v57 = vrot.slane %v1188_v32, 1  ;;  %v61_v32 = vld [vmem:[%s14333_s0 + $0x1c8] sm:$0xf] }
  0x40   :  { %v1195_v4 = vshll.u32 %v7438_v40, 16  ;;  %v1204_v18 = vrot.slane %v1202_v48, 1 }
  0x41   :  { %v1156_v34 = vor.u32 %v1155_v15, %v1151_v0  ;;  %v1177_v52 = vor.u32 %v1176_v26, %v1172_v25  ;;  %v58_v15 = vld [vmem:[%s14333_s0 + $0x1b0] sm:$0xf]  ;;  %v1193_v25 = vshrl.u32 %v7438_v40, 16  ;;  %v60_v40 = vld [vmem:[%s14333_s0 + $0x1c0] sm:$0xf] }
  0x42   :  { %1418 = vrot.lane.b32.xlu1 %v1121_v13, %s9035_s21  ;;  %v1142_v13 = vor.u32 %v1141_v44, %v1137_v41  ;;  %v57_v41 = vld [vmem:[%s14333_s0 + $0x1a8] sm:$0xf]  ;;  %v9465_v44 = vld [vmem:[%s14333_s0 + $0x1a4] sm:$0x1] }
  0x43   :  { %1416 = vrot.lane.b32.xlu0 %v1114_v23, %s9035_s21  ;;  %v1163_v23 = vor.u32 %v1162_v61, %v1158_v60  ;;  %v1179_v60 = vshrl.u32 %v7436_v17, 16  ;;  %v7440_v8 = vcombine.low %v56_v42, %v9465_v44  ;;  %v9505_v42 = vld [vmem:[%s14333_s0 + $0x1c4] sm:$0x1] }
  0x44   :  { %14377 = vst [vmem:[#allocation5_spill] sm:$0xff] %v9505_v42 }
  0x46   :  { %1422 = vrot.lane.b32.xlu1 %v1135_v39, %s9035_s21  ;;  %v1181_v39 = vshll.u32 %v7436_v17, 16  ;;  %v1200_v17 = vshrl.u32 %v7439_v24, 16 }
  0x47   :  { %1420 = vrot.lane.b32.xlu0 %v1128_v43, %s9035_s21  ;;  %v9457_v43 = vld [vmem:[%s14333_s0 + $0x1ac] sm:$0x1] }
  0x48   :  { %v7441_v61 = vcombine.low %v57_v41, %v9457_v43  ;;  %v1183_v0 = vrot.slane %v1181_v39, 1  ;;  %v1209_v39 = vshll.u32 %v7440_v8, 16  ;;  %v7442_v41 = vcombine.low %v58_v15, %v9485_v16  ;;  %v63_v16 = vld [vmem:[%s14333_s0 + $0x1e8] sm:$0xf] }
  0x49   :  { %v7444_v15 = vcombine.low %v60_v40, %v9505_v42 }
  0x4a   :  { %1426 = vrot.lane.b32.xlu1 %v1149_v62, %s9035_s21  ;;  %v1170_v62 = vor.u32 %v1169_v37, %v1165_v27  ;;  %v1216_v26 = vshll.u32 %v7441_v61, 16  ;;  %v1184_v24 = vor.u32 %v1183_v0, %v1179_v60  ;;  %v1197_v37 = vrot.slane %v1195_v4, 1 }
  0x4b   :  { %1424 = vrot.lane.b32.xlu0 %v1142_v13, %s9035_s21  ;;  %v59_v13 = vld [vmem:[%s14333_s0 + $0x1b8] sm:$0xf]  ;;  %v1207_v60 = vshrl.u32 %v7440_v8, 16  ;;  %v1211_v4 = vrot.slane %v1209_v39, 1  ;;  %v9525_v8 = vld [vmem:[%s14333_s0 + $0x1e4] sm:$0x1] }
  0x4c   :  { %v7443_v27 = vcombine.low %v59_v13, %v9477_v6  ;;  %v1198_v0 = vor.u32 %v1197_v37, %v1193_v25  ;;  %v1223_v13 = vshll.u32 %v7442_v41, 16  ;;  %14379 = vst [vmem:[#allocation7_spill] sm:$0xff] %v9525_v8  ;;  %v1237_v40 = vshll.u32 %v7444_v15, 16 }
  0x4d   :  { %v1212_v37 = vor.u32 %v1211_v4, %v1207_v60  ;;  %v1235_v60 = vshrl.u32 %v7444_v15, 16  ;;  %v67_v4 = vld [vmem:[%s14333_s0 + $0x208] sm:$0xf]  ;;  %v9565_v15 = vld [vmem:[%s14333_s0 + $0x204] sm:$0x1] }
  0x4e   :  { %1430 = vrot.lane.b32.xlu1 %v1163_v23, %s9035_s21  ;;  %v1191_v23 = vor.u32 %v1190_v57, %v1186_v45  ;;  %v1205_v45 = vor.u32 %v1204_v18, %v1200_v17  ;;  %v1218_v57 = vrot.slane %v1216_v26, 1  ;;  %v9517_v17 = vld [vmem:[%s14333_s0 + $0x1ec] sm:$0x1]  ;;  %v1228_v18 = vshrl.u32 %v7443_v27, 16  ;;  %14383 = vst [vmem:[#allocation11_spill] sm:$0xff] %v9565_v15 }
  0x4f   :  { %1428 = vrot.lane.b32.xlu0 %v1156_v34, %s9035_s21  ;;  %v9495_v34 = vld [vmem:[%s14333_s0 + $0x1cc] sm:$0x1]  ;;  %14378 = vst [vmem:[#allocation6_spill] sm:$0xff] %v9517_v17  ;;  %v1225_v39 = vrot.slane %v1223_v13, 1 }
  0x50   :  { %14376 = vst [vmem:[#allocation4_spill] sm:$0xff] %v9495_v34  ;;  %v7445_v48 = vcombine.low %v61_v32, %v9495_v34  ;;  %v1221_v32 = vshrl.u32 %v7442_v41, 16  ;;  %v65_v34 = vld [vmem:[%s14333_s0 + $0x1f8] sm:$0xf]  ;;  %v9545_v41 = vld [vmem:[%s14333_s0 + $0x1f4] sm:$0x1] }
  0x51   :  { %14381 = vst [vmem:[#allocation9_spill] sm:$0xff] %v9545_v41  ;;  %v9555_v13 = vld [vmem:[%s14333_s0 + $0x20c] sm:$0x1] }
  0x52   :  { %1434 = vrot.lane.b32.xlu1 %v1177_v52, %s9035_s21  ;;  %v1214_v52 = vshrl.u32 %v7441_v61, 16  ;;  %v62_v61 = vld [vmem:[%s14333_s0 + $0x1e0] sm:$0xf]  ;;  %14382 = vst [vmem:[#allocation10_spill] sm:$0xff] %v9555_v13 }
  0x53   :  { %1432 = vrot.lane.b32.xlu0 %v1170_v62, %s9035_s21  ;;  %v1230_v62 = vshll.u32 %v7443_v27, 16  ;;  %v7446_v42 = vcombine.low %v62_v61, %v9525_v8  ;;  %v9537_v27 = vld [vmem:[%s14333_s0 + $0x1fc] sm:$0x1]  ;;  %v1239_v61 = vrot.slane %v1237_v40, 1 }
  0x54   :  { %v1219_v25 = vor.u32 %v1218_v57, %v1214_v52  ;;  %14380 = vst [vmem:[#allocation8_spill] sm:$0xff] %v9537_v27 }
  0x55   :  { %v1232_v26 = vrot.slane %v1230_v62, 1 }
  0x56   :  { %1438 = vrot.lane.b32.xlu1 %v1191_v23, %s9035_s21  ;;  %v1244_v23 = vshll.u32 %v7445_v48, 16 }
  0x57   :  { %1436 = vrot.lane.b32.xlu0 %v1184_v24, %s9035_s21  ;;  %v7447_v24 = vcombine.low %v63_v16, %v9517_v17  ;;  %v64_v16 = vld [vmem:[%s14333_s0 + $0x1f0] sm:$0xf]  ;;  %v1233_v57 = vor.u32 %v1232_v26, %v1228_v18  ;;  %v7451_v26 = vcombine.low %v67_v4, %v9555_v13  ;;  %v69_v17 = vld [vmem:[%s14333_s0 + $0x218] sm:$0xf]  ;;  %v73_v13 = vld [vmem:[%s14333_s0 + $0x248] sm:$0xf] }
  0x58   :  { %v1246_v52 = vrot.slane %v1244_v23, 1  ;;  %v1251_v23 = vshll.u32 %v7446_v42, 16  ;;  %v7448_v18 = vcombine.low %v64_v16, %v9545_v41  ;;  %v1240_v16 = vor.u32 %v1239_v61, %v1235_v60  ;;  %v71_v61 = vld [vmem:[%s14333_s0 + $0x238] sm:$0xf] }
  0x59   :  { %v1258_v62 = vshll.u32 %v7447_v24, 16 }
  0x5a   :  { %1442 = vrot.lane.b32.xlu1 %v1205_v45, %s9035_s21  ;;  %v1242_v45 = vshrl.u32 %v7445_v48, 16  ;;  %v1226_v48 = vor.u32 %v1225_v39, %v1221_v32  ;;  %v1249_v39 = vshrl.u32 %v7446_v42, 16  ;;  %v1253_v41 = vrot.slane %v1251_v23, 1  ;;  %v68_v42 = vld [vmem:[%s14333_s0 + $0x210] sm:$0xf] }
  0x5b   :  { %1440 = vrot.lane.b32.xlu0 %v1198_v0, %s9035_s21  ;;  %v7449_v0 = vcombine.low %v65_v34, %v9537_v27  ;;  %v66_v34 = vld [vmem:[%s14333_s0 + $0x200] sm:$0xf]  ;;  %v1260_v32 = vrot.slane %v1258_v62, 1  ;;  %v1265_v27 = vshll.u32 %v7448_v18, 16  ;;  %v1263_v4 = vshrl.u32 %v7448_v18, 16 }
  0x5c   :  { %v7450_v8 = vcombine.low %v66_v34, %v9565_v15  ;;  %v9595_v23 = vld [vmem:[%s14333_s0 + $0x23c] sm:$0x1]  ;;  %v9605_v18 = vld [vmem:[%s14333_s0 + $0x234] sm:$0x1] }
  0x5d   :  { %v1272_v40 = vshll.u32 %v7449_v0, 16  ;;  %14386 = vst [vmem:[#allocation14_spill] sm:$0xff] %v9595_v23  ;;  %v1267_v34 = vrot.slane %v1265_v27, 1  ;;  %14387 = vst [vmem:[#allocation15_spill] sm:$0xff] %v9605_v18 }
  0x5e   :  { %1446 = vrot.lane.b32.xlu1 %v1219_v25, %s9035_s21  ;;  %v1247_v25 = vor.u32 %v1246_v52, %v1242_v45  ;;  %v9577_v45 = vld [vmem:[%s14333_s0 + $0x21c] sm:$0x1]  ;;  %v1270_v52 = vshrl.u32 %v7449_v0, 16  ;;  %v1254_v0 = vor.u32 %v1253_v41, %v1249_v39  ;;  %v1279_v15 = vshll.u32 %v7450_v8, 16 }
  0x5f   :  { %1444 = vrot.lane.b32.xlu0 %v1212_v37, %s9035_s21  ;;  %v1256_v37 = vshrl.u32 %v7447_v24, 16  ;;  %14384 = vst [vmem:[#allocation12_spill] sm:$0xff] %v9577_v45  ;;  %v9585_v24 = vld [vmem:[%s14333_s0 + $0x214] sm:$0x1]  ;;  %v1274_v62 = vrot.slane %v1272_v40, 1  ;;  %v7455_v40 = vcombine.low %v71_v61, %v9595_v23  ;;  %v1277_v27 = vshrl.u32 %v7450_v8, 16 }
  0x60   :  { %14385 = vst [vmem:[#allocation13_spill] sm:$0xff] %v9585_v24  ;;  %v72_v8 = vld [vmem:[%s14333_s0 + $0x240] sm:$0xf]  ;;  %v75_v23 = vld [vmem:[%s14333_s0 + $0x258] sm:$0xf] }
  0x61   :  { %v1261_v60 = vor.u32 %v1260_v32, %v1256_v37  ;;  %v1284_v37 = vshrl.u32 %v7451_v26, 16  ;;  %v1275_v41 = vor.u32 %v1274_v62, %v1270_v52 }
  0x62   :  { %1450 = vrot.lane.b32.xlu1 %v1233_v57, %s9035_s21  ;;  %v1286_v57 = vshll.u32 %v7451_v26, 16  ;;  %v9617_v26 = vld [vmem:[%s14333_s0 + $0x24c] sm:$0x1] }
  0x63   :  { %1448 = vrot.lane.b32.xlu0 %v1226_v48, %s9035_s21  ;;  %v7453_v48 = vcombine.low %v69_v17, %v9577_v45  ;;  %v70_v17 = vld [vmem:[%s14333_s0 + $0x230] sm:$0xf]  ;;  %14388 = vst [vmem:[#allocation16_spill] sm:$0xff] %v9617_v26  ;;  %v7457_v61 = vcombine.low %v73_v13, %v9617_v26  ;;  %v77_v26 = vld [vmem:[%s14333_s0 + $0x268] sm:$0xf] }
  0x64   :  { %v1288_v32 = vrot.slane %v1286_v57, 1  ;;  %v7454_v45 = vcombine.low %v70_v17, %v9605_v18  ;;  %v1314_v57 = vshll.u32 %v7455_v40, 16  ;;  %v74_v13 = vld [vmem:[%s14333_s0 + $0x250] sm:$0xf] }
  0x65   :  { %v1300_v39 = vshll.u32 %v7453_v48, 16 }
  0x66   :  { %1454 = vrot.lane.b32.xlu1 %v1247_v25, %s9035_s21  ;;  %v7452_v25 = vcombine.low %v68_v42, %v9585_v24  ;;  %v1281_v42 = vrot.slane %v1279_v15, 1  ;;  %v9625_v15 = vld [vmem:[%s14333_s0 + $0x244] sm:$0x1]  ;;  %v1289_v52 = vor.u32 %v1288_v32, %v1284_v37  ;;  %v1307_v17 = vshll.u32 %v7454_v45, 16  ;;  %v9637_v37 = vld [vmem:[%s14333_s0 + $0x25c] sm:$0x1] }
  0x67   :  { %1452 = vrot.lane.b32.xlu0 %v1240_v16, %s9035_s21  ;;  %v1268_v16 = vor.u32 %v1267_v34, %v1263_v4  ;;  %14389 = vst [vmem:[#allocation17_spill] sm:$0xff] %v9625_v15  ;;  %v1302_v62 = vrot.slane %v1300_v39, 1  ;;  %v7456_v18 = vcombine.low %v72_v8, %v9625_v15  ;;  %14390 = vst [vmem:[#allocation18_spill] sm:$0xff] %v9637_v37 }
  0x68   :  { %v1293_v24 = vshll.u32 %v7452_v25, 16  ;;  %v1291_v4 = vshrl.u32 %v7452_v25, 16  ;;  %v1316_v25 = vrot.slane %v1314_v57, 1  ;;  %v7459_v39 = vcombine.low %v75_v23, %v9637_v37  ;;  %v9665_v23 = vld [vmem:[%s14333_s0 + $0x264] sm:$0x1] }
  0x69   :  { %v1321_v8 = vshll.u32 %v7456_v18, 16  ;;  %v1326_v57 = vshrl.u32 %v7457_v61, 16 }
  0x6a   :  { %1458 = vrot.lane.b32.xlu1 %v1261_v60, %s9035_s21  ;;  %v1298_v60 = vshrl.u32 %v7453_v48, 16  ;;  %v1295_v34 = vrot.slane %v1293_v24, 1  ;;  %v9645_v24 = vld [vmem:[%s14333_s0 + $0x254] sm:$0x1]  ;;  %v1312_v48 = vshrl.u32 %v7455_v40, 16  ;;  %v1340_v6 = vshrl.u32 %v7459_v39, 16 }
  0x6b   :  { %1456 = vrot.lane.b32.xlu0 %v1254_v0, %s9035_s21  ;;  %v1282_v0 = vor.u32 %v1281_v42, %v1277_v27  ;;  %14391 = vst [vmem:[#allocation19_spill] sm:$0xff] %v9645_v24  ;;  %v1328_v27 = vshll.u32 %v7457_v61, 16  ;;  %v1309_v42 = vrot.slane %v1307_v17, 1  ;;  %v7458_v15 = vcombine.low %v74_v13, %v9645_v24  ;;  %v9657_v40 = vld [vmem:[%s14333_s0 + $0x26c] sm:$0x1] }
  0x6c   :  { %v1303_v32 = vor.u32 %v1302_v62, %v1298_v60  ;;  %v1319_v62 = vshrl.u32 %v7456_v18, 16  ;;  %v1323_v17 = vrot.slane %v1321_v8, 1 }
  0x6d   :  { %v1330_v60 = vrot.slane %v1328_v27, 1  ;;  %v1335_v13 = vshll.u32 %v7458_v15, 16  ;;  %v1333_v18 = vshrl.u32 %v7458_v15, 16  ;;  %v143_v15 = vld [vmem:[%s14333_s0 + $0x8] sm:$0xe] }
  0x6e   :  { %1462 = vrot.lane.b32.xlu1 %v1275_v41, %s9035_s21  ;;  %v1305_v41 = vshrl.u32 %v7454_v45, 16  ;;  %v76_v45 = vld [vmem:[%s14333_s0 + $0x260] sm:$0xf] }
  0x6f   :  { %1460 = vrot.lane.b32.xlu0 %v1268_v16, %s9035_s21  ;;  %v1296_v16 = vor.u32 %v1295_v34, %v1291_v4  ;;  %v1342_v4 = vshll.u32 %v7459_v39, 16  ;;  %v7460_v24 = vcombine.low %v76_v45, %v9665_v23  ;;  %v1331_v37 = vor.u32 %v1330_v60, %v1326_v57  ;;  %v142_v60 = vld [vmem:[%s14333_s0] sm:$0xe] }
  0x70   :  { %v1310_v34 = vor.u32 %v1309_v42, %v1305_v41 }
  0x71   :  { %v1349_v27 = vshll.u32 %v7460_v24, 16  ;;  %v1347_v45 = vshrl.u32 %v7460_v24, 16 }
  0x72   :  { %1466 = vrot.lane.b32.xlu1 %v1289_v52, %s9035_s21  ;;  %v1317_v52 = vor.u32 %v1316_v25, %v1312_v48  ;;  %v1344_v48 = vrot.slane %v1342_v4, 1  ;;  %v1324_v25 = vor.u32 %v1323_v17, %v1319_v62  ;;  %v8932_v4 = vld [vmem:[%s14333_s0 + $0x4] sm:$0x1] }
  0x73   :  { %1464 = vrot.lane.b32.xlu0 %v1282_v0, %s9035_s21  ;;  %v7461_v0 = vcombine.low %v77_v26, %v9657_v40 }
  0x74   :  { %v1345_v41 = vor.u32 %v1344_v48, %v1340_v6 }
  0x75   :  { %v1356_v61 = vshll.u32 %v7461_v0, 16  ;;  %v1354_v42 = vshrl.u32 %v7461_v0, 16  ;;  %v7462_v0 = vcombine.low %v142_v60, %v8932_v4 }
  0x76   :  { %1470 = vrot.lane.b32.xlu1 %v1303_v32, %s9035_s21  ;;  %v1337_v32 = vrot.slane %v1335_v13, 1  ;;  %v144_v13 = vld [vmem:[%s14333_s0 + $0x10] sm:$0xe] }
  0x77   :  { %1468 = vrot.lane.b32.xlu0 %v1296_v16, %s9035_s21  ;;  %v1358_v8 = vrot.slane %v1356_v61, 1  ;;  %v8933_v61 = vld [vmem:[%s14333_s0 + $0x1c] sm:$0x1] }
  0x78   :  { %v1338_v39 = vor.u32 %v1337_v32, %v1333_v18  ;;  %v1680_v18 = vrot.slane %v7462_v0, 1  ;;  %v8934_v32 = vld [vmem:[%s14333_s0 + $0x14] sm:$0x1]  ;;  %v148_v0 = vld [vmem:[%s14333_s0 + $0x30] sm:$0xe] }
  0x79   :  { %v1359_v6 = vor.u32 %v1358_v8, %v1354_v42  ;;  %v146_v8 = vld [vmem:[%s14333_s0 + $0x20] sm:$0xe] }
  0x7a   :  { %1474 = vrot.lane.b32.xlu1 %v1317_v52, %s9035_s21  ;;  %v1351_v52 = vrot.slane %v1349_v27, 1  ;;  %v7464_v27 = vcombine.low %v144_v13, %v8934_v32 }
  0x7b   :  { %1472 = vrot.lane.b32.xlu0 %v1310_v34, %s9035_s21  ;;  %v145_v34 = vld [vmem:[%s14333_s0 + $0x18] sm:$0xe] }
  0x7c   :  { %v9673_v26 = vpop.permute.xlu1 %1364  ;;  %v1352_v24 = vor.u32 %v1351_v52, %v1347_v45  ;;  %v8935_v52 = vld [vmem:[%s14333_s0 + $0x2c] sm:$0x1]  ;;  %v1682_v60 = vrot.slane %v7464_v27, 1  ;;  %v151_v27 = vld [vmem:[%s14333_s0 + $0x58] sm:$0xe] }
  0x7d   :  { %14392 = vst [vmem:[#allocation20_spill] sm:$0xff] %v9673_v26  ;;  %v9675_v16 = vpop.permute.xlu0 %1360  ;;  %v7079_v26 = vld [vmem:[%s14333_s0 + $0x14] sm:$0x1] }
  0x7e   :  { %14393 = vst [vmem:[#allocation21_spill] sm:$0xff] %v9675_v16  ;;  %1478 = vrot.lane.b32.xlu1 %v1331_v37, %s9035_s21  ;;  %v7463_v37 = vcombine.low %v143_v15, %v9087_v10 }
  0x7f   :  { %1476 = vrot.lane.b32.xlu0 %v1324_v25, %s9035_s21  ;;  %v7465_v25 = vcombine.low %v145_v34, %v8933_v61 }
  0x80   :  { %v9682_v57 = vpop.permute.xlu1 %1366  ;;  %v1681_v10 = vrot.slane %v7463_v37, 1 }
  0x81   :  { %14394 = vst [vmem:[#allocation22_spill] sm:$0xff] %v9682_v57  ;;  %v9687_v62 = vpop.permute.xlu0 %1362  ;;  %v1683_v45 = vrot.slane %v7465_v25, 1 }
  0x82   :  { %14395 = vst [vmem:[#allocation23_spill] sm:$0xff] %v9687_v62  ;;  %1482 = vrot.lane.b32.xlu1 %v1345_v41, %s9035_s21  ;;  %v147_v41 = vld [vmem:[%s14333_s0 + $0x28] sm:$0xe] }
  0x83   :  { %1480 = vrot.lane.b32.xlu0 %v1338_v39, %s9035_s21  ;;  %v7467_v15 = vcombine.low %v147_v41, %v8935_v52 }
  0x84   :  { %v9698_v17 = vpop.permute.xlu1 %1370 }
  0x85   :  { %14396 = vst [vmem:[#allocation24_spill] sm:$0xff] %v9698_v17  ;;  %v9703_v48 = vpop.permute.xlu0 %1368  ;;  %v1685_v13 = vrot.slane %v7467_v15, 1  ;;  %v8939_v15 = vld [vmem:[%s14333_s0 + $0x5c] sm:$0x1] }
  0x86   :  { %14397 = vst [vmem:[#allocation25_spill] sm:$0xff] %v9703_v48  ;;  %1486 = vrot.lane.b32.xlu1 %v1359_v6, %s9035_s21  ;;  %v8936_v6 = vld [vmem:[%s14333_s0 + $0x24] sm:$0x1] }
  0x87   :  { %1484 = vrot.lane.b32.xlu0 %v1352_v24, %s9035_s21  ;;  %v7466_v37 = vcombine.low %v146_v8, %v8936_v6  ;;  %v149_v24 = vld [vmem:[%s14333_s0 + $0x38] sm:$0xe]  ;;  %v150_v8 = vld [vmem:[%s14333_s0 + $0x50] sm:$0xe]  ;;  %s9040_s21 = smov 24  }
  0x88   :  { %v9716_v42 = vpop.permute.xlu1 %1374 }
  0x89   :  { %14398 = vst [vmem:[#allocation26_spill] sm:$0xff] %v9716_v42  ;;  %v9721_v39 = vpop.permute.xlu0 %1372  ;;  %v1684_v25 = vrot.slane %v7466_v37, 1  ;;  %v7470_v37 = vcombine.low %v150_v8, %v9127_v47  ;;  %v154_v8 = vld [vmem:[%s14333_s0 + $0x70] sm:$0xe] }
  0x8a   :  { %14399 = vst [vmem:[#allocation27_spill] sm:$0xff] %v9721_v39  ;;  %1746 = vrot.lane.b32.xlu1 %v1681_v10, %s9036_s26  ;;  %v8937_v10 = vld [vmem:[%s14333_s0 + $0x3c] sm:$0x1] }
  0x8b   :  { %1744 = vrot.lane.b32.xlu0 %v1680_v18, %s9036_s26  ;;  %v7469_v61 = vcombine.low %v149_v24, %v8937_v10  ;;  %v8938_v18 = vld [vmem:[%s14333_s0 + $0x34] sm:$0x1]  ;;  %v153_v24 = vld [vmem:[%s14333_s0 + $0x68] sm:$0xe]  ;;  %v1688_v47 = vrot.slane %v7470_v37, 1 }
  0x8c   :  { %v9734_v4 = vpop.permute.xlu1 %1378  ;;  %v7468_v32 = vcombine.low %v148_v0, %v8938_v18 }
  0x8d   :  { %14400 = vst [vmem:[#allocation28_spill] sm:$0xff] %v9734_v4  ;;  %v9739_v34 = vpop.permute.xlu0 %1376  ;;  %v1687_v52 = vrot.slane %v7469_v61, 1 }
  0x8e   :  { %14401 = vst [vmem:[#allocation29_spill] sm:$0xff] %v9739_v34  ;;  %1750 = vrot.lane.b32.xlu1 %v1683_v45, %s9036_s26  ;;  %v1686_v6 = vrot.slane %v7468_v32, 1  ;;  %v155_v32 = vld [vmem:[%s14333_s0 + $0x78] sm:$0xe] }
  0x8f   :  { %1748 = vrot.lane.b32.xlu0 %v1682_v60, %s9036_s26  ;;  %v7471_v60 = vcombine.low %v151_v27, %v8939_v15 }
  0x90   :  { %v9752_v41 = vpop.permute.xlu1 %1382 }
  0x91   :  { %14402 = vst [vmem:[#allocation30_spill] sm:$0xff] %v9752_v41  ;;  %v9757_v45 = vpop.permute.xlu0 %1380  ;;  %v1689_v61 = vrot.slane %v7471_v60, 1  ;;  %v7474_v60 = vcombine.low %v154_v8, %v9165_v7 }
  0x92   :  { %14403 = vst [vmem:[#allocation31_spill] sm:$0xff] %v9757_v45  ;;  %1754 = vrot.lane.b32.xlu1 %v1685_v13, %s9036_s26  ;;  %v152_v13 = vld [vmem:[%s14333_s0 + $0x60] sm:$0xe] }
  0x93   :  { %1752 = vrot.lane.b32.xlu0 %v1684_v25, %s9036_s26  ;;  %v7473_v25 = vcombine.low %v153_v24, %v9137_v53  ;;  %v7472_v18 = vcombine.low %v152_v13, %v9145_v59  ;;  %v156_v24 = vld [vmem:[%s14333_s0 + $0x80] sm:$0xe]  ;;  %v1692_v7 = vrot.slane %v7474_v60, 1 }
  0x94   :  { %v9768_v0 = vpop.permute.xlu1 %1386 }
  0x95   :  { %14404 = vst [vmem:[#allocation32_spill] sm:$0xff] %v9768_v0  ;;  %v9773_v10 = vpop.permute.xlu0 %1384  ;;  %v1691_v53 = vrot.slane %v7473_v25, 1  ;;  %v1690_v59 = vrot.slane %v7472_v18, 1  ;;  %v7476_v25 = vcombine.low %v156_v24, %v9185_v22 }
  0x96   :  { %14405 = vst [vmem:[#allocation33_spill] sm:$0xff] %v9773_v10  ;;  %1758 = vrot.lane.b32.xlu1 %v1687_v52, %s9036_s26  ;;  %v7475_v52 = vcombine.low %v155_v32, %v9157_v5  ;;  %v158_v32 = vld [vmem:[%s14333_s0 + $0xa0] sm:$0xe] }
  0x97   :  { %1756 = vrot.lane.b32.xlu0 %v1686_v6, %s9036_s26  ;;  %v157_v6 = vld [vmem:[%s14333_s0 + $0x88] sm:$0xe]  ;;  %v1694_v22 = vrot.slane %v7476_v25, 1 }
  0x98   :  { %v9782_v27 = vpop.permute.xlu1 %1390  ;;  %v1693_v5 = vrot.slane %v7475_v52, 1  ;;  %v7478_v52 = vcombine.low %v158_v32, %v9205_v36 }
  0x99   :  { %14406 = vst [vmem:[#allocation34_spill] sm:$0xff] %v9782_v27  ;;  %v9787_v15 = vpop.permute.xlu0 %1388 }
  0x9a   :  { %14407 = vst [vmem:[#allocation35_spill] sm:$0xff] %v9787_v15  ;;  %1762 = vrot.lane.b32.xlu1 %v1689_v61, %s9036_s26  ;;  %v7477_v61 = vcombine.low %v157_v6, %v9177_v20  ;;  %v160_v6 = vld [vmem:[%s14333_s0 + $0xb0] sm:$0xe]  ;;  %v1696_v36 = vrot.slane %v7478_v52, 1 }
  0x9b   :  { %1760 = vrot.lane.b32.xlu0 %v1688_v47, %s9036_s26  ;;  %v159_v47 = vld [vmem:[%s14333_s0 + $0xa8] sm:$0xe] }
  0x9c   :  { %v9796_v37 = vpop.permute.xlu1 %1394  ;;  %v1695_v20 = vrot.slane %v7477_v61, 1  ;;  %v7480_v61 = vcombine.low %v160_v6, %v9225_v51 }
  0x9d   :  { %14408 = vst [vmem:[#allocation36_spill] sm:$0xff] %v9796_v37  ;;  %v9801_v13 = vpop.permute.xlu0 %1392 }
  0x9e   :  { %14409 = vst [vmem:[#allocation37_spill] sm:$0xff] %v9801_v13  ;;  %1766 = vrot.lane.b32.xlu1 %v1691_v53, %s9036_s26  ;;  %v7479_v53 = vcombine.low %v159_v47, %v9195_v30  ;;  %v162_v47 = vld [vmem:[%s14333_s0 + $0xc0] sm:$0xe]  ;;  %v1698_v51 = vrot.slane %v7480_v61, 1 }
  0x9f   :  { %1764 = vrot.lane.b32.xlu0 %v1690_v59, %s9036_s26  ;;  %v161_v59 = vld [vmem:[%s14333_s0 + $0xb8] sm:$0xe] }
  0xa0   :  { %v9810_v18 = vpop.permute.xlu1 %1398  ;;  %v1697_v30 = vrot.slane %v7479_v53, 1  ;;  %v7482_v53 = vcombine.low %v162_v47, %v9245_v3 }
  0xa1   :  { %14410 = vst [vmem:[#allocation38_spill] sm:$0xff] %v9810_v18  ;;  %v9815_v8 = vpop.permute.xlu0 %1396 }
  0xa2   :  { %14411 = vst [vmem:[#allocation39_spill] sm:$0xff] %v9815_v8  ;;  %1770 = vrot.lane.b32.xlu1 %v1693_v5, %s9036_s26  ;;  %v7481_v5 = vcombine.low %v161_v59, %v9217_v49  ;;  %v164_v59 = vld [vmem:[%s14333_s0 + $0xd0] sm:$0xe]  ;;  %v1700_v3 = vrot.slane %v7482_v53, 1 }
  0xa3   :  { %1768 = vrot.lane.b32.xlu0 %v1692_v7, %s9036_s26  ;;  %v163_v7 = vld [vmem:[%s14333_s0 + $0xc8] sm:$0xe] }
  0xa4   :  { %v9824_v60 = vpop.permute.xlu1 %1402  ;;  %v1699_v49 = vrot.slane %v7481_v5, 1  ;;  %v7484_v5 = vcombine.low %v164_v59, %v9265_v21 }
  0xa5   :  { %14412 = vst [vmem:[#allocation40_spill] sm:$0xff] %v9824_v60  ;;  %v9829_v24 = vpop.permute.xlu0 %1400 }
  0xa6   :  { %14413 = vst [vmem:[#allocation41_spill] sm:$0xff] %v9829_v24  ;;  %1774 = vrot.lane.b32.xlu1 %v1695_v20, %s9036_s26  ;;  %v7483_v20 = vcombine.low %v163_v7, %v9237_v1  ;;  %v166_v7 = vld [vmem:[%s14333_s0 + $0xf0] sm:$0xe]  ;;  %v1702_v21 = vrot.slane %v7484_v5, 1  ;;  %v10319_v24 = vld [vmem:[%s14333_s0 + $0xa8] sm:$0xf] }
  0xa7   :  { %1772 = vrot.lane.b32.xlu0 %v1694_v22, %s9036_s26  ;;  %v165_v22 = vld [vmem:[%s14333_s0 + $0xd8] sm:$0xe]  ;;  %v7542_v60 = vcombine.low %v10319_v24, %v10319_v24 }
  0xa8   :  { %v9838_v25 = vpop.permute.xlu1 %1406  ;;  %v1701_v1 = vrot.slane %v7483_v20, 1  ;;  %v7486_v20 = vcombine.low %v166_v7, %v9285_v38 }
  0xa9   :  { %14414 = vst [vmem:[#allocation42_spill] sm:$0xff] %v9838_v25  ;;  %v9843_v32 = vpop.permute.xlu0 %1404 }
  0xaa   :  { %14415 = vst [vmem:[#allocation43_spill] sm:$0xff] %v9843_v32  ;;  %1778 = vrot.lane.b32.xlu1 %v1697_v30, %s9036_s26  ;;  %v7485_v30 = vcombine.low %v165_v22, %v9255_v14  ;;  %v168_v22 = vld [vmem:[%s14333_s0 + $0x100] sm:$0xe]  ;;  %v1704_v38 = vrot.slane %v7486_v20, 1  ;;  %v10312_v32 = vld [vmem:[%s14333_s0 + $0xb0] sm:$0xf] }
  0xab   :  { %1776 = vrot.lane.b32.xlu0 %v1696_v36, %s9036_s26  ;;  %v167_v36 = vld [vmem:[%s14333_s0 + $0xf8] sm:$0xe] }
  0xac   :  { %v9852_v52 = vpop.permute.xlu1 %1410  ;;  %v1703_v14 = vrot.slane %v7485_v30, 1  ;;  %v7488_v30 = vcombine.low %v168_v22, %v9305_v56 }
  0xad   :  { %14416 = vst [vmem:[#allocation44_spill] sm:$0xff] %v9852_v52  ;;  %v9857_v6 = vpop.permute.xlu0 %1408 }
  0xae   :  { %14417 = vst [vmem:[#allocation45_spill] sm:$0xff] %v9857_v6  ;;  %1782 = vrot.lane.b32.xlu1 %v1699_v49, %s9036_s26  ;;  %v7487_v49 = vcombine.low %v167_v36, %v9277_v35  ;;  %v170_v36 = vld [vmem:[%s14333_s0 + $0x110] sm:$0xe]  ;;  %v1706_v56 = vrot.slane %v7488_v30, 1  ;;  %v10299_v6 = vld [vmem:[%s14333_s0 + $0x88] sm:$0xf] }
  0xaf   :  { %1780 = vrot.lane.b32.xlu0 %v1698_v51, %s9036_s26  ;;  %v169_v51 = vld [vmem:[%s14333_s0 + $0x108] sm:$0xe]  ;;  %v7540_v52 = vcombine.low %v10299_v6, %v10299_v6 }
  0xb0   :  { %v9866_v61 = vpop.permute.xlu1 %1414  ;;  %v1705_v35 = vrot.slane %v7487_v49, 1  ;;  %v7490_v49 = vcombine.low %v170_v36, %v9325_v12 }
  0xb1   :  { %14418 = vst [vmem:[#allocation46_spill] sm:$0xff] %v9866_v61  ;;  %v9871_v47 = vpop.permute.xlu0 %1412 }
  0xb2   :  { %14419 = vst [vmem:[#allocation47_spill] sm:$0xff] %v9871_v47  ;;  %1786 = vrot.lane.b32.xlu1 %v1701_v1, %s9036_s26  ;;  %v7489_v1 = vcombine.low %v169_v51, %v9297_v54  ;;  %v172_v51 = vld [vmem:[%s14333_s0 + $0x120] sm:$0xe]  ;;  %v1708_v12 = vrot.slane %v7490_v49, 1  ;;  %v10292_v47 = vld [vmem:[%s14333_s0 + $0x90] sm:$0xf] }
  0xb3   :  { %1784 = vrot.lane.b32.xlu0 %v1700_v3, %s9036_s26  ;;  %v171_v3 = vld [vmem:[%s14333_s0 + $0x118] sm:$0xe] }
  0xb4   :  { %v9880_v53 = vpop.permute.xlu1 %1418  ;;  %v1707_v54 = vrot.slane %v7489_v1, 1  ;;  %v7492_v1 = vcombine.low %v172_v51, %v9345_v31 }
  0xb5   :  { %14420 = vst [vmem:[#allocation48_spill] sm:$0xff] %v9880_v53  ;;  %v9885_v59 = vpop.permute.xlu0 %1416 }
  0xb6   :  { %14421 = vst [vmem:[#allocation49_spill] sm:$0xff] %v9885_v59  ;;  %1790 = vrot.lane.b32.xlu1 %v1703_v14, %s9036_s26  ;;  %v7491_v14 = vcombine.low %v171_v3, %v9315_v2  ;;  %v174_v3 = vld [vmem:[%s14333_s0 + $0x140] sm:$0xe]  ;;  %v1710_v31 = vrot.slane %v7492_v1, 1  ;;  %v10279_v59 = vld [vmem:[%s14333_s0 + $0x78] sm:$0xf] }
  0xb7   :  { %1788 = vrot.lane.b32.xlu0 %v1702_v21, %s9036_s26  ;;  %v173_v21 = vld [vmem:[%s14333_s0 + $0x128] sm:$0xe]  ;;  %v7538_v53 = vcombine.low %v10279_v59, %v10279_v59 }
  0xb8   :  { %v9894_v5 = vpop.permute.xlu1 %1422  ;;  %v1709_v2 = vrot.slane %v7491_v14, 1  ;;  %v7494_v14 = vcombine.low %v174_v3, %v9365_v50 }
  0xb9   :  { %14422 = vst [vmem:[#allocation50_spill] sm:$0xff] %v9894_v5  ;;  %v9899_v7 = vpop.permute.xlu0 %1420 }
  0xba   :  { %14423 = vst [vmem:[#allocation51_spill] sm:$0xff] %v9899_v7  ;;  %1794 = vrot.lane.b32.xlu1 %v1705_v35, %s9036_s26  ;;  %v7493_v35 = vcombine.low %v173_v21, %v9337_v28  ;;  %v176_v21 = vld [vmem:[%s14333_s0 + $0x150] sm:$0xe]  ;;  %v1712_v50 = vrot.slane %v7494_v14, 1  ;;  %v10272_v7 = vld [vmem:[%s14333_s0 + $0x80] sm:$0xf] }
  0xbb   :  { %1792 = vrot.lane.b32.xlu0 %v1704_v38, %s9036_s26  ;;  %v175_v38 = vld [vmem:[%s14333_s0 + $0x148] sm:$0xe] }
  0xbc   :  { %v9908_v20 = vpop.permute.xlu1 %1426  ;;  %v1711_v28 = vrot.slane %v7493_v35, 1  ;;  %v7496_v35 = vcombine.low %v176_v21, %v9385_v11 }
  0xbd   :  { %14424 = vst [vmem:[#allocation52_spill] sm:$0xff] %v9908_v20  ;;  %v9913_v22 = vpop.permute.xlu0 %1424 }
  0xbe   :  { %14425 = vst [vmem:[#allocation53_spill] sm:$0xff] %v9913_v22  ;;  %1798 = vrot.lane.b32.xlu1 %v1707_v54, %s9036_s26  ;;  %v7495_v54 = vcombine.low %v175_v38, %v9357_v46  ;;  %v178_v38 = vld [vmem:[%s14333_s0 + $0x160] sm:$0xe]  ;;  %v1714_v11 = vrot.slane %v7496_v35, 1  ;;  %v10259_v22 = vld [vmem:[%s14333_s0 + $0x68] sm:$0xf] }
  0xbf   :  { %1796 = vrot.lane.b32.xlu0 %v1706_v56, %s9036_s26  ;;  %v177_v56 = vld [vmem:[%s14333_s0 + $0x158] sm:$0xe]  ;;  %v7536_v20 = vcombine.low %v10259_v22, %v10259_v22 }
  0xc0   :  { %v9922_v30 = vpop.permute.xlu1 %1430  ;;  %v1713_v46 = vrot.slane %v7495_v54, 1  ;;  %v7498_v54 = vcombine.low %v178_v38, %v9405_v33 }
  0xc1   :  { %14426 = vst [vmem:[#allocation54_spill] sm:$0xff] %v9922_v30  ;;  %v9927_v36 = vpop.permute.xlu0 %1428 }
  0xc2   :  { %14427 = vst [vmem:[#allocation55_spill] sm:$0xff] %v9927_v36  ;;  %1802 = vrot.lane.b32.xlu1 %v1709_v2, %s9036_s26  ;;  %v7497_v2 = vcombine.low %v177_v56, %v9375_v63  ;;  %v180_v56 = vld [vmem:[%s14333_s0 + $0x170] sm:$0xe]  ;;  %v1716_v33 = vrot.slane %v7498_v54, 1 }
  0xc3   :  { %1800 = vrot.lane.b32.xlu0 %v1708_v12, %s9036_s26  ;;  %v179_v12 = vld [vmem:[%s14333_s0 + $0x168] sm:$0xe]  ;;  %v10252_v36 = vld [vmem:[%s14333_s0 + $0x70] sm:$0xf] }
  0xc4   :  { %v9936_v49 = vpop.permute.xlu1 %1434  ;;  %v1715_v63 = vrot.slane %v7497_v2, 1  ;;  %v7500_v2 = vcombine.low %v180_v56, %v9425_v58 }
  0xc5   :  { %14428 = vst [vmem:[#allocation56_spill] sm:$0xff] %v9936_v49  ;;  %v9941_v51 = vpop.permute.xlu0 %1432 }
  0xc6   :  { %14429 = vst [vmem:[#allocation57_spill] sm:$0xff] %v9941_v51  ;;  %1806 = vrot.lane.b32.xlu1 %v1711_v28, %s9036_s26  ;;  %v7499_v28 = vcombine.low %v179_v12, %v9397_v29  ;;  %v182_v12 = vld [vmem:[%s14333_s0 + $0x190] sm:$0xe]  ;;  %v1718_v58 = vrot.slane %v7500_v2, 1  ;;  %v10239_v51 = vld [vmem:[%s14333_s0 + $0x58] sm:$0xf] }
  0xc7   :  { %1804 = vrot.lane.b32.xlu0 %v1710_v31, %s9036_s26  ;;  %v181_v31 = vld [vmem:[%s14333_s0 + $0x178] sm:$0xe]  ;;  %v7534_v49 = vcombine.low %v10239_v51, %v10239_v51 }
  0xc8   :  { %v9950_v1 = vpop.permute.xlu1 %1438  ;;  %v1717_v29 = vrot.slane %v7499_v28, 1  ;;  %v7502_v28 = vcombine.low %v182_v12, %v9445_v19 }
  0xc9   :  { %14430 = vst [vmem:[#allocation58_spill] sm:$0xff] %v9950_v1  ;;  %v9955_v3 = vpop.permute.xlu0 %1436 }
  0xca   :  { %14431 = vst [vmem:[#allocation59_spill] sm:$0xff] %v9955_v3  ;;  %1810 = vrot.lane.b32.xlu1 %v1713_v46, %s9036_s26  ;;  %v7501_v46 = vcombine.low %v181_v31, %v9417_v55  ;;  %v184_v31 = vld [vmem:[%s14333_s0 + $0x1a0] sm:$0xe]  ;;  %v1720_v19 = vrot.slane %v7502_v28, 1 }
  0xcb   :  { %1808 = vrot.lane.b32.xlu0 %v1712_v50, %s9036_s26  ;;  %v183_v50 = vld [vmem:[%s14333_s0 + $0x198] sm:$0xe]  ;;  %v10232_v3 = vld [vmem:[%s14333_s0 + $0x60] sm:$0xf] }
  0xcc   :  { %v9964_v14 = vpop.permute.xlu1 %1442  ;;  %v1719_v55 = vrot.slane %v7501_v46, 1  ;;  %v7504_v46 = vcombine.low %v184_v31, %v9465_v44 }
  0xcd   :  { %14432 = vst [vmem:[#allocation60_spill] sm:$0xff] %v9964_v14  ;;  %v9969_v21 = vpop.permute.xlu0 %1440 }
  0xce   :  { %14433 = vst [vmem:[#allocation61_spill] sm:$0xff] %v9969_v21  ;;  %1814 = vrot.lane.b32.xlu1 %v1715_v63, %s9036_s26  ;;  %v7503_v63 = vcombine.low %v183_v50, %v9435_v9  ;;  %v186_v50 = vld [vmem:[%s14333_s0 + $0x1b0] sm:$0xe]  ;;  %v1722_v44 = vrot.slane %v7504_v46, 1  ;;  %v10219_v21 = vld [vmem:[%s14333_s0 + $0x38] sm:$0xf] }
  0xcf   :  { %1812 = vrot.lane.b32.xlu0 %v1714_v11, %s9036_s26  ;;  %v185_v11 = vld [vmem:[%s14333_s0 + $0x1a8] sm:$0xe]  ;;  %v7532_v14 = vcombine.low %v10219_v21, %v10219_v21 }
  0xd0   :  { %v9978_v35 = vpop.permute.xlu1 %1446  ;;  %v1721_v9 = vrot.slane %v7503_v63, 1 }
  0xd1   :  { %14434 = vst [vmem:[#allocation62_spill] sm:$0xff] %v9978_v35  ;;  %v9983_v38 = vpop.permute.xlu0 %1444 }
  0xd2   :  { %14435 = vst [vmem:[#allocation63_spill] sm:$0xff] %v9983_v38  ;;  %1818 = vrot.lane.b32.xlu1 %v1717_v29, %s9036_s26  ;;  %v7505_v29 = vcombine.low %v185_v11, %v9457_v43  ;;  %v189_v11 = vld [vmem:[%s14333_s0 + $0x1c8] sm:$0xe]  ;;  %v10212_v38 = vld [vmem:[%s14333_s0 + $0x40] sm:$0xf] }
  0xd3   :  { %1816 = vrot.lane.b32.xlu0 %v1716_v33, %s9036_s26  ;;  %v187_v33 = vld [vmem:[%s14333_s0 + $0x1b8] sm:$0xe] }
  0xd4   :  { %v9992_v54 = vpop.permute.xlu1 %1450  ;;  %v1723_v43 = vrot.slane %v7505_v29, 1  ;;  %v14444_v29 = vld [vmem:[#allocation4_spill] sm:$0xff] }
  0xd5   :  { %14436 = vst [vmem:[#allocation64_spill] sm:$0xff] %v9992_v54  ;;  %v9997_v56 = vpop.permute.xlu0 %1448 }
  0xd6   :  { %14437 = vst [vmem:[#allocation65_spill] sm:$0xff] %v9997_v56  ;;  %1822 = vrot.lane.b32.xlu1 %v1719_v55, %s9036_s26  ;;  %v14440_v55 = vld [vmem:[#allocation2_spill] sm:$0xff]  ;;  %v10199_v56 = vld [vmem:[%s14333_s0 + $0x28] sm:$0xf] }
  0xd7   :  { %1820 = vrot.lane.b32.xlu0 %v1718_v58, %s9036_s26  ;;  %v7507_v63 = vcombine.low %v187_v33, %v14440_v55  ;;  %v14441_v58 = vld [vmem:[#allocation3_spill] sm:$0xff]  ;;  %v14445_v33 = vld [vmem:[#allocation5_spill] sm:$0xff]  ;;  %v7530_v54 = vcombine.low %v10199_v56, %v10199_v56 }
  0xd8   :  { %v10006_v2 = vpop.permute.xlu1 %1454  ;;  %v7506_v28 = vcombine.low %v186_v50, %v14441_v58  ;;  %v191_v55 = vld [vmem:[%s14333_s0 + $0x1e8] sm:$0xe] }
  0xd9   :  { %14438 = vst [vmem:[#allocation66_spill] sm:$0xff] %v10006_v2  ;;  %v10011_v12 = vpop.permute.xlu0 %1452 }
  0xda   :  { %14439 = vst [vmem:[#allocation67_spill] sm:$0xff] %v10011_v12  ;;  %1826 = vrot.lane.b32.xlu1 %v1721_v9, %s9036_s26  ;;  %v188_v12 = vld [vmem:[%s14333_s0 + $0x1c0] sm:$0xe]  ;;  %v1725_v9 = vrot.slane %v7507_v63, 1  ;;  %v1724_v46 = vrot.slane %v7506_v28, 1  ;;  %v14449_v28 = vld [vmem:[#allocation7_spill] sm:$0xff] }
  0xdb   :  { %1824 = vrot.lane.b32.xlu0 %v1720_v19, %s9036_s26  ;;  %v7509_v19 = vcombine.low %v189_v11, %v14444_v29  ;;  %v7508_v50 = vcombine.low %v188_v12, %v14445_v33  ;;  %v14448_v63 = vld [vmem:[#allocation6_spill] sm:$0xff]  ;;  %v193_v29 = vld [vmem:[%s14333_s0 + $0x1f8] sm:$0xe] }
  0xdc   :  { %v10020_v31 = vpop.permute.xlu1 %1458 }
  0xdd   :  { %14442 = vst [vmem:[#allocation2_spill] sm:$0xff] %v10020_v31  ;;  %v10025_v2 = vpop.permute.xlu0 %1456  ;;  %v1726_v12 = vrot.slane %v7508_v50, 1  ;;  %v14453_v50 = vld [vmem:[#allocation9_spill] sm:$0xff] }
  0xde   :  { %14443 = vst [vmem:[#allocation3_spill] sm:$0xff] %v10025_v2  ;;  %1830 = vrot.lane.b32.xlu1 %v1723_v43, %s9036_s26  ;;  %v190_v2 = vld [vmem:[%s14333_s0 + $0x1e0] sm:$0xe]  ;;  %v1727_v43 = vrot.slane %v7509_v19, 1  ;;  %v14452_v19 = vld [vmem:[#allocation8_spill] sm:$0xff] }
  0xdf   :  { %1828 = vrot.lane.b32.xlu0 %v1722_v44, %s9036_s26  ;;  %v7511_v44 = vcombine.low %v191_v55, %v14448_v63  ;;  %v7510_v11 = vcombine.low %v190_v2, %v14449_v28  ;;  %v195_v63 = vld [vmem:[%s14333_s0 + $0x208] sm:$0xe] }
  0xe0   :  { %v10034_v58 = vpop.permute.xlu1 %1462 }
  0xe1   :  { %14446 = vst [vmem:[#allocation4_spill] sm:$0xff] %v10034_v58  ;;  %v10039_v31 = vpop.permute.xlu0 %1460  ;;  %v1728_v2 = vrot.slane %v7510_v11, 1  ;;  %v14457_v11 = vld [vmem:[#allocation11_spill] sm:$0xff] }
  0xe2   :  { %14447 = vst [vmem:[#allocation5_spill] sm:$0xff] %v10039_v31  ;;  %1834 = vrot.lane.b32.xlu1 %v1725_v9, %s9036_s26  ;;  %v192_v31 = vld [vmem:[%s14333_s0 + $0x1f0] sm:$0xe]  ;;  %v1729_v9 = vrot.slane %v7511_v44, 1  ;;  %v14456_v44 = vld [vmem:[#allocation10_spill] sm:$0xff] }
  0xe3   :  { %1832 = vrot.lane.b32.xlu0 %v1724_v46, %s9036_s26  ;;  %v7513_v46 = vcombine.low %v193_v29, %v14452_v19  ;;  %v7512_v55 = vcombine.low %v192_v31, %v14453_v50  ;;  %v197_v19 = vld [vmem:[%s14333_s0 + $0x218] sm:$0xe] }
  0xe4   :  { %v10048_v33 = vpop.permute.xlu1 %1466 }
  0xe5   :  { %14450 = vst [vmem:[#allocation6_spill] sm:$0xff] %v10048_v33  ;;  %v10053_v58 = vpop.permute.xlu0 %1464  ;;  %v1730_v31 = vrot.slane %v7512_v55, 1  ;;  %v14461_v55 = vld [vmem:[#allocation13_spill] sm:$0xff] }
  0xe6   :  { %14451 = vst [vmem:[#allocation7_spill] sm:$0xff] %v10053_v58  ;;  %1838 = vrot.lane.b32.xlu1 %v1727_v43, %s9036_s26  ;;  %v194_v58 = vld [vmem:[%s14333_s0 + $0x200] sm:$0xe]  ;;  %v1731_v43 = vrot.slane %v7513_v46, 1  ;;  %v14460_v46 = vld [vmem:[#allocation12_spill] sm:$0xff] }
  0xe7   :  { %1836 = vrot.lane.b32.xlu0 %v1726_v12, %s9036_s26  ;;  %v7515_v12 = vcombine.low %v195_v63, %v14456_v44  ;;  %v7514_v29 = vcombine.low %v194_v58, %v14457_v11  ;;  %v199_v44 = vld [vmem:[%s14333_s0 + $0x238] sm:$0xe] }
  0xe8   :  { %v10062_v28 = vpop.permute.xlu1 %1470 }
  0xe9   :  { %14454 = vst [vmem:[#allocation8_spill] sm:$0xff] %v10062_v28  ;;  %v10067_v33 = vpop.permute.xlu0 %1468  ;;  %v1732_v58 = vrot.slane %v7514_v29, 1  ;;  %v14465_v29 = vld [vmem:[#allocation15_spill] sm:$0xff] }
  0xea   :  { %14455 = vst [vmem:[#allocation9_spill] sm:$0xff] %v10067_v33  ;;  %1842 = vrot.lane.b32.xlu1 %v1729_v9, %s9036_s26  ;;  %v196_v33 = vld [vmem:[%s14333_s0 + $0x210] sm:$0xe]  ;;  %v1733_v9 = vrot.slane %v7515_v12, 1  ;;  %v14464_v12 = vld [vmem:[#allocation14_spill] sm:$0xff] }
  0xeb   :  { %1840 = vrot.lane.b32.xlu0 %v1728_v2, %s9036_s26  ;;  %v7517_v2 = vcombine.low %v197_v19, %v14460_v46  ;;  %v7516_v63 = vcombine.low %v196_v33, %v14461_v55  ;;  %v201_v46 = vld [vmem:[%s14333_s0 + $0x248] sm:$0xe] }
  0xec   :  { %v10076_v50 = vpop.permute.xlu1 %1474 }
  0xed   :  { %14458 = vst [vmem:[#allocation10_spill] sm:$0xff] %v10076_v50  ;;  %v10081_v28 = vpop.permute.xlu0 %1472  ;;  %v1734_v33 = vrot.slane %v7516_v63, 1  ;;  %v14469_v63 = vld [vmem:[#allocation17_spill] sm:$0xff] }
  0xee   :  { %14459 = vst [vmem:[#allocation11_spill] sm:$0xff] %v10081_v28  ;;  %1846 = vrot.lane.b32.xlu1 %v1731_v43, %s9036_s26  ;;  %v198_v28 = vld [vmem:[%s14333_s0 + $0x230] sm:$0xe]  ;;  %v1735_v43 = vrot.slane %v7517_v2, 1 }
  0xef   :  { %1844 = vrot.lane.b32.xlu0 %v1730_v31, %s9036_s26  ;;  %v7519_v31 = vcombine.low %v199_v44, %v14464_v12  ;;  %v7518_v19 = vcombine.low %v198_v28, %v14465_v29  ;;  %v14468_v2 = vld [vmem:[#allocation16_spill] sm:$0xff]  ;;  %v203_v12 = vld [vmem:[%s14333_s0 + $0x258] sm:$0xe] }
  0xf0   :  { %v10090_v11 = vpop.permute.xlu1 %1478 }
  0xf1   :  { %14462 = vst [vmem:[#allocation12_spill] sm:$0xff] %v10090_v11  ;;  %v10095_v50 = vpop.permute.xlu0 %1476  ;;  %v1736_v28 = vrot.slane %v7518_v19, 1  ;;  %v14473_v19 = vld [vmem:[#allocation19_spill] sm:$0xff] }
  0xf2   :  { %14463 = vst [vmem:[#allocation13_spill] sm:$0xff] %v10095_v50  ;;  %1850 = vrot.lane.b32.xlu1 %v1733_v9, %s9036_s26  ;;  %v200_v50 = vld [vmem:[%s14333_s0 + $0x240] sm:$0xe]  ;;  %v1737_v9 = vrot.slane %v7519_v31, 1 }
  0xf3   :  { %1848 = vrot.lane.b32.xlu0 %v1732_v58, %s9036_s26  ;;  %v7521_v58 = vcombine.low %v201_v46, %v14468_v2  ;;  %v7520_v44 = vcombine.low %v200_v50, %v14469_v63  ;;  %v14472_v31 = vld [vmem:[#allocation18_spill] sm:$0xff]  ;;  %v205_v2 = vld [vmem:[%s14333_s0 + $0x268] sm:$0xe] }
  0xf4   :  { %v10104_v55 = vpop.permute.xlu1 %1482 }
  0xf5   :  { %14466 = vst [vmem:[#allocation14_spill] sm:$0xff] %v10104_v55  ;;  %v10109_v11 = vpop.permute.xlu0 %1480  ;;  %v1738_v50 = vrot.slane %v7520_v44, 1 }
  0xf6   :  { %14467 = vst [vmem:[#allocation15_spill] sm:$0xff] %v10109_v11  ;;  %1854 = vrot.lane.b32.xlu1 %v1735_v43, %s9036_s26  ;;  %v202_v11 = vld [vmem:[%s14333_s0 + $0x250] sm:$0xe]  ;;  %v1739_v43 = vrot.slane %v7521_v58, 1  ;;  %v7525_v58 = vcombine.low %v205_v2, %v9657_v40 }
  0xf7   :  { %1852 = vrot.lane.b32.xlu0 %v1734_v33, %s9036_s26  ;;  %v7523_v33 = vcombine.low %v203_v12, %v14472_v31  ;;  %v7522_v46 = vcombine.low %v202_v11, %v14473_v19 }
  0xf8   :  { %v10118_v29 = vpop.permute.xlu1 %1486  ;;  %v1743_v31 = vrot.slane %v7525_v58, 1 }
  0xf9   :  { %14470 = vst [vmem:[#allocation16_spill] sm:$0xff] %v10118_v29  ;;  %v10123_v55 = vpop.permute.xlu0 %1484  ;;  %v1740_v11 = vrot.slane %v7522_v46, 1  ;;  %v10172_v46 = vld [vmem:[%s14333_s0 + $0x20] sm:$0xf] }
  0xfa   :  { %14471 = vst [vmem:[#allocation17_spill] sm:$0xff] %v10123_v55  ;;  %1858 = vrot.lane.b32.xlu1 %v1737_v9, %s9036_s26  ;;  %v204_v55 = vld [vmem:[%s14333_s0 + $0x260] sm:$0xe]  ;;  %v1741_v9 = vrot.slane %v7523_v33, 1 }
  0xfb   :  { %1856 = vrot.lane.b32.xlu0 %v1736_v28, %s9036_s26  ;;  %v7524_v28 = vcombine.low %v204_v55, %v9665_v23  ;;  %v10159_v23 = vld [vmem:[%s14333_s0 + $0x8] sm:$0xf] }
  0xfc   :  { %v10132_v63 = vpop.permute.xlu1 %1746 }
  0xfd   :  { %14474 = vst [vmem:[#allocation18_spill] sm:$0xff] %v10132_v63  ;;  %v10137_v29 = vpop.permute.xlu0 %1744  ;;  %v1742_v19 = vrot.slane %v7524_v28, 1 }
  0xfe   :  { %14475 = vst [vmem:[#allocation19_spill] sm:$0xff] %v10137_v29  ;;  %1862 = vrot.lane.b32.xlu1 %v1739_v43, %s9036_s26  ;;  %v10152_v43 = vld [vmem:[%s14333_s0 + $0x10] sm:$0xf] }
  0xff   :  { %1860 = vrot.lane.b32.xlu0 %v1738_v50, %s9036_s26  ;;  %v7527_v33 = vcombine.low %v10152_v43, %v10152_v43  ;;  %v7526_v50 = vcombine.low %v10159_v23, %v10159_v23 }
 0x100   :  { %v10143_v44 = vpop.permute.xlu1 %1750 }
 0x101   :  { %14476 = vst [vmem:[#allocation68_spill] sm:$0xff] %v10143_v44  ;;  %v10145_v12 = vpop.permute.xlu0 %1748 }
 0x102   :  { %14477 = vst [vmem:[#allocation69_spill] sm:$0xff] %v10145_v12  ;;  %1866 = vrot.lane.b32.xlu1 %v1741_v9, %s9036_s26  ;;  %v10179_v9 = vld [vmem:[%s14333_s0 + $0x18] sm:$0xf] }
 0x103   :  { %1864 = vrot.lane.b32.xlu0 %v1740_v11, %s9036_s26  ;;  %v7529_v11 = vcombine.low %v10172_v46, %v10172_v46  ;;  %v7528_v28 = vcombine.low %v10179_v9, %v10179_v9 }
 0x104   :  { %v10154_v40 = vpop.permute.xlu1 %1754 }
 0x105   :  { %14478 = vst [vmem:[#allocation70_spill] sm:$0xff] %v10154_v40  ;;  %v10161_v55 = vpop.permute.xlu0 %1752 }
 0x106   :  { %14479 = vst [vmem:[#allocation71_spill] sm:$0xff] %v10161_v55  ;;  %1870 = vrot.lane.b32.xlu1 %v1743_v31, %s9036_s26  ;;  %v10192_v31 = vld [vmem:[%s14333_s0 + $0x30] sm:$0xf] }
 0x107   :  { %1868 = vrot.lane.b32.xlu0 %v1742_v19, %s9036_s26 }
 0x108   :  { %v10174_v2 = vpop.permute.xlu1 %1758 }
 0x109   :  { %14480 = vst [vmem:[#allocation72_spill] sm:$0xff] %v10174_v2  ;;  %v10181_v58 = vpop.permute.xlu0 %1756 }
 0x10a   :  { %14481 = vst [vmem:[#allocation73_spill] sm:$0xff] %v10181_v58  ;;  %2066 = vrot.lane.b32.xlu1 %v7527_v33, %s9037_s30 }
 0x10b   :  { %2064 = vrot.lane.b32.xlu0 %v7526_v50, %s9037_s30  ;;  %v7531_v50 = vcombine.low %v10192_v31, %v10192_v31 }
 0x10c   :  { %v10194_v19 = vpop.permute.xlu1 %1762 }
 0x10d   :  { %14482 = vst [vmem:[#allocation74_spill] sm:$0xff] %v10194_v19  ;;  %v10201_v33 = vpop.permute.xlu0 %1760 }
 0x10e   :  { %14483 = vst [vmem:[#allocation75_spill] sm:$0xff] %v10201_v33  ;;  %2070 = vrot.lane.b32.xlu1 %v7529_v11, %s9037_s30 }
 0x10f   :  { %2068 = vrot.lane.b32.xlu0 %v7528_v28, %s9037_s30  ;;  %v7533_v28 = vcombine.low %v10212_v38, %v10212_v38 }
 0x110   :  { %v10214_v35 = vpop.permute.xlu1 %1766 }
 0x111   :  { %14484 = vst [vmem:[#allocation76_spill] sm:$0xff] %v10214_v35  ;;  %v10221_v11 = vpop.permute.xlu0 %1764 }
 0x112   :  { %14485 = vst [vmem:[#allocation77_spill] sm:$0xff] %v10221_v11  ;;  %2074 = vrot.lane.b32.xlu1 %v7531_v50, %s9037_s30 }
 0x113   :  { %2072 = vrot.lane.b32.xlu0 %v7530_v54, %s9037_s30  ;;  %v7535_v54 = vcombine.low %v10232_v3, %v10232_v3 }
 0x114   :  { %v10234_v1 = vpop.permute.xlu1 %1770 }
 0x115   :  { %14486 = vst [vmem:[#allocation78_spill] sm:$0xff] %v10234_v1  ;;  %v10241_v50 = vpop.permute.xlu0 %1768 }
 0x116   :  { %14487 = vst [vmem:[#allocation79_spill] sm:$0xff] %v10241_v50  ;;  %2078 = vrot.lane.b32.xlu1 %v7533_v28, %s9037_s30 }
 0x117   :  { %2076 = vrot.lane.b32.xlu0 %v7532_v14, %s9037_s30  ;;  %v7537_v14 = vcombine.low %v10252_v36, %v10252_v36 }
 0x118   :  { %v10254_v30 = vpop.permute.xlu1 %1774 }
 0x119   :  { %14488 = vst [vmem:[#allocation80_spill] sm:$0xff] %v10254_v30  ;;  %v10261_v28 = vpop.permute.xlu0 %1772 }
 0x11a   :  { %14489 = vst [vmem:[#allocation81_spill] sm:$0xff] %v10261_v28  ;;  %2082 = vrot.lane.b32.xlu1 %v7535_v54, %s9037_s30 }
 0x11b   :  { %2080 = vrot.lane.b32.xlu0 %v7534_v49, %s9037_s30  ;;  %v7539_v49 = vcombine.low %v10272_v7, %v10272_v7 }
 0x11c   :  { %v10274_v5 = vpop.permute.xlu1 %1778 }
 0x11d   :  { %14490 = vst [vmem:[#allocation82_spill] sm:$0xff] %v10274_v5  ;;  %v10281_v54 = vpop.permute.xlu0 %1776 }
 0x11e   :  { %14491 = vst [vmem:[#allocation83_spill] sm:$0xff] %v10281_v54  ;;  %2086 = vrot.lane.b32.xlu1 %v7537_v14, %s9037_s30 }
 0x11f   :  { %2084 = vrot.lane.b32.xlu0 %v7536_v20, %s9037_s30  ;;  %v7541_v20 = vcombine.low %v10292_v47, %v10292_v47 }
 0x120   :  { %v10294_v61 = vpop.permute.xlu1 %1782 }
 0x121   :  { %14492 = vst [vmem:[#allocation84_spill] sm:$0xff] %v10294_v61  ;;  %v10301_v14 = vpop.permute.xlu0 %1780 }
 0x122   :  { %14493 = vst [vmem:[#allocation85_spill] sm:$0xff] %v10301_v14  ;;  %2090 = vrot.lane.b32.xlu1 %v7539_v49, %s9037_s30 }
 0x123   :  { %2088 = vrot.lane.b32.xlu0 %v7538_v53, %s9037_s30  ;;  %v7543_v53 = vcombine.low %v10312_v32, %v10312_v32 }
 0x124   :  { %v10314_v25 = vpop.permute.xlu1 %1786 }
 0x125   :  { %14494 = vst [vmem:[#allocation86_spill] sm:$0xff] %v10314_v25  ;;  %v10321_v49 = vpop.permute.xlu0 %1784  ;;  %v10332_v25 = vld [vmem:[%s14333_s0 + $0xc0] sm:$0xf] }
 0x126   :  { %14495 = vst [vmem:[#allocation87_spill] sm:$0xff] %v10321_v49  ;;  %2094 = vrot.lane.b32.xlu1 %v7541_v20, %s9037_s30  ;;  %v10339_v49 = vld [vmem:[%s14333_s0 + $0xb8] sm:$0xf] }
 0x127   :  { %2092 = vrot.lane.b32.xlu0 %v7540_v52, %s9037_s30  ;;  %v7545_v52 = vcombine.low %v10332_v25, %v10332_v25  ;;  %v7544_v61 = vcombine.low %v10339_v49, %v10339_v49 }
 0x128   :  { %v10334_v14 = vpop.permute.xlu1 %1790 }
 0x129   :  { %14496 = vst [vmem:[#allocation88_spill] sm:$0xff] %v10334_v14  ;;  %v10341_v20 = vpop.permute.xlu0 %1788  ;;  %v10352_v14 = vld [vmem:[%s14333_s0 + $0xd0] sm:$0xf] }
 0x12a   :  { %14497 = vst [vmem:[#allocation89_spill] sm:$0xff] %v10341_v20  ;;  %2098 = vrot.lane.b32.xlu1 %v7543_v53, %s9037_s30  ;;  %v10359_v20 = vld [vmem:[%s14333_s0 + $0xc8] sm:$0xf] }
 0x12b   :  { %2096 = vrot.lane.b32.xlu0 %v7542_v60, %s9037_s30  ;;  %v7547_v60 = vcombine.low %v10352_v14, %v10352_v14  ;;  %v7546_v5 = vcombine.low %v10359_v20, %v10359_v20 }
 0x12c   :  { %v10354_v54 = vpop.permute.xlu1 %1794 }
 0x12d   :  { %14498 = vst [vmem:[#allocation90_spill] sm:$0xff] %v10354_v54  ;;  %v10361_v53 = vpop.permute.xlu0 %1792  ;;  %v10372_v54 = vld [vmem:[%s14333_s0 + $0xe0] sm:$0xf] }
 0x12e   :  { %14499 = vst [vmem:[#allocation91_spill] sm:$0xff] %v10361_v53  ;;  %2102 = vrot.lane.b32.xlu1 %v7545_v52, %s9037_s30  ;;  %v10379_v53 = vld [vmem:[%s14333_s0 + $0xd8] sm:$0xf] }
 0x12f   :  { %2100 = vrot.lane.b32.xlu0 %v7544_v61, %s9037_s30  ;;  %v7549_v61 = vcombine.low %v10372_v54, %v10372_v54  ;;  %v7548_v18 = vcombine.low %v10379_v53, %v10379_v53 }
 0x130   :  { %v10374_v8 = vpop.permute.xlu1 %1798 }
 0x131   :  { %14500 = vst [vmem:[#allocation92_spill] sm:$0xff] %v10374_v8  ;;  %v10381_v52 = vpop.permute.xlu0 %1796  ;;  %v10392_v8 = vld [vmem:[%s14333_s0 + $0x100] sm:$0xf] }
 0x132   :  { %14501 = vst [vmem:[#allocation93_spill] sm:$0xff] %v10381_v52  ;;  %2106 = vrot.lane.b32.xlu1 %v7547_v60, %s9037_s30  ;;  %v10399_v52 = vld [vmem:[%s14333_s0 + $0xf8] sm:$0xf] }
 0x133   :  { %2104 = vrot.lane.b32.xlu0 %v7546_v5, %s9037_s30  ;;  %v7551_v5 = vcombine.low %v10392_v8, %v10392_v8  ;;  %v7550_v37 = vcombine.low %v10399_v52, %v10399_v52 }
 0x134   :  { %v10394_v13 = vpop.permute.xlu1 %1802 }
 0x135   :  { %14502 = vst [vmem:[#allocation94_spill] sm:$0xff] %v10394_v13  ;;  %v10401_v60 = vpop.permute.xlu0 %1800  ;;  %v10412_v13 = vld [vmem:[%s14333_s0 + $0x110] sm:$0xf] }
 0x136   :  { %14503 = vst [vmem:[#allocation95_spill] sm:$0xff] %v10401_v60  ;;  %2110 = vrot.lane.b32.xlu1 %v7549_v61, %s9037_s30  ;;  %v10419_v60 = vld [vmem:[%s14333_s0 + $0x108] sm:$0xf] }
 0x137   :  { %2108 = vrot.lane.b32.xlu0 %v7548_v18, %s9037_s30  ;;  %v7553_v18 = vcombine.low %v10412_v13, %v10412_v13  ;;  %v7552_v30 = vcombine.low %v10419_v60, %v10419_v60 }
 0x138   :  { %v10414_v28 = vpop.permute.xlu1 %1806 }
 0x139   :  { %14504 = vst [vmem:[#allocation96_spill] sm:$0xff] %v10414_v28  ;;  %v10421_v61 = vpop.permute.xlu0 %1804  ;;  %v10432_v28 = vld [vmem:[%s14333_s0 + $0x120] sm:$0xf] }
 0x13a   :  { %14505 = vst [vmem:[#allocation97_spill] sm:$0xff] %v10421_v61  ;;  %2114 = vrot.lane.b32.xlu1 %v7551_v5, %s9037_s30  ;;  %v10439_v61 = vld [vmem:[%s14333_s0 + $0x118] sm:$0xf] }
 0x13b   :  { %2112 = vrot.lane.b32.xlu0 %v7550_v37, %s9037_s30  ;;  %v7555_v37 = vcombine.low %v10432_v28, %v10432_v28  ;;  %v7554_v1 = vcombine.low %v10439_v61, %v10439_v61 }
 0x13c   :  { %v10434_v50 = vpop.permute.xlu1 %1810 }
 0x13d   :  { %14506 = vst [vmem:[#allocation98_spill] sm:$0xff] %v10434_v50  ;;  %v10441_v5 = vpop.permute.xlu0 %1808  ;;  %v10452_v50 = vld [vmem:[%s14333_s0 + $0x130] sm:$0xf] }
 0x13e   :  { %14507 = vst [vmem:[#allocation99_spill] sm:$0xff] %v10441_v5  ;;  %2118 = vrot.lane.b32.xlu1 %v7553_v18, %s9037_s30  ;;  %v10459_v5 = vld [vmem:[%s14333_s0 + $0x128] sm:$0xf] }
 0x13f   :  { %2116 = vrot.lane.b32.xlu0 %v7552_v30, %s9037_s30  ;;  %v7557_v30 = vcombine.low %v10452_v50, %v10452_v50  ;;  %v7556_v27 = vcombine.low %v10459_v5, %v10459_v5 }
 0x140   :  { %v10454_v15 = vpop.permute.xlu1 %1814 }
 0x141   :  { %14508 = vst [vmem:[#allocation100_spill] sm:$0xff] %v10454_v15  ;;  %v10461_v18 = vpop.permute.xlu0 %1812  ;;  %v10472_v15 = vld [vmem:[%s14333_s0 + $0x150] sm:$0xf] }
 0x142   :  { %14509 = vst [vmem:[#allocation101_spill] sm:$0xff] %v10461_v18  ;;  %2122 = vrot.lane.b32.xlu1 %v7555_v37, %s9037_s30  ;;  %v10479_v18 = vld [vmem:[%s14333_s0 + $0x148] sm:$0xf] }
 0x143   :  { %2120 = vrot.lane.b32.xlu0 %v7554_v1, %s9037_s30  ;;  %v7559_v1 = vcombine.low %v10472_v15, %v10472_v15  ;;  %v7558_v0 = vcombine.low %v10479_v18, %v10479_v18 }
 0x144   :  { %v10474_v10 = vpop.permute.xlu1 %1818 }
 0x145   :  { %14510 = vst [vmem:[#allocation102_spill] sm:$0xff] %v10474_v10  ;;  %v10481_v37 = vpop.permute.xlu0 %1816  ;;  %v10492_v10 = vld [vmem:[%s14333_s0 + $0x160] sm:$0xf] }
 0x146   :  { %14511 = vst [vmem:[#allocation103_spill] sm:$0xff] %v10481_v37  ;;  %2126 = vrot.lane.b32.xlu1 %v7557_v30, %s9037_s30  ;;  %v10499_v37 = vld [vmem:[%s14333_s0 + $0x158] sm:$0xf] }
 0x147   :  { %2124 = vrot.lane.b32.xlu0 %v7556_v27, %s9037_s30  ;;  %v7561_v27 = vcombine.low %v10492_v10, %v10492_v10  ;;  %v7560_v35 = vcombine.low %v10499_v37, %v10499_v37 }
 0x148   :  { %v10494_v11 = vpop.permute.xlu1 %1822 }
 0x149   :  { %14512 = vst [vmem:[#allocation104_spill] sm:$0xff] %v10494_v11  ;;  %v10501_v30 = vpop.permute.xlu0 %1820  ;;  %v10512_v11 = vld [vmem:[%s14333_s0 + $0x170] sm:$0xf] }
 0x14a   :  { %14513 = vst [vmem:[#allocation105_spill] sm:$0xff] %v10501_v30  ;;  %2130 = vrot.lane.b32.xlu1 %v7559_v1, %s9037_s30  ;;  %v10519_v30 = vld [vmem:[%s14333_s0 + $0x168] sm:$0xf] }
 0x14b   :  { %2128 = vrot.lane.b32.xlu0 %v7558_v0, %s9037_s30  ;;  %v7563_v0 = vcombine.low %v10512_v11, %v10512_v11  ;;  %v7562_v19 = vcombine.low %v10519_v30, %v10519_v30 }
 0x14c   :  { %v10514_v33 = vpop.permute.xlu1 %1826 }
 0x14d   :  { %14514 = vst [vmem:[#allocation106_spill] sm:$0xff] %v10514_v33  ;;  %v10521_v1 = vpop.permute.xlu0 %1824  ;;  %v10532_v33 = vld [vmem:[%s14333_s0 + $0x180] sm:$0xf] }
 0x14e   :  { %14515 = vst [vmem:[#allocation107_spill] sm:$0xff] %v10521_v1  ;;  %2134 = vrot.lane.b32.xlu1 %v7561_v27, %s9037_s30  ;;  %v10539_v1 = vld [vmem:[%s14333_s0 + $0x178] sm:$0xf] }
 0x14f   :  { %2132 = vrot.lane.b32.xlu0 %v7560_v35, %s9037_s30  ;;  %v7565_v35 = vcombine.low %v10532_v33, %v10532_v33  ;;  %v7564_v41 = vcombine.low %v10539_v1, %v10539_v1 }
 0x150   :  { %v10534_v45 = vpop.permute.xlu1 %1830 }
 0x151   :  { %14516 = vst [vmem:[#allocation108_spill] sm:$0xff] %v10534_v45  ;;  %v10541_v27 = vpop.permute.xlu0 %1828  ;;  %v10552_v45 = vld [vmem:[%s14333_s0 + $0x1a0] sm:$0xf] }
 0x152   :  { %14517 = vst [vmem:[#allocation109_spill] sm:$0xff] %v10541_v27  ;;  %2138 = vrot.lane.b32.xlu1 %v7563_v0, %s9037_s30  ;;  %v10559_v27 = vld [vmem:[%s14333_s0 + $0x198] sm:$0xf] }
 0x153   :  { %2136 = vrot.lane.b32.xlu0 %v7562_v19, %s9037_s30  ;;  %v7567_v19 = vcombine.low %v10552_v45, %v10552_v45  ;;  %v7566_v4 = vcombine.low %v10559_v27, %v10559_v27 }
 0x154   :  { %v10554_v34 = vpop.permute.xlu1 %1834 }
 0x155   :  { %14518 = vst [vmem:[#allocation110_spill] sm:$0xff] %v10554_v34  ;;  %v10561_v0 = vpop.permute.xlu0 %1832  ;;  %v10572_v34 = vld [vmem:[%s14333_s0 + $0x1b0] sm:$0xf] }
 0x156   :  { %14519 = vst [vmem:[#allocation111_spill] sm:$0xff] %v10561_v0  ;;  %2142 = vrot.lane.b32.xlu1 %v7565_v35, %s9037_s30  ;;  %v10579_v0 = vld [vmem:[%s14333_s0 + $0x1a8] sm:$0xf] }
 0x157   :  { %2140 = vrot.lane.b32.xlu0 %v7564_v41, %s9037_s30  ;;  %v7569_v41 = vcombine.low %v10572_v34, %v10572_v34  ;;  %v7568_v2 = vcombine.low %v10579_v0, %v10579_v0 }
 0x158   :  { %v10574_v58 = vpop.permute.xlu1 %1838 }
 0x159   :  { %14520 = vst [vmem:[#allocation112_spill] sm:$0xff] %v10574_v58  ;;  %v10581_v35 = vpop.permute.xlu0 %1836  ;;  %v10592_v58 = vld [vmem:[%s14333_s0 + $0x1c0] sm:$0xf] }
 0x15a   :  { %14521 = vst [vmem:[#allocation113_spill] sm:$0xff] %v10581_v35  ;;  %2146 = vrot.lane.b32.xlu1 %v7567_v19, %s9037_s30  ;;  %v10599_v35 = vld [vmem:[%s14333_s0 + $0x1b8] sm:$0xf] }
 0x15b   :  { %2144 = vrot.lane.b32.xlu0 %v7566_v4, %s9037_s30  ;;  %14523 = vst [vmem:[#allocation115_spill] sm:$0xff] %v10599_v35  ;;  %v7571_v4 = vcombine.low %v10592_v58, %v10592_v58  ;;  %v7570_v40 = vcombine.low %v10599_v35, %v10599_v35 }
 0x15c   :  { %v10594_v55 = vpop.permute.xlu1 %1842 }
 0x15d   :  { %14522 = vst [vmem:[#allocation114_spill] sm:$0xff] %v10594_v55  ;;  %v10601_v19 = vpop.permute.xlu0 %1840  ;;  %v10612_v55 = vld [vmem:[%s14333_s0 + $0x1d0] sm:$0xf] }
 0x15e   :  { %14524 = vst [vmem:[#allocation116_spill] sm:$0xff] %v10601_v19  ;;  %2150 = vrot.lane.b32.xlu1 %v7569_v41, %s9037_s30  ;;  %14525 = vst [vmem:[#allocation117_spill] sm:$0xff] %v10612_v55  ;;  %v10619_v19 = vld [vmem:[%s14333_s0 + $0x1c8] sm:$0xf] }
 0x15f   :  { %2148 = vrot.lane.b32.xlu0 %v7568_v2, %s9037_s30  ;;  %14527 = vst [vmem:[#allocation119_spill] sm:$0xff] %v10619_v19  ;;  %v7573_v2 = vcombine.low %v10612_v55, %v10612_v55  ;;  %v7572_v42 = vcombine.low %v10619_v19, %v10619_v19 }
 0x160   :  { %v10614_v39 = vpop.permute.xlu1 %1846 }
 0x161   :  { %14526 = vst [vmem:[#allocation118_spill] sm:$0xff] %v10614_v39  ;;  %v10621_v41 = vpop.permute.xlu0 %1844  ;;  %v10632_v39 = vld [vmem:[%s14333_s0 + $0x1f0] sm:$0xf] }
 0x162   :  { %14528 = vst [vmem:[#allocation120_spill] sm:$0xff] %v10621_v41  ;;  %2154 = vrot.lane.b32.xlu1 %v7571_v4, %s9037_s30  ;;  %14529 = vst [vmem:[#allocation121_spill] sm:$0xff] %v10632_v39  ;;  %v10639_v41 = vld [vmem:[%s14333_s0 + $0x1e8] sm:$0xf] }
 0x163   :  { %2152 = vrot.lane.b32.xlu0 %v7570_v40, %s9037_s30  ;;  %14531 = vst [vmem:[#allocation123_spill] sm:$0xff] %v10639_v41  ;;  %v7575_v40 = vcombine.low %v10632_v39, %v10632_v39  ;;  %v7574_v17 = vcombine.low %v10639_v41, %v10639_v41 }
 0x164   :  { %v10634_v48 = vpop.permute.xlu1 %1850 }
 0x165   :  { %14530 = vst [vmem:[#allocation122_spill] sm:$0xff] %v10634_v48  ;;  %v10641_v4 = vpop.permute.xlu0 %1848  ;;  %v10652_v48 = vld [vmem:[%s14333_s0 + $0x200] sm:$0xf] }
 0x166   :  { %14532 = vst [vmem:[#allocation124_spill] sm:$0xff] %v10641_v4  ;;  %2158 = vrot.lane.b32.xlu1 %v7573_v2, %s9037_s30  ;;  %14533 = vst [vmem:[#allocation125_spill] sm:$0xff] %v10652_v48  ;;  %v10659_v4 = vld [vmem:[%s14333_s0 + $0x1f8] sm:$0xf] }
 0x167   :  { %2156 = vrot.lane.b32.xlu0 %v7572_v42, %s9037_s30  ;;  %14535 = vst [vmem:[#allocation127_spill] sm:$0xff] %v10659_v4  ;;  %v7577_v42 = vcombine.low %v10652_v48, %v10652_v48  ;;  %v7576_v44 = vcombine.low %v10659_v4, %v10659_v4 }
 0x168   :  { %v10654_v12 = vpop.permute.xlu1 %1854 }
 0x169   :  { %14534 = vst [vmem:[#allocation126_spill] sm:$0xff] %v10654_v12  ;;  %v10661_v2 = vpop.permute.xlu0 %1852  ;;  %v10672_v12 = vld [vmem:[%s14333_s0 + $0x210] sm:$0xf] }
 0x16a   :  { %14536 = vst [vmem:[#allocation128_spill] sm:$0xff] %v10661_v2  ;;  %2162 = vrot.lane.b32.xlu1 %v7575_v40, %s9037_s30  ;;  %14537 = vst [vmem:[#allocation129_spill] sm:$0xff] %v10672_v12  ;;  %v10679_v2 = vld [vmem:[%s14333_s0 + $0x208] sm:$0xf] }
 0x16b   :  { %2160 = vrot.lane.b32.xlu0 %v7574_v17, %s9037_s30  ;;  %14539 = vst [vmem:[#allocation131_spill] sm:$0xff] %v10679_v2  ;;  %v7579_v17 = vcombine.low %v10672_v12, %v10672_v12  ;;  %v7578_v63 = vcombine.low %v10679_v2, %v10679_v2 }
 0x16c   :  { %v10674_v29 = vpop.permute.xlu1 %1858 }
 0x16d   :  { %14538 = vst [vmem:[#allocation130_spill] sm:$0xff] %v10674_v29  ;;  %v10681_v40 = vpop.permute.xlu0 %1856  ;;  %v10692_v29 = vld [vmem:[%s14333_s0 + $0x220] sm:$0xf] }
 0x16e   :  { %14540 = vst [vmem:[#allocation132_spill] sm:$0xff] %v10681_v40  ;;  %2166 = vrot.lane.b32.xlu1 %v7577_v42, %s9037_s30  ;;  %14541 = vst [vmem:[#allocation133_spill] sm:$0xff] %v10692_v29  ;;  %v10699_v40 = vld [vmem:[%s14333_s0 + $0x218] sm:$0xf] }
 0x16f   :  { %2164 = vrot.lane.b32.xlu0 %v7576_v44, %s9037_s30  ;;  %14543 = vst [vmem:[#allocation135_spill] sm:$0xff] %v10699_v40  ;;  %v7581_v44 = vcombine.low %v10692_v29, %v10692_v29  ;;  %v7580_v62 = vcombine.low %v10699_v40, %v10699_v40  ;;  %v10735_v40 = vld [vmem:[%s14333_s0 + $0x250] sm:$0xf] }
 0x170   :  { %v10694_v57 = vpop.permute.xlu1 %1862  ;;  %14549 = vst [vmem:[#allocation141_spill] sm:$0xff] %v10735_v40  ;;  %v7585_v29 = vcombine.low %v10735_v40, %v10735_v40 }
 0x171   :  { %14542 = vst [vmem:[#allocation134_spill] sm:$0xff] %v10694_v57  ;;  %v10701_v42 = vpop.permute.xlu0 %1860  ;;  %v10712_v57 = vld [vmem:[%s14333_s0 + $0x240] sm:$0xf] }
 0x172   :  { %14544 = vst [vmem:[#allocation136_spill] sm:$0xff] %v10701_v42  ;;  %2170 = vrot.lane.b32.xlu1 %v7579_v17, %s9037_s30  ;;  %14545 = vst [vmem:[#allocation137_spill] sm:$0xff] %v10712_v57  ;;  %v10719_v42 = vld [vmem:[%s14333_s0 + $0x238] sm:$0xf] }
 0x173   :  { %2168 = vrot.lane.b32.xlu0 %v7578_v63, %s9037_s30  ;;  %14547 = vst [vmem:[#allocation139_spill] sm:$0xff] %v10719_v42  ;;  %v7583_v63 = vcombine.low %v10712_v57, %v10712_v57  ;;  %v10745_v57 = vld [vmem:[%s14333_s0 + $0x248] sm:$0xf] }
 0x174   :  { %v10714_v16 = vpop.permute.xlu1 %1866  ;;  %14551 = vst [vmem:[#allocation143_spill] sm:$0xff] %v10745_v57  ;;  %v7584_v12 = vcombine.low %v10745_v57, %v10745_v57  ;;  %v7082_v57 = vld [vmem:[%s14333_s0 + $0x2c] sm:$0x1] }
 0x175   :  { %14546 = vst [vmem:[#allocation138_spill] sm:$0xff] %v10714_v16  ;;  %v10721_v17 = vpop.permute.xlu0 %1864  ;;  %v7582_v16 = vcombine.low %v10719_v42, %v10719_v42  ;;  %v7591_v42 = vcombine.low %v10152_v43, %v7079_v26  ;;  %v10763_v26 = vld [vmem:[%s14333_s0 + $0x260] sm:$0xf]  ;;  %v7080_v43 = vld [vmem:[%s14333_s0 + $0x1c] sm:$0x1] }
 0x176   :  { %14548 = vst [vmem:[#allocation140_spill] sm:$0xff] %v10721_v17  ;;  %2174 = vrot.lane.b32.xlu1 %v7581_v44, %s9037_s30  ;;  %v7078_v44 = vld [vmem:[%s14333_s0 + $0xc] sm:$0x1]  ;;  %14553 = vst [vmem:[#allocation145_spill] sm:$0xff] %v10763_v26  ;;  %v7592_v4 = vcombine.low %v10179_v9, %v7080_v43  ;;  %v7085_v43 = vld [vmem:[%s14333_s0 + $0x44] sm:$0x1] }
 0x177   :  { %2172 = vrot.lane.b32.xlu0 %v7580_v62, %s9037_s30  ;;  %v7590_v2 = vcombine.low %v10159_v23, %v7078_v44  ;;  %v10773_v23 = vld [vmem:[%s14333_s0 + $0x258] sm:$0xf]  ;;  %v2394_v40 = vshll.u32 %v7591_v42, 16  ;;  %v2392_v41 = vshrl.u32 %v7591_v42, 16  ;;  %v7597_v55 = vcombine.low %v10212_v38, %v7085_v43  ;;  %v7087_v42 = vld [vmem:[%s14333_s0 + $0x64] sm:$0x1] }
 0x178   :  { %v10740_v17 = vpop.permute.xlu1 %1870  ;;  %14555 = vst [vmem:[#allocation147_spill] sm:$0xff] %v10773_v23 }
 0x179   :  { %14550 = vst [vmem:[#allocation142_spill] sm:$0xff] %v10740_v17  ;;  %v10747_v62 = vpop.permute.xlu0 %1868  ;;  %v7081_v17 = vld [vmem:[%s14333_s0 + $0x24] sm:$0x1]  ;;  %v2396_v39 = vrot.slane %v2394_v40, 1 }
 0x17a   :  { %14552 = vst [vmem:[#allocation144_spill] sm:$0xff] %v10747_v62  ;;  %2178 = vrot.lane.b32.xlu1 %v7583_v63, %s9037_s30  ;;  %v7593_v44 = vcombine.low %v10172_v46, %v7081_v17  ;;  %v7083_v62 = vld [vmem:[%s14333_s0 + $0x34] sm:$0x1]  ;;  %v7586_v46 = vcombine.low %v10773_v23, %v10773_v23  ;;  %v10794_v17 = vld [vmem:[%s14333_s0 + $0x270] sm:$0xf] }
 0x17b   :  { %2176 = vrot.lane.b32.xlu0 %v7582_v16, %s9037_s30  ;;  %14557 = vst [vmem:[#allocation149_spill] sm:$0xff] %v10794_v17  ;;  %v7595_v9 = vcombine.low %v10192_v31, %v7083_v62 }
 0x17c   :  { %v10768_v63 = vpop.permute.xlu1 %2066  ;;  %v2408_v31 = vshll.u32 %v7593_v44, 16 }
 0x17d   :  { %14554 = vst [vmem:[#allocation146_spill] sm:$0xff] %v10768_v63  ;;  %v10775_v16 = vpop.permute.xlu0 %2064  ;;  %v7587_v63 = vcombine.low %v10763_v26, %v10763_v26  ;;  %v7084_v26 = vld [vmem:[%s14333_s0 + $0x3c] sm:$0x1] }
 0x17e   :  { %14556 = vst [vmem:[#allocation148_spill] sm:$0xff] %v10775_v16  ;;  %2182 = vrot.lane.b32.xlu1 %v7585_v29, %s9037_s30  ;;  %v2387_v16 = vshll.u32 %v7590_v2, 16  ;;  %v10801_v29 = vld [vmem:[%s14333_s0 + $0x268] sm:$0xf] }
 0x17f   :  { %2180 = vrot.lane.b32.xlu0 %v7584_v12, %s9037_s30  ;;  %14559 = vst [vmem:[#allocation151_spill] sm:$0xff] %v10801_v29  ;;  %v7594_v12 = vcombine.low %v10199_v56, %v7082_v57  ;;  %v7588_v57 = vcombine.low %v10801_v29, %v10801_v29  ;;  %v2385_v56 = vshrl.u32 %v7590_v2, 16  ;;  %v2397_v2 = vor.u32 %v2396_v39, %v2392_v41  ;;  %v7088_v41 = vld [vmem:[%s14333_s0 + $0x6c] sm:$0x1] }
 0x180   :  { %v10796_v48 = vpop.permute.xlu1 %2070  ;;  %v2389_v62 = vrot.slane %v2387_v16, 1  ;;  %v2406_v16 = vshrl.u32 %v7593_v44, 16  ;;  %v2410_v29 = vrot.slane %v2408_v31, 1  ;;  %v2436_v31 = vshll.u32 %v7597_v55, 16 }
 0x181   :  { %14558 = vst [vmem:[#allocation150_spill] sm:$0xff] %v10796_v48  ;;  %v10808_v23 = vpop.permute.xlu0 %2068  ;;  %v7589_v48 = vcombine.low %v10794_v17, %v10794_v17  ;;  %v2415_v43 = vshll.u32 %v7594_v12, 16 }
 0x182   :  { %14560 = vst [vmem:[#allocation152_spill] sm:$0xff] %v10808_v23  ;;  %2186 = vrot.lane.b32.xlu1 %v7587_v63, %s9037_s30  ;;  %v2401_v23 = vshll.u32 %v7592_v4, 16  ;;  %v7596_v63 = vcombine.low %v10219_v21, %v7084_v26  ;;  %v2390_v38 = vor.u32 %v2389_v62, %v2385_v56  ;;  %v2399_v21 = vshrl.u32 %v7592_v4, 16 }
 0x183   :  { %2184 = vrot.lane.b32.xlu0 %v7586_v46, %s9037_s30  ;;  %v7086_v46 = vld [vmem:[%s14333_s0 + $0x5c] sm:$0x1]  ;;  %v2411_v4 = vor.u32 %v2410_v29, %v2406_v16  ;;  %v2438_v16 = vrot.slane %v2436_v31, 1 }
 0x184   :  { %v10819_v19 = vpop.permute.xlu1 %2074  ;;  %v2403_v26 = vrot.slane %v2401_v23, 1  ;;  %v7598_v35 = vcombine.low %v10239_v51, %v7086_v46  ;;  %v2420_v23 = vshrl.u32 %v7595_v9, 16  ;;  %v2429_v56 = vshll.u32 %v7596_v63, 16 }
 0x185   :  { %14561 = vst [vmem:[#allocation153_spill] sm:$0xff] %v10819_v19  ;;  %v10826_v40 = vpop.permute.xlu0 %2072  ;;  %v2422_v19 = vshll.u32 %v7595_v9, 16  ;;  %v7600_v46 = vcombine.low %v10259_v22, %v7088_v41  ;;  %v2427_v22 = vshrl.u32 %v7596_v63, 16 }
 0x186   :  { %14562 = vst [vmem:[#allocation154_spill] sm:$0xff] %v10826_v40  ;;  %2190 = vrot.lane.b32.xlu1 %v7589_v48, %s9037_s30  ;;  %v7599_v40 = vcombine.low %v10232_v3, %v7087_v42  ;;  %v7089_v48 = vld [vmem:[%s14333_s0 + $0x74] sm:$0x1]  ;;  %v2404_v51 = vor.u32 %v2403_v26, %v2399_v21  ;;  %v2413_v3 = vshrl.u32 %v7594_v12, 16  ;;  %v2434_v12 = vshrl.u32 %v7597_v55, 16 }
 0x187   :  { %2188 = vrot.lane.b32.xlu0 %v7588_v57, %s9037_s30  ;;  %s9038_s30 = smov 16   ;;  %v2424_v44 = vrot.slane %v2422_v19, 1  ;;  %v2417_v57 = vrot.slane %v2415_v43, 1  ;;  %v7601_v42 = vcombine.low %v10252_v36, %v7089_v48  ;;  %v7090_v19 = vld [vmem:[%s14333_s0 + $0x7c] sm:$0x1]  ;;  %v2431_v21 = vrot.slane %v2429_v56, 1 }
 0x188   :  { %v10833_v17 = vpop.permute.xlu1 %2078  ;;  %v2443_v26 = vshll.u32 %v7598_v35, 16  ;;  %v7602_v41 = vcombine.low %v10279_v59, %v7090_v19  ;;  %v2439_v63 = vor.u32 %v2438_v16, %v2434_v12 }
 0x189   :  { %v10840_v39 = vpop.permute.xlu0 %2076  ;;  %v2425_v9 = vor.u32 %v2424_v44, %v2420_v23  ;;  %v2418_v36 = vor.u32 %v2417_v57, %v2413_v3  ;;  %v10875_v23 = vld [vmem:[%s14333_s0 + $0x8c] sm:$0x1]  ;;  %v2448_v44 = vshrl.u32 %v7599_v40, 16  ;;  %v2432_v59 = vor.u32 %v2431_v21, %v2427_v22 }
 0x18a   :  { %14563 = vst [vmem:[#allocation155_spill] sm:$0xff] %v10840_v39  ;;  %2834 = vrot.lane.b32.xlu1 %v2397_v2, %s9038_s30  ;;  %v7091_v2 = vld [vmem:[%s14333_s0 + $0x84] sm:$0x1]  ;;  %v2445_v3 = vrot.slane %v2443_v26, 1  ;;  %v2457_v57 = vshll.u32 %v7600_v46, 16  ;;  %v7604_v19 = vcombine.low %v10299_v6, %v10875_v23  ;;  %v2462_v16 = vshrl.u32 %v7601_v42, 16 }
 0x18b   :  { %2832 = vrot.lane.b32.xlu0 %v2390_v38, %s9038_s30  ;;  %v2450_v38 = vshll.u32 %v7599_v40, 16  ;;  %v7603_v48 = vcombine.low %v10272_v7, %v7091_v2  ;;  %v2464_v7 = vshll.u32 %v7601_v42, 16  ;;  %v10888_v40 = vld [vmem:[%s14333_s0 + $0xb4] sm:$0x1]  ;;  %v2471_v21 = vshll.u32 %v7602_v41, 16 }
 0x18c   :  { %v10847_v62 = vpop.permute.xlu1 %2082  ;;  %v2459_v22 = vrot.slane %v2457_v57, 1  ;;  %v10908_v42 = vld [vmem:[%s14333_s0 + $0xc4] sm:$0x1] }
 0x18d   :  { %14564 = vst [vmem:[#allocation156_spill] sm:$0xff] %v10847_v62  ;;  %v10854_v29 = vpop.permute.xlu0 %2080  ;;  %v2452_v31 = vrot.slane %v2450_v38, 1  ;;  %v2478_v38 = vshll.u32 %v7603_v48, 16 }
 0x18e   :  { %14565 = vst [vmem:[#allocation157_spill] sm:$0xff] %v10854_v29  ;;  %2838 = vrot.lane.b32.xlu1 %v2411_v4, %s9038_s30  ;;  %v10868_v4 = vld [vmem:[%s14333_s0 + $0x94] sm:$0x1] }
 0x18f   :  { %2836 = vrot.lane.b32.xlu0 %v2404_v51, %s9038_s30  ;;  %v2441_v51 = vshrl.u32 %v7598_v35, 16  ;;  %v7605_v2 = vcombine.low %v10292_v47, %v10868_v4  ;;  %v10895_v35 = vld [vmem:[%s14333_s0 + $0xac] sm:$0x1]  ;;  %v2453_v12 = vor.u32 %v2452_v31, %v2448_v44  ;;  %v2466_v47 = vrot.slane %v2464_v7, 1 }
 0x190   :  { %v10861_v43 = vpop.permute.xlu1 %2086  ;;  %v2476_v31 = vshrl.u32 %v7603_v48, 16  ;;  %v10928_v48 = vld [vmem:[%s14333_s0 + $0xd4] sm:$0x1] }
 0x191   :  { %14566 = vst [vmem:[#allocation158_spill] sm:$0xff] %v10861_v43  ;;  %v10870_v55 = vpop.permute.xlu0 %2084  ;;  %v2446_v6 = vor.u32 %v2445_v3, %v2441_v51  ;;  %v2467_v44 = vor.u32 %v2466_v47, %v2462_v16  ;;  %v2492_v7 = vshll.u32 %v7605_v2, 16  ;;  %v2473_v51 = vrot.slane %v2471_v21, 1  ;;  %v14603_v43 = vld [vmem:[#allocation119_spill] sm:$0xff] }
 0x192   :  { %14567 = vst [vmem:[#allocation159_spill] sm:$0xff] %v10870_v55  ;;  %2842 = vrot.lane.b32.xlu1 %v2425_v9, %s9038_s30  ;;  %v2485_v3 = vshll.u32 %v7604_v19, 16  ;;  %v2490_v47 = vshrl.u32 %v7605_v2, 16  ;;  %v10948_v2 = vld [vmem:[%s14333_s0 + $0xe4] sm:$0x1] }
 0x193   :  { %2840 = vrot.lane.b32.xlu0 %v2418_v36, %s9038_s30  ;;  %v2455_v36 = vshrl.u32 %v7600_v46, 16  ;;  %v10915_v46 = vld [vmem:[%s14333_s0 + $0xbc] sm:$0x1] }
 0x194   :  { %v10879_v56 = vpop.permute.xlu1 %2090 }
 0x195   :  { %14568 = vst [vmem:[#allocation160_spill] sm:$0xff] %v10879_v56  ;;  %v10890_v9 = vpop.permute.xlu0 %2088  ;;  %v7606_v56 = vcombine.low %v10319_v24, %v10895_v35  ;;  %v2460_v24 = vor.u32 %v2459_v22, %v2455_v36  ;;  %v2487_v36 = vrot.slane %v2485_v3, 1 }
 0x196   :  { %14569 = vst [vmem:[#allocation161_spill] sm:$0xff] %v10890_v9  ;;  %2846 = vrot.lane.b32.xlu1 %v2439_v63, %s9038_s30  ;;  %v7607_v9 = vcombine.low %v10312_v32, %v10888_v40  ;;  %v2480_v32 = vrot.slane %v2478_v38, 1 }
 0x197   :  { %2844 = vrot.lane.b32.xlu0 %v2432_v59, %s9038_s30  ;;  %v2469_v59 = vshrl.u32 %v7602_v41, 16  ;;  %v10935_v41 = vld [vmem:[%s14333_s0 + $0xcc] sm:$0x1]  ;;  %v2499_v22 = vshll.u32 %v7606_v56, 16 }
 0x198   :  { %v10899_v26 = vpop.permute.xlu1 %2094  ;;  %v2481_v16 = vor.u32 %v2480_v32, %v2476_v31  ;;  %v2506_v38 = vshll.u32 %v7607_v9, 16  ;;  %v2504_v32 = vshrl.u32 %v7607_v9, 16  ;;  %v10968_v9 = vld [vmem:[%s14333_s0 + $0x104] sm:$0x1] }
 0x199   :  { %14570 = vst [vmem:[#allocation162_spill] sm:$0xff] %v10899_v26  ;;  %v10910_v63 = vpop.permute.xlu0 %2092  ;;  %v7608_v26 = vcombine.low %v10339_v49, %v10915_v46  ;;  %v2474_v49 = vor.u32 %v2473_v51, %v2469_v59  ;;  %v2501_v59 = vrot.slane %v2499_v22, 1 }
 0x19a   :  { %14571 = vst [vmem:[#allocation163_spill] sm:$0xff] %v10910_v63  ;;  %2850 = vrot.lane.b32.xlu1 %v2453_v12, %s9038_s30  ;;  %v7609_v63 = vcombine.low %v10332_v25, %v10908_v42  ;;  %v2494_v25 = vrot.slane %v2492_v7, 1 }
 0x19b   :  { %2848 = vrot.lane.b32.xlu0 %v2446_v6, %s9038_s30  ;;  %v2483_v6 = vshrl.u32 %v7604_v19, 16  ;;  %v10955_v19 = vld [vmem:[%s14333_s0 + $0xdc] sm:$0x1]  ;;  %v2513_v51 = vshll.u32 %v7608_v26, 16 }
 0x19c   :  { %v10919_v57 = vpop.permute.xlu1 %2098  ;;  %v2495_v31 = vor.u32 %v2494_v25, %v2490_v47  ;;  %v2520_v7 = vshll.u32 %v7609_v63, 16  ;;  %v2518_v25 = vshrl.u32 %v7609_v63, 16  ;;  %v10988_v63 = vld [vmem:[%s14333_s0 + $0x114] sm:$0x1] }
 0x19d   :  { %14572 = vst [vmem:[#allocation164_spill] sm:$0xff] %v10919_v57  ;;  %v10930_v12 = vpop.permute.xlu0 %2096  ;;  %v7610_v57 = vcombine.low %v10359_v20, %v10935_v41  ;;  %v2488_v20 = vor.u32 %v2487_v36, %v2483_v6  ;;  %v2515_v6 = vrot.slane %v2513_v51, 1 }
 0x19e   :  { %14573 = vst [vmem:[#allocation165_spill] sm:$0xff] %v10930_v12  ;;  %2854 = vrot.lane.b32.xlu1 %v2467_v44, %s9038_s30  ;;  %v7611_v12 = vcombine.low %v10352_v14, %v10928_v48  ;;  %v2508_v14 = vrot.slane %v2506_v38, 1 }
 0x19f   :  { %2852 = vrot.lane.b32.xlu0 %v2460_v24, %s9038_s30  ;;  %v2497_v24 = vshrl.u32 %v7606_v56, 16  ;;  %v10975_v56 = vld [vmem:[%s14333_s0 + $0xfc] sm:$0x1]  ;;  %v2527_v36 = vshll.u32 %v7610_v57, 16 }
 0x1a0   :  { %v10939_v21 = vpop.permute.xlu1 %2102  ;;  %v2509_v47 = vor.u32 %v2508_v14, %v2504_v32  ;;  %v2534_v38 = vshll.u32 %v7611_v12, 16  ;;  %v2532_v14 = vshrl.u32 %v7611_v12, 16  ;;  %v11008_v12 = vld [vmem:[%s14333_s0 + $0x124] sm:$0x1] }
 0x1a1   :  { %14574 = vst [vmem:[#allocation166_spill] sm:$0xff] %v10939_v21  ;;  %v10950_v44 = vpop.permute.xlu0 %2100  ;;  %v7612_v21 = vcombine.low %v10379_v53, %v10955_v19  ;;  %v2502_v53 = vor.u32 %v2501_v59, %v2497_v24  ;;  %v2529_v24 = vrot.slane %v2527_v36, 1 }
 0x1a2   :  { %14575 = vst [vmem:[#allocation167_spill] sm:$0xff] %v10950_v44  ;;  %2858 = vrot.lane.b32.xlu1 %v2481_v16, %s9038_s30  ;;  %v7613_v44 = vcombine.low %v10372_v54, %v10948_v2  ;;  %v2522_v54 = vrot.slane %v2520_v7, 1 }
 0x1a3   :  { %2856 = vrot.lane.b32.xlu0 %v2474_v49, %s9038_s30  ;;  %v2511_v49 = vshrl.u32 %v7608_v26, 16  ;;  %v10995_v26 = vld [vmem:[%s14333_s0 + $0x10c] sm:$0x1]  ;;  %v2541_v59 = vshll.u32 %v7612_v21, 16 }
 0x1a4   :  { %v10959_v3 = vpop.permute.xlu1 %2106  ;;  %v2523_v32 = vor.u32 %v2522_v54, %v2518_v25  ;;  %v2548_v7 = vshll.u32 %v7613_v44, 16  ;;  %v2546_v54 = vshrl.u32 %v7613_v44, 16  ;;  %v11028_v44 = vld [vmem:[%s14333_s0 + $0x134] sm:$0x1] }
 0x1a5   :  { %14576 = vst [vmem:[#allocation168_spill] sm:$0xff] %v10959_v3  ;;  %v10970_v16 = vpop.permute.xlu0 %2104  ;;  %v7614_v3 = vcombine.low %v10399_v52, %v10975_v56  ;;  %v2516_v52 = vor.u32 %v2515_v6, %v2511_v49  ;;  %v2543_v49 = vrot.slane %v2541_v59, 1 }
 0x1a6   :  { %14577 = vst [vmem:[#allocation169_spill] sm:$0xff] %v10970_v16  ;;  %2862 = vrot.lane.b32.xlu1 %v2495_v31, %s9038_s30  ;;  %v7615_v16 = vcombine.low %v10392_v8, %v10968_v9  ;;  %v2536_v8 = vrot.slane %v2534_v38, 1 }
 0x1a7   :  { %2860 = vrot.lane.b32.xlu0 %v2488_v20, %s9038_s30  ;;  %v2525_v20 = vshrl.u32 %v7610_v57, 16  ;;  %v11015_v57 = vld [vmem:[%s14333_s0 + $0x11c] sm:$0x1]  ;;  %v2555_v6 = vshll.u32 %v7614_v3, 16 }
 0x1a8   :  { %v10979_v22 = vpop.permute.xlu1 %2110  ;;  %v2537_v25 = vor.u32 %v2536_v8, %v2532_v14  ;;  %v2562_v38 = vshll.u32 %v7615_v16, 16  ;;  %v2560_v8 = vshrl.u32 %v7615_v16, 16  ;;  %v11048_v16 = vld [vmem:[%s14333_s0 + $0x154] sm:$0x1] }
 0x1a9   :  { %14578 = vst [vmem:[#allocation170_spill] sm:$0xff] %v10979_v22  ;;  %v10990_v31 = vpop.permute.xlu0 %2108  ;;  %v7616_v22 = vcombine.low %v10419_v60, %v10995_v26  ;;  %v2530_v60 = vor.u32 %v2529_v24, %v2525_v20  ;;  %v2557_v20 = vrot.slane %v2555_v6, 1 }
 0x1aa   :  { %14579 = vst [vmem:[#allocation171_spill] sm:$0xff] %v10990_v31  ;;  %2866 = vrot.lane.b32.xlu1 %v2509_v47, %s9038_s30  ;;  %v7617_v31 = vcombine.low %v10412_v13, %v10988_v63  ;;  %v2550_v13 = vrot.slane %v2548_v7, 1 }
 0x1ab   :  { %2864 = vrot.lane.b32.xlu0 %v2502_v53, %s9038_s30  ;;  %v2539_v53 = vshrl.u32 %v7612_v21, 16  ;;  %v11035_v21 = vld [vmem:[%s14333_s0 + $0x12c] sm:$0x1]  ;;  %v2569_v24 = vshll.u32 %v7616_v22, 16 }
 0x1ac   :  { %v10999_v51 = vpop.permute.xlu1 %2114  ;;  %v2551_v14 = vor.u32 %v2550_v13, %v2546_v54  ;;  %v2576_v7 = vshll.u32 %v7617_v31, 16  ;;  %v2574_v13 = vshrl.u32 %v7617_v31, 16  ;;  %v11068_v31 = vld [vmem:[%s14333_s0 + $0x164] sm:$0x1] }
 0x1ad   :  { %14580 = vst [vmem:[#allocation172_spill] sm:$0xff] %v10999_v51  ;;  %v11010_v47 = vpop.permute.xlu0 %2112  ;;  %v7618_v51 = vcombine.low %v10439_v61, %v11015_v57  ;;  %v2544_v61 = vor.u32 %v2543_v49, %v2539_v53  ;;  %v2571_v53 = vrot.slane %v2569_v24, 1 }
 0x1ae   :  { %14581 = vst [vmem:[#allocation173_spill] sm:$0xff] %v11010_v47  ;;  %2870 = vrot.lane.b32.xlu1 %v2523_v32, %s9038_s30  ;;  %v7619_v47 = vcombine.low %v10432_v28, %v11008_v12  ;;  %v2564_v28 = vrot.slane %v2562_v38, 1 }
 0x1af   :  { %2868 = vrot.lane.b32.xlu0 %v2516_v52, %s9038_s30  ;;  %v2553_v52 = vshrl.u32 %v7614_v3, 16  ;;  %v11055_v3 = vld [vmem:[%s14333_s0 + $0x14c] sm:$0x1]  ;;  %v2583_v49 = vshll.u32 %v7618_v51, 16 }
 0x1b0   :  { %v11019_v36 = vpop.permute.xlu1 %2118  ;;  %v2565_v54 = vor.u32 %v2564_v28, %v2560_v8  ;;  %v2590_v38 = vshll.u32 %v7619_v47, 16  ;;  %v2588_v28 = vshrl.u32 %v7619_v47, 16  ;;  %v11088_v47 = vld [vmem:[%s14333_s0 + $0x174] sm:$0x1] }
 0x1b1   :  { %14582 = vst [vmem:[#allocation174_spill] sm:$0xff] %v11019_v36  ;;  %v11030_v32 = vpop.permute.xlu0 %2116  ;;  %v7620_v36 = vcombine.low %v10459_v5, %v11035_v21  ;;  %v2558_v5 = vor.u32 %v2557_v20, %v2553_v52  ;;  %v2585_v52 = vrot.slane %v2583_v49, 1 }
 0x1b2   :  { %14583 = vst [vmem:[#allocation175_spill] sm:$0xff] %v11030_v32  ;;  %2874 = vrot.lane.b32.xlu1 %v2537_v25, %s9038_s30  ;;  %v7621_v32 = vcombine.low %v10452_v50, %v11028_v44  ;;  %v2578_v50 = vrot.slane %v2576_v7, 1 }
 0x1b3   :  { %2872 = vrot.lane.b32.xlu0 %v2530_v60, %s9038_s30  ;;  %v2567_v60 = vshrl.u32 %v7616_v22, 16  ;;  %v11075_v22 = vld [vmem:[%s14333_s0 + $0x15c] sm:$0x1]  ;;  %v2597_v20 = vshll.u32 %v7620_v36, 16 }
 0x1b4   :  { %v11039_v59 = vpop.permute.xlu1 %2122  ;;  %v2579_v8 = vor.u32 %v2578_v50, %v2574_v13  ;;  %v2604_v7 = vshll.u32 %v7621_v32, 16  ;;  %v2602_v50 = vshrl.u32 %v7621_v32, 16  ;;  %v11108_v32 = vld [vmem:[%s14333_s0 + $0x184] sm:$0x1] }
 0x1b5   :  { %14584 = vst [vmem:[#allocation176_spill] sm:$0xff] %v11039_v59  ;;  %v11050_v25 = vpop.permute.xlu0 %2120  ;;  %v7622_v59 = vcombine.low %v10479_v18, %v11055_v3  ;;  %v2572_v18 = vor.u32 %v2571_v53, %v2567_v60  ;;  %v2599_v60 = vrot.slane %v2597_v20, 1 }
 0x1b6   :  { %14585 = vst [vmem:[#allocation177_spill] sm:$0xff] %v11050_v25  ;;  %2878 = vrot.lane.b32.xlu1 %v2551_v14, %s9038_s30  ;;  %v7623_v25 = vcombine.low %v10472_v15, %v11048_v16  ;;  %v2592_v15 = vrot.slane %v2590_v38, 1 }
 0x1b7   :  { %2876 = vrot.lane.b32.xlu0 %v2544_v61, %s9038_s30  ;;  %v2581_v61 = vshrl.u32 %v7618_v51, 16  ;;  %v11095_v51 = vld [vmem:[%s14333_s0 + $0x16c] sm:$0x1]  ;;  %v2611_v53 = vshll.u32 %v7622_v59, 16 }
 0x1b8   :  { %v11059_v6 = vpop.permute.xlu1 %2126  ;;  %v2593_v13 = vor.u32 %v2592_v15, %v2588_v28  ;;  %v2618_v38 = vshll.u32 %v7623_v25, 16  ;;  %v2616_v15 = vshrl.u32 %v7623_v25, 16  ;;  %v11128_v25 = vld [vmem:[%s14333_s0 + $0x1a4] sm:$0x1] }
 0x1b9   :  { %14586 = vst [vmem:[#allocation178_spill] sm:$0xff] %v11059_v6  ;;  %v11070_v14 = vpop.permute.xlu0 %2124  ;;  %v7624_v6 = vcombine.low %v10499_v37, %v11075_v22  ;;  %v2586_v37 = vor.u32 %v2585_v52, %v2581_v61  ;;  %v2613_v61 = vrot.slane %v2611_v53, 1 }
 0x1ba   :  { %14587 = vst [vmem:[#allocation179_spill] sm:$0xff] %v11070_v14  ;;  %2882 = vrot.lane.b32.xlu1 %v2565_v54, %s9038_s30  ;;  %v7625_v14 = vcombine.low %v10492_v10, %v11068_v31  ;;  %v2606_v10 = vrot.slane %v2604_v7, 1 }
 0x1bb   :  { %2880 = vrot.lane.b32.xlu0 %v2558_v5, %s9038_s30  ;;  %v2595_v5 = vshrl.u32 %v7620_v36, 16  ;;  %v11115_v36 = vld [vmem:[%s14333_s0 + $0x17c] sm:$0x1]  ;;  %v2625_v52 = vshll.u32 %v7624_v6, 16 }
 0x1bc   :  { %v11079_v24 = vpop.permute.xlu1 %2130  ;;  %v2607_v28 = vor.u32 %v2606_v10, %v2602_v50  ;;  %v2632_v7 = vshll.u32 %v7625_v14, 16  ;;  %v2630_v10 = vshrl.u32 %v7625_v14, 16  ;;  %v11148_v14 = vld [vmem:[%s14333_s0 + $0x1b4] sm:$0x1] }
 0x1bd   :  { %14588 = vst [vmem:[#allocation180_spill] sm:$0xff] %v11079_v24  ;;  %v11090_v54 = vpop.permute.xlu0 %2128  ;;  %v7626_v24 = vcombine.low %v10519_v30, %v11095_v51  ;;  %v2600_v30 = vor.u32 %v2599_v60, %v2595_v5  ;;  %v2627_v5 = vrot.slane %v2625_v52, 1 }
 0x1be   :  { %14589 = vst [vmem:[#allocation181_spill] sm:$0xff] %v11090_v54  ;;  %2886 = vrot.lane.b32.xlu1 %v2579_v8, %s9038_s30  ;;  %v7627_v54 = vcombine.low %v10512_v11, %v11088_v47  ;;  %v2620_v11 = vrot.slane %v2618_v38, 1 }
 0x1bf   :  { %2884 = vrot.lane.b32.xlu0 %v2572_v18, %s9038_s30  ;;  %v2609_v18 = vshrl.u32 %v7622_v59, 16  ;;  %v11135_v59 = vld [vmem:[%s14333_s0 + $0x19c] sm:$0x1]  ;;  %v2639_v60 = vshll.u32 %v7626_v24, 16 }
 0x1c0   :  { %v11099_v49 = vpop.permute.xlu1 %2134  ;;  %v2621_v50 = vor.u32 %v2620_v11, %v2616_v15  ;;  %v2646_v38 = vshll.u32 %v7627_v54, 16  ;;  %v2644_v11 = vshrl.u32 %v7627_v54, 16  ;;  %v11168_v54 = vld [vmem:[%s14333_s0 + $0x1c4] sm:$0x1] }
 0x1c1   :  { %14590 = vst [vmem:[#allocation182_spill] sm:$0xff] %v11099_v49  ;;  %v11110_v8 = vpop.permute.xlu0 %2132  ;;  %v7628_v49 = vcombine.low %v10539_v1, %v11115_v36  ;;  %v2614_v1 = vor.u32 %v2613_v61, %v2609_v18  ;;  %v2641_v18 = vrot.slane %v2639_v60, 1 }
 0x1c2   :  { %14591 = vst [vmem:[#allocation183_spill] sm:$0xff] %v11110_v8  ;;  %2890 = vrot.lane.b32.xlu1 %v2593_v13, %s9038_s30  ;;  %v7629_v8 = vcombine.low %v10532_v33, %v11108_v32  ;;  %v2634_v33 = vrot.slane %v2632_v7, 1 }
 0x1c3   :  { %2888 = vrot.lane.b32.xlu0 %v2586_v37, %s9038_s30  ;;  %v2623_v37 = vshrl.u32 %v7624_v6, 16  ;;  %v11155_v6 = vld [vmem:[%s14333_s0 + $0x1ac] sm:$0x1]  ;;  %v2653_v61 = vshll.u32 %v7628_v49, 16 }
 0x1c4   :  { %v11119_v20 = vpop.permute.xlu1 %2138  ;;  %v2635_v15 = vor.u32 %v2634_v33, %v2630_v10  ;;  %v2660_v7 = vshll.u32 %v7629_v8, 16  ;;  %v2658_v33 = vshrl.u32 %v7629_v8, 16  ;;  %v7125_v8 = vld [vmem:[%s14333_s0 + $0x1d4] sm:$0x1] }
 0x1c5   :  { %14592 = vst [vmem:[#allocation184_spill] sm:$0xff] %v11119_v20  ;;  %v11130_v13 = vpop.permute.xlu0 %2136  ;;  %v7630_v20 = vcombine.low %v10559_v27, %v11135_v59  ;;  %v2628_v27 = vor.u32 %v2627_v5, %v2623_v37  ;;  %v2655_v37 = vrot.slane %v2653_v61, 1 }
 0x1c6   :  { %14593 = vst [vmem:[#allocation185_spill] sm:$0xff] %v11130_v13  ;;  %2894 = vrot.lane.b32.xlu1 %v2607_v28, %s9038_s30  ;;  %v7631_v13 = vcombine.low %v10552_v45, %v11128_v25  ;;  %v2648_v45 = vrot.slane %v2646_v38, 1 }
 0x1c7   :  { %2892 = vrot.lane.b32.xlu0 %v2600_v30, %s9038_s30  ;;  %v2637_v30 = vshrl.u32 %v7626_v24, 16  ;;  %v11175_v24 = vld [vmem:[%s14333_s0 + $0x1bc] sm:$0x1]  ;;  %v2667_v5 = vshll.u32 %v7630_v20, 16 }
 0x1c8   :  { %v11139_v53 = vpop.permute.xlu1 %2142  ;;  %v2649_v10 = vor.u32 %v2648_v45, %v2644_v11  ;;  %v2674_v38 = vshll.u32 %v7631_v13, 16  ;;  %v2672_v45 = vshrl.u32 %v7631_v13, 16 }
 0x1c9   :  { %14594 = vst [vmem:[#allocation186_spill] sm:$0xff] %v11139_v53  ;;  %v11150_v28 = vpop.permute.xlu0 %2140  ;;  %v7632_v53 = vcombine.low %v10579_v0, %v11155_v6  ;;  %v2642_v0 = vor.u32 %v2641_v18, %v2637_v30  ;;  %v2665_v30 = vshrl.u32 %v7630_v20, 16  ;;  %v2669_v18 = vrot.slane %v2667_v5, 1 }
 0x1ca   :  { %14595 = vst [vmem:[#allocation187_spill] sm:$0xff] %v11150_v28  ;;  %2898 = vrot.lane.b32.xlu1 %v2621_v50, %s9038_s30  ;;  %v7633_v28 = vcombine.low %v10572_v34, %v11148_v14  ;;  %v2662_v34 = vrot.slane %v2660_v7, 1  ;;  %v2676_v7 = vrot.slane %v2674_v38, 1 }
 0x1cb   :  { %2896 = vrot.lane.b32.xlu0 %v2614_v1, %s9038_s30  ;;  %v2651_v1 = vshrl.u32 %v7628_v49, 16  ;;  %v11193_v49 = vld [vmem:[%s14333_s0 + $0x1cc] sm:$0x1]  ;;  %v2681_v61 = vshll.u32 %v7632_v53, 16 }
 0x1cc   :  { %v11159_v52 = vpop.permute.xlu1 %2146  ;;  %v2663_v11 = vor.u32 %v2662_v34, %v2658_v33  ;;  %v7636_v29 = vcombine.low %v14603_v43, %v11193_v49  ;;  %v7126_v33 = vld [vmem:[%s14333_s0 + $0x1ec] sm:$0x1]  ;;  %v2677_v20 = vor.u32 %v2676_v7, %v2672_v45  ;;  %v2686_v34 = vshrl.u32 %v7633_v28, 16 }
 0x1cd   :  { %14596 = vst [vmem:[#allocation188_spill] sm:$0xff] %v11159_v52  ;;  %v11170_v50 = vpop.permute.xlu0 %2144  ;;  %v14599_v52 = vld [vmem:[#allocation115_spill] sm:$0xff]  ;;  %v2679_v43 = vshrl.u32 %v7632_v53, 16 }
 0x1ce   :  { %14597 = vst [vmem:[#allocation189_spill] sm:$0xff] %v11170_v50  ;;  %2902 = vrot.lane.b32.xlu1 %v2635_v15, %s9038_s30  ;;  %v7635_v50 = vcombine.low %v10592_v58, %v11168_v54  ;;  %v7634_v55 = vcombine.low %v14599_v52, %v11175_v24  ;;  %v2688_v58 = vshll.u32 %v7633_v28, 16  ;;  %v7128_v28 = vld [vmem:[%s14333_s0 + $0x1fc] sm:$0x1] }
 0x1cf   :  { %2900 = vrot.lane.b32.xlu0 %v2628_v27, %s9038_s30  ;;  %v2656_v27 = vor.u32 %v2655_v37, %v2651_v1  ;;  %v2670_v1 = vor.u32 %v2669_v18, %v2665_v30  ;;  %v2683_v37 = vrot.slane %v2681_v61, 1 }
 0x1d0   :  { %v11179_v60 = vpop.permute.xlu1 %2150  ;;  %v2690_v38 = vrot.slane %v2688_v58, 1  ;;  %v2695_v5 = vshll.u32 %v7634_v55, 16  ;;  %v2700_v7 = vshrl.u32 %v7635_v50, 16  ;;  %v2693_v18 = vshrl.u32 %v7634_v55, 16 }
 0x1d1   :  { %14598 = vst [vmem:[#allocation190_spill] sm:$0xff] %v11179_v60  ;;  %v11188_v15 = vpop.permute.xlu0 %2148  ;;  %v2684_v30 = vor.u32 %v2683_v37, %v2679_v43  ;;  %v2707_v37 = vshrl.u32 %v7636_v29, 16 }
 0x1d2   :  { %14600 = vst [vmem:[#allocation115_spill] sm:$0xff] %v11188_v15  ;;  %2906 = vrot.lane.b32.xlu1 %v2649_v10, %s9038_s30  ;;  %v14602_v15 = vld [vmem:[#allocation117_spill] sm:$0xff]  ;;  %v7127_v10 = vld [vmem:[%s14333_s0 + $0x1f4] sm:$0x1]  ;;  %v2691_v53 = vor.u32 %v2690_v38, %v2686_v34  ;;  %v2697_v61 = vrot.slane %v2695_v5, 1 }
 0x1d3   :  { %2904 = vrot.lane.b32.xlu0 %v2642_v0, %s9038_s30  ;;  %v7637_v60 = vcombine.low %v14602_v15, %v7125_v8  ;;  %v2702_v0 = vshll.u32 %v7635_v50, 16  ;;  %v14606_v15 = vld [vmem:[#allocation121_spill] sm:$0xff]  ;;  %v7130_v50 = vld [vmem:[%s14333_s0 + $0x20c] sm:$0x1] }
 0x1d4   :  { %v11197_v52 = vpop.permute.xlu1 %2154  ;;  %v2698_v43 = vor.u32 %v2697_v61, %v2693_v18 }
 0x1d5   :  { %14601 = vst [vmem:[#allocation191_spill] sm:$0xff] %v11197_v52  ;;  %v11205_v13 = vpop.permute.xlu0 %2152  ;;  %v14607_v52 = vld [vmem:[#allocation123_spill] sm:$0xff]  ;;  %v2704_v58 = vrot.slane %v2702_v0, 1  ;;  %v2714_v38 = vshrl.u32 %v7637_v60, 16 }
 0x1d6   :  { %14604 = vst [vmem:[#allocation117_spill] sm:$0xff] %v11205_v13  ;;  %2910 = vrot.lane.b32.xlu1 %v2663_v11, %s9038_s30  ;;  %v7639_v13 = vcombine.low %v14606_v15, %v7127_v10  ;;  %v7638_v62 = vcombine.low %v14607_v52, %v7126_v33  ;;  %v7129_v11 = vld [vmem:[%s14333_s0 + $0x204] sm:$0x1]  ;;  %v2709_v52 = vshll.u32 %v7636_v29, 16  ;;  %v14610_v33 = vld [vmem:[#allocation125_spill] sm:$0xff] }
 0x1d7   :  { %2908 = vrot.lane.b32.xlu0 %v2656_v27, %s9038_s30  ;;  %v2716_v27 = vshll.u32 %v7637_v60, 16  ;;  %v7641_v15 = vcombine.low %v14610_v33, %v7129_v11  ;;  %v2705_v55 = vor.u32 %v2704_v58, %v2700_v7  ;;  %v7132_v60 = vld [vmem:[%s14333_s0 + $0x21c] sm:$0x1] }
 0x1d8   :  { %v11212_v8 = vpop.permute.xlu1 %2158  ;;  %v2711_v5 = vrot.slane %v2709_v52, 1  ;;  %v2723_v11 = vshll.u32 %v7638_v62, 16  ;;  %v2728_v58 = vshrl.u32 %v7639_v13, 16  ;;  %v2721_v61 = vshrl.u32 %v7638_v62, 16 }
 0x1d9   :  { %14605 = vst [vmem:[#allocation119_spill] sm:$0xff] %v11212_v8  ;;  %v11219_v45 = vpop.permute.xlu0 %2156  ;;  %v2718_v0 = vrot.slane %v2716_v27, 1 }
 0x1da   :  { %14608 = vst [vmem:[#allocation121_spill] sm:$0xff] %v11219_v45  ;;  %2914 = vrot.lane.b32.xlu1 %v2677_v20, %s9038_s30  ;;  %v14611_v45 = vld [vmem:[#allocation127_spill] sm:$0xff]  ;;  %v7131_v20 = vld [vmem:[%s14333_s0 + $0x214] sm:$0x1]  ;;  %v2712_v18 = vor.u32 %v2711_v5, %v2707_v37  ;;  %v2725_v52 = vrot.slane %v2723_v11, 1 }
 0x1db   :  { %2912 = vrot.lane.b32.xlu0 %v2670_v1, %s9038_s30  ;;  %v7640_v8 = vcombine.low %v14611_v45, %v7128_v28  ;;  %v2730_v1 = vshll.u32 %v7639_v13, 16  ;;  %v14614_v28 = vld [vmem:[#allocation129_spill] sm:$0xff]  ;;  %v2719_v29 = vor.u32 %v2718_v0, %v2714_v38  ;;  %v2742_v0 = vshrl.u32 %v7641_v15, 16 }
 0x1dc   :  { %v11226_v10 = vpop.permute.xlu1 %2162  ;;  %v7643_v33 = vcombine.low %v14614_v28, %v7131_v20  ;;  %v7134_v13 = vld [vmem:[%s14333_s0 + $0x23c] sm:$0x1]  ;;  %v2726_v37 = vor.u32 %v2725_v52, %v2721_v61 }
 0x1dd   :  { %14609 = vst [vmem:[#allocation123_spill] sm:$0xff] %v11226_v10  ;;  %v11233_v34 = vpop.permute.xlu0 %2160  ;;  %v2732_v27 = vrot.slane %v2730_v1, 1  ;;  %v2737_v20 = vshll.u32 %v7640_v8, 16  ;;  %v2735_v5 = vshrl.u32 %v7640_v8, 16 }
 0x1de   :  { %14612 = vst [vmem:[#allocation125_spill] sm:$0xff] %v11233_v34  ;;  %2918 = vrot.lane.b32.xlu1 %v2691_v53, %s9038_s30  ;;  %v14615_v34 = vld [vmem:[#allocation131_spill] sm:$0xff]  ;;  %v7133_v53 = vld [vmem:[%s14333_s0 + $0x224] sm:$0x1] }
 0x1df   :  { %2916 = vrot.lane.b32.xlu0 %v2684_v30, %s9038_s30  ;;  %v7642_v10 = vcombine.low %v14615_v34, %v7130_v50  ;;  %v2744_v30 = vshll.u32 %v7641_v15, 16  ;;  %v14618_v50 = vld [vmem:[#allocation133_spill] sm:$0xff]  ;;  %v2733_v62 = vor.u32 %v2732_v27, %v2728_v58  ;;  %v2739_v11 = vrot.slane %v2737_v20, 1  ;;  %v7136_v15 = vld [vmem:[%s14333_s0 + $0x24c] sm:$0x1] }
 0x1e0   :  { %v11240_v45 = vpop.permute.xlu1 %2166  ;;  %v7645_v28 = vcombine.low %v14618_v50, %v7133_v53  ;;  %v2756_v27 = vshrl.u32 %v7643_v33, 16 }
 0x1e1   :  { %14613 = vst [vmem:[#allocation127_spill] sm:$0xff] %v11240_v45  ;;  %v11247_v7 = vpop.permute.xlu0 %2164  ;;  %v2746_v1 = vrot.slane %v2744_v30, 1  ;;  %v2751_v53 = vshll.u32 %v7642_v10, 16  ;;  %v2740_v61 = vor.u32 %v2739_v11, %v2735_v5  ;;  %v2749_v52 = vshrl.u32 %v7642_v10, 16 }
 0x1e2   :  { %14616 = vst [vmem:[#allocation129_spill] sm:$0xff] %v11247_v7  ;;  %2922 = vrot.lane.b32.xlu1 %v2705_v55, %s9038_s30  ;;  %v14619_v7 = vld [vmem:[#allocation135_spill] sm:$0xff]  ;;  %v7135_v55 = vld [vmem:[%s14333_s0 + $0x244] sm:$0x1] }
 0x1e3   :  { %2920 = vrot.lane.b32.xlu0 %v2698_v43, %s9038_s30  ;;  %v7644_v45 = vcombine.low %v14619_v7, %v7132_v60  ;;  %v2758_v43 = vshll.u32 %v7643_v33, 16  ;;  %v14622_v60 = vld [vmem:[#allocation137_spill] sm:$0xff]  ;;  %v2747_v8 = vor.u32 %v2746_v1, %v2742_v0  ;;  %v2753_v20 = vrot.slane %v2751_v53, 1 }
 0x1e4   :  { %v11254_v34 = vpop.permute.xlu1 %2170  ;;  %v7647_v50 = vcombine.low %v14622_v60, %v7135_v55  ;;  %v7138_v33 = vld [vmem:[%s14333_s0 + $0x25c] sm:$0x1]  ;;  %v2770_v1 = vshrl.u32 %v7645_v28, 16 }
 0x1e5   :  { %14617 = vst [vmem:[#allocation131_spill] sm:$0xff] %v11254_v34  ;;  %v11261_v38 = vpop.permute.xlu0 %2168  ;;  %v2760_v30 = vrot.slane %v2758_v43, 1  ;;  %v2765_v55 = vshll.u32 %v7644_v45, 16  ;;  %v2754_v5 = vor.u32 %v2753_v20, %v2749_v52  ;;  %v2763_v11 = vshrl.u32 %v7644_v45, 16 }
 0x1e6   :  { %14620 = vst [vmem:[#allocation133_spill] sm:$0xff] %v11261_v38  ;;  %2926 = vrot.lane.b32.xlu1 %v2719_v29, %s9038_s30  ;;  %v14623_v38 = vld [vmem:[#allocation139_spill] sm:$0xff]  ;;  %v7137_v29 = vld [vmem:[%s14333_s0 + $0x254] sm:$0x1] }
 0x1e7   :  { %2924 = vrot.lane.b32.xlu0 %v2712_v18, %s9038_s30  ;;  %v7646_v34 = vcombine.low %v14623_v38, %v7134_v13  ;;  %v2772_v18 = vshll.u32 %v7645_v28, 16  ;;  %v14626_v13 = vld [vmem:[#allocation141_spill] sm:$0xff]  ;;  %v2761_v10 = vor.u32 %v2760_v30, %v2756_v27  ;;  %v2767_v53 = vrot.slane %v2765_v55, 1  ;;  %v7140_v28 = vld [vmem:[%s14333_s0 + $0x26c] sm:$0x1] }
 0x1e8   :  { %v11268_v7 = vpop.permute.xlu1 %2174  ;;  %v7649_v60 = vcombine.low %v14626_v13, %v7137_v29  ;;  %v2784_v30 = vshrl.u32 %v7647_v50, 16 }
 0x1e9   :  { %14621 = vst [vmem:[#allocation135_spill] sm:$0xff] %v11268_v7  ;;  %v11275_v58 = vpop.permute.xlu0 %2172  ;;  %v2774_v43 = vrot.slane %v2772_v18, 1  ;;  %v2779_v29 = vshll.u32 %v7646_v34, 16  ;;  %v2768_v52 = vor.u32 %v2767_v53, %v2763_v11  ;;  %v2777_v20 = vshrl.u32 %v7646_v34, 16 }
 0x1ea   :  { %14624 = vst [vmem:[#allocation137_spill] sm:$0xff] %v11275_v58  ;;  %2930 = vrot.lane.b32.xlu1 %v2733_v62, %s9038_s30  ;;  %v14627_v58 = vld [vmem:[#allocation143_spill] sm:$0xff]  ;;  %v7139_v62 = vld [vmem:[%s14333_s0 + $0x264] sm:$0x1] }
 0x1eb   :  { %2928 = vrot.lane.b32.xlu0 %v2726_v37, %s9038_s30  ;;  %v7648_v7 = vcombine.low %v14627_v58, %v7136_v15  ;;  %v2786_v37 = vshll.u32 %v7647_v50, 16  ;;  %v14630_v15 = vld [vmem:[#allocation145_spill] sm:$0xff]  ;;  %v2775_v45 = vor.u32 %v2774_v43, %v2770_v1  ;;  %v2781_v55 = vrot.slane %v2779_v29, 1 }
 0x1ec   :  { %v11282_v38 = vpop.permute.xlu1 %2178  ;;  %v7651_v13 = vcombine.low %v14630_v15, %v7139_v62  ;;  %v2798_v50 = vshrl.u32 %v7649_v60, 16 }
 0x1ed   :  { %14625 = vst [vmem:[#allocation139_spill] sm:$0xff] %v11282_v38  ;;  %v11289_v0 = vpop.permute.xlu0 %2176  ;;  %v2788_v18 = vrot.slane %v2786_v37, 1  ;;  %v2793_v62 = vshll.u32 %v7648_v7, 16  ;;  %v2782_v37 = vor.u32 %v2781_v55, %v2777_v20  ;;  %v2791_v34 = vshrl.u32 %v7648_v7, 16 }
 0x1ee   :  { %14628 = vst [vmem:[#allocation141_spill] sm:$0xff] %v11289_v0  ;;  %2934 = vrot.lane.b32.xlu1 %v2747_v8, %s9038_s30  ;;  %v14631_v0 = vld [vmem:[#allocation147_spill] sm:$0xff]  ;;  %v7141_v8 = vld [vmem:[%s14333_s0 + $0x274] sm:$0x1]  ;;  %v2814_v43 = vshll.u32 %v7651_v13, 16 }
 0x1ef   :  { %2932 = vrot.lane.b32.xlu0 %v2740_v61, %s9038_s30  ;;  %v7650_v38 = vcombine.low %v14631_v0, %v7138_v33  ;;  %v2800_v61 = vshll.u32 %v7649_v60, 16  ;;  %v14634_v33 = vld [vmem:[#allocation149_spill] sm:$0xff] }
 0x1f0   :  { %v11296_v58 = vpop.permute.xlu1 %2182  ;;  %v7653_v15 = vcombine.low %v14634_v33, %v7141_v8 }
 0x1f1   :  { %14629 = vst [vmem:[#allocation143_spill] sm:$0xff] %v11296_v58  ;;  %v11303_v27 = vpop.permute.xlu0 %2180  ;;  %v2802_v1 = vrot.slane %v2800_v61, 1  ;;  %v2807_v11 = vshll.u32 %v7650_v38, 16 }
 0x1f2   :  { %14632 = vst [vmem:[#allocation145_spill] sm:$0xff] %v11303_v27  ;;  %2938 = vrot.lane.b32.xlu1 %v2761_v10, %s9038_s30  ;;  %v14635_v27 = vld [vmem:[#allocation151_spill] sm:$0xff]  ;;  %v2789_v10 = vor.u32 %v2788_v18, %v2784_v30  ;;  %v2805_v30 = vshrl.u32 %v7650_v38, 16  ;;  %v2826_v55 = vshrl.u32 %v7653_v15, 16  ;;  %v7143_v38 = vld [vmem:[%s14333_s0 + $0x10] sm:$0xe] }
 0x1f3   :  { %2936 = vrot.lane.b32.xlu0 %v2754_v5, %s9038_s30  ;;  %v7652_v58 = vcombine.low %v14635_v27, %v7140_v28  ;;  %v2795_v5 = vrot.slane %v2793_v62, 1  ;;  %v2803_v8 = vor.u32 %v2802_v1, %v2798_v50  ;;  %v2812_v27 = vshrl.u32 %v7651_v13, 16  ;;  %v7142_v1 = vld [vmem:[%s14333_s0 + $0x8] sm:$0xe] }
 0x1f4   :  { %v11310_v0 = vpop.permute.xlu1 %2186  ;;  %v2816_v28 = vrot.slane %v2814_v43, 1  ;;  %v2809_v18 = vrot.slane %v2807_v11, 1 }
 0x1f5   :  { %14633 = vst [vmem:[#allocation147_spill] sm:$0xff] %v11310_v0  ;;  %v11314_v39 = vpop.permute.xlu0 %2184  ;;  %v2796_v60 = vor.u32 %v2795_v5, %v2791_v34  ;;  %v2821_v61 = vshll.u32 %v7652_v58, 16  ;;  %v2819_v33 = vshrl.u32 %v7652_v58, 16  ;;  %v8940_v58 = vld [vmem:[%s14333_s0 + $0x14] sm:$0x1] }
 0x1f6   :  { %14636 = vst [vmem:[#allocation149_spill] sm:$0xff] %v11314_v39  ;;  %2942 = vrot.lane.b32.xlu1 %v2775_v45, %s9038_s30  ;;  %v2828_v45 = vshll.u32 %v7653_v15, 16  ;;  %v2817_v20 = vor.u32 %v2816_v28, %v2812_v27  ;;  %v2810_v13 = vor.u32 %v2809_v18, %v2805_v30  ;;  %v8941_v5 = vld [vmem:[%s14333_s0 + $0xc] sm:$0x1]  ;;  %v7144_v28 = vld [vmem:[%s14333_s0 + $0x18] sm:$0xe] }
 0x1f7   :  { %2940 = vrot.lane.b32.xlu0 %v2768_v52, %s9038_s30  ;;  %v7654_v11 = vcombine.low %v7142_v1, %v8941_v5  ;;  %v8942_v30 = vld [vmem:[%s14333_s0 + $0x24] sm:$0x1]  ;;  %v8944_v1 = vld [vmem:[%s14333_s0 + $0x34] sm:$0x1]  ;;  %v7149_v5 = vld [vmem:[%s14333_s0 + $0x40] sm:$0xe] }
 0x1f8   :  { %v11318_v53 = vpop.permute.xlu1 %2190  ;;  %v2830_v62 = vrot.slane %v2828_v45, 1  ;;  %v7157_v39 = vld [vmem:[%s14333_s0 + $0x90] sm:$0xe] }
 0x1f9   :  { %14637 = vst [vmem:[#allocation151_spill] sm:$0xff] %v11318_v53  ;;  %v11320_v29 = vpop.permute.xlu0 %2188 }
 0x1fa   :  { %14638 = vst [vmem:[#allocation192_spill] sm:$0xff] %v11320_v29  ;;  %2946 = vrot.lane.b32.xlu1 %v2789_v10, %s9038_s30  ;;  %v2823_v10 = vrot.slane %v2821_v61, 1  ;;  %v2831_v15 = vor.u32 %v2830_v62, %v2826_v55  ;;  %v3152_v61 = vrot.slane %v7654_v11, 1  ;;  %v7147_v62 = vld [vmem:[%s14333_s0 + $0x30] sm:$0xe] }
 0x1fb   :  { %2944 = vrot.lane.b32.xlu0 %v2782_v37, %s9038_s30  ;;  %v7655_v37 = vcombine.low %v7143_v38, %v8940_v58  ;;  %v7155_v29 = vld [vmem:[%s14333_s0 + $0x80] sm:$0xe] }
 0x1fc   :  { %v11324_v52 = vpop.permute.xlu1 %2834  ;;  %v2824_v34 = vor.u32 %v2823_v10, %v2819_v33  ;;  %v7146_v33 = vld [vmem:[%s14333_s0 + $0x28] sm:$0xe] }
 0x1fd   :  { %v11326_v7 = vpop.permute.xlu0 %2832 }
 0x1fe   :  { %2950 = vrot.lane.b32.xlu1 %v2803_v8, %s9038_s30  ;;  %v7145_v8 = vld [vmem:[%s14333_s0 + $0x20] sm:$0xe] }
 0x1ff   :  { %2948 = vrot.lane.b32.xlu0 %v2796_v60, %s9038_s30  ;;  %v3153_v60 = vrot.slane %v7655_v37, 1  ;;  %v7657_v18 = vcombine.low %v7145_v8, %v8942_v30  ;;  %v8945_v37 = vld [vmem:[%s14333_s0 + $0x2c] sm:$0x1]  ;;  %v7148_v8 = vld [vmem:[%s14333_s0 + $0x38] sm:$0xe] }
 0x200   :  { %v11333_v50 = vpop.permute.xlu1 %2838  ;;  %v8946_v30 = vld [vmem:[%s14333_s0 + $0x44] sm:$0x1] }
 0x201   :  { %v11338_v43 = vpop.permute.xlu0 %2836  ;;  %v3155_v38 = vrot.slane %v7657_v18, 1  ;;  %v7661_v18 = vcombine.low %v7149_v5, %v8946_v30  ;;  %v8949_v5 = vld [vmem:[%s14333_s0 + $0x5c] sm:$0x1]  ;;  %v7153_v30 = vld [vmem:[%s14333_s0 + $0x70] sm:$0xe] }
 0x202   :  { %2954 = vrot.lane.b32.xlu1 %v2817_v20, %s9038_s30  ;;  %v8943_v20 = vld [vmem:[%s14333_s0 + $0x1c] sm:$0x1] }
 0x203   :  { %2952 = vrot.lane.b32.xlu0 %v2810_v13, %s9038_s30  ;;  %v7656_v55 = vcombine.low %v7144_v28, %v8943_v20  ;;  %v8947_v20 = vld [vmem:[%s14333_s0 + $0x3c] sm:$0x1] }
 0x204   :  { %v11351_v27 = vpop.permute.xlu1 %2842 }
 0x205   :  { %v11356_v45 = vpop.permute.xlu0 %2840  ;;  %v3154_v58 = vrot.slane %v7656_v55, 1  ;;  %v7660_v55 = vcombine.low %v7148_v8, %v8947_v20 }
 0x206   :  { %2958 = vrot.lane.b32.xlu1 %v2831_v15, %s9038_s30  ;;  %v7659_v15 = vcombine.low %v7147_v62, %v8944_v1  ;;  %v7151_v62 = vld [vmem:[%s14333_s0 + $0x60] sm:$0xe] }
 0x207   :  { %2956 = vrot.lane.b32.xlu0 %v2824_v34, %s9038_s30  ;;  %v7658_v34 = vcombine.low %v7146_v33, %v8945_v37 }
 0x208   :  { %v11369_v13 = vpop.permute.xlu1 %2846 }
 0x209   :  { %v11374_v10 = vpop.permute.xlu0 %2844 }
 0x20a   :  { %3218 = vrot.lane.b32.xlu1 %v3153_v60, %s9039_s11  ;;  %v3157_v60 = vrot.slane %v7659_v15, 1  ;;  %v3159_v15 = vrot.slane %v7661_v18, 1 }
 0x20b   :  { %3216 = vrot.lane.b32.xlu0 %v3152_v61, %s9039_s11  ;;  %v3156_v61 = vrot.slane %v7658_v34, 1  ;;  %v3158_v34 = vrot.slane %v7660_v55, 1  ;;  %v8950_v55 = vld [vmem:[%s14333_s0 + $0x74] sm:$0x1] }
 0x20c   :  { %v11387_v11 = vpop.permute.xlu1 %2850 }
 0x20d   :  { %v11392_v28 = vpop.permute.xlu0 %2848 }
 0x20e   :  { %3222 = vrot.lane.b32.xlu1 %v3155_v38, %s9039_s11  ;;  %v7150_v38 = vld [vmem:[%s14333_s0 + $0x58] sm:$0xe] }
 0x20f   :  { %3220 = vrot.lane.b32.xlu0 %v3154_v58, %s9039_s11  ;;  %v8948_v58 = vld [vmem:[%s14333_s0 + $0x64] sm:$0x1]  ;;  %v7662_v8 = vcombine.low %v7150_v38, %v8949_v5 }
 0x210   :  { %v11405_v33 = vpop.permute.xlu1 %2854  ;;  %v7663_v37 = vcombine.low %v7151_v62, %v8948_v58  ;;  %v7665_v62 = vcombine.low %v7153_v30, %v8950_v55  ;;  %v8951_v58 = vld [vmem:[%s14333_s0 + $0x6c] sm:$0x1]  ;;  %v8953_v55 = vld [vmem:[%s14333_s0 + $0x7c] sm:$0x1] }
 0x211   :  { %v11410_v1 = vpop.permute.xlu0 %2852  ;;  %v3160_v38 = vrot.slane %v7662_v8, 1  ;;  %v8952_v8 = vld [vmem:[%s14333_s0 + $0x84] sm:$0x1] }
 0x212   :  { %3226 = vrot.lane.b32.xlu1 %v3157_v60, %s9039_s11  ;;  %v7152_v60 = vld [vmem:[%s14333_s0 + $0x68] sm:$0xe]  ;;  %v7667_v30 = vcombine.low %v7155_v29, %v8952_v8  ;;  %v7159_v8 = vld [vmem:[%s14333_s0 + $0xb0] sm:$0xe] }
 0x213   :  { %3224 = vrot.lane.b32.xlu0 %v3156_v61, %s9039_s11  ;;  %v3161_v61 = vrot.slane %v7663_v37, 1  ;;  %v7664_v5 = vcombine.low %v7152_v60, %v8951_v58 }
 0x214   :  { %v11423_v20 = vpop.permute.xlu1 %2858  ;;  %v3165_v29 = vrot.slane %v7667_v30, 1  ;;  %v7161_v30 = vld [vmem:[%s14333_s0 + $0xc0] sm:$0xe] }
 0x215   :  { %v11428_v18 = vpop.permute.xlu0 %2856  ;;  %v3162_v60 = vrot.slane %v7664_v5, 1 }
 0x216   :  { %3230 = vrot.lane.b32.xlu1 %v3159_v15, %s9039_s11  ;;  %v7154_v15 = vld [vmem:[%s14333_s0 + $0x78] sm:$0xe] }
 0x217   :  { %3228 = vrot.lane.b32.xlu0 %v3158_v34, %s9039_s11  ;;  %v3163_v34 = vrot.slane %v7665_v62, 1  ;;  %v7666_v58 = vcombine.low %v7154_v15, %v8953_v55 }
 0x218   :  { %v11441_v53 = vpop.permute.xlu1 %2862 }
 0x219   :  { %v11446_v37 = vpop.permute.xlu0 %2860  ;;  %v3164_v5 = vrot.slane %v7666_v58, 1  ;;  %v7160_v58 = vld [vmem:[%s14333_s0 + $0xb8] sm:$0xe] }
 0x21a   :  { %14639 = vst [vmem:[#allocation193_spill] sm:$0xff] %v11446_v37  ;;  %3234 = vrot.lane.b32.xlu1 %v3161_v61, %s9039_s11  ;;  %v7156_v61 = vld [vmem:[%s14333_s0 + $0x88] sm:$0xe] }
 0x21b   :  { %3232 = vrot.lane.b32.xlu0 %v3160_v38, %s9039_s11  ;;  %v7669_v38 = vcombine.low %v7157_v39, %v10868_v4  ;;  %v7668_v15 = vcombine.low %v7156_v61, %v10875_v23  ;;  %v7671_v4 = vcombine.low %v7159_v8, %v10888_v40 }
 0x21c   :  { %v11459_v0 = vpop.permute.xlu1 %2866 }
 0x21d   :  { %14640 = vst [vmem:[#allocation194_spill] sm:$0xff] %v11459_v0  ;;  %v11464_v62 = vpop.permute.xlu0 %2864  ;;  %v3167_v39 = vrot.slane %v7669_v38, 1  ;;  %v3166_v23 = vrot.slane %v7668_v15, 1  ;;  %v3169_v40 = vrot.slane %v7671_v4, 1  ;;  %v7163_v38 = vld [vmem:[%s14333_s0 + $0xd0] sm:$0xe] }
 0x21e   :  { %14641 = vst [vmem:[#allocation195_spill] sm:$0xff] %v11464_v62  ;;  %3238 = vrot.lane.b32.xlu1 %v3163_v34, %s9039_s11  ;;  %v7158_v62 = vld [vmem:[%s14333_s0 + $0xa8] sm:$0xe] }
 0x21f   :  { %3236 = vrot.lane.b32.xlu0 %v3162_v60, %s9039_s11  ;;  %v7670_v34 = vcombine.low %v7158_v62, %v10895_v35  ;;  %v7672_v62 = vcombine.low %v7160_v58, %v10915_v46  ;;  %v7162_v15 = vld [vmem:[%s14333_s0 + $0xc8] sm:$0xe] }
 0x220   :  { %v11473_v55 = vpop.permute.xlu1 %2870  ;;  %v7674_v4 = vcombine.low %v7162_v15, %v10935_v41 }
 0x221   :  { %14642 = vst [vmem:[#allocation196_spill] sm:$0xff] %v11473_v55  ;;  %v11478_v0 = vpop.permute.xlu0 %2868  ;;  %v3168_v35 = vrot.slane %v7670_v34, 1  ;;  %v3170_v46 = vrot.slane %v7672_v62, 1  ;;  %v14721_v55 = vld [vmem:[#allocation20_spill] sm:$0xff] }
 0x222   :  { %14643 = vst [vmem:[#allocation197_spill] sm:$0xff] %v11478_v0  ;;  %3242 = vrot.lane.b32.xlu1 %v3165_v29, %s9039_s11  ;;  %v7673_v29 = vcombine.low %v7161_v30, %v10908_v42  ;;  %v7164_v30 = vld [vmem:[%s14333_s0 + $0xd8] sm:$0xe]  ;;  %v3172_v41 = vrot.slane %v7674_v4, 1  ;;  %v8954_v0 = vld [vmem:[%s14333_s0 + $0x10] sm:$0xf] }
 0x223   :  { %3240 = vrot.lane.b32.xlu0 %v3164_v5, %s9039_s11 }
 0x224   :  { %v11487_v60 = vpop.permute.xlu1 %2874  ;;  %v3171_v42 = vrot.slane %v7673_v29, 1  ;;  %v7676_v29 = vcombine.low %v7164_v30, %v10955_v19 }
 0x225   :  { %14644 = vst [vmem:[#allocation198_spill] sm:$0xff] %v11487_v60  ;;  %v11492_v61 = vpop.permute.xlu0 %2872 }
 0x226   :  { %14645 = vst [vmem:[#allocation199_spill] sm:$0xff] %v11492_v61  ;;  %3246 = vrot.lane.b32.xlu1 %v3167_v39, %s9039_s11  ;;  %v7675_v39 = vcombine.low %v7163_v38, %v10928_v48  ;;  %v7166_v38 = vld [vmem:[%s14333_s0 + $0xf8] sm:$0xe]  ;;  %v3174_v19 = vrot.slane %v7676_v29, 1 }
 0x227   :  { %3244 = vrot.lane.b32.xlu0 %v3166_v23, %s9039_s11  ;;  %v7165_v23 = vld [vmem:[%s14333_s0 + $0xe0] sm:$0xe] }
 0x228   :  { %v11501_v5 = vpop.permute.xlu1 %2878  ;;  %v3173_v48 = vrot.slane %v7675_v39, 1  ;;  %v7678_v39 = vcombine.low %v7166_v38, %v10975_v56 }
 0x229   :  { %14646 = vst [vmem:[#allocation200_spill] sm:$0xff] %v11501_v5  ;;  %v11506_v8 = vpop.permute.xlu0 %2876 }
 0x22a   :  { %14647 = vst [vmem:[#allocation201_spill] sm:$0xff] %v11506_v8  ;;  %3250 = vrot.lane.b32.xlu1 %v3169_v40, %s9039_s11  ;;  %v7677_v40 = vcombine.low %v7165_v23, %v10948_v2  ;;  %v7168_v23 = vld [vmem:[%s14333_s0 + $0x108] sm:$0xe]  ;;  %v3176_v56 = vrot.slane %v7678_v39, 1 }
 0x22b   :  { %3248 = vrot.lane.b32.xlu0 %v3168_v35, %s9039_s11  ;;  %v7167_v35 = vld [vmem:[%s14333_s0 + $0x100] sm:$0xe] }
 0x22c   :  { %v11515_v34 = vpop.permute.xlu1 %2882  ;;  %v3175_v2 = vrot.slane %v7677_v40, 1  ;;  %v7680_v40 = vcombine.low %v7168_v23, %v10995_v26 }
 0x22d   :  { %14648 = vst [vmem:[#allocation202_spill] sm:$0xff] %v11515_v34  ;;  %v11520_v58 = vpop.permute.xlu0 %2880  ;;  %v12001_v34 = vld [vmem:[%s14333_s0 + $0x9c] sm:$0x1] }
 0x22e   :  { %14649 = vst [vmem:[#allocation203_spill] sm:$0xff] %v11520_v58  ;;  %3254 = vrot.lane.b32.xlu1 %v3171_v42, %s9039_s11  ;;  %v7679_v42 = vcombine.low %v7167_v35, %v10968_v9  ;;  %v7170_v35 = vld [vmem:[%s14333_s0 + $0x118] sm:$0xe]  ;;  %v3178_v26 = vrot.slane %v7680_v40, 1 }
 0x22f   :  { %3252 = vrot.lane.b32.xlu0 %v3170_v46, %s9039_s11  ;;  %v7169_v46 = vld [vmem:[%s14333_s0 + $0x110] sm:$0xe] }
 0x230   :  { %v11529_v62 = vpop.permute.xlu1 %2886  ;;  %v3177_v9 = vrot.slane %v7679_v42, 1  ;;  %v7682_v42 = vcombine.low %v7170_v35, %v11015_v57 }
 0x231   :  { %14650 = vst [vmem:[#allocation204_spill] sm:$0xff] %v11529_v62  ;;  %v11534_v15 = vpop.permute.xlu0 %2884 }
 0x232   :  { %14651 = vst [vmem:[#allocation205_spill] sm:$0xff] %v11534_v15  ;;  %3258 = vrot.lane.b32.xlu1 %v3173_v48, %s9039_s11  ;;  %v7681_v48 = vcombine.low %v7169_v46, %v10988_v63  ;;  %v7172_v46 = vld [vmem:[%s14333_s0 + $0x128] sm:$0xe]  ;;  %v3180_v57 = vrot.slane %v7682_v42, 1 }
 0x233   :  { %3256 = vrot.lane.b32.xlu0 %v3172_v41, %s9039_s11  ;;  %v7171_v41 = vld [vmem:[%s14333_s0 + $0x120] sm:$0xe] }
 0x234   :  { %v11543_v4 = vpop.permute.xlu1 %2890  ;;  %v3179_v63 = vrot.slane %v7681_v48, 1  ;;  %v7684_v48 = vcombine.low %v7172_v46, %v11035_v21 }
 0x235   :  { %14652 = vst [vmem:[#allocation206_spill] sm:$0xff] %v11543_v4  ;;  %v11548_v30 = vpop.permute.xlu0 %2888 }
 0x236   :  { %14653 = vst [vmem:[#allocation207_spill] sm:$0xff] %v11548_v30  ;;  %3262 = vrot.lane.b32.xlu1 %v3175_v2, %s9039_s11  ;;  %v7683_v2 = vcombine.low %v7171_v41, %v11008_v12  ;;  %v7174_v41 = vld [vmem:[%s14333_s0 + $0x148] sm:$0xe]  ;;  %v3182_v21 = vrot.slane %v7684_v48, 1 }
 0x237   :  { %3260 = vrot.lane.b32.xlu0 %v3174_v19, %s9039_s11  ;;  %v7173_v19 = vld [vmem:[%s14333_s0 + $0x130] sm:$0xe] }
 0x238   :  { %v11557_v29 = vpop.permute.xlu1 %2894  ;;  %v3181_v12 = vrot.slane %v7683_v2, 1  ;;  %v7686_v2 = vcombine.low %v7174_v41, %v11055_v3 }
 0x239   :  { %14654 = vst [vmem:[#allocation208_spill] sm:$0xff] %v11557_v29  ;;  %v11562_v38 = vpop.permute.xlu0 %2892 }
 0x23a   :  { %14655 = vst [vmem:[#allocation209_spill] sm:$0xff] %v11562_v38  ;;  %3266 = vrot.lane.b32.xlu1 %v3177_v9, %s9039_s11  ;;  %v7685_v9 = vcombine.low %v7173_v19, %v11028_v44  ;;  %v7176_v19 = vld [vmem:[%s14333_s0 + $0x158] sm:$0xe]  ;;  %v3184_v3 = vrot.slane %v7686_v2, 1 }
 0x23b   :  { %3264 = vrot.lane.b32.xlu0 %v3176_v56, %s9039_s11  ;;  %v7175_v56 = vld [vmem:[%s14333_s0 + $0x150] sm:$0xe] }
 0x23c   :  { %v11571_v39 = vpop.permute.xlu1 %2898  ;;  %v3183_v44 = vrot.slane %v7685_v9, 1  ;;  %v7688_v9 = vcombine.low %v7176_v19, %v11075_v22 }
 0x23d   :  { %14656 = vst [vmem:[#allocation210_spill] sm:$0xff] %v11571_v39  ;;  %v11576_v23 = vpop.permute.xlu0 %2896 }
 0x23e   :  { %14657 = vst [vmem:[#allocation211_spill] sm:$0xff] %v11576_v23  ;;  %3270 = vrot.lane.b32.xlu1 %v3179_v63, %s9039_s11  ;;  %v7687_v63 = vcombine.low %v7175_v56, %v11048_v16  ;;  %v7178_v56 = vld [vmem:[%s14333_s0 + $0x168] sm:$0xe]  ;;  %v3186_v22 = vrot.slane %v7688_v9, 1 }
 0x23f   :  { %3268 = vrot.lane.b32.xlu0 %v3178_v26, %s9039_s11  ;;  %v7177_v26 = vld [vmem:[%s14333_s0 + $0x160] sm:$0xe] }
 0x240   :  { %v11585_v40 = vpop.permute.xlu1 %2902  ;;  %v3185_v16 = vrot.slane %v7687_v63, 1  ;;  %v7690_v63 = vcombine.low %v7178_v56, %v11095_v51 }
 0x241   :  { %14658 = vst [vmem:[#allocation212_spill] sm:$0xff] %v11585_v40  ;;  %v11590_v35 = vpop.permute.xlu0 %2900 }
 0x242   :  { %14659 = vst [vmem:[#allocation213_spill] sm:$0xff] %v11590_v35  ;;  %3274 = vrot.lane.b32.xlu1 %v3181_v12, %s9039_s11  ;;  %v7689_v12 = vcombine.low %v7177_v26, %v11068_v31  ;;  %v7180_v26 = vld [vmem:[%s14333_s0 + $0x178] sm:$0xe]  ;;  %v3188_v51 = vrot.slane %v7690_v63, 1 }
 0x243   :  { %3272 = vrot.lane.b32.xlu0 %v3180_v57, %s9039_s11  ;;  %v7179_v57 = vld [vmem:[%s14333_s0 + $0x170] sm:$0xe] }
 0x244   :  { %v11599_v42 = vpop.permute.xlu1 %2906  ;;  %v3187_v31 = vrot.slane %v7689_v12, 1  ;;  %v7692_v12 = vcombine.low %v7180_v26, %v11115_v36 }
 0x245   :  { %14660 = vst [vmem:[#allocation214_spill] sm:$0xff] %v11599_v42  ;;  %v11604_v46 = vpop.permute.xlu0 %2904  ;;  %v11913_v42 = vld [vmem:[%s14333_s0 + $0x7c] sm:$0x1] }
 0x246   :  { %14661 = vst [vmem:[#allocation215_spill] sm:$0xff] %v11604_v46  ;;  %3278 = vrot.lane.b32.xlu1 %v3183_v44, %s9039_s11  ;;  %v7691_v44 = vcombine.low %v7179_v57, %v11088_v47  ;;  %v7182_v57 = vld [vmem:[%s14333_s0 + $0x198] sm:$0xe]  ;;  %v3190_v36 = vrot.slane %v7692_v12, 1 }
 0x247   :  { %3276 = vrot.lane.b32.xlu0 %v3182_v21, %s9039_s11  ;;  %v7181_v21 = vld [vmem:[%s14333_s0 + $0x180] sm:$0xe] }
 0x248   :  { %v11613_v48 = vpop.permute.xlu1 %2910  ;;  %v3189_v47 = vrot.slane %v7691_v44, 1  ;;  %v7694_v44 = vcombine.low %v7182_v57, %v11135_v59 }
 0x249   :  { %14662 = vst [vmem:[#allocation216_spill] sm:$0xff] %v11613_v48  ;;  %v11618_v41 = vpop.permute.xlu0 %2908 }
 0x24a   :  { %14663 = vst [vmem:[#allocation217_spill] sm:$0xff] %v11618_v41  ;;  %3282 = vrot.lane.b32.xlu1 %v3185_v16, %s9039_s11  ;;  %v7693_v16 = vcombine.low %v7181_v21, %v11108_v32  ;;  %v7184_v21 = vld [vmem:[%s14333_s0 + $0x1a8] sm:$0xe]  ;;  %v3192_v59 = vrot.slane %v7694_v44, 1 }
 0x24b   :  { %3280 = vrot.lane.b32.xlu0 %v3184_v3, %s9039_s11  ;;  %v7183_v3 = vld [vmem:[%s14333_s0 + $0x1a0] sm:$0xe] }
 0x24c   :  { %v11627_v2 = vpop.permute.xlu1 %2914  ;;  %v3191_v32 = vrot.slane %v7693_v16, 1  ;;  %v7696_v16 = vcombine.low %v7184_v21, %v11155_v6 }
 0x24d   :  { %14664 = vst [vmem:[#allocation218_spill] sm:$0xff] %v11627_v2  ;;  %v11632_v19 = vpop.permute.xlu0 %2912 }
 0x24e   :  { %14665 = vst [vmem:[#allocation219_spill] sm:$0xff] %v11632_v19  ;;  %3286 = vrot.lane.b32.xlu1 %v3187_v31, %s9039_s11  ;;  %v7695_v31 = vcombine.low %v7183_v3, %v11128_v25  ;;  %v7186_v3 = vld [vmem:[%s14333_s0 + $0x1b8] sm:$0xe]  ;;  %v3194_v6 = vrot.slane %v7696_v16, 1  ;;  %v11702_v16 = vld [vmem:[%s14333_s0 + $0x24] sm:$0x1] }
 0x24f   :  { %3284 = vrot.lane.b32.xlu0 %v3186_v22, %s9039_s11  ;;  %v7185_v22 = vld [vmem:[%s14333_s0 + $0x1b0] sm:$0xe] }
 0x250   :  { %v11641_v9 = vpop.permute.xlu1 %2918  ;;  %v3193_v25 = vrot.slane %v7695_v31, 1  ;;  %v7698_v31 = vcombine.low %v7186_v3, %v11175_v24  ;;  %v11709_v3 = vld [vmem:[%s14333_s0 + $0x1c] sm:$0x1] }
 0x251   :  { %14666 = vst [vmem:[#allocation220_spill] sm:$0xff] %v11641_v9  ;;  %v11646_v56 = vpop.permute.xlu0 %2916 }
 0x252   :  { %14667 = vst [vmem:[#allocation221_spill] sm:$0xff] %v11646_v56  ;;  %3290 = vrot.lane.b32.xlu1 %v3189_v47, %s9039_s11  ;;  %v7697_v47 = vcombine.low %v7185_v22, %v11148_v14  ;;  %v7188_v22 = vld [vmem:[%s14333_s0 + $0x1c8] sm:$0xe] }
 0x253   :  { %3288 = vrot.lane.b32.xlu0 %v3188_v51, %s9039_s11  ;;  %v7187_v51 = vld [vmem:[%s14333_s0 + $0x1c0] sm:$0xe] }
 0x254   :  { %v11655_v63 = vpop.permute.xlu1 %2922  ;;  %v3195_v14 = vrot.slane %v7697_v47, 1  ;;  %v3196_v47 = vrot.slane %v7698_v31, 1  ;;  %v7207_v31 = vld [vmem:[%s14333_s0 + $0x18] sm:$0xf] }
 0x255   :  { %14668 = vst [vmem:[#allocation222_spill] sm:$0xff] %v11655_v63  ;;  %v11660_v26 = vpop.permute.xlu0 %2920  ;;  %v7719_v63 = vcombine.low %v7207_v31, %v7207_v31 }
 0x256   :  { %14669 = vst [vmem:[#allocation223_spill] sm:$0xff] %v11660_v26  ;;  %3294 = vrot.lane.b32.xlu1 %v3191_v32, %s9039_s11  ;;  %v7699_v32 = vcombine.low %v7187_v51, %v11168_v54  ;;  %v7206_v54 = vld [vmem:[%s14333_s0 + $0x10] sm:$0xf] }
 0x257   :  { %3292 = vrot.lane.b32.xlu0 %v3190_v36, %s9039_s11  ;;  %v11683_v36 = vld [vmem:[%s14333_s0 + $0x14] sm:$0x1] }
 0x258   :  { %v11669_v12 = vpop.permute.xlu1 %2926  ;;  %v3197_v24 = vrot.slane %v7699_v32, 1  ;;  %v7208_v32 = vld [vmem:[%s14333_s0 + $0x20] sm:$0xf] }
 0x259   :  { %14670 = vst [vmem:[#allocation224_spill] sm:$0xff] %v11669_v12  ;;  %v11674_v57 = vpop.permute.xlu0 %2924  ;;  %v7209_v12 = vld [vmem:[%s14333_s0 + $0x28] sm:$0xf] }
 0x25a   :  { %14671 = vst [vmem:[#allocation225_spill] sm:$0xff] %v11674_v57  ;;  %3298 = vrot.lane.b32.xlu1 %v3193_v25, %s9039_s11  ;;  %v7782_v25 = vcombine.low %v7206_v54, %v11683_v36 }
 0x25b   :  { %3296 = vrot.lane.b32.xlu0 %v3192_v59, %s9039_s11  ;;  %v7700_v59 = vcombine.low %v7188_v22, %v11193_v49  ;;  %v7718_v49 = vcombine.low %v7206_v54, %v7206_v54 }
 0x25c   :  { %v11685_v44 = vpop.permute.xlu1 %2930  ;;  %v3859_v22 = vshll.u32 %v7782_v25, 16 }
 0x25d   :  { %14672 = vst [vmem:[#allocation226_spill] sm:$0xff] %v11685_v44  ;;  %v11690_v21 = vpop.permute.xlu0 %2928 }
 0x25e   :  { %14673 = vst [vmem:[#allocation227_spill] sm:$0xff] %v11690_v21  ;;  %3302 = vrot.lane.b32.xlu1 %v3195_v14, %s9039_s11  ;;  %v7783_v21 = vcombine.low %v7207_v31, %v11709_v3 }
 0x25f   :  { %3300 = vrot.lane.b32.xlu0 %v3194_v6, %s9039_s11  ;;  %v7784_v6 = vcombine.low %v7208_v32, %v11702_v16 }
 0x260   :  { %v11704_v51 = vpop.permute.xlu1 %2934  ;;  %v3866_v56 = vshll.u32 %v7783_v21, 16  ;;  %v3864_v31 = vshrl.u32 %v7783_v21, 16 }
 0x261   :  { %14674 = vst [vmem:[#allocation228_spill] sm:$0xff] %v11704_v51  ;;  %v11711_v14 = vpop.permute.xlu0 %2932  ;;  %v3198_v51 = vrot.slane %v7700_v59, 1  ;;  %v3861_v59 = vrot.slane %v3859_v22, 1  ;;  %v3873_v26 = vshll.u32 %v7784_v6, 16 }
 0x262   :  { %14675 = vst [vmem:[#allocation229_spill] sm:$0xff] %v11711_v14  ;;  %3306 = vrot.lane.b32.xlu1 %v3197_v24, %s9039_s11  ;;  %v11726_v14 = vld [vmem:[%s14333_s0 + $0x2c] sm:$0x1]  ;;  %v7720_v24 = vcombine.low %v7208_v32, %v7208_v32  ;;  %v8788_v32 = vld [vmem:[%s14334_s1] sm:$0xff]   ;;  %v3868_v19 = vrot.slane %v3866_v56, 1 }
 0x263   :  { %3304 = vrot.lane.b32.xlu0 %v3196_v47, %s9039_s11  ;;  %v3857_v47 = vshrl.u32 %v7782_v25, 16  ;;  %v7785_v57 = vcombine.low %v7209_v12, %v11726_v14  ;;  %8331 = vmatprep.subr.bf16.mxu0 %v8788_v32  ;;  %v3875_v22 = vrot.slane %v3873_v26, 1 }
 0x264   :  { %v11728_v44 = vpop.permute.xlu1 %2938  ;;  %8401 = vmatprep.subr.bf16.mxu1 %v8788_v32  ;;  %8332 = vmatpush3.bf16.msra.mxu0 %v8788_v32  ;;  %v3869_v21 = vor.u32 %v3868_v19, %v3864_v31 }
 0x265   :  { %14676 = vst [vmem:[#allocation230_spill] sm:$0xff] %v11728_v44  ;;  %v11730_v54 = vpop.permute.xlu0 %2936  ;;  %v3862_v25 = vor.u32 %v3861_v59, %v3857_v47  ;;  %v3880_v9 = vshll.u32 %v7785_v57, 16  ;;  %8404 = vmatpush3.bf16.msra.mxu1 %v8788_v32  ;;  %v3878_v26 = vshrl.u32 %v7785_v57, 16  ;;  %v7336_v47 = vld [vmem:[%s14333_s0 + $0x20] sm:$0xe] }
 0x266   :  { %14677 = vst [vmem:[#allocation231_spill] sm:$0xff] %v11730_v54  ;;  %3536 = vrot.lane.b32.xlu1 %v7718_v49, %s9040_s21  ;;  %v3871_v49 = vshrl.u32 %v7784_v6, 16  ;;  %v8791_v59 = vld [vmem:[%s14334_s1 + $0x10] ss:$0 sps:$4 sm:$0x33]  }
 0x267   :  { %3308 = vrot.lane.b32.xlu0 %v3198_v51, %s9039_s11  ;;  %v7721_v51 = vcombine.low %v7209_v12, %v7209_v12  ;;  %v3882_v12 = vrot.slane %v3880_v9, 1  ;;  %v7335_v9 = vld [vmem:[%s14333_s0 + $0x18] sm:$0xe]  ;;  %v6191_v19 = vsel %vm6189_vm0, %v8791_v59, 0 }
 0x268   :  { %v11741_v54 = vpop.permute.xlu1 %2942 }
 0x269   :  { %14678 = vst [vmem:[#allocation232_spill] sm:$0xff] %v11741_v54  ;;  %v11743_v44 = vpop.permute.xlu0 %2940  ;;  %v7334_v54 = vld [vmem:[%s14333_s0 + $0x10] sm:$0xe] }
 0x26a   :  { %14679 = vst [vmem:[#allocation233_spill] sm:$0xff] %v11743_v44  ;;  %3540 = vrot.lane.b32.xlu1 %v7720_v24, %s9040_s21  ;;  %v8789_v44 = vld [vmem:[%s14334_s1 + $0x8] sm:$0xff]   ;;  %v7846_v56 = vcombine.low %v7334_v54, %v11683_v36  ;;  %v7848_v54 = vcombine.low %v7336_v47, %v11702_v16  ;;  %v7210_v16 = vld [vmem:[%s14333_s0 + $0x30] sm:$0xf]  ;;  %v11806_v47 = vld [vmem:[%s14333_s0 + $0x3c] sm:$0x1] }
 0x26b   :  { %3538 = vrot.lane.b32.xlu0 %v7719_v63, %s9040_s21  ;;  %8333 = vmatprep.subr.bf16.mxu0 %v8789_v44  ;;  %v3876_v63 = vor.u32 %v3875_v22, %v3871_v49  ;;  %v11780_v49 = vld [vmem:[%s14333_s0 + $0x34] sm:$0x1] }
 0x26c   :  { %v11753_v24 = vpop.permute.xlu1 %2946  ;;  %8402 = vmatprep.subr.bf16.mxu1 %v8789_v44  ;;  %8334 = vmatpush3.bf16.msra.mxu0 %v8789_v44  ;;  %v4624_v36 = vrot.slane %v7846_v56, 1 }
 0x26d   :  { %14680 = vst [vmem:[#allocation234_spill] sm:$0xff] %v11753_v24  ;;  %v11755_v6 = vpop.permute.xlu0 %2944  ;;  %8405 = vmatpush3.bf16.msra.mxu1 %v8789_v44  ;;  %8407 = vmatprep.subr.msk.bf16.mxu0 %vm6189_vm0, %v8791_v59  ;;  %v3883_v44 = vor.u32 %v3882_v12, %v3878_v26  ;;  %v11799_v12 = vld [vmem:[%s14333_s0 + $0x44] sm:$0x1] }
 0x26e   :  { %14681 = vst [vmem:[#allocation235_spill] sm:$0xff] %v11755_v6  ;;  %4304 = vrot.lane.b32.xlu1 %v3862_v25, %s9041_s6  ;;  %8408 = vmatprep.subr.msk.bf16.mxu1 %vm6189_vm0, %v8791_v59  ;;  %v7847_v25 = vcombine.low %v7335_v9, %v11709_v3  ;;  %v4626_v3 = vrot.slane %v7848_v54, 1  ;;  %v7212_v9 = vld [vmem:[%s14333_s0 + $0x40] sm:$0xf] }
 0x26f   :  { %3542 = vrot.lane.b32.xlu0 %v7721_v51, %s9040_s21  ;;  %v7337_v51 = vld [vmem:[%s14333_s0 + $0x28] sm:$0xe] }
 0x270   :  { %v11766_v32 = vpop.permute.xlu1 %2950  ;;  %8336 = vmatpush3.bf16.msra.mxu0 %v6191_v19  ;;  %v4625_v56 = vrot.slane %v7847_v25, 1  ;;  %v7849_v26 = vcombine.low %v7337_v51, %v11726_v14  ;;  %v7722_v14 = vcombine.low %v7210_v16, %v7210_v16 }
 0x271   :  { %14682 = vst [vmem:[#allocation236_spill] sm:$0xff] %v11766_v32  ;;  %v11771_v57 = vpop.permute.xlu0 %2948  ;;  %8406 = vmatpush3.bf16.msra.mxu1 %v6191_v19  ;;  %v7788_v19 = vcombine.low %v7212_v9, %v11799_v12 }
 0x272   :  { %14683 = vst [vmem:[#allocation237_spill] sm:$0xff] %v11771_v57  ;;  %4308 = vrot.lane.b32.xlu1 %v3876_v63, %s9041_s6  ;;  %v7786_v63 = vcombine.low %v7210_v16, %v11780_v49 }
 0x273   :  { %4306 = vrot.lane.b32.xlu0 %v3869_v21, %s9041_s6 }
 0x274   :  { %v11782_v22 = vpop.permute.xlu1 %2954  ;;  %v3887_v54 = vshll.u32 %v7786_v63, 16 }
 0x275   :  { %14684 = vst [vmem:[#allocation238_spill] sm:$0xff] %v11782_v22  ;;  %v11787_v31 = vpop.permute.xlu0 %2952 }
 0x276   :  { %14685 = vst [vmem:[#allocation239_spill] sm:$0xff] %v11787_v31  ;;  %4688 = vrot.lane.b32.xlu1 %v4624_v36, %s9042_s18  ;;  %v7211_v36 = vld [vmem:[%s14333_s0 + $0x38] sm:$0xf]  ;;  %v3889_v31 = vrot.slane %v3887_v54, 1 }
 0x277   :  { %4310 = vrot.lane.b32.xlu0 %v3883_v44, %s9041_s6  ;;  %v4627_v44 = vrot.slane %v7849_v26, 1  ;;  %v7787_v25 = vcombine.low %v7211_v36, %v11806_v47  ;;  %v3901_v26 = vshll.u32 %v7788_v19, 16  ;;  %v7723_v22 = vcombine.low %v7211_v36, %v7211_v36  ;;  %v7338_v36 = vld [vmem:[%s14333_s0 + $0x30] sm:$0xe] }
 0x278   :  { %v11801_v21 = vpop.permute.xlu1 %2958 }
 0x279   :  { %14686 = vst [vmem:[#allocation240_spill] sm:$0xff] %v11801_v21  ;;  %v11808_v59 = vpop.permute.xlu0 %2956  ;;  %v3885_v21 = vshrl.u32 %v7786_v63, 16  ;;  %v3894_v32 = vshll.u32 %v7787_v25, 16  ;;  %v3899_v63 = vshrl.u32 %v7788_v19, 16  ;;  %v3892_v2 = vshrl.u32 %v7787_v25, 16 }
 0x27a   :  { %14687 = vst [vmem:[#allocation241_spill] sm:$0xff] %v11808_v59  ;;  %4692 = vrot.lane.b32.xlu1 %v4626_v3, %s9042_s18  ;;  %v11825_v59 = vld [vmem:[%s14333_s0 + $0x4c] sm:$0x1]  ;;  %v7724_v3 = vcombine.low %v7212_v9, %v7212_v9 }
 0x27b   :  { %4690 = vrot.lane.b32.xlu0 %v4625_v56, %s9042_s18  ;;  %v7213_v56 = vld [vmem:[%s14333_s0 + $0x48] sm:$0xf]  ;;  %v3890_v9 = vor.u32 %v3889_v31, %v3885_v21  ;;  %v3896_v41 = vrot.slane %v3894_v32, 1  ;;  %v7850_v31 = vcombine.low %v7338_v36, %v11780_v49  ;;  %v7340_v32 = vld [vmem:[%s14333_s0 + $0x40] sm:$0xe] }
 0x27c   :  { %v11820_v51 = vpop.permute.xlu1 %3218  ;;  %v7789_v57 = vcombine.low %v7213_v56, %v11825_v59  ;;  %v7725_v54 = vcombine.low %v7213_v56, %v7213_v56  ;;  %v7339_v56 = vld [vmem:[%s14333_s0 + $0x38] sm:$0xe] }
 0x27d   :  { %v11827_v16 = vpop.permute.xlu0 %3216  ;;  %v4628_v49 = vrot.slane %v7850_v31, 1  ;;  %v11887_v31 = vld [vmem:[%s14333_s0 + $0x74] sm:$0x1] }
 0x27e   :  { %3544 = vrot.lane.b32.xlu1 %v7722_v14, %s9040_s21  ;;  %v3903_v14 = vrot.slane %v3901_v26, 1  ;;  %v3906_v21 = vshrl.u32 %v7789_v57, 16 }
 0x27f   :  { %4694 = vrot.lane.b32.xlu0 %v4627_v44, %s9042_s18  ;;  %v3908_v44 = vshll.u32 %v7789_v57, 16  ;;  %v11868_v57 = vld [vmem:[%s14333_s0 + $0x64] sm:$0x1] }
 0x280   :  { %v11835_v6 = vpop.permute.xlu1 %3222 }
 0x281   :  { %v11837_v24 = vpop.permute.xlu0 %3220  ;;  %v3910_v19 = vrot.slane %v3908_v44, 1 }
 0x282   :  { %3548 = vrot.lane.b32.xlu1 %v7724_v3, %s9040_s21  ;;  %v3904_v3 = vor.u32 %v3903_v14, %v3899_v63  ;;  %v7341_v14 = vld [vmem:[%s14333_s0 + $0x48] sm:$0xe] }
 0x283   :  { %3546 = vrot.lane.b32.xlu0 %v7723_v22, %s9040_s21  ;;  %v3897_v22 = vor.u32 %v3896_v41, %v3892_v2  ;;  %v3911_v41 = vor.u32 %v3910_v19, %v3906_v21  ;;  %v7851_v2 = vcombine.low %v7339_v56, %v11806_v47  ;;  %v11894_v21 = vld [vmem:[%s14333_s0 + $0x6c] sm:$0x1] }
 0x284   :  { %v11844_v48 = vpop.permute.xlu1 %3226 }
 0x285   :  { %v11846_v46 = vpop.permute.xlu0 %3224  ;;  %v4629_v44 = vrot.slane %v7851_v2, 1 }
 0x286   :  { %4312 = vrot.lane.b32.xlu1 %v3890_v9, %s9041_s6  ;;  %v7852_v9 = vcombine.low %v7340_v32, %v11799_v12  ;;  %v7214_v12 = vld [vmem:[%s14333_s0 + $0x60] sm:$0xf]  ;;  %v7216_v32 = vld [vmem:[%s14333_s0 + $0x70] sm:$0xf] }
 0x287   :  { %3550 = vrot.lane.b32.xlu0 %v7725_v54, %s9040_s21  ;;  %v7790_v36 = vcombine.low %v7214_v12, %v11868_v57  ;;  %v7792_v56 = vcombine.low %v7216_v32, %v11887_v31 }
 0x288   :  { %v11854_v25 = vpop.permute.xlu1 %3230  ;;  %v4630_v47 = vrot.slane %v7852_v9, 1 }
 0x289   :  { %v11859_v26 = vpop.permute.xlu0 %3228  ;;  %v3915_v9 = vshll.u32 %v7790_v36, 16  ;;  %v3913_v35 = vshrl.u32 %v7790_v36, 16  ;;  %v3927_v36 = vshrl.u32 %v7792_v56, 16 }
 0x28a   :  { %4316 = vrot.lane.b32.xlu1 %v3904_v3, %s9041_s6  ;;  %v7853_v3 = vcombine.low %v7341_v14, %v11825_v59  ;;  %v7726_v59 = vcombine.low %v7214_v12, %v7214_v12 }
 0x28b   :  { %4314 = vrot.lane.b32.xlu0 %v3897_v22, %s9041_s6  ;;  %v3917_v40 = vrot.slane %v3915_v9, 1 }
 0x28c   :  { %v11870_v63 = vpop.permute.xlu1 %3234 }
 0x28d   :  { %v11875_v54 = vpop.permute.xlu0 %3232 }
 0x28e   :  { %4696 = vrot.lane.b32.xlu1 %v4628_v49, %s9042_s18  ;;  %v7215_v49 = vld [vmem:[%s14333_s0 + $0x68] sm:$0xf] }
 0x28f   :  { %4318 = vrot.lane.b32.xlu0 %v3911_v41, %s9041_s6  ;;  %v4631_v41 = vrot.slane %v7853_v3, 1  ;;  %v7791_v2 = vcombine.low %v7215_v49, %v11894_v21  ;;  %v3929_v3 = vshll.u32 %v7792_v56, 16  ;;  %v7727_v23 = vcombine.low %v7215_v49, %v7215_v49  ;;  %v7342_v49 = vld [vmem:[%s14333_s0 + $0x60] sm:$0xe] }
 0x290   :  { %v11889_v22 = vpop.permute.xlu1 %3238 }
 0x291   :  { %v11896_v19 = vpop.permute.xlu0 %3236  ;;  %v3922_v38 = vshll.u32 %v7791_v2, 16  ;;  %v3920_v4 = vshrl.u32 %v7791_v2, 16 }
 0x292   :  { %4700 = vrot.lane.b32.xlu1 %v4630_v47, %s9042_s18  ;;  %v7728_v47 = vcombine.low %v7216_v32, %v7216_v32  ;;  %v3918_v32 = vor.u32 %v3917_v40, %v3913_v35  ;;  %v7854_v40 = vcombine.low %v7342_v49, %v11868_v57 }
 0x293   :  { %4698 = vrot.lane.b32.xlu0 %v4629_v44, %s9042_s18  ;;  %v7217_v44 = vld [vmem:[%s14333_s0 + $0x78] sm:$0xf]  ;;  %v3924_v15 = vrot.slane %v3922_v38, 1  ;;  %v7344_v38 = vld [vmem:[%s14333_s0 + $0x70] sm:$0xe] }
 0x294   :  { %v11908_v14 = vpop.permute.xlu1 %3242  ;;  %v7793_v39 = vcombine.low %v7217_v44, %v11913_v42  ;;  %v7729_v9 = vcombine.low %v7217_v44, %v7217_v44  ;;  %v7343_v44 = vld [vmem:[%s14333_s0 + $0x68] sm:$0xe]  ;;  %v4632_v57 = vrot.slane %v7854_v40, 1  ;;  %v11975_v40 = vld [vmem:[%s14333_s0 + $0x94] sm:$0x1] }
 0x295   :  { %v11915_v12 = vpop.permute.xlu0 %3240 }
 0x296   :  { %3552 = vrot.lane.b32.xlu1 %v7726_v59, %s9040_s21  ;;  %v3931_v59 = vrot.slane %v3929_v3, 1  ;;  %v3934_v35 = vshrl.u32 %v7793_v39, 16 }
 0x297   :  { %4702 = vrot.lane.b32.xlu0 %v4631_v41, %s9042_s18  ;;  %v3936_v41 = vshll.u32 %v7793_v39, 16  ;;  %v11956_v39 = vld [vmem:[%s14333_s0 + $0x84] sm:$0x1] }
 0x298   :  { %v11923_v29 = vpop.permute.xlu1 %3246 }
 0x299   :  { %14688 = vst [vmem:[#allocation242_spill] sm:$0xff] %v11923_v29  ;;  %v11925_v30 = vpop.permute.xlu0 %3244  ;;  %v3938_v56 = vrot.slane %v3936_v41, 1  ;;  %v14727_v29 = vld [vmem:[#allocation68_spill] sm:$0xff] }
 0x29a   :  { %14689 = vst [vmem:[#allocation243_spill] sm:$0xff] %v11925_v30  ;;  %3556 = vrot.lane.b32.xlu1 %v7728_v47, %s9040_s21  ;;  %v3932_v47 = vor.u32 %v3931_v59, %v3927_v36  ;;  %v7345_v59 = vld [vmem:[%s14333_s0 + $0x78] sm:$0xe] }
 0x29b   :  { %3554 = vrot.lane.b32.xlu0 %v7727_v23, %s9040_s21  ;;  %v3925_v23 = vor.u32 %v3924_v15, %v3920_v4  ;;  %v3939_v15 = vor.u32 %v3938_v56, %v3934_v35  ;;  %v7855_v4 = vcombine.low %v7343_v44, %v11894_v21  ;;  %v11982_v35 = vld [vmem:[%s14333_s0 + $0x8c] sm:$0x1] }
 0x29c   :  { %v11932_v62 = vpop.permute.xlu1 %3250 }
 0x29d   :  { %14690 = vst [vmem:[#allocation244_spill] sm:$0xff] %v11932_v62  ;;  %v11934_v58 = vpop.permute.xlu0 %3248  ;;  %v4633_v41 = vrot.slane %v7855_v4, 1 }
 0x29e   :  { %14691 = vst [vmem:[#allocation245_spill] sm:$0xff] %v11934_v58  ;;  %4320 = vrot.lane.b32.xlu1 %v3918_v32, %s9041_s6  ;;  %v7856_v32 = vcombine.low %v7344_v38, %v11887_v31  ;;  %v7218_v31 = vld [vmem:[%s14333_s0 + $0x80] sm:$0xf]  ;;  %v7220_v38 = vld [vmem:[%s14333_s0 + $0x90] sm:$0xf] }
 0x29f   :  { %3558 = vrot.lane.b32.xlu0 %v7729_v9, %s9040_s21  ;;  %v7794_v49 = vcombine.low %v7218_v31, %v11956_v39  ;;  %v7796_v44 = vcombine.low %v7220_v38, %v11975_v40  ;;  %v14725_v58 = vld [vmem:[#allocation18_spill] sm:$0xff] }
 0x2a0   :  { %v11942_v2 = vpop.permute.xlu1 %3254  ;;  %v4634_v21 = vrot.slane %v7856_v32, 1 }
 0x2a1   :  { %14692 = vst [vmem:[#allocation246_spill] sm:$0xff] %v11942_v2  ;;  %v11947_v3 = vpop.permute.xlu0 %3252  ;;  %v3943_v32 = vshll.u32 %v7794_v49, 16 }
 0x2a2   :  { %14693 = vst [vmem:[#allocation247_spill] sm:$0xff] %v11947_v3  ;;  %4324 = vrot.lane.b32.xlu1 %v3932_v47, %s9041_s6  ;;  %v7857_v47 = vcombine.low %v7345_v59, %v11913_v42  ;;  %v7730_v42 = vcombine.low %v7218_v31, %v7218_v31 }
 0x2a3   :  { %4322 = vrot.lane.b32.xlu0 %v3925_v23, %s9041_s6 }
 0x2a4   :  { %v11958_v36 = vpop.permute.xlu1 %3258 }
 0x2a5   :  { %14694 = vst [vmem:[#allocation248_spill] sm:$0xff] %v11958_v36  ;;  %v11963_v9 = vpop.permute.xlu0 %3256 }
 0x2a6   :  { %14695 = vst [vmem:[#allocation249_spill] sm:$0xff] %v11963_v9  ;;  %4704 = vrot.lane.b32.xlu1 %v4632_v57, %s9042_s18  ;;  %v7219_v57 = vld [vmem:[%s14333_s0 + $0x88] sm:$0xf] }
 0x2a7   :  { %4326 = vrot.lane.b32.xlu0 %v3939_v15, %s9041_s6  ;;  %v4635_v15 = vrot.slane %v7857_v47, 1  ;;  %v7795_v4 = vcombine.low %v7219_v57, %v11982_v35  ;;  %v3957_v47 = vshll.u32 %v7796_v44, 16 }
 0x2a8   :  { %v11977_v23 = vpop.permute.xlu1 %3262 }
 0x2a9   :  { %14696 = vst [vmem:[#allocation250_spill] sm:$0xff] %v11977_v23  ;;  %v11984_v56 = vpop.permute.xlu0 %3260  ;;  %v3945_v23 = vrot.slane %v3943_v32, 1  ;;  %v3950_v5 = vshll.u32 %v7795_v4, 16 }
 0x2aa   :  { %14697 = vst [vmem:[#allocation251_spill] sm:$0xff] %v11984_v56  ;;  %4708 = vrot.lane.b32.xlu1 %v4634_v21, %s9042_s18  ;;  %v7732_v21 = vcombine.low %v7220_v38, %v7220_v38  ;;  %v3941_v56 = vshrl.u32 %v7794_v49, 16  ;;  %v3955_v49 = vshrl.u32 %v7796_v44, 16 }
 0x2ab   :  { %4706 = vrot.lane.b32.xlu0 %v4633_v41, %s9042_s18  ;;  %v7221_v41 = vld [vmem:[%s14333_s0 + $0x98] sm:$0xf]  ;;  %v3952_v61 = vrot.slane %v3950_v5, 1  ;;  %v7348_v5 = vld [vmem:[%s14333_s0 + $0x90] sm:$0xe] }
 0x2ac   :  { %v11996_v59 = vpop.permute.xlu1 %3266  ;;  %v7797_v8 = vcombine.low %v7221_v41, %v12001_v34  ;;  %v3946_v38 = vor.u32 %v3945_v23, %v3941_v56  ;;  %v7733_v32 = vcombine.low %v7221_v41, %v7221_v41  ;;  %v7347_v41 = vld [vmem:[%s14333_s0 + $0x88] sm:$0xe] }
 0x2ad   :  { %14698 = vst [vmem:[#allocation252_spill] sm:$0xff] %v11996_v59  ;;  %v12003_v31 = vpop.permute.xlu0 %3264  ;;  %v7731_v59 = vcombine.low %v7219_v57, %v7219_v57  ;;  %v7346_v57 = vld [vmem:[%s14333_s0 + $0x80] sm:$0xe] }
 0x2ae   :  { %14699 = vst [vmem:[#allocation253_spill] sm:$0xff] %v12003_v31  ;;  %3560 = vrot.lane.b32.xlu1 %v7730_v42, %s9040_s21  ;;  %v3959_v42 = vrot.slane %v3957_v47, 1  ;;  %v3948_v31 = vshrl.u32 %v7795_v4, 16  ;;  %v7858_v23 = vcombine.low %v7346_v57, %v11956_v39  ;;  %v3962_v44 = vshrl.u32 %v7797_v8, 16 }
 0x2af   :  { %4710 = vrot.lane.b32.xlu0 %v4635_v15, %s9042_s18  ;;  %v3964_v15 = vshll.u32 %v7797_v8, 16  ;;  %v7859_v8 = vcombine.low %v7347_v41, %v11982_v35 }
 0x2b0   :  { %v12011_v9 = vpop.permute.xlu1 %3270  ;;  %v3953_v56 = vor.u32 %v3952_v61, %v3948_v31  ;;  %v4636_v39 = vrot.slane %v7858_v23, 1  ;;  %v12044_v31 = vld [vmem:[%s14333_s0 + $0xb4] sm:$0x1]  ;;  %v12063_v23 = vld [vmem:[%s14333_s0 + $0xc4] sm:$0x1] }
 0x2b1   :  { %14700 = vst [vmem:[#allocation254_spill] sm:$0xff] %v12011_v9  ;;  %v12013_v36 = vpop.permute.xlu0 %3268  ;;  %v3966_v4 = vrot.slane %v3964_v15, 1  ;;  %v4637_v15 = vrot.slane %v7859_v8, 1 }
 0x2b2   :  { %14701 = vst [vmem:[#allocation255_spill] sm:$0xff] %v12013_v36  ;;  %3564 = vrot.lane.b32.xlu1 %v7732_v21, %s9040_s21  ;;  %v3960_v21 = vor.u32 %v3959_v42, %v3955_v49  ;;  %v7349_v42 = vld [vmem:[%s14333_s0 + $0x98] sm:$0xe] }
 0x2b3   :  { %3562 = vrot.lane.b32.xlu0 %v7731_v59, %s9040_s21  ;;  %v3967_v61 = vor.u32 %v3966_v4, %v3962_v44  ;;  %v12070_v44 = vld [vmem:[%s14333_s0 + $0xbc] sm:$0x1] }
 0x2b4   :  { %v12020_v60 = vpop.permute.xlu1 %3274 }
 0x2b5   :  { %14702 = vst [vmem:[#allocation256_spill] sm:$0xff] %v12020_v60  ;;  %v12022_v9 = vpop.permute.xlu0 %3272 }
 0x2b6   :  { %14703 = vst [vmem:[#allocation257_spill] sm:$0xff] %v12022_v9  ;;  %4328 = vrot.lane.b32.xlu1 %v3946_v38, %s9041_s6  ;;  %v7860_v38 = vcombine.low %v7348_v5, %v11975_v40  ;;  %v7222_v40 = vld [vmem:[%s14333_s0 + $0xb0] sm:$0xf]  ;;  %v7224_v5 = vld [vmem:[%s14333_s0 + $0xc0] sm:$0xf] }
 0x2b7   :  { %3566 = vrot.lane.b32.xlu0 %v7733_v32, %s9040_s21  ;;  %v7798_v57 = vcombine.low %v7222_v40, %v12044_v31  ;;  %v7800_v41 = vcombine.low %v7224_v5, %v12063_v23 }
 0x2b8   :  { %v12030_v59 = vpop.permute.xlu1 %3278  ;;  %v4638_v35 = vrot.slane %v7860_v38, 1 }
 0x2b9   :  { %14704 = vst [vmem:[#allocation258_spill] sm:$0xff] %v12030_v59  ;;  %v12035_v47 = vpop.permute.xlu0 %3276  ;;  %v3971_v38 = vshll.u32 %v7798_v57, 16 }
 0x2ba   :  { %14705 = vst [vmem:[#allocation259_spill] sm:$0xff] %v12035_v47  ;;  %4332 = vrot.lane.b32.xlu1 %v3960_v21, %s9041_s6  ;;  %v7861_v21 = vcombine.low %v7349_v42, %v12001_v34  ;;  %v7734_v34 = vcombine.low %v7222_v40, %v7222_v40 }
 0x2bb   :  { %4330 = vrot.lane.b32.xlu0 %v3953_v56, %s9041_s6 }
 0x2bc   :  { %v12046_v49 = vpop.permute.xlu1 %3282 }
 0x2bd   :  { %14706 = vst [vmem:[#allocation260_spill] sm:$0xff] %v12046_v49  ;;  %v12051_v32 = vpop.permute.xlu0 %3280 }
 0x2be   :  { %14707 = vst [vmem:[#allocation261_spill] sm:$0xff] %v12051_v32  ;;  %4712 = vrot.lane.b32.xlu1 %v4636_v39, %s9042_s18  ;;  %v7223_v39 = vld [vmem:[%s14333_s0 + $0xb8] sm:$0xf]  ;;  %v3973_v32 = vrot.slane %v3971_v38, 1 }
 0x2bf   :  { %4334 = vrot.lane.b32.xlu0 %v3967_v61, %s9041_s6  ;;  %v4639_v61 = vrot.slane %v7861_v21, 1  ;;  %v7799_v8 = vcombine.low %v7223_v39, %v12070_v44  ;;  %v3985_v21 = vshll.u32 %v7800_v41, 16 }
 0x2c0   :  { %v12065_v56 = vpop.permute.xlu1 %3286 }
 0x2c1   :  { %14708 = vst [vmem:[#allocation262_spill] sm:$0xff] %v12065_v56  ;;  %v12072_v4 = vpop.permute.xlu0 %3284  ;;  %v3969_v56 = vshrl.u32 %v7798_v57, 16  ;;  %v3978_v47 = vshll.u32 %v7799_v8, 16  ;;  %v3983_v57 = vshrl.u32 %v7800_v41, 16 }
 0x2c2   :  { %14709 = vst [vmem:[#allocation263_spill] sm:$0xff] %v12072_v4  ;;  %4716 = vrot.lane.b32.xlu1 %v4638_v35, %s9042_s18  ;;  %v12089_v4 = vld [vmem:[%s14333_s0 + $0xcc] sm:$0x1]  ;;  %v7736_v35 = vcombine.low %v7224_v5, %v7224_v5 }
 0x2c3   :  { %4714 = vrot.lane.b32.xlu0 %v4637_v15, %s9042_s18  ;;  %v7225_v15 = vld [vmem:[%s14333_s0 + $0xc8] sm:$0xf]  ;;  %v3974_v5 = vor.u32 %v3973_v32, %v3969_v56  ;;  %v3980_v60 = vrot.slane %v3978_v47, 1  ;;  %v7352_v47 = vld [vmem:[%s14333_s0 + $0xc0] sm:$0xe] }
 0x2c4   :  { %v12084_v42 = vpop.permute.xlu1 %3290  ;;  %v7801_v49 = vcombine.low %v7225_v15, %v12089_v4  ;;  %v7737_v38 = vcombine.low %v7225_v15, %v7225_v15  ;;  %v7351_v15 = vld [vmem:[%s14333_s0 + $0xb8] sm:$0xe] }
 0x2c5   :  { %14710 = vst [vmem:[#allocation264_spill] sm:$0xff] %v12084_v42  ;;  %v12091_v40 = vpop.permute.xlu0 %3288  ;;  %v7735_v42 = vcombine.low %v7223_v39, %v7223_v39  ;;  %v7350_v39 = vld [vmem:[%s14333_s0 + $0xb0] sm:$0xe] }
 0x2c6   :  { %14711 = vst [vmem:[#allocation265_spill] sm:$0xff] %v12091_v40  ;;  %3568 = vrot.lane.b32.xlu1 %v7734_v34, %s9040_s21  ;;  %v3987_v34 = vrot.slane %v3985_v21, 1  ;;  %v3976_v40 = vshrl.u32 %v7799_v8, 16  ;;  %v7862_v32 = vcombine.low %v7350_v39, %v12044_v31  ;;  %v3990_v41 = vshrl.u32 %v7801_v49, 16 }
 0x2c7   :  { %4718 = vrot.lane.b32.xlu0 %v4639_v61, %s9042_s18  ;;  %v3992_v61 = vshll.u32 %v7801_v49, 16  ;;  %v7863_v49 = vcombine.low %v7351_v15, %v12070_v44 }
 0x2c8   :  { %v12099_v59 = vpop.permute.xlu1 %3294  ;;  %v3981_v56 = vor.u32 %v3980_v60, %v3976_v40  ;;  %v4640_v31 = vrot.slane %v7862_v32, 1  ;;  %v12132_v40 = vld [vmem:[%s14333_s0 + $0xd4] sm:$0x1]  ;;  %v12151_v32 = vld [vmem:[%s14333_s0 + $0xe4] sm:$0x1] }
 0x2c9   :  { %14712 = vst [vmem:[#allocation266_spill] sm:$0xff] %v12099_v59  ;;  %v12101_v9 = vpop.permute.xlu0 %3292  ;;  %v3994_v8 = vrot.slane %v3992_v61, 1  ;;  %v4641_v61 = vrot.slane %v7863_v49, 1 }
 0x2ca   :  { %14713 = vst [vmem:[#allocation267_spill] sm:$0xff] %v12101_v9  ;;  %3572 = vrot.lane.b32.xlu1 %v7736_v35, %s9040_s21  ;;  %v3988_v35 = vor.u32 %v3987_v34, %v3983_v57  ;;  %v7353_v34 = vld [vmem:[%s14333_s0 + $0xc8] sm:$0xe] }
 0x2cb   :  { %3570 = vrot.lane.b32.xlu0 %v7735_v42, %s9040_s21  ;;  %v3995_v60 = vor.u32 %v3994_v8, %v3990_v41  ;;  %v12158_v41 = vld [vmem:[%s14333_s0 + $0xdc] sm:$0x1] }
 0x2cc   :  { %v12108_v36 = vpop.permute.xlu1 %3298 }
 0x2cd   :  { %14714 = vst [vmem:[#allocation268_spill] sm:$0xff] %v12108_v36  ;;  %v12110_v59 = vpop.permute.xlu0 %3296 }
 0x2ce   :  { %14715 = vst [vmem:[#allocation269_spill] sm:$0xff] %v12110_v59  ;;  %4336 = vrot.lane.b32.xlu1 %v3974_v5, %s9041_s6  ;;  %v7864_v5 = vcombine.low %v7352_v47, %v12063_v23  ;;  %v7226_v23 = vld [vmem:[%s14333_s0 + $0xd0] sm:$0xf]  ;;  %v7228_v47 = vld [vmem:[%s14333_s0 + $0xe0] sm:$0xf] }
 0x2cf   :  { %3574 = vrot.lane.b32.xlu0 %v7737_v38, %s9040_s21  ;;  %v7802_v39 = vcombine.low %v7226_v23, %v12132_v40  ;;  %v7804_v15 = vcombine.low %v7228_v47, %v12151_v32 }
 0x2d0   :  { %v12118_v42 = vpop.permute.xlu1 %3302  ;;  %v4642_v44 = vrot.slane %v7864_v5, 1 }
 0x2d1   :  { %14716 = vst [vmem:[#allocation270_spill] sm:$0xff] %v12118_v42  ;;  %v12123_v21 = vpop.permute.xlu0 %3300  ;;  %v3999_v5 = vshll.u32 %v7802_v39, 16 }
 0x2d2   :  { %14717 = vst [vmem:[#allocation271_spill] sm:$0xff] %v12123_v21  ;;  %4340 = vrot.lane.b32.xlu1 %v3988_v35, %s9041_s6  ;;  %v7865_v35 = vcombine.low %v7353_v34, %v12089_v4  ;;  %v7738_v4 = vcombine.low %v7226_v23, %v7226_v23 }
 0x2d3   :  { %4338 = vrot.lane.b32.xlu0 %v3981_v56, %s9041_s6 }
 0x2d4   :  { %v12134_v57 = vpop.permute.xlu1 %3306 }
 0x2d5   :  { %14718 = vst [vmem:[#allocation272_spill] sm:$0xff] %v12134_v57  ;;  %v12139_v38 = vpop.permute.xlu0 %3304  ;;  %v4001_v57 = vrot.slane %v3999_v5, 1 }
 0x2d6   :  { %14719 = vst [vmem:[#allocation273_spill] sm:$0xff] %v12139_v38  ;;  %4720 = vrot.lane.b32.xlu1 %v4640_v31, %s9042_s18  ;;  %v7227_v31 = vld [vmem:[%s14333_s0 + $0xd8] sm:$0xf]  ;;  %v3997_v38 = vshrl.u32 %v7802_v39, 16 }
 0x2d7   :  { %4342 = vrot.lane.b32.xlu0 %v3995_v60, %s9041_s6  ;;  %v4643_v60 = vrot.slane %v7865_v35, 1  ;;  %v7803_v49 = vcombine.low %v7227_v31, %v12158_v41  ;;  %v4013_v35 = vshll.u32 %v7804_v15, 16  ;;  %v7739_v21 = vcombine.low %v7227_v31, %v7227_v31  ;;  %v7354_v31 = vld [vmem:[%s14333_s0 + $0xd0] sm:$0xe] }
 0x2d8   :  { %v12153_v56 = vpop.permute.xlu1 %3536  ;;  %v4002_v39 = vor.u32 %v4001_v57, %v3997_v38  ;;  %v8955_v57 = vld [vmem:[%s14333_s0] sm:$0xf]  ;;  %v7866_v37 = vcombine.low %v7354_v31, %v12132_v40  ;;  %v14730_v40 = vld [vmem:[#allocation148_spill] sm:$0xff] }
 0x2d9   :  { %v12160_v8 = vpop.permute.xlu0 %3308  ;;  %v4006_v59 = vshll.u32 %v7803_v49, 16  ;;  %v4004_v3 = vshrl.u32 %v7803_v49, 16  ;;  %v14731_v31 = vld [vmem:[#allocation150_spill] sm:$0xff] }
 0x2da   :  { %14720 = vst [vmem:[#allocation274_spill] sm:$0xff] %v12160_v8  ;;  %4724 = vrot.lane.b32.xlu1 %v4642_v44, %s9042_s18  ;;  %v12177_v8 = vld [vmem:[%s14333_s0 + $0xec] sm:$0x1]  ;;  %v7740_v44 = vcombine.low %v7228_v47, %v7228_v47  ;;  %v4011_v47 = vshrl.u32 %v7804_v15, 16 }
 0x2db   :  { %4722 = vrot.lane.b32.xlu0 %v4641_v61, %s9042_s18  ;;  %v7229_v61 = vld [vmem:[%s14333_s0 + $0xe8] sm:$0xf] }
 0x2dc   :  { %v12172_v34 = vpop.permute.xlu1 %3540  ;;  %v7805_v42 = vcombine.low %v7229_v61, %v12177_v8  ;;  %v7741_v5 = vcombine.low %v7229_v61, %v7229_v61  ;;  %v14723_v15 = vld [vmem:[#allocation23_spill] sm:$0xff] }
 0x2dd   :  { %v12179_v23 = vpop.permute.xlu0 %3538 }
 0x2de   :  { %3576 = vrot.lane.b32.xlu1 %v7738_v4, %s9040_s21  ;;  %v4015_v4 = vrot.slane %v4013_v35, 1  ;;  %v4020_v2 = vshll.u32 %v7805_v42, 16 }
 0x2df   :  { %4726 = vrot.lane.b32.xlu0 %v4643_v60, %s9042_s18  ;;  %v4008_v60 = vrot.slane %v4006_v59, 1  ;;  %v8956_v59 = vld [vmem:[%s14333_s0 + $0x8] sm:$0xf] }
 0x2e0   :  { %v12187_v36 = vpop.permute.xlu1 %4304  ;;  %v4822_v49 = vsel %vm4816_vm1, %v8956_v59, %v14723_v15  ;;  %v4016_v15 = vor.u32 %v4015_v4, %v4011_v47 }
 0x2e1   :  { %v12189_v9 = vpop.permute.xlu0 %3542  ;;  %v5013_v62 = vsel %vm5009_vm2, %v4822_v49, %v14725_v58  ;;  %v4018_v49 = vshrl.u32 %v7805_v42, 16 }
 0x2e2   :  { %3580 = vrot.lane.b32.xlu1 %v7740_v44, %s9040_s21  ;;  %v4825_v44 = vsel %vm4816_vm1, %v8954_v0, %v14721_v55  ;;  %v8957_v0 = vld [vmem:[%s14333_s0 + $0x18] sm:$0xf]  ;;  %v14724_v55 = vld [vmem:[#allocation22_spill] sm:$0xff] }
 0x2e3   :  { %3578 = vrot.lane.b32.xlu0 %v7739_v21, %s9040_s21  ;;  %v14722_v21 = vld [vmem:[#allocation21_spill] sm:$0xff]  ;;  %v4828_v35 = vsel %vm4816_vm1, %v8957_v0, %v14724_v55  ;;  %v7356_v0 = vld [vmem:[%s14333_s0 + $0xe0] sm:$0xe] }
 0x2e4   :  { %v4819_v38 = vsel %vm4816_vm1, %v8955_v57, %v14722_v21  ;;  %v12211_v61 = vpop.permute.xlu1 %4308  ;;  %v14726_v57 = vld [vmem:[#allocation19_spill] sm:$0xff]  ;;  %v5017_v59 = vsel %vm5009_vm2, %v4828_v35, %v14727_v29  ;;  %v14728_v55 = vld [vmem:[#allocation69_spill] sm:$0xff] }
 0x2e5   :  { %v5011_v21 = vsel %vm5009_vm2, %v4819_v38, %v14726_v57  ;;  %v4307_v30 = vpop.permute.xlu0 %4306  ;;  %v5015_v58 = vsel %vm5009_vm2, %v4825_v44, %v14728_v55  ;;  %v4009_v38 = vor.u32 %v4008_v60, %v4004_v3  ;;  %v4022_v57 = vrot.slane %v4020_v2, 1  ;;  %v7355_v29 = vld [vmem:[%s14333_s0 + $0xd8] sm:$0xe]  ;;  %v14732_v55 = vld [vmem:[#allocation152_spill] sm:$0xff] }
 0x2e6   :  { %4344 = vrot.lane.b32.xlu1 %v4002_v39, %s9041_s6  ;;  %v14729_v39 = vld [vmem:[#allocation146_spill] sm:$0xff]  ;;  %v5140_v4 = vsel %vm5138_vm3, %v5011_v21, %v14730_v40  ;;  %v5146_v35 = vsel %vm5138_vm3, %v5017_v59, %v14731_v31  ;;  %v5144_v3 = vsel %vm5138_vm3, %v5015_v58, %v14732_v55  ;;  %v4644_v60 = vrot.slane %v7866_v37, 1  ;;  %v12290_v40 = vld [vmem:[%s14333_s0 + $0x114] sm:$0x1] }
 0x2e7   :  { %3582 = vrot.lane.b32.xlu0 %v7741_v5, %s9040_s21  ;;  %v5142_v47 = vsel %vm5138_vm3, %v5013_v62, %v14729_v39  ;;  %v7868_v5 = vcombine.low %v7356_v0, %v12151_v32  ;;  %v5269_v62 = vsel %vm5267_vm4, %v5140_v4, %v11326_v7  ;;  %v7867_v21 = vcombine.low %v7355_v29, %v12158_v41  ;;  %v12258_v7 = vld [vmem:[%s14333_s0 + $0x104] sm:$0x1] }
 0x2e8   :  { %v4689_v44 = vpop.permute.xlu1 %4688  ;;  %v5271_v2 = vsel %vm5267_vm4, %v5142_v47, %v11324_v52  ;;  %v5398_v58 = vsel %vm5396_vm5, %v5269_v62, %v11827_v16  ;;  %v4023_v52 = vor.u32 %v4022_v57, %v4018_v49  ;;  %v5275_v37 = vsel %vm5267_vm4, %v5146_v35, %v11333_v50 }
 0x2e9   :  { %v4311_v42 = vpop.permute.xlu0 %4310  ;;  %v5400_v59 = vsel %vm5396_vm5, %v5271_v2, %v11820_v51  ;;  %v5273_v32 = vsel %vm5267_vm4, %v5144_v3, %v11338_v43  ;;  %v5527_v51 = vsel %vm5525_vm6, %v5398_v58, %v12153_v56  ;;  %v4646_v49 = vrot.slane %v7868_v5, 1  ;;  %v7230_v43 = vld [vmem:[%s14333_s0 + $0x100] sm:$0xf] }
 0x2ea   :  { %4348 = vrot.lane.b32.xlu1 %v4016_v15, %s9041_s6  ;;  %v5529_v16 = vsel %vm5525_vm6, %v5400_v59, %v12179_v23  ;;  %v7357_v15 = vld [vmem:[%s14333_s0 + $0xe8] sm:$0xe]  ;;  %v5656_v0 = vsel %vm5654_vm7, %v5527_v51, %v12187_v36  ;;  %v4645_v57 = vrot.slane %v7867_v21, 1  ;;  %v7806_v29 = vcombine.low %v7230_v43, %v12258_v7  ;;  %v12324_v59 = vld [vmem:[%s14333_s0 + $0x11c] sm:$0x1] }
 0x2eb   :  { %4346 = vrot.lane.b32.xlu0 %v4009_v38, %s9041_s6  ;;  %v5658_v38 = vsel %vm5654_vm7, %v5529_v16, %v4307_v30  ;;  %v5785_v56 = vsel %vm5783_vm8, %v5656_v0, %v4689_v44  ;;  %v5404_v36 = vsel %vm5396_vm5, %v5275_v37, %v11835_v6  ;;  %v5402_v30 = vsel %vm5396_vm5, %v5273_v32, %v11837_v24  ;;  %v12301_v24 = vld [vmem:[%s14333_s0 + $0x10c] sm:$0x1]  ;;  %v7233_v51 = vld [vmem:[%s14333_s0 + $0x118] sm:$0xf] }
 0x2ec   :  { %v4693_v41 = vpop.permute.xlu1 %4692  ;;  %v7869_v47 = vcombine.low %v7357_v15, %v12177_v8  ;;  %v5531_v4 = vsel %vm5525_vm6, %v5402_v30, %v12172_v34  ;;  %v5533_v31 = vsel %vm5525_vm6, %v5404_v36, %v12189_v9  ;;  %v7742_v55 = vcombine.low %v7230_v43, %v7230_v43  ;;  %v7232_v9 = vld [vmem:[%s14333_s0 + $0x110] sm:$0xf]  ;;  %v7358_v36 = vld [vmem:[%s14333_s0 + $0x100] sm:$0xe] }
 0x2ed   :  { %v4691_v50 = vpop.permute.xlu0 %4690  ;;  %v5660_v8 = vsel %vm5654_vm7, %v5531_v4, %v12211_v61  ;;  %v5662_v35 = vsel %vm5654_vm7, %v5533_v31, %v4311_v42  ;;  %v7808_v2 = vcombine.low %v7232_v9, %v12290_v40  ;;  %v7231_v61 = vld [vmem:[%s14333_s0 + $0x108] sm:$0xf]  ;;  %v4027_v42 = vshll.u32 %v7806_v29, 16  ;;  %v14733_v31 = vld [vmem:[#allocation24_spill] sm:$0xff] }
 0x2ee   :  { %v5787_v23 = vsel %vm5783_vm8, %v5658_v38, %v4691_v50  ;;  %4728 = vrot.lane.b32.xlu1 %v4644_v60, %s9042_s18  ;;  %v5789_v34 = vsel %vm5783_vm8, %v5660_v8, %v4693_v41  ;;  %v4647_v62 = vrot.slane %v7869_v47, 1  ;;  %v7807_v60 = vcombine.low %v7231_v61, %v12301_v24  ;;  %v8958_v4 = vld [vmem:[%s14333_s0 + $0x28] sm:$0xf] }
 0x2ef   :  { %4350 = vrot.lane.b32.xlu0 %v4023_v52, %s9041_s6  ;;  %v7910_v39 = vcombine.low %v5785_v56, %v5787_v23  ;;  %v7744_v52 = vcombine.low %v7232_v9, %v7232_v9  ;;  %v4025_v37 = vshrl.u32 %v7806_v29, 16  ;;  %v4029_v32 = vrot.slane %v4027_v42, 1 }
 0x2f0   :  { %v12296_v6 = vpop.permute.xlu1 %3544  ;;  %v4041_v16 = vshll.u32 %v7808_v2, 16  ;;  %v7743_v41 = vcombine.low %v7231_v61, %v7231_v61  ;;  %v7809_v15 = vcombine.low %v7233_v51, %v12324_v59  ;;  %v4034_v0 = vshll.u32 %v7807_v60, 16 }
 0x2f1   :  { %8337 = vmatprep.mubr.msk.bf16.mxu0 %vm6092_vm9, %v7910_v39  ;;  %v4695_v44 = vpop.permute.xlu0 %4694  ;;  %v4039_v43 = vshrl.u32 %v7808_v2, 16  ;;  %v7745_v23 = vcombine.low %v7233_v51, %v7233_v51  ;;  %v4834_v8 = vsel %vm4816_vm1, %v8958_v4, %v14733_v31  ;;  %v14735_v2 = vld [vmem:[#allocation26_spill] sm:$0xff] }
 0x2f2   :  { %v5791_v3 = vsel %vm5783_vm8, %v5662_v35, %v4695_v44  ;;  %4732 = vrot.lane.b32.xlu1 %v4646_v49, %s9042_s18  ;;  %v4030_v49 = vor.u32 %v4029_v32, %v4025_v37  ;;  %v4043_v56 = vrot.slane %v4041_v16, 1  ;;  %v4036_v29 = vrot.slane %v4034_v0, 1  ;;  %v8959_v35 = vld [vmem:[%s14333_s0 + $0x20] sm:$0xf]  ;;  %v14734_v44 = vld [vmem:[#allocation25_spill] sm:$0xff]  ;;  %v14738_v16 = vld [vmem:[#allocation71_spill] sm:$0xff] }
 0x2f3   :  { %v7911_v5 = vcombine.low %v5789_v34, %v5791_v3  ;;  %4730 = vrot.lane.b32.xlu0 %v4645_v57, %s9042_s18  ;;  %v4032_v57 = vshrl.u32 %v7807_v60, 16  ;;  %v4048_v30 = vshll.u32 %v7809_v15, 16  ;;  %v7870_v34 = vcombine.low %v7358_v36, %v12258_v7  ;;  %v8960_v3 = vld [vmem:[%s14333_s0 + $0x38] sm:$0xf]  ;;  %v7360_v60 = vld [vmem:[%s14333_s0 + $0x110] sm:$0xe] }
 0x2f4   :  { %v12319_v21 = vpop.permute.xlu1 %3548  ;;  %v4044_v9 = vor.u32 %v4043_v56, %v4039_v43  ;;  %v4840_v61 = vsel %vm4816_vm1, %v8960_v3, %v14735_v2  ;;  %v8961_v7 = vld [vmem:[%s14333_s0 + $0x30] sm:$0xf]  ;;  %v14737_v32 = vld [vmem:[#allocation70_spill] sm:$0xff]  ;;  %v7359_v43 = vld [vmem:[%s14333_s0 + $0x108] sm:$0xe] }
 0x2f5   :  { %8338 = vmatmul.mubr.msk.bf16.vlgmr.msra.gmra.mrb[0].mxu0 %vm6092_vm9, %v7911_v5  ;;  %v12327_v58 = vpop.permute.xlu0 %3546  ;;  %v4037_v42 = vor.u32 %v4036_v29, %v4032_v57  ;;  %v4046_v5 = vshrl.u32 %v7809_v15, 16  ;;  %v5021_v51 = vsel %vm5009_vm2, %v4834_v8, %v14737_v32  ;;  %v14739_v0 = vld [vmem:[#allocation72_spill] sm:$0xff]  ;;  %v14740_v56 = vld [vmem:[#allocation73_spill] sm:$0xff]  ;;  %v14742_v36 = vld [vmem:[#allocation154_spill] sm:$0xff] }
 0x2f6   :  { %3584 = vrot.lane.b32.xlu1 %v7742_v55, %s9040_s21  ;;  %v4831_v55 = vsel %vm4816_vm1, %v8959_v35, %v14734_v44  ;;  %v5025_v15 = vsel %vm5009_vm2, %v4840_v61, %v14739_v0  ;;  %v14741_v57 = vld [vmem:[#allocation153_spill] sm:$0xff]  ;;  %v4648_v44 = vrot.slane %v7870_v34, 1  ;;  %v7871_v61 = vcombine.low %v7359_v43, %v12301_v24  ;;  %v12435_v32 = vld [vmem:[%s14333_s0 + $0x134] sm:$0x1] }
 0x2f7   :  { %4734 = vrot.lane.b32.xlu0 %v4647_v62, %s9042_s18  ;;  %v4050_v62 = vrot.slane %v4048_v30, 1  ;;  %v5150_v29 = vsel %vm5138_vm3, %v5021_v51, %v14741_v57  ;;  %v5154_v4 = vsel %vm5138_vm3, %v5025_v15, %v10833_v17  ;;  %v7361_v24 = vld [vmem:[%s14333_s0 + $0x118] sm:$0xe] }
 0x2f8   :  { %v4313_v38 = vpop.permute.xlu1 %4312  ;;  %v5279_v8 = vsel %vm5267_vm4, %v5150_v29, %v11351_v27  ;;  %v12402_v27 = vld [vmem:[%s14333_s0 + $0x124] sm:$0x1] }
 0x2f9   :  { %v12335_v50 = vpop.permute.xlu0 %3550  ;;  %v5408_v3 = vsel %vm5396_vm5, %v5279_v8, %v11844_v48  ;;  %v4051_v17 = vor.u32 %v4050_v62, %v4046_v5 }
 0x2fa   :  { %3588 = vrot.lane.b32.xlu1 %v7744_v52, %s9040_s21  ;;  %v14736_v52 = vld [vmem:[#allocation27_spill] sm:$0xff] }
 0x2fb   :  { %3586 = vrot.lane.b32.xlu0 %v7743_v41, %s9040_s21  ;;  %v4837_v37 = vsel %vm4816_vm1, %v8961_v7, %v14736_v52  ;;  %v5019_v41 = vsel %vm5009_vm2, %v4831_v55, %v14738_v16  ;;  %v7872_v55 = vcombine.low %v7360_v60, %v12290_v40  ;;  %v5283_v40 = vsel %vm5267_vm4, %v5154_v4, %v11369_v13  ;;  %v12469_v4 = vld [vmem:[%s14333_s0 + $0x13c] sm:$0x1] }
 0x2fc   :  { %v12342_v39 = vpop.permute.xlu1 %4316  ;;  %v5148_v30 = vsel %vm5138_vm3, %v5019_v41, %v14742_v36  ;;  %v5412_v5 = vsel %vm5396_vm5, %v5283_v40, %v11854_v25 }
 0x2fd   :  { %v4315_v47 = vpop.permute.xlu0 %4314  ;;  %v5277_v35 = vsel %vm5267_vm4, %v5148_v30, %v11356_v45  ;;  %v14743_v45 = vld [vmem:[#allocation155_spill] sm:$0xff]  ;;  %v4650_v52 = vrot.slane %v7872_v55, 1  ;;  %v5541_v16 = vsel %vm5525_vm6, %v5412_v5, %v12335_v50  ;;  %v7237_v55 = vld [vmem:[%s14333_s0 + $0x138] sm:$0xf]  ;;  %v7362_v5 = vld [vmem:[%s14333_s0 + $0x120] sm:$0xe] }
 0x2fe   :  { %4352 = vrot.lane.b32.xlu1 %v4030_v49, %s9041_s6  ;;  %v5406_v2 = vsel %vm5396_vm5, %v5277_v35, %v11846_v46  ;;  %v5537_v46 = vsel %vm5525_vm6, %v5408_v3, %v12327_v58 }
 0x2ff   :  { %3590 = vrot.lane.b32.xlu0 %v7745_v23, %s9040_s21  ;;  %v5023_v23 = vsel %vm5009_vm2, %v4837_v37, %v14740_v56  ;;  %v5535_v48 = vsel %vm5525_vm6, %v5406_v2, %v12296_v6  ;;  %v5666_v13 = vsel %vm5654_vm7, %v5537_v46, %v4315_v47  ;;  %v7234_v6 = vld [vmem:[%s14333_s0 + $0x120] sm:$0xf]  ;;  %v4649_v47 = vrot.slane %v7871_v61, 1 }
 0x300   :  { %v4697_v49 = vpop.permute.xlu1 %4696  ;;  %v5664_v62 = vsel %vm5654_vm7, %v5535_v48, %v4313_v38  ;;  %v7873_v37 = vcombine.low %v7361_v24, %v12324_v59 }
 0x301   :  { %v4319_v31 = vpop.permute.xlu0 %4318  ;;  %v5793_v58 = vsel %vm5783_vm8, %v5664_v62, %v4697_v49  ;;  %v7746_v49 = vcombine.low %v7234_v6, %v7234_v6 }
 0x302   :  { %4356 = vrot.lane.b32.xlu1 %v4044_v9, %s9041_s6  ;;  %v5152_v9 = vsel %vm5138_vm3, %v5023_v23, %v14743_v45  ;;  %v5670_v0 = vsel %vm5654_vm7, %v5541_v16, %v4319_v31  ;;  %v4651_v29 = vrot.slane %v7873_v37, 1  ;;  %v8964_v37 = vld [vmem:[%s14333_s0 + $0x68] sm:$0xf] }
 0x303   :  { %4354 = vrot.lane.b32.xlu0 %v4037_v42, %s9041_s6  ;;  %v5281_v42 = vsel %vm5267_vm4, %v5152_v9, %v11374_v10  ;;  %v7810_v10 = vcombine.low %v7234_v6, %v12402_v27  ;;  %v8962_v6 = vld [vmem:[%s14333_s0 + $0x58] sm:$0xf] }
 0x304   :  { %v4701_v34 = vpop.permute.xlu1 %4700  ;;  %v5410_v25 = vsel %vm5396_vm5, %v5281_v42, %v11859_v26  ;;  %v12446_v26 = vld [vmem:[%s14333_s0 + $0x12c] sm:$0x1] }
 0x305   :  { %v4699_v60 = vpop.permute.xlu0 %4698  ;;  %v5539_v51 = vsel %vm5525_vm6, %v5410_v25, %v12319_v21  ;;  %v7236_v21 = vld [vmem:[%s14333_s0 + $0x130] sm:$0xf]  ;;  %v4055_v23 = vshll.u32 %v7810_v10, 16  ;;  %v4053_v35 = vshrl.u32 %v7810_v10, 16  ;;  %v14745_v10 = vld [vmem:[#allocation29_spill] sm:$0xff] }
 0x306   :  { %v5795_v7 = vsel %vm5783_vm8, %v5666_v13, %v4699_v60  ;;  %4736 = vrot.lane.b32.xlu1 %v4648_v44, %s9042_s18  ;;  %v5668_v59 = vsel %vm5654_vm7, %v5539_v51, %v12342_v39  ;;  %v7812_v56 = vcombine.low %v7236_v21, %v12435_v32  ;;  %v7235_v39 = vld [vmem:[%s14333_s0 + $0x128] sm:$0xf]  ;;  %v7748_v8 = vcombine.low %v7236_v21, %v7236_v21  ;;  %v14746_v51 = vld [vmem:[#allocation30_spill] sm:$0xff] }
 0x307   :  { %v7912_v38 = vcombine.low %v5793_v58, %v5795_v7  ;;  %4358 = vrot.lane.b32.xlu0 %v4051_v17, %s9041_s6  ;;  %v5797_v50 = vsel %vm5783_vm8, %v5668_v59, %v4701_v34  ;;  %v7811_v36 = vcombine.low %v7235_v39, %v12446_v26  ;;  %v4057_v44 = vrot.slane %v4055_v23, 1  ;;  %v14744_v58 = vld [vmem:[#allocation28_spill] sm:$0xff]  ;;  %v14747_v21 = vld [vmem:[#allocation31_spill] sm:$0xff] }
 0x308   :  { %v12441_v41 = vpop.permute.xlu1 %3552  ;;  %v4069_v3 = vshll.u32 %v7812_v56, 16  ;;  %v7747_v2 = vcombine.low %v7235_v39, %v7235_v39  ;;  %v7813_v17 = vcombine.low %v7237_v55, %v12469_v4  ;;  %v4067_v48 = vshrl.u32 %v7812_v56, 16  ;;  %v14749_v39 = vld [vmem:[#allocation75_spill] sm:$0xff] }
 0x309   :  { %8341 = vmatprep.mubr.msk.bf16.mxu0 %vm6092_vm9, %v7912_v38  ;;  %v4703_v15 = vpop.permute.xlu0 %4702  ;;  %v4062_v61 = vshll.u32 %v7811_v36, 16  ;;  %v4058_v40 = vor.u32 %v4057_v44, %v4053_v35  ;;  %v7749_v34 = vcombine.low %v7237_v55, %v7237_v55  ;;  %v4060_v24 = vshrl.u32 %v7811_v36, 16  ;;  %v14751_v35 = vld [vmem:[#allocation77_spill] sm:$0xff]  ;;  %v14752_v55 = vld [vmem:[#allocation156_spill] sm:$0xff] }
 0x30a   :  { %v5799_v43 = vsel %vm5783_vm8, %v5670_v0, %v4703_v15  ;;  %4740 = vrot.lane.b32.xlu1 %v4650_v52, %s9042_s18  ;;  %v4071_v46 = vrot.slane %v4069_v3, 1  ;;  %v4076_v62 = vshll.u32 %v7813_v17, 16  ;;  %v4846_v7 = vsel %vm4816_vm1, %v8962_v6, %v14744_v58  ;;  %v8963_v52 = vld [vmem:[%s14333_s0 + $0x50] sm:$0xf] }
 0x30b   :  { %v7913_v57 = vcombine.low %v5797_v50, %v5799_v43  ;;  %4738 = vrot.lane.b32.xlu0 %v4649_v47, %s9042_s18  ;;  %v4064_v42 = vrot.slane %v4062_v61, 1  ;;  %v4843_v25 = vsel %vm4816_vm1, %v8963_v52, %v14745_v10  ;;  %v7874_v47 = vcombine.low %v7362_v5, %v12402_v27  ;;  %v8965_v27 = vld [vmem:[%s14333_s0 + $0x60] sm:$0xf] }
 0x30c   :  { %v12464_v30 = vpop.permute.xlu1 %3556  ;;  %v4072_v38 = vor.u32 %v4071_v46, %v4067_v48  ;;  %v4852_v16 = vsel %vm4816_vm1, %v8964_v37, %v14746_v51  ;;  %v4074_v0 = vshrl.u32 %v7813_v17, 16  ;;  %v4078_v15 = vrot.slane %v4076_v62, 1  ;;  %v14748_v43 = vld [vmem:[#allocation74_spill] sm:$0xff] }
 0x30d   :  { %8342 = vmatmul.mubr.msk.bf16.gmra.mrb[4].mxu0 %vm6092_vm9, %v7913_v57  ;;  %v12472_v31 = vpop.permute.xlu0 %3554  ;;  %v4065_v59 = vor.u32 %v4064_v42, %v4060_v24  ;;  %v4849_v50 = vsel %vm4816_vm1, %v8965_v27, %v14747_v21  ;;  %v5029_v56 = vsel %vm5009_vm2, %v4846_v7, %v14748_v43  ;;  %v5027_v23 = vsel %vm5009_vm2, %v4843_v25, %v14749_v39  ;;  %v14750_v57 = vld [vmem:[#allocation76_spill] sm:$0xff]  ;;  %v14754_v61 = vld [vmem:[#allocation158_spill] sm:$0xff] }
 0x30e   :  { %3592 = vrot.lane.b32.xlu1 %v7746_v49, %s9040_s21  ;;  %v7364_v49 = vld [vmem:[%s14333_s0 + $0x130] sm:$0xe]  ;;  %v5031_v44 = vsel %vm5009_vm2, %v4849_v50, %v14751_v35  ;;  %v5158_v3 = vsel %vm5138_vm3, %v5029_v56, %v14752_v55  ;;  %v4652_v24 = vrot.slane %v7874_v47, 1  ;;  %v4079_v6 = vor.u32 %v4078_v15, %v4074_v0 }
 0x30f   :  { %4742 = vrot.lane.b32.xlu0 %v4651_v29, %s9042_s18  ;;  %v5033_v29 = vsel %vm5009_vm2, %v4852_v16, %v14750_v57  ;;  %v5287_v46 = vsel %vm5267_vm4, %v5158_v3, %v11387_v11  ;;  %v7876_v42 = vcombine.low %v7364_v49, %v12435_v32  ;;  %v12547_v11 = vld [vmem:[%s14333_s0 + $0x154] sm:$0x1] }
 0x310   :  { %v4321_v45 = vpop.permute.xlu1 %4320  ;;  %v5416_v5 = vsel %vm5396_vm5, %v5287_v46, %v11870_v63 }
 0x311   :  { %v12480_v9 = vpop.permute.xlu0 %3558  ;;  %v4654_v51 = vrot.slane %v7876_v42, 1 }
 0x312   :  { %3596 = vrot.lane.b32.xlu1 %v7748_v8, %s9040_s21  ;;  %v7363_v8 = vld [vmem:[%s14333_s0 + $0x128] sm:$0xe] }
 0x313   :  { %3594 = vrot.lane.b32.xlu0 %v7747_v2, %s9040_s21  ;;  %v14753_v2 = vld [vmem:[#allocation157_spill] sm:$0xff]  ;;  %v7875_v58 = vcombine.low %v7363_v8, %v12446_v26  ;;  %v12614_v8 = vld [vmem:[%s14333_s0 + $0x16c] sm:$0x1] }
 0x314   :  { %v12487_v13 = vpop.permute.xlu1 %4324  ;;  %v5156_v17 = vsel %vm5138_vm3, %v5027_v23, %v14753_v2  ;;  %v7365_v26 = vld [vmem:[%s14333_s0 + $0x138] sm:$0xe]  ;;  %v7241_v2 = vld [vmem:[%s14333_s0 + $0x168] sm:$0xf] }
 0x315   :  { %v4323_v60 = vpop.permute.xlu0 %4322  ;;  %v7877_v16 = vcombine.low %v7365_v26, %v12469_v4 }
 0x316   :  { %4360 = vrot.lane.b32.xlu1 %v4058_v40, %s9041_s6  ;;  %v5162_v40 = vsel %vm5138_vm3, %v5033_v29, %v14754_v61 }
 0x317   :  { %3598 = vrot.lane.b32.xlu0 %v7749_v34, %s9040_s21  ;;  %v5285_v34 = vsel %vm5267_vm4, %v5156_v17, %v11392_v28  ;;  %v14755_v28 = vld [vmem:[#allocation159_spill] sm:$0xff]  ;;  %v5291_v32 = vsel %vm5267_vm4, %v5162_v40, %v11405_v33  ;;  %v4655_v57 = vrot.slane %v7877_v16, 1  ;;  %v7817_v40 = vcombine.low %v7241_v2, %v12614_v8 }
 0x318   :  { %v4705_v36 = vpop.permute.xlu1 %4704  ;;  %v5414_v62 = vsel %vm5396_vm5, %v5285_v34, %v11875_v54  ;;  %v5160_v7 = vsel %vm5138_vm3, %v5031_v44, %v14755_v28  ;;  %v5545_v54 = vsel %vm5525_vm6, %v5416_v5, %v12472_v31  ;;  %v5420_v25 = vsel %vm5396_vm5, %v5291_v32, %v11889_v22  ;;  %v7366_v28 = vld [vmem:[%s14333_s0 + $0x150] sm:$0xe] }
 0x319   :  { %v4327_v48 = vpop.permute.xlu0 %4326  ;;  %v5543_v63 = vsel %vm5525_vm6, %v5414_v62, %v12441_v41  ;;  %v5289_v10 = vsel %vm5267_vm4, %v5160_v7, %v11410_v1  ;;  %v5674_v33 = vsel %vm5654_vm7, %v5545_v54, %v4323_v60  ;;  %v7238_v41 = vld [vmem:[%s14333_s0 + $0x150] sm:$0xf]  ;;  %v4653_v60 = vrot.slane %v7875_v58, 1  ;;  %v8966_v54 = vld [vmem:[%s14333_s0 + $0x78] sm:$0xf] }
 0x31a   :  { %4364 = vrot.lane.b32.xlu1 %v4072_v38, %s9041_s6  ;;  %v5672_v38 = vsel %vm5654_vm7, %v5543_v63, %v4321_v45  ;;  %v7814_v1 = vcombine.low %v7238_v41, %v12547_v11  ;;  %v5418_v22 = vsel %vm5396_vm5, %v5289_v10, %v11896_v19  ;;  %v5549_v15 = vsel %vm5525_vm6, %v5420_v25, %v12480_v9  ;;  %v12591_v19 = vld [vmem:[%s14333_s0 + $0x15c] sm:$0x1]  ;;  %v8967_v10 = vld [vmem:[%s14333_s0 + $0x70] sm:$0xf] }
 0x31b   :  { %4362 = vrot.lane.b32.xlu0 %v4065_v59, %s9041_s6  ;;  %v5801_v31 = vsel %vm5783_vm8, %v5672_v38, %v4705_v36  ;;  %v12580_v59 = vld [vmem:[%s14333_s0 + $0x164] sm:$0x1]  ;;  %v5547_v0 = vsel %vm5525_vm6, %v5418_v22, %v12464_v30  ;;  %v5678_v27 = vsel %vm5654_vm7, %v5549_v15, %v4327_v48  ;;  %v7750_v50 = vcombine.low %v7238_v41, %v7238_v41  ;;  %v7240_v30 = vld [vmem:[%s14333_s0 + $0x160] sm:$0xf]  ;;  %v14757_v25 = vld [vmem:[#allocation33_spill] sm:$0xff] }
 0x31c   :  { %v4709_v52 = vpop.permute.xlu1 %4708  ;;  %v5676_v4 = vsel %vm5654_vm7, %v5547_v0, %v12487_v13  ;;  %v7816_v56 = vcombine.low %v7240_v30, %v12580_v59  ;;  %v7239_v13 = vld [vmem:[%s14333_s0 + $0x158] sm:$0xf]  ;;  %v4083_v39 = vshll.u32 %v7814_v1, 16  ;;  %v7752_v44 = vcombine.low %v7240_v30, %v7240_v30  ;;  %v8968_v41 = vld [vmem:[%s14333_s0 + $0x88] sm:$0xf]  ;;  %v14760_v0 = vld [vmem:[#allocation78_spill] sm:$0xff] }
 0x31d   :  { %v4707_v47 = vpop.permute.xlu0 %4706  ;;  %v5805_v9 = vsel %vm5783_vm8, %v5676_v4, %v4709_v52  ;;  %v7815_v29 = vcombine.low %v7239_v13, %v12591_v19  ;;  %v4081_v55 = vshrl.u32 %v7814_v1, 16  ;;  %v7751_v61 = vcombine.low %v7239_v13, %v7239_v13  ;;  %v14756_v52 = vld [vmem:[#allocation32_spill] sm:$0xff]  ;;  %v14761_v4 = vld [vmem:[#allocation79_spill] sm:$0xff] }
 0x31e   :  { %v5803_v37 = vsel %vm5783_vm8, %v5674_v33, %v4707_v47  ;;  %4744 = vrot.lane.b32.xlu1 %v4652_v24, %s9042_s18  ;;  %v4085_v3 = vrot.slane %v4083_v39, 1  ;;  %v4097_v17 = vshll.u32 %v7816_v56, 16  ;;  %v4095_v42 = vshrl.u32 %v7816_v56, 16  ;;  %v14764_v13 = vld [vmem:[#allocation160_spill] sm:$0xff] }
 0x31f   :  { %v7914_v45 = vcombine.low %v5801_v31, %v5803_v37  ;;  %4366 = vrot.lane.b32.xlu0 %v4079_v6, %s9041_s6  ;;  %v4090_v48 = vshll.u32 %v7815_v29, 16  ;;  %v7753_v62 = vcombine.low %v7241_v2, %v7241_v2  ;;  %v4088_v6 = vshrl.u32 %v7815_v29, 16  ;;  %v14758_v31 = vld [vmem:[#allocation34_spill] sm:$0xff] }
 0x320   :  { %v12586_v49 = vpop.permute.xlu1 %3560  ;;  %v4086_v24 = vor.u32 %v4085_v3, %v4081_v55  ;;  %v4099_v5 = vrot.slane %v4097_v17, 1  ;;  %v4104_v7 = vshll.u32 %v7817_v40, 16  ;;  %v4858_v26 = vsel %vm4816_vm1, %v8966_v54, %v14756_v52  ;;  %v14766_v29 = vld [vmem:[#allocation162_spill] sm:$0xff] }
 0x321   :  { %8345 = vmatprep.mubr.msk.bf16.mxu0 %vm6092_vm9, %v7914_v45  ;;  %v4711_v21 = vpop.permute.xlu0 %4710  ;;  %v4092_v58 = vrot.slane %v4090_v48, 1  ;;  %v4855_v38 = vsel %vm4816_vm1, %v8967_v10, %v14757_v25  ;;  %v7878_v47 = vcombine.low %v7366_v28, %v12547_v11  ;;  %v4864_v37 = vsel %vm4816_vm1, %v8968_v41, %v14758_v31  ;;  %v7368_v45 = vld [vmem:[%s14333_s0 + $0x160] sm:$0xe]  ;;  %v12725_v41 = vld [vmem:[%s14333_s0 + $0x184] sm:$0x1] }
 0x322   :  { %v5807_v43 = vsel %vm5783_vm8, %v5678_v27, %v4711_v21  ;;  %4748 = vrot.lane.b32.xlu1 %v4654_v51, %s9042_s18  ;;  %v4100_v33 = vor.u32 %v4099_v5, %v4095_v42  ;;  %v4102_v1 = vshrl.u32 %v7817_v40, 16  ;;  %v4106_v22 = vrot.slane %v4104_v7, 1  ;;  %v8969_v11 = vld [vmem:[%s14333_s0 + $0x80] sm:$0xf]  ;;  %v14762_v21 = vld [vmem:[#allocation80_spill] sm:$0xff] }
 0x323   :  { %v7915_v23 = vcombine.low %v5805_v9, %v5807_v43  ;;  %4746 = vrot.lane.b32.xlu0 %v4653_v60, %s9042_s18  ;;  %v4093_v51 = vor.u32 %v4092_v58, %v4088_v6  ;;  %v14759_v60 = vld [vmem:[#allocation35_spill] sm:$0xff]  ;;  %v5037_v15 = vsel %vm5009_vm2, %v4858_v26, %v14760_v0  ;;  %v5035_v27 = vsel %vm5009_vm2, %v4855_v38, %v14761_v4  ;;  %v7367_v9 = vld [vmem:[%s14333_s0 + $0x158] sm:$0xe]  ;;  %v14769_v28 = vld [vmem:[#allocation242_spill] sm:$0xff] }
 0x324   :  { %v12609_v36 = vpop.permute.xlu1 %3564  ;;  %v4861_v16 = vsel %vm4816_vm1, %v8969_v11, %v14759_v60  ;;  %v14763_v43 = vld [vmem:[#allocation81_spill] sm:$0xff]  ;;  %v5166_v39 = vsel %vm5138_vm3, %v5037_v15, %v14764_v13  ;;  %v4656_v17 = vrot.slane %v7878_v47, 1  ;;  %v7879_v42 = vcombine.low %v7367_v9, %v12591_v19  ;;  %v7369_v19 = vld [vmem:[%s14333_s0 + $0x168] sm:$0xe] }
 0x325   :  { %8346 = vmatmul.mubr.msk.bf16.gmra.mrb[8].mxu0 %vm6092_vm9, %v7915_v23  ;;  %v12617_v35 = vpop.permute.xlu0 %3562  ;;  %v5039_v56 = vsel %vm5009_vm2, %v4861_v16, %v14763_v43  ;;  %v14765_v23 = vld [vmem:[#allocation161_spill] sm:$0xff]  ;;  %v5295_v3 = vsel %vm5267_vm4, %v5166_v39, %v11423_v20  ;;  %v12692_v20 = vld [vmem:[%s14333_s0 + $0x174] sm:$0x1]  ;;  %v14770_v38 = vld [vmem:[#allocation243_spill] sm:$0xff]  ;;  %v7881_v47 = vcombine.low %v7369_v19, %v12614_v8 }
 0x326   :  { %3600 = vrot.lane.b32.xlu1 %v7750_v50, %s9040_s21  ;;  %v5041_v50 = vsel %vm5009_vm2, %v4864_v37, %v14762_v21  ;;  %v5424_v40 = vsel %vm5396_vm5, %v5295_v3, %v11908_v14  ;;  %v14768_v6 = vld [vmem:[#allocation193_spill] sm:$0xff]  ;;  %v7245_v13 = vld [vmem:[%s14333_s0 + $0x188] sm:$0xf] }
 0x327   :  { %4750 = vrot.lane.b32.xlu0 %v4655_v57, %s9042_s18  ;;  %v5164_v57 = vsel %vm5138_vm3, %v5035_v27, %v14765_v23  ;;  %v4659_v4 = vrot.slane %v7881_v47, 1  ;;  %v14772_v19 = vld [vmem:[#allocation37_spill] sm:$0xff]  ;;  %v14777_v47 = vld [vmem:[#allocation84_spill] sm:$0xff] }
 0x328   :  { %v4329_v46 = vpop.permute.xlu1 %4328  ;;  %v5293_v2 = vsel %vm5267_vm4, %v5164_v57, %v11428_v18  ;;  %v14767_v18 = vld [vmem:[#allocation163_spill] sm:$0xff] }
 0x329   :  { %v12625_v34 = vpop.permute.xlu0 %3566  ;;  %v5422_v48 = vsel %vm5396_vm5, %v5293_v2, %v11915_v12  ;;  %v5168_v5 = vsel %vm5138_vm3, %v5039_v56, %v14767_v18  ;;  %v5553_v12 = vsel %vm5525_vm6, %v5424_v40, %v12617_v35 }
 0x32a   :  { %3604 = vrot.lane.b32.xlu1 %v7752_v44, %s9040_s21  ;;  %v5170_v44 = vsel %vm5138_vm3, %v5041_v50, %v14766_v29  ;;  %v5551_v14 = vsel %vm5525_vm6, %v5422_v48, %v12586_v49  ;;  %v5297_v58 = vsel %vm5267_vm4, %v5168_v5, %v14768_v6  ;;  %v7242_v49 = vld [vmem:[%s14333_s0 + $0x170] sm:$0xf]  ;;  %v12759_v50 = vld [vmem:[%s14333_s0 + $0x18c] sm:$0x1] }
 0x32b   :  { %3602 = vrot.lane.b32.xlu0 %v7751_v61, %s9040_s21  ;;  %v7880_v61 = vcombine.low %v7368_v45, %v12580_v59  ;;  %v5299_v59 = vsel %vm5267_vm4, %v5170_v44, %v11441_v53  ;;  %v5680_v54 = vsel %vm5654_vm7, %v5551_v14, %v4329_v46  ;;  %v7818_v25 = vcombine.low %v7242_v49, %v12692_v20  ;;  %v14771_v14 = vld [vmem:[#allocation36_spill] sm:$0xff] }
 0x32c   :  { %v12632_v32 = vpop.permute.xlu1 %4332  ;;  %v5428_v7 = vsel %vm5396_vm5, %v5299_v59, %v14769_v28  ;;  %v7754_v11 = vcombine.low %v7242_v49, %v7242_v49  ;;  %v7821_v57 = vcombine.low %v7245_v13, %v12759_v50  ;;  %v8970_v59 = vld [vmem:[%s14333_s0 + $0xa8] sm:$0xf] }
 0x32d   :  { %v4331_v63 = vpop.permute.xlu0 %4330  ;;  %v4658_v10 = vrot.slane %v7880_v61, 1  ;;  %v5557_v37 = vsel %vm5525_vm6, %v5428_v7, %v12625_v34  ;;  %v4111_v0 = vshll.u32 %v7818_v25, 16  ;;  %v4109_v43 = vshrl.u32 %v7818_v25, 16  ;;  %v8972_v7 = vld [vmem:[%s14333_s0 + $0xb8] sm:$0xf] }
 0x32e   :  { %4368 = vrot.lane.b32.xlu1 %v4086_v24, %s9041_s6  ;;  %v4107_v24 = vor.u32 %v4106_v22, %v4102_v1  ;;  %v5682_v53 = vsel %vm5654_vm7, %v5553_v12, %v4331_v63  ;;  %v4657_v63 = vrot.slane %v7879_v42, 1  ;;  %v12736_v1 = vld [vmem:[%s14333_s0 + $0x17c] sm:$0x1]  ;;  %v7757_v61 = vcombine.low %v7245_v13, %v7245_v13  ;;  %v14784_v13 = vld [vmem:[#allocation244_spill] sm:$0xff] }
 0x32f   :  { %3606 = vrot.lane.b32.xlu0 %v7753_v62, %s9040_s21  ;;  %v4113_v56 = vrot.slane %v4111_v0, 1  ;;  %v4132_v42 = vshll.u32 %v7821_v57, 16  ;;  %v4870_v12 = vsel %vm4816_vm1, %v8970_v59, %v14771_v14  ;;  %v4130_v49 = vshrl.u32 %v7821_v57, 16  ;;  %v14788_v59 = vld [vmem:[#allocation197_spill] sm:$0xff] }
 0x330   :  { %v4713_v30 = vpop.permute.xlu1 %4712 }
 0x331   :  { %v4335_v55 = vpop.permute.xlu0 %4334  ;;  %v5809_v35 = vsel %vm5783_vm8, %v5680_v54, %v4713_v30  ;;  %v4114_v3 = vor.u32 %v4113_v56, %v4109_v43  ;;  %v14773_v54 = vld [vmem:[#allocation38_spill] sm:$0xff] }
 0x332   :  { %4372 = vrot.lane.b32.xlu1 %v4100_v33, %s9041_s6  ;;  %v5426_v33 = vsel %vm5396_vm5, %v5297_v58, %v14770_v38  ;;  %v5686_v22 = vsel %vm5654_vm7, %v5557_v37, %v4335_v55  ;;  %v14775_v38 = vld [vmem:[#allocation82_spill] sm:$0xff] }
 0x333   :  { %4370 = vrot.lane.b32.xlu0 %v4093_v51, %s9041_s6  ;;  %v5555_v31 = vsel %vm5525_vm6, %v5426_v33, %v12609_v36  ;;  %v7244_v36 = vld [vmem:[%s14333_s0 + $0x180] sm:$0xf]  ;;  %v5045_v33 = vsel %vm5009_vm2, %v4870_v12, %v14775_v38 }
 0x334   :  { %v4717_v62 = vpop.permute.xlu1 %4716  ;;  %v5684_v8 = vsel %vm5654_vm7, %v5555_v31, %v12632_v32  ;;  %v7820_v16 = vcombine.low %v7244_v36, %v12725_v41  ;;  %v7243_v32 = vld [vmem:[%s14333_s0 + $0x178] sm:$0xf]  ;;  %v7756_v9 = vcombine.low %v7244_v36, %v7244_v36  ;;  %v14789_v12 = vld [vmem:[#allocation246_spill] sm:$0xff] }
 0x335   :  { %v4715_v52 = vpop.permute.xlu0 %4714  ;;  %v5813_v34 = vsel %vm5783_vm8, %v5684_v8, %v4717_v62  ;;  %v7819_v27 = vcombine.low %v7243_v32, %v12736_v1  ;;  %v7755_v23 = vcombine.low %v7243_v32, %v7243_v32  ;;  %v8971_v62 = vld [vmem:[%s14333_s0 + $0xa0] sm:$0xf]  ;;  %v7371_v8 = vld [vmem:[%s14333_s0 + $0x178] sm:$0xe] }
 0x336   :  { %v5811_v26 = vsel %vm5783_vm8, %v5682_v53, %v4715_v52  ;;  %4752 = vrot.lane.b32.xlu1 %v4656_v17, %s9042_s18  ;;  %v4125_v39 = vshll.u32 %v7820_v16, 16  ;;  %v4123_v2 = vshrl.u32 %v7820_v16, 16  ;;  %v4867_v6 = vsel %vm4816_vm1, %v8971_v62, %v14772_v19  ;;  %v14781_v16 = vld [vmem:[#allocation166_spill] sm:$0xff] }
 0x337   :  { %v7916_v46 = vcombine.low %v5809_v35, %v5811_v26  ;;  %4374 = vrot.lane.b32.xlu0 %v4107_v24, %s9041_s6  ;;  %v4118_v29 = vshll.u32 %v7819_v27, 16  ;;  %v4116_v40 = vshrl.u32 %v7819_v27, 16  ;;  %v7370_v24 = vld [vmem:[%s14333_s0 + $0x170] sm:$0xe]  ;;  %v4876_v53 = vsel %vm4816_vm1, %v8972_v7, %v14773_v54  ;;  %v7372_v26 = vld [vmem:[%s14333_s0 + $0x180] sm:$0xe] }
 0x338   :  { %v12731_v51 = vpop.permute.xlu1 %3568  ;;  %v4127_v17 = vrot.slane %v4125_v39, 1  ;;  %v7882_v28 = vcombine.low %v7370_v24, %v12692_v20  ;;  %v4134_v35 = vrot.slane %v4132_v42, 1  ;;  %v8973_v20 = vld [vmem:[%s14333_s0 + $0xb0] sm:$0xf]  ;;  %v5049_v31 = vsel %vm5009_vm2, %v4876_v53, %v14777_v47  ;;  %v14783_v27 = vld [vmem:[#allocation195_spill] sm:$0xff] }
 0x339   :  { %8349 = vmatprep.mubr.msk.bf16.mxu0 %vm6092_vm9, %v7916_v46  ;;  %v4719_v45 = vpop.permute.xlu0 %4718  ;;  %v4120_v48 = vrot.slane %v4118_v29, 1  ;;  %v14776_v46 = vld [vmem:[#allocation83_spill] sm:$0xff]  ;;  %v5178_v32 = vsel %vm5138_vm3, %v5049_v31, %v14781_v16  ;;  %v7884_v56 = vcombine.low %v7372_v26, %v12725_v41  ;;  %v14787_v41 = vld [vmem:[#allocation196_spill] sm:$0xff] }
 0x33a   :  { %v5815_v60 = vsel %vm5783_vm8, %v5686_v22, %v4719_v45  ;;  %4756 = vrot.lane.b32.xlu1 %v4658_v10, %s9042_s18  ;;  %v4128_v58 = vor.u32 %v4127_v17, %v4123_v2  ;;  %v14774_v10 = vld [vmem:[#allocation39_spill] sm:$0xff]  ;;  %v14778_v22 = vld [vmem:[#allocation85_spill] sm:$0xff]  ;;  %v4660_v43 = vrot.slane %v7882_v28, 1  ;;  %v4135_v29 = vor.u32 %v4134_v35, %v4130_v49  ;;  %v12837_v2 = vld [vmem:[%s14333_s0 + $0x1a4] sm:$0x1] }
 0x33b   :  { %v7917_v15 = vcombine.low %v5813_v34, %v5815_v60  ;;  %4754 = vrot.lane.b32.xlu0 %v4657_v63, %s9042_s18  ;;  %v4121_v52 = vor.u32 %v4120_v48, %v4116_v40  ;;  %v4873_v25 = vsel %vm4816_vm1, %v8973_v20, %v14774_v10  ;;  %v5043_v63 = vsel %vm5009_vm2, %v4867_v6, %v14776_v46  ;;  %v14780_v34 = vld [vmem:[#allocation165_spill] sm:$0xff]  ;;  %v14786_v17 = vld [vmem:[#allocation167_spill] sm:$0xff]  ;;  %v12870_v35 = vld [vmem:[%s14333_s0 + $0x1b4] sm:$0x1] }
 0x33c   :  { %v12754_v21 = vpop.permute.xlu1 %3572  ;;  %v5047_v45 = vsel %vm5009_vm2, %v4873_v25, %v14778_v22  ;;  %v5172_v60 = vsel %vm5138_vm3, %v5043_v63, %v14780_v34  ;;  %v5307_v40 = vsel %vm5267_vm4, %v5178_v32, %v14787_v41  ;;  %v4662_v7 = vrot.slane %v7884_v56, 1  ;;  %v14790_v53 = vld [vmem:[#allocation247_spill] sm:$0xff]  ;;  %v7249_v32 = vld [vmem:[%s14333_s0 + $0x1b8] sm:$0xf] }
 0x33d   :  { %8350 = vmatmul.mubr.msk.bf16.gmra.mrb[12].mxu0 %vm6092_vm9, %v7917_v15  ;;  %v12762_v30 = vpop.permute.xlu0 %3570  ;;  %v14782_v15 = vld [vmem:[#allocation194_spill] sm:$0xff]  ;;  %v5436_v62 = vsel %vm5396_vm5, %v5307_v40, %v14789_v12  ;;  %v12881_v25 = vld [vmem:[%s14333_s0 + $0x1ac] sm:$0x1]  ;;  %v8974_v40 = vld [vmem:[%s14333_s0 + $0xc8] sm:$0xf] }
 0x33e   :  { %3608 = vrot.lane.b32.xlu1 %v7754_v11, %s9040_s21  ;;  %v14779_v11 = vld [vmem:[#allocation164_spill] sm:$0xff] }
 0x33f   :  { %4758 = vrot.lane.b32.xlu0 %v4659_v4, %s9042_s18  ;;  %v5174_v36 = vsel %vm5138_vm3, %v5045_v33, %v14779_v11  ;;  %v12904_v11 = vld [vmem:[%s14333_s0 + $0x1bc] sm:$0x1] }
 0x340   :  { %v4337_v44 = vpop.permute.xlu1 %4336  ;;  %v5303_v4 = vsel %vm5267_vm4, %v5174_v36, %v14782_v15 }
 0x341   :  { %v12770_v55 = vpop.permute.xlu0 %3574  ;;  %v5432_v39 = vsel %vm5396_vm5, %v5303_v4, %v14784_v13  ;;  %v7825_v4 = vcombine.low %v7249_v32, %v12904_v11 }
 0x342   :  { %3612 = vrot.lane.b32.xlu1 %v7756_v9, %s9040_s21  ;;  %v5301_v9 = vsel %vm5267_vm4, %v5172_v60, %v14783_v27  ;;  %v5561_v24 = vsel %vm5525_vm6, %v5432_v39, %v12762_v30  ;;  %v5565_v20 = vsel %vm5525_vm6, %v5436_v62, %v12770_v55  ;;  %v8976_v62 = vld [vmem:[%s14333_s0 + $0xd8] sm:$0xf] }
 0x343   :  { %3610 = vrot.lane.b32.xlu0 %v7755_v23, %s9040_s21  ;;  %v14785_v23 = vld [vmem:[#allocation245_spill] sm:$0xff] }
 0x344   :  { %v12777_v18 = vpop.permute.xlu1 %4340  ;;  %v5430_v57 = vsel %vm5396_vm5, %v5301_v9, %v14785_v23  ;;  %v7761_v23 = vcombine.low %v7249_v32, %v7249_v32  ;;  %v14804_v32 = vld [vmem:[#allocation248_spill] sm:$0xff] }
 0x345   :  { %v4339_v5 = vpop.permute.xlu0 %4338  ;;  %v5559_v48 = vsel %vm5525_vm6, %v5430_v57, %v12731_v51  ;;  %v7246_v51 = vld [vmem:[%s14333_s0 + $0x1a0] sm:$0xf] }
 0x346   :  { %4376 = vrot.lane.b32.xlu1 %v4114_v3, %s9041_s6  ;;  %v7883_v3 = vcombine.low %v7371_v8, %v12736_v1  ;;  %v7373_v1 = vld [vmem:[%s14333_s0 + $0x188] sm:$0xe]  ;;  %v5688_v19 = vsel %vm5654_vm7, %v5559_v48, %v4337_v44  ;;  %v5690_v6 = vsel %vm5654_vm7, %v5561_v24, %v4339_v5  ;;  %v7822_v54 = vcombine.low %v7246_v51, %v12837_v2  ;;  %v14791_v48 = vld [vmem:[#allocation40_spill] sm:$0xff] }
 0x347   :  { %3614 = vrot.lane.b32.xlu0 %v7757_v61, %s9040_s21  ;;  %v5176_v61 = vsel %vm5138_vm3, %v5047_v45, %v14786_v17  ;;  %v7885_v49 = vcombine.low %v7373_v1, %v12759_v50  ;;  %v7758_v46 = vcombine.low %v7246_v51, %v7246_v51  ;;  %v4160_v17 = vshll.u32 %v7825_v4, 16  ;;  %v14792_v1 = vld [vmem:[#allocation41_spill] sm:$0xff] }
 0x348   :  { %v4721_v37 = vpop.permute.xlu1 %4720  ;;  %v5305_v14 = vsel %vm5267_vm4, %v5176_v61, %v14788_v59  ;;  %v4661_v5 = vrot.slane %v7883_v3, 1  ;;  %v4139_v31 = vshll.u32 %v7822_v54, 16  ;;  %v4137_v60 = vshrl.u32 %v7822_v54, 16  ;;  %v7374_v3 = vld [vmem:[%s14333_s0 + $0x1a0] sm:$0xe] }
 0x349   :  { %v4343_v0 = vpop.permute.xlu0 %4342  ;;  %v5817_v30 = vsel %vm5783_vm8, %v5688_v19, %v4721_v37  ;;  %v4663_v8 = vrot.slane %v7885_v49, 1  ;;  %v4882_v24 = vsel %vm4816_vm1, %v8974_v40, %v14791_v48  ;;  %v7886_v12 = vcombine.low %v7374_v3, %v12837_v2  ;;  %v14793_v19 = vld [vmem:[#allocation42_spill] sm:$0xff]  ;;  %v8977_v2 = vld [vmem:[%s14333_s0 + $0xd0] sm:$0xf]  ;;  %v14808_v40 = vld [vmem:[#allocation201_spill] sm:$0xff] }
 0x34a   :  { %4380 = vrot.lane.b32.xlu1 %v4128_v58, %s9041_s6  ;;  %v5694_v38 = vsel %vm5654_vm7, %v5565_v20, %v4343_v0  ;;  %v4141_v16 = vrot.slane %v4139_v31, 1  ;;  %v4158_v51 = vshrl.u32 %v7825_v4, 16  ;;  %v14797_v49 = vld [vmem:[#allocation88_spill] sm:$0xff] }
 0x34b   :  { %4378 = vrot.lane.b32.xlu0 %v4121_v52, %s9041_s6  ;;  %v5434_v52 = vsel %vm5396_vm5, %v5305_v14, %v14790_v53  ;;  %v14795_v53 = vld [vmem:[#allocation86_spill] sm:$0xff] }
 0x34c   :  { %v4725_v42 = vpop.permute.xlu1 %4724  ;;  %v5563_v26 = vsel %vm5525_vm6, %v5434_v52, %v12754_v21  ;;  %v7248_v21 = vld [vmem:[%s14333_s0 + $0x1b0] sm:$0xf]  ;;  %v4142_v56 = vor.u32 %v4141_v16, %v4137_v60  ;;  %v5053_v52 = vsel %vm5009_vm2, %v4882_v24, %v14795_v53  ;;  %v4664_v60 = vrot.slane %v7886_v12, 1  ;;  %v14809_v24 = vld [vmem:[#allocation250_spill] sm:$0xff] }
 0x34d   :  { %v4723_v58 = vpop.permute.xlu0 %4722  ;;  %v5692_v50 = vsel %vm5654_vm7, %v5563_v26, %v12777_v18  ;;  %v7824_v47 = vcombine.low %v7248_v21, %v12870_v35  ;;  %v7247_v18 = vld [vmem:[%s14333_s0 + $0x1a8] sm:$0xf]  ;;  %v7760_v34 = vcombine.low %v7248_v21, %v7248_v21 }
 0x34e   :  { %v5819_v28 = vsel %vm5783_vm8, %v5690_v6, %v4723_v58  ;;  %4760 = vrot.lane.b32.xlu1 %v4660_v43, %s9042_s18  ;;  %v5821_v55 = vsel %vm5783_vm8, %v5692_v50, %v4725_v42  ;;  %v7823_v22 = vcombine.low %v7247_v18, %v12881_v25  ;;  %v7759_v15 = vcombine.low %v7247_v18, %v7247_v18  ;;  %v8975_v42 = vld [vmem:[%s14333_s0 + $0xc0] sm:$0xf]  ;;  %v7375_v50 = vld [vmem:[%s14333_s0 + $0x1a8] sm:$0xe] }
 0x34f   :  { %v7918_v44 = vcombine.low %v5817_v30, %v5819_v28  ;;  %4382 = vrot.lane.b32.xlu0 %v4135_v29, %s9041_s6  ;;  %v4153_v0 = vshll.u32 %v7824_v47, 16  ;;  %v4151_v13 = vshrl.u32 %v7824_v47, 16  ;;  %v4879_v59 = vsel %vm4816_vm1, %v8975_v42, %v14792_v1  ;;  %v7376_v28 = vld [vmem:[%s14333_s0 + $0x1b0] sm:$0xe]  ;;  %v14801_v47 = vld [vmem:[#allocation170_spill] sm:$0xff] }
 0x350   :  { %v12876_v10 = vpop.permute.xlu1 %3576  ;;  %v4146_v27 = vshll.u32 %v7823_v22, 16  ;;  %v4144_v57 = vshrl.u32 %v7823_v22, 16  ;;  %v4888_v6 = vsel %vm4816_vm1, %v8976_v62, %v14793_v19  ;;  %v4162_v30 = vrot.slane %v4160_v17, 1  ;;  %v14803_v22 = vld [vmem:[#allocation199_spill] sm:$0xff]  ;;  %v8978_v62 = vld [vmem:[%s14333_s0 + $0x1d4] sm:$0x1] }
 0x351   :  { %8353 = vmatprep.mubr.msk.bf16.mxu0 %vm6092_vm9, %v7918_v44  ;;  %v4727_v33 = vpop.permute.xlu0 %4726  ;;  %v4155_v39 = vrot.slane %v4153_v0, 1  ;;  %v14796_v44 = vld [vmem:[#allocation87_spill] sm:$0xff]  ;;  %v5057_v26 = vsel %vm5009_vm2, %v4888_v6, %v14797_v49  ;;  %v7888_v16 = vcombine.low %v7376_v28, %v12870_v35 }
 0x352   :  { %v5823_v63 = vsel %vm5783_vm8, %v5694_v38, %v4727_v33  ;;  %4764 = vrot.lane.b32.xlu1 %v4662_v7, %s9042_s18  ;;  %v4148_v29 = vrot.slane %v4146_v27, 1  ;;  %v14794_v7 = vld [vmem:[#allocation43_spill] sm:$0xff]  ;;  %v14798_v38 = vld [vmem:[#allocation89_spill] sm:$0xff]  ;;  %v5186_v18 = vsel %vm5138_vm3, %v5057_v26, %v14801_v47  ;;  %v4163_v27 = vor.u32 %v4162_v30, %v4158_v51 }
 0x353   :  { %v7919_v37 = vcombine.low %v5821_v55, %v5823_v63  ;;  %4762 = vrot.lane.b32.xlu0 %v4661_v5, %s9042_s18  ;;  %v4156_v14 = vor.u32 %v4155_v39, %v4151_v13  ;;  %v4885_v54 = vsel %vm4816_vm1, %v8977_v2, %v14794_v7  ;;  %v5051_v5 = vsel %vm5009_vm2, %v4879_v59, %v14796_v44  ;;  %v14800_v55 = vld [vmem:[#allocation169_spill] sm:$0xff]  ;;  %v7189_v13 = vld [vmem:[%s14333_s0 + $0x1d0] sm:$0xe]  ;;  %v14806_v39 = vld [vmem:[#allocation171_spill] sm:$0xff] }
 0x354   :  { %v12899_v45 = vpop.permute.xlu1 %3580  ;;  %v4149_v58 = vor.u32 %v4148_v29, %v4144_v57  ;;  %v5055_v33 = vsel %vm5009_vm2, %v4885_v54, %v14798_v38  ;;  %v5180_v63 = vsel %vm5138_vm3, %v5051_v5, %v14800_v55  ;;  %v14807_v57 = vld [vmem:[#allocation200_spill] sm:$0xff]  ;;  %v4666_v12 = vrot.slane %v7888_v16, 1  ;;  %v14810_v6 = vld [vmem:[#allocation251_spill] sm:$0xff]  ;;  %v13023_v54 = vld [vmem:[%s14333_s0 + $0x1c4] sm:$0x1] }
 0x355   :  { %8354 = vmatmul.mubr.msk.bf16.gmra.mrb[16].mxu0 %vm6092_vm9, %v7919_v37  ;;  %v12907_v36 = vpop.permute.xlu0 %3578  ;;  %v14802_v37 = vld [vmem:[#allocation198_spill] sm:$0xff]  ;;  %v5315_v35 = vsel %vm5267_vm4, %v5186_v18, %v14807_v57  ;;  %v7701_v19 = vcombine.low %v7189_v13, %v8978_v62  ;;  %v13012_v30 = vld [vmem:[%s14333_s0 + $0x1cc] sm:$0x1]  ;;  %v13044_v38 = vld [vmem:[%s14333_s0 + $0x1dc] sm:$0x1] }
 0x356   :  { %3616 = vrot.lane.b32.xlu1 %v7758_v46, %s9040_s21  ;;  %v14799_v46 = vld [vmem:[#allocation168_spill] sm:$0xff]  ;;  %v5444_v42 = vsel %vm5396_vm5, %v5315_v35, %v14809_v24  ;;  %v7253_v55 = vld [vmem:[%s14333_s0 + $0x1d8] sm:$0xf]  ;;  %v8982_v62 = vld [vmem:[%s14333_s0 + $0x100] sm:$0xf] }
 0x357   :  { %4766 = vrot.lane.b32.xlu0 %v4663_v8, %s9042_s18  ;;  %v5182_v21 = vsel %vm5138_vm3, %v5053_v52, %v14799_v46  ;;  %v3199_v5 = vrot.slane %v7701_v19, 1  ;;  %v13051_v46 = vld [vmem:[%s14333_s0 + $0x1d4] sm:$0x1]  ;;  %v7829_v47 = vcombine.low %v7253_v55, %v13044_v38  ;;  %v7252_v18 = vld [vmem:[%s14333_s0 + $0x1d0] sm:$0xf]  ;;  %v7765_v16 = vcombine.low %v7253_v55, %v7253_v55  ;;  %v14814_v19 = vld [vmem:[#allocation47_spill] sm:$0xff] }
 0x358   :  { %v4345_v9 = vpop.permute.xlu1 %4344  ;;  %v5311_v8 = vsel %vm5267_vm4, %v5182_v21, %v14802_v37  ;;  %v14811_v57 = vld [vmem:[#allocation44_spill] sm:$0xff] }
 0x359   :  { %v12915_v43 = vpop.permute.xlu0 %3582  ;;  %v5440_v0 = vsel %vm5396_vm5, %v5311_v8, %v14804_v32  ;;  %v7828_v8 = vcombine.low %v7252_v18, %v13051_v46 }
 0x35a   :  { %3620 = vrot.lane.b32.xlu1 %v7760_v34, %s9040_s21  ;;  %v5309_v34 = vsel %vm5267_vm4, %v5180_v63, %v14803_v22  ;;  %v5569_v3 = vsel %vm5525_vm6, %v5440_v0, %v12907_v36  ;;  %v5573_v2 = vsel %vm5525_vm6, %v5444_v42, %v12915_v43  ;;  %v8981_v42 = vld [vmem:[%s14333_s0 + $0x108] sm:$0xf] }
 0x35b   :  { %3618 = vrot.lane.b32.xlu0 %v7759_v15, %s9040_s21  ;;  %v14805_v15 = vld [vmem:[#allocation249_spill] sm:$0xff]  ;;  %v4181_v13 = vshll.u32 %v7828_v8, 16 }
 0x35c   :  { %v12922_v61 = vpop.permute.xlu1 %4348  ;;  %v5438_v4 = vsel %vm5396_vm5, %v5309_v34, %v14805_v15  ;;  %v4188_v15 = vshll.u32 %v7829_v47, 16 }
 0x35d   :  { %v4347_v41 = vpop.permute.xlu0 %4346  ;;  %v5567_v29 = vsel %vm5525_vm6, %v5438_v4, %v12876_v10  ;;  %v7764_v4 = vcombine.low %v7252_v18, %v7252_v18 }
 0x35e   :  { %4384 = vrot.lane.b32.xlu1 %v4142_v56, %s9041_s6  ;;  %v7887_v56 = vcombine.low %v7375_v50, %v12881_v25  ;;  %v7377_v25 = vld [vmem:[%s14333_s0 + $0x1b8] sm:$0xe]  ;;  %v5696_v1 = vsel %vm5654_vm7, %v5567_v29, %v4345_v9  ;;  %v5698_v59 = vsel %vm5654_vm7, %v5569_v3, %v4347_v41  ;;  %v8980_v3 = vld [vmem:[%s14333_s0 + $0xf0] sm:$0xf]  ;;  %v4190_v24 = vrot.slane %v4188_v15, 1 }
 0x35f   :  { %3622 = vrot.lane.b32.xlu0 %v7761_v23, %s9040_s21  ;;  %v5184_v23 = vsel %vm5138_vm3, %v5055_v33, %v14806_v39  ;;  %v7889_v41 = vcombine.low %v7377_v25, %v12904_v11  ;;  %v7381_v15 = vld [vmem:[%s14333_s0 + $0x1d8] sm:$0xe] }
 0x360   :  { %v4729_v20 = vpop.permute.xlu1 %4728  ;;  %v5313_v48 = vsel %vm5267_vm4, %v5184_v23, %v14808_v40  ;;  %v4665_v9 = vrot.slane %v7887_v56, 1  ;;  %v8979_v23 = vld [vmem:[%s14333_s0 + $0xf8] sm:$0xf] }
 0x361   :  { %v4351_v31 = vpop.permute.xlu0 %4350  ;;  %v5825_v10 = vsel %vm5783_vm8, %v5696_v1, %v4729_v20  ;;  %v4667_v20 = vrot.slane %v7889_v41, 1  ;;  %v4894_v35 = vsel %vm4816_vm1, %v8979_v23, %v14811_v57  ;;  %v14813_v1 = vld [vmem:[#allocation46_spill] sm:$0xff] }
 0x362   :  { %4388 = vrot.lane.b32.xlu1 %v4156_v14, %s9041_s6  ;;  %v5702_v53 = vsel %vm5654_vm7, %v5573_v2, %v4351_v31 }
 0x363   :  { %4386 = vrot.lane.b32.xlu0 %v4149_v58, %s9041_s6  ;;  %v5442_v58 = vsel %vm5396_vm5, %v5313_v48, %v14810_v6  ;;  %v4186_v48 = vshrl.u32 %v7829_v47, 16  ;;  %v4897_v6 = vsel %vm4816_vm1, %v8982_v62, %v14814_v19  ;;  %v7190_v19 = vld [vmem:[%s14333_s0 + $0x1e8] sm:$0xe] }
 0x364   :  { %v4733_v17 = vpop.permute.xlu1 %4732  ;;  %v5571_v28 = vsel %vm5525_vm6, %v5442_v58, %v12899_v45  ;;  %v7251_v45 = vld [vmem:[%s14333_s0 + $0x1c8] sm:$0xf]  ;;  %v14815_v58 = vld [vmem:[#allocation90_spill] sm:$0xff] }
 0x365   :  { %v4731_v14 = vpop.permute.xlu0 %4730  ;;  %v5700_v11 = vsel %vm5654_vm7, %v5571_v28, %v12922_v61  ;;  %v7827_v49 = vcombine.low %v7251_v45, %v13012_v30  ;;  %v7250_v61 = vld [vmem:[%s14333_s0 + $0x1c0] sm:$0xf]  ;;  %v7763_v63 = vcombine.low %v7251_v45, %v7251_v45  ;;  %v14817_v28 = vld [vmem:[#allocation92_spill] sm:$0xff]  ;;  %v4191_v18 = vor.u32 %v4190_v24, %v4186_v48 }
 0x366   :  { %v5827_v36 = vsel %vm5783_vm8, %v5698_v59, %v4731_v14  ;;  %4768 = vrot.lane.b32.xlu1 %v4664_v60, %s9042_s18  ;;  %v5829_v43 = vsel %vm5783_vm8, %v5700_v11, %v4733_v17  ;;  %v7826_v50 = vcombine.low %v7250_v61, %v13023_v54  ;;  %v7762_v37 = vcombine.low %v7250_v61, %v7250_v61  ;;  %v14812_v17 = vld [vmem:[#allocation45_spill] sm:$0xff]  ;;  %v14821_v61 = vld [vmem:[#allocation174_spill] sm:$0xff] }
 0x367   :  { %v7920_v51 = vcombine.low %v5825_v10, %v5827_v36  ;;  %4390 = vrot.lane.b32.xlu0 %v4163_v27, %s9041_s6  ;;  %v4174_v31 = vshll.u32 %v7827_v49, 16  ;;  %v4172_v32 = vshrl.u32 %v7827_v49, 16  ;;  %v4891_v25 = vsel %vm4816_vm1, %v8980_v3, %v14812_v17  ;;  %v14829_v17 = vld [vmem:[#allocation254_spill] sm:$0xff] }
 0x368   :  { %v13018_v7 = vpop.permute.xlu1 %3584  ;;  %v4167_v22 = vshll.u32 %v7826_v50, 16  ;;  %v4165_v27 = vshrl.u32 %v7826_v50, 16  ;;  %v4900_v59 = vsel %vm4816_vm1, %v8981_v42, %v14813_v1  ;;  %v4179_v10 = vshrl.u32 %v7828_v8, 16  ;;  %v14822_v50 = vld [vmem:[#allocation202_spill] sm:$0xff] }
 0x369   :  { %8357 = vmatprep.mubr.msk.bf16.mxu0 %vm6092_vm9, %v7920_v51  ;;  %v4735_v52 = vpop.permute.xlu0 %4734  ;;  %v4176_v0 = vrot.slane %v4174_v31, 1  ;;  %v4183_v36 = vrot.slane %v4181_v13, 1  ;;  %v5061_v51 = vsel %vm5009_vm2, %v4894_v35, %v14815_v58  ;;  %v5065_v2 = vsel %vm5009_vm2, %v4900_v59, %v14817_v28  ;;  %v14828_v35 = vld [vmem:[#allocation205_spill] sm:$0xff]  ;;  %v14830_v59 = vld [vmem:[#allocation255_spill] sm:$0xff] }
 0x36a   :  { %v5831_v44 = vsel %vm5783_vm8, %v5702_v53, %v4735_v52  ;;  %4772 = vrot.lane.b32.xlu1 %v4666_v12, %s9042_s18  ;;  %v4169_v56 = vrot.slane %v4167_v22, 1  ;;  %v7379_v12 = vld [vmem:[%s14333_s0 + $0x1c8] sm:$0xe]  ;;  %v7378_v53 = vld [vmem:[%s14333_s0 + $0x1c0] sm:$0xe]  ;;  %v14818_v52 = vld [vmem:[#allocation93_spill] sm:$0xff]  ;;  %v7893_v1 = vcombine.low %v7381_v15, %v13044_v38 }
 0x36b   :  { %v7921_v26 = vcombine.low %v5829_v43, %v5831_v44  ;;  %4770 = vrot.lane.b32.xlu0 %v4665_v9, %s9042_s18  ;;  %v4177_v40 = vor.u32 %v4176_v0, %v4172_v32  ;;  %v14816_v9 = vld [vmem:[#allocation91_spill] sm:$0xff]  ;;  %v5063_v45 = vsel %vm5009_vm2, %v4897_v6, %v14818_v52  ;;  %v14819_v43 = vld [vmem:[#allocation172_spill] sm:$0xff]  ;;  %v7891_v31 = vcombine.low %v7379_v12, %v13012_v30  ;;  %v14825_v22 = vld [vmem:[#allocation253_spill] sm:$0xff] }
 0x36c   :  { %v13046_v33 = vpop.permute.xlu1 %3588  ;;  %v4170_v14 = vor.u32 %v4169_v56, %v4165_v27  ;;  %v5059_v41 = vsel %vm5009_vm2, %v4891_v25, %v14816_v9  ;;  %v5190_v44 = vsel %vm5138_vm3, %v5061_v51, %v14819_v43  ;;  %v4184_v32 = vor.u32 %v4183_v36, %v4179_v10  ;;  %v14827_v56 = vld [vmem:[#allocation204_spill] sm:$0xff] }
 0x36d   :  { %8358 = vmatmul.mubr.msk.bf16.gmra.mrb[20].mxu0 %vm6092_vm9, %v7921_v26  ;;  %v13054_v21 = vpop.permute.xlu0 %3586  ;;  %v5194_v26 = vsel %vm5138_vm3, %v5065_v2, %v14821_v61  ;;  %v5319_v55 = vsel %vm5267_vm4, %v5190_v44, %v14822_v50  ;;  %v7890_v0 = vcombine.low %v7378_v53, %v13023_v54  ;;  %v7380_v54 = vld [vmem:[%s14333_s0 + $0x1d0] sm:$0xe]  ;;  %v4669_v42 = vrot.slane %v7891_v31, 1  ;;  %v8983_v9 = vld [vmem:[%s14333_s0 + $0x1f4] sm:$0x1] }
 0x36e   :  { %3310 = vrot.lane.b32.xlu1 %v3199_v5, %s9039_s11  ;;  %v14820_v5 = vld [vmem:[#allocation173_spill] sm:$0xff]  ;;  %v5323_v30 = vsel %vm5267_vm4, %v5194_v26, %v14827_v56  ;;  %v8984_v2 = vld [vmem:[%s14333_s0 + $0x1ec] sm:$0x1]  ;;  %v7193_v53 = vld [vmem:[%s14333_s0 + $0x200] sm:$0xe] }
 0x36f   :  { %4774 = vrot.lane.b32.xlu0 %v4667_v20, %s9042_s18  ;;  %v5188_v49 = vsel %vm5138_vm3, %v5059_v41, %v14820_v5  ;;  %v5452_v25 = vsel %vm5396_vm5, %v5323_v30, %v14829_v17  ;;  %v4668_v36 = vrot.slane %v7890_v0, 1  ;;  %v8985_v5 = vld [vmem:[%s14333_s0 + $0x204] sm:$0x1]  ;;  %v13198_v61 = vld [vmem:[%s14333_s0 + $0x1fc] sm:$0x1]  ;;  %v14831_v15 = vld [vmem:[#allocation48_spill] sm:$0xff] }
 0x370   :  { %v4353_v34 = vpop.permute.xlu1 %4352  ;;  %v8987_v0 = vld [vmem:[%s14333_s0 + $0x118] sm:$0xf]  ;;  %v14834_v17 = vld [vmem:[#allocation51_spill] sm:$0xff] }
 0x371   :  { %v13066_v60 = vpop.permute.xlu0 %3590  ;;  %v14832_v56 = vld [vmem:[#allocation49_spill] sm:$0xff] }
 0x372   :  { %3626 = vrot.lane.b32.xlu1 %v7763_v63, %s9040_s21  ;;  %v14823_v63 = vld [vmem:[#allocation203_spill] sm:$0xff]  ;;  %v5581_v62 = vsel %vm5525_vm6, %v5452_v25, %v13066_v60  ;;  %v4671_v60 = vrot.slane %v7893_v1, 1 }
 0x373   :  { %3624 = vrot.lane.b32.xlu0 %v7762_v37, %s9040_s21  ;;  %v5317_v47 = vsel %vm5267_vm4, %v5188_v49, %v14823_v63  ;;  %v14824_v37 = vld [vmem:[#allocation252_spill] sm:$0xff]  ;;  %v7705_v49 = vcombine.low %v7193_v53, %v8985_v5  ;;  %v7255_v63 = vld [vmem:[%s14333_s0 + $0x1f8] sm:$0xf]  ;;  %v14844_v53 = vld [vmem:[#allocation207_spill] sm:$0xff] }
 0x374   :  { %v13070_v39 = vpop.permute.xlu1 %4356  ;;  %v5448_v8 = vsel %vm5396_vm5, %v5319_v55, %v14824_v37  ;;  %v13217_v31 = vcombine.low %v7255_v63, %v13198_v61 }
 0x375   :  { %v4355_v29 = vpop.permute.xlu0 %4354  ;;  %v5577_v23 = vsel %vm5525_vm6, %v5448_v8, %v13054_v21  ;;  %v3203_v37 = vrot.slane %v7705_v49, 1  ;;  %v7254_v8 = vld [vmem:[%s14333_s0 + $0x1f0] sm:$0xf] }
 0x376   :  { %3630 = vrot.lane.b32.xlu1 %v7765_v16, %s9040_s21  ;;  %v5446_v16 = vsel %vm5396_vm5, %v5317_v47, %v14825_v22  ;;  %v5706_v48 = vsel %vm5654_vm7, %v5577_v23, %v4355_v29  ;;  %v7191_v29 = vld [vmem:[%s14333_s0 + $0x1f0] sm:$0xe]  ;;  %v13212_v47 = vld [vmem:[%s14333_s0 + $0x1f4] sm:$0x1]  ;;  %v14833_v23 = vld [vmem:[#allocation50_spill] sm:$0xff]  ;;  %v4202_v1 = vshll.u32 %v13217_v31, 16 }
 0x377   :  { %3628 = vrot.lane.b32.xlu0 %v7764_v4, %s9040_s21  ;;  %v14826_v4 = vld [vmem:[#allocation175_spill] sm:$0xff]  ;;  %v5575_v13 = vsel %vm5525_vm6, %v5446_v16, %v13018_v7  ;;  %v7703_v41 = vcombine.low %v7191_v29, %v8983_v9  ;;  %v13225_v16 = vcombine.low %v7254_v8, %v13212_v47 }
 0x378   :  { %v4737_v11 = vpop.permute.xlu1 %4736  ;;  %v5192_v27 = vsel %vm5138_vm3, %v5063_v45, %v14826_v4  ;;  %v7192_v45 = vld [vmem:[%s14333_s0 + $0x1f8] sm:$0xe]  ;;  %v4906_v4 = vsel %vm4816_vm1, %v8987_v0, %v14831_v15 }
 0x379   :  { %v4359_v20 = vpop.permute.xlu0 %4358  ;;  %v5321_v3 = vsel %vm5267_vm4, %v5192_v27, %v14828_v35  ;;  %v3201_v44 = vrot.slane %v7703_v41, 1  ;;  %v8988_v27 = vld [vmem:[%s14333_s0 + $0x110] sm:$0xf]  ;;  %v13252_v35 = vld [vmem:[%s14333_s0 + $0x204] sm:$0x1]  ;;  %v14842_v41 = vld [vmem:[#allocation179_spill] sm:$0xff] }
 0x37a   :  { %4394 = vrot.lane.b32.xlu1 %v4177_v40, %s9041_s6  ;;  %v5704_v40 = vsel %vm5654_vm7, %v5575_v13, %v4353_v34  ;;  %v7892_v34 = vcombine.low %v7380_v54, %v13051_v46  ;;  %v5710_v46 = vsel %vm5654_vm7, %v5581_v62, %v4359_v20  ;;  %v8986_v20 = vld [vmem:[%s14333_s0 + $0x1fc] sm:$0x1]  ;;  %v4903_v30 = vsel %vm4816_vm1, %v8988_v27, %v14832_v56  ;;  %v8989_v13 = vld [vmem:[%s14333_s0 + $0x128] sm:$0xf]  ;;  %v14839_v62 = vld [vmem:[#allocation176_spill] sm:$0xff] }
 0x37b   :  { %4392 = vrot.lane.b32.xlu0 %v4170_v14, %s9041_s6  ;;  %v5833_v7 = vsel %vm5783_vm8, %v5704_v40, %v4737_v11  ;;  %v5450_v14 = vsel %vm5396_vm5, %v5321_v3, %v14830_v59  ;;  %v7702_v11 = vcombine.low %v7190_v19, %v8984_v2  ;;  %v7704_v50 = vcombine.low %v7192_v45, %v8986_v20  ;;  %v8990_v3 = vld [vmem:[%s14333_s0 + $0x120] sm:$0xf]  ;;  %v14837_v59 = vld [vmem:[#allocation96_spill] sm:$0xff] }
 0x37c   :  { %v4741_v57 = vpop.permute.xlu1 %4740  ;;  %v5579_v12 = vsel %vm5525_vm6, %v5450_v14, %v13046_v33  ;;  %v4909_v25 = vsel %vm4816_vm1, %v8990_v3, %v14834_v17  ;;  %v14835_v40 = vld [vmem:[#allocation94_spill] sm:$0xff]  ;;  %v4204_v20 = vrot.slane %v4202_v1, 1 }
 0x37d   :  { %v4739_v24 = vpop.permute.xlu0 %4738  ;;  %v5708_v6 = vsel %vm5654_vm7, %v5579_v12, %v13070_v39  ;;  %v4670_v39 = vrot.slane %v7892_v34, 1  ;;  %v3200_v26 = vrot.slane %v7702_v11, 1  ;;  %v3202_v22 = vrot.slane %v7704_v50, 1  ;;  %v7256_v12 = vld [vmem:[%s14333_s0 + $0x200] sm:$0xf]  ;;  %v14846_v50 = vld [vmem:[#allocation256_spill] sm:$0xff] }
 0x37e   :  { %v5835_v21 = vsel %vm5783_vm8, %v5706_v48, %v4739_v24  ;;  %4398 = vrot.lane.b32.xlu1 %v4191_v18, %s9041_s6  ;;  %v5837_v51 = vsel %vm5783_vm8, %v5708_v6, %v4741_v57  ;;  %v4912_v57 = vsel %vm4816_vm1, %v8989_v13, %v14833_v23  ;;  %v5069_v48 = vsel %vm5009_vm2, %v4906_v4, %v14835_v40  ;;  %v14836_v24 = vld [vmem:[#allocation95_spill] sm:$0xff]  ;;  %v14849_v13 = vld [vmem:[#allocation258_spill] sm:$0xff] }
 0x37f   :  { %v7922_v10 = vcombine.low %v5833_v7, %v5835_v21  ;;  %4396 = vrot.lane.b32.xlu0 %v4184_v32, %s9041_s6  ;;  %v13230_v32 = vld [vmem:[%s14333_s0 + $0x20c] sm:$0x1]  ;;  %v5067_v7 = vsel %vm5009_vm2, %v4903_v30, %v14836_v24  ;;  %v5073_v14 = vsel %vm5009_vm2, %v4912_v57, %v14837_v59  ;;  %v7767_v34 = vcombine.low %v7255_v63, %v7255_v63  ;;  %v14848_v30 = vld [vmem:[#allocation209_spill] sm:$0xff] }
 0x380   :  { %v13161_v38 = vpop.permute.xlu1 %3592  ;;  %v5198_v19 = vsel %vm5138_vm3, %v5069_v48, %v14839_v62  ;;  %v7766_v6 = vcombine.low %v7254_v8, %v7254_v8  ;;  %v7768_v15 = vcombine.low %v7256_v12, %v7256_v12  ;;  %v4193_v4 = vshrl.u32 %v13225_v16, 16 }
 0x381   :  { %8361 = vmatprep.mubr.msk.bf16.mxu0 %vm6092_vm9, %v7922_v10  ;;  %v4743_v58 = vpop.permute.xlu0 %4742  ;;  %v14838_v10 = vld [vmem:[#allocation97_spill] sm:$0xff] }
 0x382   :  { %v5839_v33 = vsel %vm5783_vm8, %v5710_v46, %v4743_v58  ;;  %4778 = vrot.lane.b32.xlu1 %v4669_v42, %s9042_s18  ;;  %v7257_v42 = vld [vmem:[%s14333_s0 + $0x208] sm:$0xf]  ;;  %v7832_v46 = vcombine.low %v7256_v12, %v13252_v35  ;;  %v4195_v58 = vshll.u32 %v13225_v16, 16 }
 0x383   :  { %v7923_v28 = vcombine.low %v5837_v51, %v5839_v33  ;;  %4776 = vrot.lane.b32.xlu0 %v4668_v36, %s9042_s18  ;;  %v5071_v36 = vsel %vm5009_vm2, %v4909_v25, %v14838_v10  ;;  %v7833_v29 = vcombine.low %v7257_v42, %v13230_v32  ;;  %v14840_v51 = vld [vmem:[#allocation177_spill] sm:$0xff]  ;;  %v14850_v25 = vld [vmem:[#allocation259_spill] sm:$0xff] }
 0x384   :  { %v13183_v52 = vpop.permute.xlu1 %3596  ;;  %v5196_v33 = vsel %vm5138_vm3, %v5067_v7, %v14840_v51  ;;  %v4197_v27 = vrot.slane %v4195_v58, 1  ;;  %v4209_v56 = vshll.u32 %v7832_v46, 16  ;;  %v4207_v10 = vshrl.u32 %v7832_v46, 16 }
 0x385   :  { %8362 = vmatmul.mubr.msk.bf16.gmra.mrb[24].mxu0 %vm6092_vm9, %v7923_v28  ;;  %v13189_v43 = vpop.permute.xlu0 %3594  ;;  %v5200_v28 = vsel %vm5138_vm3, %v5071_v36, %v14842_v41  ;;  %v5325_v45 = vsel %vm5267_vm4, %v5196_v33, %v14844_v53  ;;  %v4216_v0 = vshll.u32 %v7833_v29, 16  ;;  %v7384_v41 = vld [vmem:[%s14333_s0 + $0x200] sm:$0xe] }
 0x386   :  { %4782 = vrot.lane.b32.xlu1 %v4671_v60, %s9042_s18  ;;  %v14841_v60 = vld [vmem:[#allocation178_spill] sm:$0xff]  ;;  %v4211_v36 = vrot.slane %v4209_v56, 1 }
 0x387   :  { %4780 = vrot.lane.b32.xlu0 %v4670_v39, %s9042_s18  ;;  %v5202_v9 = vsel %vm5138_vm3, %v5073_v14, %v14841_v60  ;;  %v14843_v39 = vld [vmem:[#allocation206_spill] sm:$0xff]  ;;  %v4218_v59 = vrot.slane %v4216_v0, 1  ;;  %v4198_v14 = vor.u32 %v4197_v27, %v4193_v4  ;;  %v7385_v60 = vld [vmem:[%s14333_s0 + $0x208] sm:$0xe]  ;;  %v14852_v27 = vld [vmem:[#allocation53_spill] sm:$0xff] }
 0x388   :  { %v13204_v55 = vpop.permute.xlu1 %4360  ;;  %v5327_v2 = vsel %vm5267_vm4, %v5198_v19, %v14843_v39  ;;  %v4212_v33 = vor.u32 %v4211_v36, %v4207_v10  ;;  %v7897_v39 = vcombine.low %v7385_v60, %v13230_v32  ;;  %v8994_v4 = vld [vmem:[%s14333_s0 + $0x140] sm:$0xf]  ;;  %v14858_v10 = vld [vmem:[#allocation101_spill] sm:$0xff]  ;;  %v14864_v60 = vld [vmem:[#allocation211_spill] sm:$0xff] }
 0x389   :  { %v13214_v18 = vpop.permute.xlu0 %3598  ;;  %v5456_v63 = vsel %vm5396_vm5, %v5327_v2, %v14846_v50  ;;  %v7896_v2 = vcombine.low %v7384_v41, %v13252_v35  ;;  %v7197_v50 = vld [vmem:[%s14333_s0 + $0x220] sm:$0xe]  ;;  %v4915_v56 = vsel %vm4816_vm1, %v8994_v4, %v14852_v27 }
 0x38a   :  { %3314 = vrot.lane.b32.xlu1 %v3201_v44, %s9039_s11  ;;  %v14845_v44 = vld [vmem:[#allocation208_spill] sm:$0xff]  ;;  %v5585_v3 = vsel %vm5525_vm6, %v5456_v63, %v13189_v43  ;;  %v4675_v32 = vrot.slane %v7897_v39, 1 }
 0x38b   :  { %3312 = vrot.lane.b32.xlu0 %v3200_v26, %s9039_s11  ;;  %v5331_v5 = vsel %vm5267_vm4, %v5202_v9, %v14845_v44  ;;  %v4200_v26 = vshrl.u32 %v13217_v31, 16  ;;  %v5329_v31 = vsel %vm5267_vm4, %v5200_v28, %v14848_v30  ;;  %v8995_v30 = vld [vmem:[%s14333_s0 + $0x158] sm:$0xf] }
 0x38c   :  { %v13247_v54 = vpop.permute.xlu1 %4364  ;;  %v5460_v23 = vsel %vm5396_vm5, %v5331_v5, %v14849_v13  ;;  %v5458_v40 = vsel %vm5396_vm5, %v5329_v31, %v14850_v25  ;;  %v8991_v5 = vld [vmem:[%s14333_s0 + $0x214] sm:$0x1]  ;;  %v14853_v31 = vld [vmem:[#allocation54_spill] sm:$0xff]  ;;  %v14854_v25 = vld [vmem:[#allocation55_spill] sm:$0xff] }
 0x38d   :  { %v4363_v21 = vpop.permute.xlu0 %4362  ;;  %v4205_v7 = vor.u32 %v4204_v20, %v4200_v26  ;;  %v8992_v26 = vld [vmem:[%s14333_s0 + $0x20c] sm:$0x1]  ;;  %v4924_v13 = vsel %vm4816_vm1, %v8995_v30, %v14853_v31 }
 0x38e   :  { %3318 = vrot.lane.b32.xlu1 %v3203_v37, %s9039_s11  ;;  %v14847_v37 = vld [vmem:[#allocation257_spill] sm:$0xff]  ;;  %v5714_v48 = vsel %vm5654_vm7, %v5585_v3, %v4363_v21  ;;  %v5587_v21 = vsel %vm5525_vm6, %v5458_v40, %v13183_v52  ;;  %v14870_v30 = vld [vmem:[#allocation263_spill] sm:$0xff] }
 0x38f   :  { %3316 = vrot.lane.b32.xlu0 %v3202_v22, %s9039_s11  ;;  %v5454_v8 = vsel %vm5396_vm5, %v5325_v45, %v14847_v37  ;;  %v7769_v22 = vcombine.low %v7257_v42, %v7257_v42  ;;  %v5716_v62 = vsel %vm5654_vm7, %v5587_v21, %v13247_v54  ;;  %v7194_v45 = vld [vmem:[%s14333_s0 + $0x208] sm:$0xe]  ;;  %v7196_v37 = vld [vmem:[%s14333_s0 + $0x218] sm:$0xe] }
 0x390   :  { %v4745_v11 = vpop.permute.xlu1 %4744  ;;  %v5583_v57 = vsel %vm5525_vm6, %v5454_v8, %v13161_v38  ;;  %v4214_v38 = vshrl.u32 %v7833_v29, 16  ;;  %v7382_v29 = vld [vmem:[%s14333_s0 + $0x1f0] sm:$0xe]  ;;  %v7706_v20 = vcombine.low %v7194_v45, %v8992_v26  ;;  %v8993_v8 = vld [vmem:[%s14333_s0 + $0x148] sm:$0xf] }
 0x391   :  { %v4367_v49 = vpop.permute.xlu0 %4366  ;;  %v5712_v16 = vsel %vm5654_vm7, %v5583_v57, %v13204_v55  ;;  %v7383_v55 = vld [vmem:[%s14333_s0 + $0x1f8] sm:$0xe]  ;;  %v7894_v54 = vcombine.low %v7382_v29, %v13212_v47  ;;  %v8996_v57 = vld [vmem:[%s14333_s0 + $0x224] sm:$0x1]  ;;  %v13427_v29 = vld [vmem:[%s14333_s0 + $0x214] sm:$0x1] }
 0x392   :  { %3634 = vrot.lane.b32.xlu1 %v7767_v34, %s9040_s21  ;;  %v5841_v42 = vsel %vm5783_vm8, %v5712_v16, %v4745_v11  ;;  %v5589_v34 = vsel %vm5525_vm6, %v5460_v23, %v13214_v18  ;;  %v4219_v18 = vor.u32 %v4218_v59, %v4214_v38  ;;  %v7895_v58 = vcombine.low %v7383_v55, %v13198_v61  ;;  %v7195_v11 = vld [vmem:[%s14333_s0 + $0x210] sm:$0xe]  ;;  %v14855_v16 = vld [vmem:[#allocation98_spill] sm:$0xff]  ;;  %v14856_v38 = vld [vmem:[#allocation99_spill] sm:$0xff] }
 0x393   :  { %3632 = vrot.lane.b32.xlu0 %v7766_v6, %s9040_s21  ;;  %v5718_v19 = vsel %vm5654_vm7, %v5589_v34, %v4367_v49  ;;  %v4672_v47 = vrot.slane %v7894_v54, 1  ;;  %v7707_v35 = vcombine.low %v7195_v11, %v8991_v5  ;;  %v4674_v49 = vrot.slane %v7896_v2, 1  ;;  %v14859_v55 = vld [vmem:[#allocation180_spill] sm:$0xff]  ;;  %v7259_v54 = vld [vmem:[%s14333_s0 + $0x218] sm:$0xf] }
 0x394   :  { %v4749_v17 = vpop.permute.xlu1 %4748  ;;  %v4673_v61 = vrot.slane %v7895_v58, 1  ;;  %v7709_v3 = vcombine.low %v7197_v50, %v8996_v57  ;;  %v5075_v59 = vsel %vm5009_vm2, %v4915_v56, %v14856_v38  ;;  %v14863_v58 = vld [vmem:[#allocation210_spill] sm:$0xff]  ;;  %v7258_v11 = vld [vmem:[%s14333_s0 + $0x210] sm:$0xf]  ;;  %v14867_v5 = vld [vmem:[#allocation261_spill] sm:$0xff] }
 0x395   :  { %v4747_v24 = vpop.permute.xlu0 %4746  ;;  %v5845_v46 = vsel %vm5783_vm8, %v5716_v62, %v4749_v17  ;;  %v3205_v23 = vrot.slane %v7707_v35, 1  ;;  %v8997_v17 = vld [vmem:[%s14333_s0 + $0x150] sm:$0xf]  ;;  %v14860_v62 = vld [vmem:[#allocation181_spill] sm:$0xff]  ;;  %v7834_v26 = vcombine.low %v7258_v11, %v13427_v29  ;;  %v13471_v56 = vld [vmem:[%s14333_s0 + $0x224] sm:$0x1] }
 0x396   :  { %v5843_v1 = vsel %vm5783_vm8, %v5714_v48, %v4747_v24  ;;  %3638 = vrot.lane.b32.xlu1 %v7769_v22, %s9040_s21  ;;  %v14851_v22 = vld [vmem:[#allocation52_spill] sm:$0xff]  ;;  %v4921_v40 = vsel %vm4816_vm1, %v8997_v17, %v14854_v25  ;;  %v3204_v24 = vrot.slane %v7706_v20, 1  ;;  %v13458_v20 = vld [vmem:[%s14333_s0 + $0x22c] sm:$0x1]  ;;  %v14868_v50 = vld [vmem:[#allocation213_spill] sm:$0xff] }
 0x397   :  { %v7924_v43 = vcombine.low %v5841_v42, %v5843_v1  ;;  %3636 = vrot.lane.b32.xlu0 %v7768_v15, %s9040_s21  ;;  %v4918_v0 = vsel %vm4816_vm1, %v8993_v8, %v14851_v22  ;;  %v13414_v1 = vld [vmem:[%s14333_s0 + $0x21c] sm:$0x1]  ;;  %v5079_v36 = vsel %vm5009_vm2, %v4921_v40, %v14858_v10  ;;  %v14866_v45 = vld [vmem:[#allocation260_spill] sm:$0xff]  ;;  %v14869_v8 = vld [vmem:[#allocation262_spill] sm:$0xff] }
 0x398   :  { %v13325_v12 = vpop.permute.xlu1 %3600  ;;  %v5077_v48 = vsel %vm5009_vm2, %v4918_v0, %v14855_v16  ;;  %v7835_v2 = vcombine.low %v7259_v54, %v13414_v1  ;;  %v7770_v16 = vcombine.low %v7258_v11, %v7258_v11 }
 0x399   :  { %8365 = vmatprep.mubr.msk.bf16.mxu0 %vm6092_vm9, %v7924_v43  ;;  %v4751_v6 = vpop.permute.xlu0 %4750  ;;  %v14857_v43 = vld [vmem:[#allocation100_spill] sm:$0xff]  ;;  %v5206_v21 = vsel %vm5138_vm3, %v5077_v48, %v14859_v55 }
 0x39a   :  { %v5847_v52 = vsel %vm5783_vm8, %v5718_v19, %v4751_v6  ;;  %4402 = vrot.lane.b32.xlu1 %v4205_v7, %s9041_s6  ;;  %v8998_v7 = vld [vmem:[%s14333_s0 + $0x21c] sm:$0x1]  ;;  %v5204_v19 = vsel %vm5138_vm3, %v5075_v59, %v14860_v62  ;;  %v14861_v6 = vld [vmem:[#allocation182_spill] sm:$0xff]  ;;  %v4230_v40 = vshll.u32 %v7835_v2, 16  ;;  %v4228_v55 = vshrl.u32 %v7835_v2, 16 }
 0x39b   :  { %v7925_v51 = vcombine.low %v5845_v46, %v5847_v52  ;;  %4400 = vrot.lane.b32.xlu0 %v4198_v14, %s9041_s6  ;;  %v7708_v42 = vcombine.low %v7196_v37, %v8998_v7  ;;  %v5081_v14 = vsel %vm5009_vm2, %v4924_v13, %v14857_v43  ;;  %v14862_v52 = vld [vmem:[#allocation183_spill] sm:$0xff]  ;;  %v5333_v41 = vsel %vm5267_vm4, %v5204_v19, %v14864_v60 }
 0x39c   :  { %v13343_v9 = vpop.permute.xlu1 %3604  ;;  %v5210_v46 = vsel %vm5138_vm3, %v5081_v14, %v14861_v6  ;;  %v5462_v35 = vsel %vm5396_vm5, %v5333_v41, %v14867_v5  ;;  %v4221_v19 = vshrl.u32 %v7834_v26, 16  ;;  %v7387_v41 = vld [vmem:[%s14333_s0 + $0x218] sm:$0xe]  ;;  %v7389_v5 = vld [vmem:[%s14333_s0 + $0x228] sm:$0xe] }
 0x39d   :  { %8366 = vmatmul.mubr.msk.bf16.gmra.mrb[28].mxu0 %vm6092_vm9, %v7925_v51  ;;  %v13349_v28 = vpop.permute.xlu0 %3602  ;;  %v5335_v51 = vsel %vm5267_vm4, %v5206_v21, %v14863_v58  ;;  %v5591_v0 = vsel %vm5525_vm6, %v5462_v35, %v13325_v12  ;;  %v7261_v12 = vld [vmem:[%s14333_s0 + $0x228] sm:$0xf]  ;;  %v7899_v11 = vcombine.low %v7387_v41, %v13414_v1 }
 0x39e   :  { %4406 = vrot.lane.b32.xlu1 %v4219_v18, %s9041_s6  ;;  %v5208_v18 = vsel %vm5138_vm3, %v5079_v36, %v14862_v52  ;;  %v7837_v25 = vcombine.low %v7261_v12, %v13458_v20  ;;  %v7773_v59 = vcombine.low %v7261_v12, %v7261_v12  ;;  %v8999_v1 = vld [vmem:[%s14333_s0 + $0x168] sm:$0xf] }
 0x39f   :  { %4404 = vrot.lane.b32.xlu0 %v4212_v33, %s9041_s6  ;;  %v5337_v37 = vsel %vm5267_vm4, %v5208_v18, %v14868_v50  ;;  %v14871_v50 = vld [vmem:[#allocation56_spill] sm:$0xff]  ;;  %v14886_v41 = vld [vmem:[#allocation187_spill] sm:$0xff] }
 0x3a0   :  { %v13358_v53 = vpop.permute.xlu1 %4368  ;;  %v5466_v31 = vsel %vm5396_vm5, %v5337_v37, %v14870_v30  ;;  %v4242_v58 = vshrl.u32 %v7837_v25, 16  ;;  %v4930_v37 = vsel %vm4816_vm1, %v8999_v1, %v14871_v50  ;;  %v14873_v30 = vld [vmem:[#allocation58_spill] sm:$0xff]  ;;  %v14888_v1 = vld [vmem:[#allocation217_spill] sm:$0xff] }
 0x3a1   :  { %v13363_v44 = vpop.permute.xlu0 %3606  ;;  %v5720_v13 = vsel %vm5654_vm7, %v5591_v0, %v13358_v53  ;;  %v7260_v53 = vld [vmem:[%s14333_s0 + $0x220] sm:$0xf]  ;;  %v5595_v7 = vsel %vm5525_vm6, %v5466_v31, %v13343_v9  ;;  %v14872_v0 = vld [vmem:[#allocation57_spill] sm:$0xff] }
 0x3a2   :  { %4786 = vrot.lane.b32.xlu1 %v4673_v61, %s9042_s18  ;;  %v14865_v61 = vld [vmem:[#allocation212_spill] sm:$0xff]  ;;  %v7836_v48 = vcombine.low %v7260_v53, %v13471_v56  ;;  %v7772_v36 = vcombine.low %v7260_v53, %v7260_v53 }
 0x3a3   :  { %4784 = vrot.lane.b32.xlu0 %v4672_v47, %s9042_s18  ;;  %v5339_v39 = vsel %vm5267_vm4, %v5210_v46, %v14865_v61  ;;  %v3207_v47 = vrot.slane %v7709_v3, 1  ;;  %v7771_v3 = vcombine.low %v7259_v54, %v7259_v54 }
 0x3a4   :  { %v13376_v63 = vpop.permute.xlu1 %4372  ;;  %v5468_v22 = vsel %vm5396_vm5, %v5339_v39, %v14869_v8  ;;  %v4237_v6 = vshll.u32 %v7836_v48, 16  ;;  %v4235_v54 = vshrl.u32 %v7836_v48, 16  ;;  %v7386_v39 = vld [vmem:[%s14333_s0 + $0x210] sm:$0xe]  ;;  %v7901_v8 = vcombine.low %v7389_v5, %v13458_v20  ;;  %v7199_v20 = vld [vmem:[%s14333_s0 + $0x240] sm:$0xe] }
 0x3a5   :  { %v4371_v15 = vpop.permute.xlu0 %4370  ;;  %v5724_v43 = vsel %vm5654_vm7, %v5595_v7, %v13376_v63  ;;  %v14878_v48 = vld [vmem:[#allocation105_spill] sm:$0xff]  ;;  %v14879_v7 = vld [vmem:[#allocation184_spill] sm:$0xff] }
 0x3a6   :  { %4790 = vrot.lane.b32.xlu1 %v4675_v32, %s9042_s18  ;;  %v5464_v32 = vsel %vm5396_vm5, %v5335_v51, %v14866_v45  ;;  %v4239_v60 = vrot.slane %v4237_v6, 1 }
 0x3a7   :  { %4788 = vrot.lane.b32.xlu0 %v4674_v49, %s9042_s18  ;;  %v3206_v49 = vrot.slane %v7708_v42, 1  ;;  %v5593_v4 = vsel %vm5525_vm6, %v5464_v32, %v13349_v28  ;;  %v5597_v42 = vsel %vm5525_vm6, %v5468_v22, %v13363_v44  ;;  %v4232_v44 = vrot.slane %v4230_v40, 1  ;;  %v9000_v22 = vld [vmem:[%s14333_s0 + $0x160] sm:$0xf]  ;;  %v14877_v40 = vld [vmem:[#allocation104_spill] sm:$0xff] }
 0x3a8   :  { %v4753_v34 = vpop.permute.xlu1 %4752  ;;  %v4240_v45 = vor.u32 %v4239_v60, %v4235_v54  ;;  %v7898_v32 = vcombine.low %v7386_v39, %v13427_v29  ;;  %v4677_v29 = vrot.slane %v7899_v11, 1  ;;  %v7201_v60 = vld [vmem:[%s14333_s0 + $0x250] sm:$0xe] }
 0x3a9   :  { %v4375_v33 = vpop.permute.xlu0 %4374  ;;  %v5849_v28 = vsel %vm5783_vm8, %v5720_v13, %v4753_v34  ;;  %v4244_v34 = vshll.u32 %v7837_v25, 16  ;;  %v4233_v18 = vor.u32 %v4232_v44, %v4228_v55  ;;  %v14876_v25 = vld [vmem:[#allocation103_spill] sm:$0xff]  ;;  %v14882_v55 = vld [vmem:[#allocation214_spill] sm:$0xff] }
 0x3aa   :  { %3322 = vrot.lane.b32.xlu1 %v3205_v23, %s9039_s11  ;;  %v5722_v23 = vsel %vm5654_vm7, %v5593_v4, %v4371_v15  ;;  %v5726_v14 = vsel %vm5654_vm7, %v5597_v42, %v4375_v33  ;;  %v4927_v4 = vsel %vm4816_vm1, %v9000_v22, %v14872_v0  ;;  %v4676_v13 = vrot.slane %v7898_v32, 1 }
 0x3ab   :  { %3320 = vrot.lane.b32.xlu0 %v3204_v24, %s9039_s11  ;;  %v4223_v24 = vshll.u32 %v7834_v26, 16  ;;  %v4246_v51 = vrot.slane %v4244_v34, 1  ;;  %v5083_v53 = vsel %vm5009_vm2, %v4927_v4, %v14876_v25  ;;  %v4679_v34 = vrot.slane %v7901_v8, 1  ;;  %v7263_v25 = vld [vmem:[%s14333_s0 + $0x248] sm:$0xf] }
 0x3ac   :  { %v4757_v27 = vpop.permute.xlu1 %4756 }
 0x3ad   :  { %v4755_v57 = vpop.permute.xlu0 %4754  ;;  %v5853_v21 = vsel %vm5783_vm8, %v5724_v43, %v4757_v27  ;;  %v4225_v63 = vrot.slane %v4223_v24, 1  ;;  %v4247_v2 = vor.u32 %v4246_v51, %v4242_v58  ;;  %v9001_v27 = vld [vmem:[%s14333_s0 + $0x178] sm:$0xf] }
 0x3ae   :  { %v5851_v17 = vsel %vm5783_vm8, %v5722_v23, %v4755_v57  ;;  %3326 = vrot.lane.b32.xlu1 %v3207_v47, %s9039_s11  ;;  %v4936_v31 = vsel %vm4816_vm1, %v9001_v27, %v14873_v30  ;;  %v9002_v57 = vld [vmem:[%s14333_s0 + $0x170] sm:$0xf]  ;;  %v9005_v27 = vld [vmem:[%s14333_s0 + $0x254] sm:$0x1] }
 0x3af   :  { %3324 = vrot.lane.b32.xlu0 %v3206_v49, %s9039_s11  ;;  %v7926_v15 = vcombine.low %v5849_v28, %v5851_v17  ;;  %v4226_v33 = vor.u32 %v4225_v63, %v4221_v19  ;;  %v7388_v49 = vld [vmem:[%s14333_s0 + $0x220] sm:$0xe]  ;;  %v14884_v63 = vld [vmem:[#allocation264_spill] sm:$0xff]  ;;  %v7713_v30 = vcombine.low %v7201_v60, %v9005_v27  ;;  %v9007_v27 = vld [vmem:[%s14333_s0 + $0x198] sm:$0xf] }
 0x3b0   :  { %v13494_v38 = vpop.permute.xlu1 %3608  ;;  %v7900_v23 = vcombine.low %v7388_v49, %v13471_v56  ;;  %v14875_v28 = vld [vmem:[#allocation102_spill] sm:$0xff]  ;;  %v5089_v56 = vsel %vm5009_vm2, %v4936_v31, %v14877_v40  ;;  %v7200_v49 = vld [vmem:[%s14333_s0 + $0x248] sm:$0xe]  ;;  %v13620_v31 = vld [vmem:[%s14333_s0 + $0x24c] sm:$0x1] }
 0x3b1   :  { %8369 = vmatprep.mubr.msk.bf16.mxu1 %vm6092_vm9, %v7926_v15  ;;  %v4759_v10 = vpop.permute.xlu0 %4758  ;;  %v5085_v17 = vsel %vm5009_vm2, %v4930_v37, %v14875_v28  ;;  %v14889_v37 = vld [vmem:[#allocation266_spill] sm:$0xff]  ;;  %v7264_v60 = vld [vmem:[%s14333_s0 + $0x250] sm:$0xf] }
 0x3b2   :  { %v5855_v9 = vsel %vm5783_vm8, %v5726_v14, %v4759_v10  ;;  %3642 = vrot.lane.b32.xlu1 %v7771_v3, %s9040_s21  ;;  %v14874_v3 = vld [vmem:[#allocation59_spill] sm:$0xff]  ;;  %v5214_v42 = vsel %vm5138_vm3, %v5085_v17, %v14879_v7  ;;  %v14881_v14 = vld [vmem:[#allocation186_spill] sm:$0xff]  ;;  %v4678_v51 = vrot.slane %v7900_v23, 1  ;;  %v3211_v7 = vrot.slane %v7713_v30, 1  ;;  %v14891_v30 = vld [vmem:[#allocation60_spill] sm:$0xff] }
 0x3b3   :  { %v7927_v62 = vcombine.low %v5853_v21, %v5855_v9  ;;  %3640 = vrot.lane.b32.xlu0 %v7770_v16, %s9040_s21  ;;  %v4933_v12 = vsel %vm4816_vm1, %v9002_v57, %v14874_v3  ;;  %v7198_v16 = vld [vmem:[%s14333_s0 + $0x238] sm:$0xe]  ;;  %v5218_v10 = vsel %vm5138_vm3, %v5089_v56, %v14881_v14  ;;  %v5343_v21 = vsel %vm5267_vm4, %v5214_v42, %v14882_v55  ;;  %v14883_v9 = vld [vmem:[#allocation215_spill] sm:$0xff] }
 0x3b4   :  { %v13504_v46 = vpop.permute.xlu1 %3612  ;;  %v5087_v24 = vsel %vm5009_vm2, %v4933_v12, %v14878_v48  ;;  %v5472_v6 = vsel %vm5396_vm5, %v5343_v21, %v14884_v63  ;;  %v7775_v63 = vcombine.low %v7263_v25, %v7263_v25 }
 0x3b5   :  { %8370 = vmatmul.mubr.msk.bf16.vlgmr.msra.gmra.mrb[0].mxu1 %vm6092_vm9, %v7927_v62  ;;  %v13507_v52 = vpop.permute.xlu0 %3610  ;;  %v9003_v62 = vld [vmem:[%s14333_s0 + $0x244] sm:$0x1]  ;;  %v5216_v39 = vsel %vm5138_vm3, %v5087_v24, %v14886_v41 }
 0x3b6   :  { %3646 = vrot.lane.b32.xlu1 %v7773_v59, %s9040_s21  ;;  %v14880_v59 = vld [vmem:[#allocation185_spill] sm:$0xff]  ;;  %v7711_v19 = vcombine.low %v7199_v20, %v9003_v62  ;;  %v5601_v32 = vsel %vm5525_vm6, %v5472_v6, %v13507_v52  ;;  %v5345_v50 = vsel %vm5267_vm4, %v5216_v39, %v14888_v1  ;;  %v9006_v20 = vld [vmem:[%s14333_s0 + $0x24c] sm:$0x1]  ;;  %v13665_v62 = vld [vmem:[%s14333_s0 + $0x254] sm:$0x1] }
 0x3b7   :  { %3644 = vrot.lane.b32.xlu0 %v7772_v36, %s9040_s21  ;;  %v5212_v43 = vsel %vm5138_vm3, %v5083_v53, %v14880_v59  ;;  %v7712_v57 = vcombine.low %v7200_v49, %v9006_v20  ;;  %v13640_v53 = vld [vmem:[%s14333_s0 + $0x244] sm:$0x1]  ;;  %v7265_v6 = vld [vmem:[%s14333_s0 + $0x258] sm:$0xf]  ;;  %v7840_v39 = vcombine.low %v7264_v60, %v13665_v62 }
 0x3b8   :  { %v4377_v61 = vpop.permute.xlu1 %4376  ;;  %v5341_v44 = vsel %vm5267_vm4, %v5212_v43, %v14883_v9  ;;  %v3209_v4 = vrot.slane %v7711_v19, 1  ;;  %v7777_v1 = vcombine.low %v7265_v6, %v7265_v6 }
 0x3b9   :  { %v13517_v47 = vpop.permute.xlu0 %3614  ;;  %v3210_v14 = vrot.slane %v7712_v57, 1 }
 0x3ba   :  { %4410 = vrot.lane.b32.xlu1 %v4233_v18, %s9041_s6  ;;  %v14885_v18 = vld [vmem:[#allocation265_spill] sm:$0xff] }
 0x3bb   :  { %4408 = vrot.lane.b32.xlu0 %v4226_v33, %s9041_s6  ;;  %v5470_v58 = vsel %vm5396_vm5, %v5341_v44, %v14885_v18  ;;  %v9004_v33 = vld [vmem:[%s14333_s0 + $0x23c] sm:$0x1] }
 0x3bc   :  { %v13526_v35 = vpop.permute.xlu1 %4380  ;;  %v7710_v54 = vcombine.low %v7198_v16, %v9004_v33 }
 0x3bd   :  { %v4379_v26 = vpop.permute.xlu0 %4378 }
 0x3be   :  { %4414 = vrot.lane.b32.xlu1 %v4247_v2, %s9041_s6  ;;  %v14887_v2 = vld [vmem:[#allocation216_spill] sm:$0xff]  ;;  %v5730_v22 = vsel %vm5654_vm7, %v5601_v32, %v4379_v26  ;;  %v3208_v23 = vrot.slane %v7710_v54, 1 }
 0x3bf   :  { %4412 = vrot.lane.b32.xlu0 %v4240_v45, %s9041_s6  ;;  %v5347_v11 = vsel %vm5267_vm4, %v5218_v10, %v14887_v2  ;;  %v5599_v45 = vsel %vm5525_vm6, %v5470_v58, %v13494_v38 }
 0x3c0   :  { %v4761_v15 = vpop.permute.xlu1 %4760  ;;  %v5728_v8 = vsel %vm5654_vm7, %v5599_v45, %v4377_v61  ;;  %v14890_v61 = vld [vmem:[#allocation267_spill] sm:$0xff] }
 0x3c1   :  { %v4383_v36 = vpop.permute.xlu0 %4382  ;;  %v5857_v38 = vsel %vm5783_vm8, %v5728_v8, %v4761_v15  ;;  %v5474_v26 = vsel %vm5396_vm5, %v5345_v50, %v14890_v61  ;;  %v7839_v15 = vcombine.low %v7263_v25, %v13620_v31  ;;  %v4942_v61 = vsel %vm4816_vm1, %v9007_v27, %v14891_v30  ;;  %v14893_v25 = vld [vmem:[#allocation62_spill] sm:$0xff]  ;;  %v14907_v27 = vld [vmem:[#allocation220_spill] sm:$0xff] }
 0x3c2   :  { %4794 = vrot.lane.b32.xlu1 %v4677_v29, %s9042_s18  ;;  %v5476_v29 = vsel %vm5396_vm5, %v5347_v11, %v14889_v37  ;;  %v5603_v3 = vsel %vm5525_vm6, %v5474_v26, %v13504_v46 }
 0x3c3   :  { %4792 = vrot.lane.b32.xlu0 %v4676_v13, %s9042_s18  ;;  %v5605_v12 = vsel %vm5525_vm6, %v5476_v29, %v13517_v47  ;;  %v5732_v40 = vsel %vm5654_vm7, %v5603_v3, %v13526_v35  ;;  %v7262_v35 = vld [vmem:[%s14333_s0 + $0x240] sm:$0xf]  ;;  %v4258_v18 = vshll.u32 %v7839_v15, 16  ;;  %v4256_v50 = vshrl.u32 %v7839_v15, 16  ;;  %v7391_v15 = vld [vmem:[%s14333_s0 + $0x248] sm:$0xe] }
 0x3c4   :  { %v4765_v5 = vpop.permute.xlu1 %4764  ;;  %v5734_v46 = vsel %vm5654_vm7, %v5605_v12, %v4383_v36  ;;  %v7838_v10 = vcombine.low %v7262_v35, %v13640_v53  ;;  %v13658_v36 = vld [vmem:[%s14333_s0 + $0x25c] sm:$0x1]  ;;  %v7774_v41 = vcombine.low %v7262_v35, %v7262_v35 }
 0x3c5   :  { %v4763_v0 = vpop.permute.xlu0 %4762  ;;  %v5861_v16 = vsel %vm5783_vm8, %v5732_v40, %v4765_v5  ;;  %v7841_v54 = vcombine.low %v7265_v6, %v13658_v36  ;;  %v4260_v37 = vrot.slane %v4258_v18, 1  ;;  %v14900_v6 = vld [vmem:[#allocation189_spill] sm:$0xff] }
 0x3c6   :  { %v5859_v52 = vsel %vm5783_vm8, %v5730_v22, %v4763_v0  ;;  %4798 = vrot.lane.b32.xlu1 %v4679_v34, %s9042_s18  ;;  %v4251_v2 = vshll.u32 %v7838_v10, 16  ;;  %v7776_v22 = vcombine.low %v7264_v60, %v7264_v60  ;;  %v4249_v0 = vshrl.u32 %v7838_v10, 16 }
 0x3c7   :  { %v7928_v13 = vcombine.low %v5857_v38, %v5859_v52  ;;  %4796 = vrot.lane.b32.xlu0 %v4678_v51, %s9042_s18  ;;  %v4272_v29 = vshll.u32 %v7841_v54, 16  ;;  %v4265_v52 = vshll.u32 %v7840_v39, 16  ;;  %v4261_v57 = vor.u32 %v4260_v37, %v4256_v50  ;;  %v14905_v37 = vld [vmem:[#allocation269_spill] sm:$0xff] }
 0x3c8   :  { %v8339_v28 = vpop.f32.mrb[0].mxu0  ;;  %v13632_v17 = vpop.permute.xlu1 %3616  ;;  %v4253_v38 = vrot.slane %v4251_v2, 1  ;;  %v4270_v3 = vshrl.u32 %v7841_v54, 16  ;;  %v14902_v54 = vld [vmem:[#allocation218_spill] sm:$0xff] }
 0x3c9   :  { %v6227_v56 = vpop.f32.mrb[1].mxu0  ;;  %8373 = vmatprep.mubr.msk.bf16.mxu1 %vm6092_vm9, %v7928_v13  ;;  %v4767_v47 = vpop.permute.xlu0 %4766  ;;  %v6874_v58 = vmul.f32 %v8339_v28, %v8339_v28  ;;  %v9008_v13 = vld [vmem:[%s14333_s0 + $0x190] sm:$0xf]  ;;  %v4274_v12 = vrot.slane %v4272_v29, 1 }
 0x3ca   :  { %v5863_v48 = vsel %vm5783_vm8, %v5734_v46, %v4767_v47  ;;  %v8340_v24 = vpop.f32.mrb[2].mxu0  ;;  %3330 = vrot.lane.b32.xlu1 %v3209_v4, %s9039_s11  ;;  %v6872_v55 = vmul.f32 %v6227_v56, %v6227_v56  ;;  %v4254_v46 = vor.u32 %v4253_v38, %v4249_v0  ;;  %v4267_v47 = vrot.slane %v4265_v52, 1  ;;  %v14906_v38 = vld [vmem:[#allocation115_spill] sm:$0xff] }
 0x3cb   :  { %v7929_v42 = vcombine.low %v5861_v16, %v5863_v48  ;;  %v8113_v59 = vpack.c.bf16 %v8340_v24, %v8339_v28  ;;  %v6230_v43 = vpop.f32.mrb[3].mxu0  ;;  %3328 = vrot.lane.b32.xlu0 %v3208_v23, %s9039_s11  ;;  %v6875_v11 = vmul.f32 %v8340_v24, %v8340_v24  ;;  %v14892_v23 = vld [vmem:[#allocation61_spill] sm:$0xff]  ;;  %v9010_v16 = vld [vmem:[%s14333_s0 + $0x1a0] sm:$0xf]  ;;  %v14894_v48 = vld [vmem:[#allocation63_spill] sm:$0xff]  ;;  %v4275_v2 = vor.u32 %v4274_v12, %v4270_v3 }
 0x3cc   :  { %v8108_v21 = vpack.c.bf16 %v6230_v43, %v6227_v56  ;;  %v6802_v9 = vadd.f32 %v6230_v43, %v6227_v56  ;;  %v6873_v44 = vmul.f32 %v6230_v43, %v6230_v43  ;;  %v13660_v34 = vpop.permute.xlu1 %3620  ;;  %v4939_v20 = vsel %vm4816_vm1, %v9008_v13, %v14892_v23  ;;  %v14897_v43 = vld [vmem:[#allocation108_spill] sm:$0xff] }
 0x3cd   :  { %8265 = vst [vmem:[%s14335_s2 + $0x8] sm:$0xff] %v8113_v59   ;;  %8374 = vmatmul.mubr.msk.bf16.gmra.mrb[4].mxu1 %vm6092_vm9, %v7929_v42  ;;  %v13671_v19 = vpop.permute.xlu0 %3618  ;;  %v4263_v56 = vshrl.u32 %v7840_v39, 16  ;;  %v14896_v42 = vld [vmem:[#allocation107_spill] sm:$0xff]  ;;  %v7392_v23 = vld [vmem:[%s14333_s0 + $0x250] sm:$0xe] }
 0x3ce   :  { %8109 = vst [vmem:[%s14335_s2] sm:$0xff] %v8108_v21   ;;  %v6803_v51 = vadd.f32 %v8339_v28, %v6802_v9  ;;  %v6936_v33 = vadd.f32 %v6873_v44, %v6872_v55  ;;  %3334 = vrot.lane.b32.xlu1 %v3211_v7, %s9039_s11  ;;  %v9009_v28 = vld [vmem:[%s14333_s0 + $0x1a8] sm:$0xf]  ;;  %v14895_v7 = vld [vmem:[#allocation106_spill] sm:$0xff]  ;;  %v5091_v59 = vsel %vm5009_vm2, %v4939_v20, %v14896_v42  ;;  %v14898_v21 = vld [vmem:[#allocation109_spill] sm:$0xff] }
 0x3cf   :  { %3332 = vrot.lane.b32.xlu0 %v3210_v14, %s9039_s11  ;;  %v4948_v40 = vsel %vm4816_vm1, %v9009_v28, %v14893_v25  ;;  %v5093_v35 = vsel %vm5009_vm2, %v4942_v61, %v14895_v7  ;;  %v7390_v55 = vld [vmem:[%s14333_s0 + $0x240] sm:$0xe]  ;;  %v14899_v44 = vld [vmem:[#allocation188_spill] sm:$0xff]  ;;  %v5220_v18 = vsel %vm5138_vm3, %v5091_v59, %v14900_v6  ;;  %v14908_v20 = vld [vmem:[#allocation221_spill] sm:$0xff] }
 0x3d0   :  { %v6937_v45 = vadd.f32 %v6936_v33, %v6874_v58  ;;  %v4385_v32 = vpop.permute.xlu1 %4384  ;;  %v13686_v5 = vadd.f32 %v8340_v24, %v6803_v51  ;;  %v4945_v24 = vsel %vm4816_vm1, %v9010_v16, %v14894_v48  ;;  %v5097_v14 = vsel %vm5009_vm2, %v4948_v40, %v14897_v43  ;;  %v14901_v58 = vld [vmem:[#allocation190_spill] sm:$0xff] }
 0x3d1   :  { %v13688_v49 = vpop.permute.xlu0 %3622  ;;  %v5095_v9 = vsel %vm5009_vm2, %v4945_v24, %v14898_v21  ;;  %v5226_v51 = vsel %vm5138_vm3, %v5097_v14, %v14901_v58  ;;  %v7902_v0 = vcombine.low %v7390_v55, %v13640_v53  ;;  %v14909_v25 = vld [vmem:[#allocation270_spill] sm:$0xff]  ;;  %v9012_v58 = vld [vmem:[%s14333_s0 + $0x25c] sm:$0x1] }
 0x3d2   :  { %3650 = vrot.lane.b32.xlu1 %v7775_v63, %s9040_s21  ;;  %v13691_v8 = vadd.f32 %v6937_v45, %v6875_v11  ;;  %v5222_v63 = vsel %vm5138_vm3, %v5093_v35, %v14899_v44  ;;  %v7903_v11 = vcombine.low %v7391_v15, %v13620_v31  ;;  %v7393_v45 = vld [vmem:[%s14333_s0 + $0x258] sm:$0xe]  ;;  %v5224_v52 = vsel %vm5138_vm3, %v5095_v9, %v14906_v38 }
 0x3d3   :  { %3648 = vrot.lane.b32.xlu0 %v7774_v41, %s9040_s21  ;;  %v5351_v60 = vsel %vm5267_vm4, %v5222_v63, %v14902_v54  ;;  %v14903_v41 = vld [vmem:[#allocation219_spill] sm:$0xff]  ;;  %v5355_v31 = vsel %vm5267_vm4, %v5226_v51, %v14907_v27  ;;  %v5353_v53 = vsel %vm5267_vm4, %v5224_v52, %v14908_v20  ;;  %v7905_v28 = vcombine.low %v7393_v45, %v13658_v36  ;;  %v7202_v35 = vld [vmem:[%s14333_s0 + $0x258] sm:$0xe] }
 0x3d4   :  { %v13694_v4 = vpop.permute.xlu1 %4388  ;;  %v5349_v39 = vsel %vm5267_vm4, %v5220_v18, %v14903_v41  ;;  %v4680_v36 = vrot.slane %v7902_v0, 1  ;;  %v7904_v15 = vcombine.low %v7392_v23, %v13665_v62  ;;  %v7714_v51 = vcombine.low %v7202_v35, %v9012_v58  ;;  %v13835_v0 = vld [vmem:[%s14333_s0 + $0x264] sm:$0x1]  ;;  %v9014_v52 = vld [vmem:[%s14333_s0 + $0x26c] sm:$0x1] }
 0x3d5   :  { %v4387_v26 = vpop.permute.xlu0 %4386  ;;  %v5478_v29 = vsel %vm5396_vm5, %v5349_v39, %v14905_v37  ;;  %v9013_v37 = vld [vmem:[%s14333_s0 + $0x274] sm:$0x1]  ;;  %v7266_v23 = vld [vmem:[%s14333_s0 + $0x260] sm:$0xf]  ;;  %v14919_v58 = vld [vmem:[#allocation191_spill] sm:$0xff] }
 0x3d6   :  { %3654 = vrot.lane.b32.xlu1 %v7777_v1, %s9040_s21  ;;  %v14904_v1 = vld [vmem:[#allocation268_spill] sm:$0xff]  ;;  %v5607_v30 = vsel %vm5525_vm6, %v5478_v29, %v13632_v17  ;;  %v5484_v17 = vsel %vm5396_vm5, %v5355_v31, %v14909_v25  ;;  %v4682_v18 = vrot.slane %v7904_v15, 1  ;;  %v3212_v38 = vrot.slane %v7714_v51, 1 }
 0x3d7   :  { %3652 = vrot.lane.b32.xlu0 %v7776_v22, %s9040_s21  ;;  %v5480_v50 = vsel %vm5396_vm5, %v5351_v60, %v14904_v1  ;;  %v4268_v22 = vor.u32 %v4267_v47, %v4263_v56  ;;  %v7203_v56 = vld [vmem:[%s14333_s0 + $0x260] sm:$0xe]  ;;  %v5613_v48 = vsel %vm5525_vm6, %v5484_v17, %v13688_v49  ;;  %v9011_v49 = vld [vmem:[%s14333_s0 + $0x264] sm:$0x1]  ;;  %v13866_v17 = vld [vmem:[%s14333_s0 + $0x27c] sm:$0x1] }
 0x3d8   :  { %v4769_v10 = vpop.permute.xlu1 %4768  ;;  %v5609_v61 = vsel %vm5525_vm6, %v5480_v50, %v13671_v19  ;;  %v7715_v14 = vcombine.low %v7203_v56, %v9011_v49  ;;  %v9016_v56 = vld [vmem:[%s14333_s0 + $0x1b0] sm:$0xf] }
 0x3d9   :  { %v4391_v33 = vpop.permute.xlu0 %4390  ;;  %v5738_v3 = vsel %vm5654_vm7, %v5609_v61, %v4387_v26 }
 0x3da   :  { %4418 = vrot.lane.b32.xlu1 %v4261_v57, %s9041_s6  ;;  %v5736_v57 = vsel %vm5654_vm7, %v5607_v30, %v4385_v32  ;;  %v14910_v32 = vld [vmem:[#allocation271_spill] sm:$0xff]  ;;  %v5742_v59 = vsel %vm5654_vm7, %v5613_v48, %v4391_v33  ;;  %v3213_v45 = vrot.slane %v7715_v14, 1  ;;  %v7269_v14 = vld [vmem:[%s14333_s0 + $0x278] sm:$0xf] }
 0x3db   :  { %4416 = vrot.lane.b32.xlu0 %v4254_v46, %s9041_s6  ;;  %v5865_v19 = vsel %vm5783_vm8, %v5736_v57, %v4769_v10  ;;  %v4681_v46 = vrot.slane %v7903_v11, 1  ;;  %v5482_v26 = vsel %vm5396_vm5, %v5353_v53, %v14910_v32  ;;  %v14912_v32 = vld [vmem:[#allocation65_spill] sm:$0xff]  ;;  %v14914_v48 = vld [vmem:[#allocation67_spill] sm:$0xff] }
 0x3dc   :  { %v4773_v13 = vpop.permute.xlu1 %4772  ;;  %v5611_v16 = vsel %vm5525_vm6, %v5482_v26, %v13660_v34  ;;  %v4683_v34 = vrot.slane %v7905_v28, 1  ;;  %v4951_v26 = vsel %vm4816_vm1, %v9016_v56, %v14912_v32  ;;  %v14927_v56 = vld [vmem:[#allocation273_spill] sm:$0xff] }
 0x3dd   :  { %v4771_v12 = vpop.permute.xlu0 %4770  ;;  %v5740_v42 = vsel %vm5654_vm7, %v5611_v16, %v13694_v4  ;;  %v9018_v16 = vld [vmem:[%s14333_s0 + $0x1c0] sm:$0xf] }
 0x3de   :  { %v5867_v40 = vsel %vm5783_vm8, %v5738_v3, %v4771_v12  ;;  %4422 = vrot.lane.b32.xlu1 %v4275_v2, %s9041_s6  ;;  %v5869_v10 = vsel %vm5783_vm8, %v5740_v42, %v4773_v13  ;;  %v7204_v2 = vld [vmem:[%s14333_s0 + $0x268] sm:$0xe]  ;;  %v13857_v3 = vcombine.low %v7266_v23, %v13835_v0  ;;  %v13891_v42 = vld [vmem:[%s14333_s0 + $0x274] sm:$0x1] }
 0x3df   :  { %v7930_v47 = vcombine.low %v5865_v19, %v5867_v40  ;;  %4420 = vrot.lane.b32.xlu0 %v4268_v22, %s9041_s6  ;;  %v13830_v22 = vld [vmem:[%s14333_s0 + $0x26c] sm:$0x1]  ;;  %v7716_v27 = vcombine.low %v7204_v2, %v9014_v52  ;;  %v7267_v13 = vld [vmem:[%s14333_s0 + $0x268] sm:$0xf]  ;;  %v9015_v19 = vld [vmem:[%s14333_s0 + $0x1b8] sm:$0xf] }
 0x3e0   :  { %v8343_v24 = vpop.f32.mrb[4].mxu0  ;;  %v13785_v7 = vpop.permute.xlu1 %3310  ;;  %v13854_v57 = vcombine.low %v7267_v13, %v13830_v22  ;;  %v14911_v40 = vld [vmem:[#allocation64_spill] sm:$0xff] }
 0x3e1   :  { %v6243_v43 = vpop.f32.mrb[5].mxu0  ;;  %8377 = vmatprep.mubr.msk.bf16.mxu1 %vm6092_vm9, %v7930_v47  ;;  %v4775_v62 = vpop.permute.xlu0 %4774  ;;  %v6878_v1 = vmul.f32 %v8343_v24, %v8343_v24  ;;  %v3214_v25 = vrot.slane %v7716_v27, 1  ;;  %v9017_v47 = vld [vmem:[%s14333_s0 + $0x1c8] sm:$0xf] }
 0x3e2   :  { %v6805_v55 = vadd.f32 %v13686_v5, %v6243_v43  ;;  %v6876_v21 = vmul.f32 %v6243_v43, %v6243_v43  ;;  %v5871_v9 = vsel %vm5783_vm8, %v5742_v59, %v4775_v62  ;;  %v8344_v4 = vpop.f32.mrb[6].mxu0  ;;  %4802 = vrot.lane.b32.xlu1 %v4681_v46, %s9042_s18  ;;  %v7205_v5 = vld [vmem:[%s14333_s0 + $0x270] sm:$0xe]  ;;  %v4954_v46 = vsel %vm4816_vm1, %v9015_v19, %v14911_v40  ;;  %v14915_v59 = vld [vmem:[#allocation110_spill] sm:$0xff]  ;;  %v14916_v62 = vld [vmem:[#allocation111_spill] sm:$0xff] }
 0x3e3   :  { %v7931_v44 = vcombine.low %v5869_v10, %v5871_v9  ;;  %v8123_v63 = vpack.c.bf16 %v8344_v4, %v8343_v24  ;;  %v6246_v6 = vpop.f32.mrb[7].mxu0  ;;  %4800 = vrot.lane.b32.xlu0 %v4680_v36, %s9042_s18  ;;  %v7717_v29 = vcombine.low %v7205_v5, %v9013_v37  ;;  %v6879_v31 = vmul.f32 %v8344_v4, %v8344_v4  ;;  %v14913_v36 = vld [vmem:[#allocation66_spill] sm:$0xff]  ;;  %v14920_v5 = vld [vmem:[#allocation117_spill] sm:$0xff]  ;;  %v14924_v37 = vld [vmem:[#allocation223_spill] sm:$0xff] }
 0x3e4   :  { %v6939_v33 = vadd.f32 %v13691_v8, %v6876_v21  ;;  %v8118_v54 = vpack.c.bf16 %v6246_v6, %v6243_v43  ;;  %v6806_v60 = vadd.f32 %v6805_v55, %v6246_v6  ;;  %v6877_v41 = vmul.f32 %v6246_v6, %v6246_v6  ;;  %v13809_v39 = vpop.permute.xlu1 %3626  ;;  %v14917_v21 = vld [vmem:[#allocation112_spill] sm:$0xff] }
 0x3e5   :  { %8267 = vst [vmem:[%s14335_s2 + $0x18] sm:$0xff] %v8123_v63   ;;  %8378 = vmatmul.mubr.msk.bf16.gmra.mrb[8].mxu1 %vm6092_vm9, %v7931_v44  ;;  %v13818_v11 = vpop.permute.xlu0 %3624  ;;  %v3215_v12 = vrot.slane %v7717_v29, 1  ;;  %v4960_v15 = vsel %vm4816_vm1, %v9017_v47, %v14913_v36  ;;  %v5101_v43 = vsel %vm5009_vm2, %v4954_v46, %v14915_v59  ;;  %v4286_v10 = vshll.u32 %v13854_v57, 16  ;;  %v14928_v47 = vld [vmem:[#allocation224_spill] sm:$0xff] }
 0x3e6   :  { %8266 = vst [vmem:[%s14335_s2 + $0x10] sm:$0xff] %v8118_v54   ;;  %v6807_v8 = vadd.f32 %v8343_v24, %v6806_v60  ;;  %v6940_v50 = vadd.f32 %v6939_v33, %v6877_v41  ;;  %4806 = vrot.lane.b32.xlu1 %v4683_v34, %s9042_s18  ;;  %v4957_v24 = vsel %vm4816_vm1, %v9018_v16, %v14914_v48  ;;  %v4279_v55 = vshll.u32 %v13857_v3, 16  ;;  %v14921_v41 = vld [vmem:[#allocation119_spill] sm:$0xff] }
 0x3e7   :  { %4804 = vrot.lane.b32.xlu0 %v4682_v18, %s9042_s18  ;;  %v5099_v34 = vsel %vm5009_vm2, %v4951_v26, %v14916_v62  ;;  %v5105_v9 = vsel %vm5009_vm2, %v4960_v15, %v14917_v21  ;;  %v7779_v63 = vcombine.low %v7267_v13, %v7267_v13  ;;  %v13908_v6 = vcombine.low %v7269_v14, %v13866_v17  ;;  %v7268_v18 = vld [vmem:[%s14333_s0 + $0x270] sm:$0xf]  ;;  %v14929_v15 = vld [vmem:[#allocation274_spill] sm:$0xff] }
 0x3e8   :  { %v6941_v30 = vadd.f32 %v6940_v50, %v6878_v1  ;;  %v13841_v61 = vpop.permute.xlu1 %3630  ;;  %v13849_v20 = vadd.f32 %v8344_v4, %v6807_v8  ;;  %v14918_v4 = vld [vmem:[#allocation113_spill] sm:$0xff]  ;;  %v5230_v51 = vsel %vm5138_vm3, %v5101_v43, %v14919_v58  ;;  %v5228_v33 = vsel %vm5138_vm3, %v5099_v34, %v14920_v5  ;;  %v14923_v8 = vld [vmem:[#allocation222_spill] sm:$0xff] }
 0x3e9   :  { %v13851_v53 = vpop.permute.xlu0 %3628  ;;  %v5103_v44 = vsel %vm5009_vm2, %v4957_v24, %v14918_v4  ;;  %v7778_v54 = vcombine.low %v7266_v23, %v7266_v23  ;;  %v13919_v60 = vcombine.low %v7268_v18, %v13891_v42  ;;  %v5234_v2 = vsel %vm5138_vm3, %v5105_v9, %v14921_v41  ;;  %v14925_v23 = vld [vmem:[#allocation225_spill] sm:$0xff]  ;;  %v7394_v58 = vld [vmem:[%s14333_s0 + $0x260] sm:$0xe] }
 0x3ea   :  { %3338 = vrot.lane.b32.xlu1 %v3213_v45, %s9039_s11  ;;  %v13860_v28 = vadd.f32 %v6941_v30, %v6879_v31  ;;  %v14922_v45 = vld [vmem:[#allocation121_spill] sm:$0xff]  ;;  %v5359_v50 = vsel %vm5267_vm4, %v5230_v51, %v14923_v8  ;;  %v5357_v29 = vsel %vm5267_vm4, %v5228_v33, %v14924_v37  ;;  %v4284_v27 = vshrl.u32 %v13854_v57, 16 }
 0x3eb   :  { %3336 = vrot.lane.b32.xlu0 %v3212_v38, %s9039_s11  ;;  %v5232_v1 = vsel %vm5138_vm3, %v5103_v44, %v14922_v45  ;;  %v4288_v31 = vrot.slane %v4286_v10, 1  ;;  %v4277_v30 = vshrl.u32 %v13857_v3, 16  ;;  %v4281_v13 = vrot.slane %v4279_v55, 1 }
 0x3ec   :  { %v4395_v35 = vpop.permute.xlu1 %4394  ;;  %v7781_v40 = vcombine.low %v7269_v14, %v7269_v14  ;;  %v4300_v46 = vshll.u32 %v13908_v6, 16  ;;  %v5486_v32 = vsel %vm5396_vm5, %v5357_v29, %v14927_v56  ;;  %v7780_v3 = vcombine.low %v7268_v18, %v7268_v18 }
 0x3ed   :  { %v4393_v49 = vpop.permute.xlu0 %4392  ;;  %v4293_v26 = vshll.u32 %v13919_v60, 16  ;;  %v5363_v36 = vsel %vm5267_vm4, %v5234_v2, %v14928_v47  ;;  %v5615_v48 = vsel %vm5525_vm6, %v5486_v32, %v13818_v11  ;;  %v4289_v34 = vor.u32 %v4288_v31, %v4284_v27 }
 0x3ee   :  { %3342 = vrot.lane.b32.xlu1 %v3215_v12, %s9039_s11  ;;  %v5361_v12 = vsel %vm5267_vm4, %v5232_v1, %v14925_v23  ;;  %v5744_v43 = vsel %vm5654_vm7, %v5615_v48, %v4393_v49  ;;  %v4282_v14 = vor.u32 %v4281_v13, %v4277_v30  ;;  %v5492_v10 = vsel %vm5396_vm5, %v5363_v36, %v13785_v7  ;;  %v7396_v30 = vld [vmem:[%s14333_s0 + $0x270] sm:$0xe] }
 0x3ef   :  { %3340 = vrot.lane.b32.xlu0 %v3214_v25, %s9039_s11  ;;  %v14926_v25 = vld [vmem:[#allocation272_spill] sm:$0xff]  ;;  %v5490_v16 = vsel %vm5396_vm5, %v5361_v12, %v14929_v15  ;;  %v4298_v21 = vshrl.u32 %v13908_v6, 16  ;;  %v4302_v11 = vrot.slane %v4300_v46, 1  ;;  %v5621_v49 = vsel %vm5525_vm6, %v5492_v10, %v13841_v61  ;;  %v9021_v10 = vld [vmem:[%s14333_s0 + $0x1f8] sm:$0xf] }
 0x3f0   :  { %v4399_v38 = vpop.permute.xlu1 %4398  ;;  %v5488_v19 = vsel %vm5396_vm5, %v5359_v50, %v14926_v25  ;;  %v4291_v4 = vshrl.u32 %v13919_v60, 16  ;;  %v4295_v7 = vrot.slane %v4293_v26, 1  ;;  %v5619_v44 = vsel %vm5525_vm6, %v5490_v16, %v13851_v53 }
 0x3f1   :  { %v4397_v52 = vpop.permute.xlu0 %4396  ;;  %v5617_v57 = vsel %vm5525_vm6, %v5488_v19, %v13809_v39  ;;  %v4303_v45 = vor.u32 %v4302_v11, %v4298_v21  ;;  %v7906_v29 = vcombine.low %v7394_v58, %v13835_v0  ;;  %v14933_v11 = vld [vmem:[#allocation114_spill] sm:$0xff] }
 0x3f2   :  { %3658 = vrot.lane.b32.xlu1 %v7779_v63, %s9040_s21  ;;  %v5746_v24 = vsel %vm5654_vm7, %v5617_v57, %v4395_v35  ;;  %v7395_v35 = vld [vmem:[%s14333_s0 + $0x268] sm:$0xe]  ;;  %v5750_v63 = vsel %vm5654_vm7, %v5621_v49, %v4399_v38  ;;  %v5748_v51 = vsel %vm5654_vm7, %v5619_v44, %v4397_v52  ;;  %v4296_v37 = vor.u32 %v4295_v7, %v4291_v4  ;;  %v9022_v49 = vld [vmem:[%s14333_s0 + $0x1f0] sm:$0xf] }
 0x3f3   :  { %3656 = vrot.lane.b32.xlu0 %v7778_v54, %s9040_s21  ;;  %v7907_v54 = vcombine.low %v7395_v35, %v13830_v22  ;;  %v7397_v22 = vld [vmem:[%s14333_s0 + $0x278] sm:$0xe]  ;;  %v4684_v19 = vrot.slane %v7906_v29, 1  ;;  %v14935_v7 = vld [vmem:[#allocation116_spill] sm:$0xff] }
 0x3f4   :  { %v4779_v59 = vpop.permute.xlu1 %4778  ;;  %v7909_v25 = vcombine.low %v7397_v22, %v13866_v17  ;;  %v14944_v29 = vld [vmem:[#allocation228_spill] sm:$0xff] }
 0x3f5   :  { %v5875_v39 = vsel %vm5783_vm8, %v5746_v24, %v4779_v59  ;;  %v4777_v62 = vpop.permute.xlu0 %4776  ;;  %v4685_v13 = vrot.slane %v7907_v54, 1  ;;  %v9019_v24 = vld [vmem:[%s14333_s0 + $0x1e8] sm:$0xf]  ;;  %v14930_v59 = vld [vmem:[#allocation2_spill] sm:$0xff] }
 0x3f6   :  { %v5873_v55 = vsel %vm5783_vm8, %v5744_v43, %v4777_v62  ;;  %3662 = vrot.lane.b32.xlu1 %v7781_v40, %s9040_s21  ;;  %v7908_v40 = vcombine.low %v7396_v30, %v13891_v42  ;;  %v4687_v26 = vrot.slane %v7909_v25, 1  ;;  %v4966_v43 = vsel %vm4816_vm1, %v9019_v24, %v14930_v59  ;;  %v9020_v62 = vld [vmem:[%s14333_s0 + $0x1e0] sm:$0xf]  ;;  %v14940_v54 = vld [vmem:[#allocation127_spill] sm:$0xff] }
 0x3f7   :  { %v7932_v9 = vcombine.low %v5873_v55, %v5875_v39  ;;  %3660 = vrot.lane.b32.xlu0 %v7780_v3, %s9040_s21  ;;  %v14932_v55 = vld [vmem:[#allocation4_spill] sm:$0xff]  ;;  %v5109_v35 = vsel %vm5009_vm2, %v4966_v43, %v14933_v11 }
 0x3f8   :  { %v8347_v6 = vpop.f32.mrb[8].mxu0  ;;  %v4783_v18 = vpop.permute.xlu1 %4782  ;;  %v4686_v36 = vrot.slane %v7908_v40, 1  ;;  %v4972_v21 = vsel %vm4816_vm1, %v9021_v10, %v14932_v55 }
 0x3f9   :  { %v5879_v61 = vsel %vm5783_vm8, %v5750_v63, %v4783_v18  ;;  %v6259_v5 = vpop.f32.mrb[9].mxu0  ;;  %8381 = vmatprep.mubr.msk.bf16.mxu1 %vm6092_vm9, %v7932_v9  ;;  %v4781_v33 = vpop.permute.xlu0 %4780  ;;  %v6882_v23 = vmul.f32 %v8347_v6, %v8347_v6  ;;  %v14934_v9 = vld [vmem:[#allocation5_spill] sm:$0xff]  ;;  %v14936_v63 = vld [vmem:[#allocation118_spill] sm:$0xff]  ;;  %v14937_v18 = vld [vmem:[#allocation123_spill] sm:$0xff] }
 0x3fa   :  { %v6809_v53 = vadd.f32 %v13849_v20, %v6259_v5  ;;  %v6880_v60 = vmul.f32 %v6259_v5, %v6259_v5  ;;  %v5877_v41 = vsel %vm5783_vm8, %v5748_v51, %v4781_v33  ;;  %v8348_v2 = vpop.f32.mrb[10].mxu0  ;;  %4426 = vrot.lane.b32.xlu1 %v4289_v34, %s9041_s6  ;;  %v14931_v34 = vld [vmem:[#allocation3_spill] sm:$0xff]  ;;  %v4969_v4 = vsel %vm4816_vm1, %v9022_v49, %v14934_v9  ;;  %v14938_v51 = vld [vmem:[#allocation120_spill] sm:$0xff] }
 0x3fb   :  { %v7933_v1 = vcombine.low %v5877_v41, %v5879_v61  ;;  %v8133_v8 = vpack.c.bf16 %v8348_v2, %v8347_v6  ;;  %v6262_v50 = vpop.f32.mrb[11].mxu0  ;;  %4424 = vrot.lane.b32.xlu0 %v4282_v14, %s9041_s6  ;;  %v6883_v46 = vmul.f32 %v8348_v2, %v8348_v2  ;;  %v4963_v14 = vsel %vm4816_vm1, %v9020_v62, %v14931_v34 }
 0x3fc   :  { %v6943_v20 = vadd.f32 %v13860_v28, %v6880_v60  ;;  %v8128_v38 = vpack.c.bf16 %v6262_v50, %v6259_v5  ;;  %v6810_v52 = vadd.f32 %v6809_v53, %v6262_v50  ;;  %v6881_v27 = vmul.f32 %v6262_v50, %v6262_v50  ;;  %v3315_v31 = vpop.permute.xlu1 %3314  ;;  %v14939_v5 = vld [vmem:[#allocation125_spill] sm:$0xff]  ;;  %v14941_v60 = vld [vmem:[#allocation226_spill] sm:$0xff]  ;;  %v14943_v50 = vld [vmem:[#allocation227_spill] sm:$0xff] }
 0x3fd   :  { %8269 = vst [vmem:[%s14335_s2 + $0x28] sm:$0xff] %v8133_v8   ;;  %8382 = vmatmul.mubr.msk.bf16.gmra.mrb[12].mxu1 %vm6092_vm9, %v7933_v1  ;;  %v3313_v0 = vpop.permute.xlu0 %3312  ;;  %v5107_v44 = vsel %vm5009_vm2, %v4963_v14, %v14935_v7  ;;  %v5238_v58 = vsel %vm5138_vm3, %v5109_v35, %v14937_v18  ;;  %v5111_v61 = vsel %vm5009_vm2, %v4969_v4, %v14938_v51  ;;  %v14942_v1 = vld [vmem:[#allocation129_spill] sm:$0xff] }
 0x3fe   :  { %8268 = vst [vmem:[%s14335_s2 + $0x20] sm:$0xff] %v8128_v38   ;;  %v6811_v28 = vadd.f32 %v8347_v6, %v6810_v52  ;;  %v6944_v12 = vadd.f32 %v6943_v20, %v6881_v27  ;;  %4430 = vrot.lane.b32.xlu1 %v4303_v45, %s9041_s6  ;;  %v5113_v6 = vsel %vm5009_vm2, %v4972_v21, %v14936_v63 }
 0x3ff   :  { %4428 = vrot.lane.b32.xlu0 %v4296_v37, %s9041_s6  ;;  %v5236_v33 = vsel %vm5138_vm3, %v5107_v44, %v14939_v5  ;;  %v5242_v53 = vsel %vm5138_vm3, %v5113_v6, %v14940_v54  ;;  %v5367_v41 = vsel %vm5267_vm4, %v5238_v58, %v14941_v60  ;;  %v5240_v8 = vsel %vm5138_vm3, %v5111_v61, %v14942_v1 }
 0x400   :  { %v6945_v56 = vadd.f32 %v6944_v12, %v6882_v23  ;;  %v3319_v32 = vpop.permute.xlu1 %3318  ;;  %v6812_v57 = vadd.f32 %v8348_v2, %v6811_v28  ;;  %v5365_v37 = vsel %vm5267_vm4, %v5236_v33, %v14943_v50  ;;  %v5371_v22 = vsel %vm5267_vm4, %v5242_v53, %v14944_v29  ;;  %v14945_v12 = vld [vmem:[#allocation229_spill] sm:$0xff]  ;;  %v9023_v29 = vld [vmem:[%s14333_s0 + $0x208] sm:$0xf] }
 0x401   :  { %v3317_v3 = vpop.permute.xlu0 %3316  ;;  %v5496_v20 = vsel %vm5396_vm5, %v5367_v41, %v3315_v31  ;;  %v5494_v27 = vsel %vm5396_vm5, %v5365_v37, %v3313_v0  ;;  %v5369_v25 = vsel %vm5267_vm4, %v5240_v8, %v14945_v12  ;;  %v5500_v0 = vsel %vm5396_vm5, %v5371_v22, %v3319_v32  ;;  %v14946_v22 = vld [vmem:[#allocation6_spill] sm:$0xff] }
 0x402   :  { %4810 = vrot.lane.b32.xlu1 %v4685_v13, %s9042_s18  ;;  %v6946_v47 = vadd.f32 %v6945_v56, %v6883_v46  ;;  %v14948_v12 = vld [vmem:[#allocation122_spill] sm:$0xff] }
 0x403   :  { %4808 = vrot.lane.b32.xlu0 %v4684_v19, %s9042_s18 }
 0x404   :  { %v3635_v15 = vpop.permute.xlu1 %3634 }
 0x405   :  { %v3633_v16 = vpop.permute.xlu0 %3632  ;;  %v5625_v30 = vsel %vm5525_vm6, %v5496_v20, %v3635_v15  ;;  %v4978_v20 = vsel %vm4816_vm1, %v9023_v29, %v14946_v22 }
 0x406   :  { %4814 = vrot.lane.b32.xlu1 %v4687_v26, %s9042_s18  ;;  %v5623_v19 = vsel %vm5525_vm6, %v5494_v27, %v3633_v16  ;;  %v14947_v27 = vld [vmem:[#allocation7_spill] sm:$0xff] }
 0x407   :  { %4812 = vrot.lane.b32.xlu0 %v4686_v36, %s9042_s18 }
 0x408   :  { %v3639_v17 = vpop.permute.xlu1 %3638 }
 0x409   :  { %v3637_v42 = vpop.permute.xlu0 %3636 }
 0x40c   :  { %v4403_v48 = vpop.permute.xlu1 %4402 }
 0x40d   :  { %v4401_v39 = vpop.permute.xlu0 %4400  ;;  %v5754_v40 = vsel %vm5654_vm7, %v5625_v30, %v4403_v48 }
 0x40e   :  { %v5752_v15 = vsel %vm5654_vm7, %v5623_v19, %v4401_v39  ;;  %v14949_v19 = vld [vmem:[#allocation124_spill] sm:$0xff] }
 0x410   :  { %v8351_v2 = vpop.f32.mrb[12].mxu0  ;;  %v4407_v45 = vpop.permute.xlu1 %4406 }
 0x411   :  { %v6275_v38 = vpop.f32.mrb[13].mxu0  ;;  %v4405_v52 = vpop.permute.xlu0 %4404  ;;  %v6886_v43 = vmul.f32 %v8351_v2, %v8351_v2 }
 0x412   :  { %v6813_v13 = vadd.f32 %v6812_v57, %v6275_v38  ;;  %v6884_v23 = vmul.f32 %v6275_v38, %v6275_v38  ;;  %v8352_v28 = vpop.f32.mrb[14].mxu0  ;;  %v5498_v57 = vsel %vm5396_vm5, %v5369_v25, %v3317_v3  ;;  %v5629_v3 = vsel %vm5525_vm6, %v5500_v0, %v3639_v17 }
 0x413   :  { %v8143_v46 = vpack.c.bf16 %v8352_v28, %v8351_v2  ;;  %v6278_v56 = vpop.f32.mrb[15].mxu0  ;;  %v5627_v39 = vsel %vm5525_vm6, %v5498_v57, %v3637_v42  ;;  %v5758_v14 = vsel %vm5654_vm7, %v5629_v3, %v4407_v45  ;;  %v6887_v10 = vmul.f32 %v8352_v28, %v8352_v28  ;;  %v14952_v57 = vld [vmem:[#allocation230_spill] sm:$0xff] }
 0x414   :  { %v6947_v26 = vadd.f32 %v6946_v47, %v6884_v23  ;;  %v8138_v31 = vpack.c.bf16 %v6278_v56, %v6275_v38  ;;  %v6814_v36 = vadd.f32 %v6813_v13, %v6278_v56  ;;  %v6885_v24 = vmul.f32 %v6278_v56, %v6278_v56  ;;  %v4787_v59 = vpop.permute.xlu1 %4786 }
 0x415   :  { %8271 = vst [vmem:[%s14335_s2 + $0x38] sm:$0xff] %v8143_v46   ;;  %v5883_v16 = vsel %vm5783_vm8, %v5754_v40, %v4787_v59  ;;  %v4785_v48 = vpop.permute.xlu0 %4784  ;;  %v5756_v35 = vsel %vm5654_vm7, %v5627_v39, %v4405_v52  ;;  %v9024_v52 = vld [vmem:[%s14333_s0 + $0x200] sm:$0xf]  ;;  %v5117_v25 = vsel %vm5009_vm2, %v4978_v20, %v14948_v12  ;;  %v14950_v46 = vld [vmem:[#allocation131_spill] sm:$0xff]  ;;  %v14951_v59 = vld [vmem:[#allocation133_spill] sm:$0xff] }
 0x416   :  { %8270 = vst [vmem:[%s14335_s2 + $0x30] sm:$0xff] %v8138_v31   ;;  %v6815_v47 = vadd.f32 %v8351_v2, %v6814_v36  ;;  %v6948_v62 = vadd.f32 %v6947_v26, %v6885_v24  ;;  %v5881_v32 = vsel %vm5783_vm8, %v5752_v15, %v4785_v48  ;;  %v4975_v30 = vsel %vm4816_vm1, %v9024_v52, %v14947_v27  ;;  %v9025_v48 = vld [vmem:[%s14333_s0 + $0x218] sm:$0xf] }
 0x417   :  { %v7934_v34 = vcombine.low %v5881_v32, %v5883_v16  ;;  %v5115_v40 = vsel %vm5009_vm2, %v4975_v30, %v14949_v19  ;;  %v5246_v56 = vsel %vm5138_vm3, %v5117_v25, %v14950_v46 }
 0x418   :  { %v6949_v55 = vadd.f32 %v6948_v62, %v6886_v43  ;;  %v4791_v21 = vpop.permute.xlu1 %4790  ;;  %v6816_v11 = vadd.f32 %v8352_v28, %v6815_v47  ;;  %v5244_v0 = vsel %vm5138_vm3, %v5115_v40, %v14951_v59  ;;  %v5375_v15 = vsel %vm5267_vm4, %v5246_v56, %v14952_v57  ;;  %v14953_v43 = vld [vmem:[#allocation8_spill] sm:$0xff]  ;;  %v14954_v62 = vld [vmem:[#allocation231_spill] sm:$0xff] }
 0x419   :  { %v5887_v49 = vsel %vm5783_vm8, %v5758_v14, %v4791_v21  ;;  %8385 = vmatprep.mubr.msk.bf16.mxu1 %vm6092_vm9, %v7934_v34  ;;  %v4789_v9 = vpop.permute.xlu0 %4788  ;;  %v4984_v47 = vsel %vm4816_vm1, %v9025_v48, %v14953_v43  ;;  %v5373_v32 = vsel %vm5267_vm4, %v5244_v0, %v14954_v62  ;;  %v9026_v34 = vld [vmem:[%s14333_s0 + $0x210] sm:$0xf]  ;;  %v14955_v14 = vld [vmem:[#allocation9_spill] sm:$0xff] }
 0x41a   :  { %v5885_v4 = vsel %vm5783_vm8, %v5756_v35, %v4789_v9  ;;  %v6950_v7 = vadd.f32 %v6949_v55, %v6887_v10  ;;  %v4981_v10 = vsel %vm4816_vm1, %v9026_v34, %v14955_v14  ;;  %v14956_v55 = vld [vmem:[#allocation126_spill] sm:$0xff]  ;;  %v9027_v34 = vld [vmem:[%s14333_s0 + $0x238] sm:$0xf] }
 0x41b   :  { %v7935_v17 = vcombine.low %v5885_v4, %v5887_v49  ;;  %v5121_v21 = vsel %vm5009_vm2, %v4984_v47, %v14956_v55  ;;  %v14957_v49 = vld [vmem:[#allocation128_spill] sm:$0xff]  ;;  %v14958_v4 = vld [vmem:[#allocation135_spill] sm:$0xff]  ;;  %v14962_v14 = vld [vmem:[#allocation10_spill] sm:$0xff] }
 0x41c   :  { %v3323_v44 = vpop.permute.xlu1 %3322  ;;  %v5119_v9 = vsel %vm5009_vm2, %v4981_v10, %v14957_v49  ;;  %v4990_v10 = vsel %vm4816_vm1, %v9027_v34, %v14962_v14  ;;  %v9028_v55 = vld [vmem:[%s14333_s0 + $0x230] sm:$0xf] }
 0x41d   :  { %8386 = vmatmul.mubr.msk.bf16.gmra.mrb[16].mxu1 %vm6092_vm9, %v7935_v17  ;;  %v3321_v42 = vpop.permute.xlu0 %3320  ;;  %v5504_v3 = vsel %vm5396_vm5, %v5375_v15, %v3323_v44 }
 0x420   :  { %v3327_v63 = vpop.permute.xlu1 %3326 }
 0x421   :  { %v3325_v6 = vpop.permute.xlu0 %3324 }
 0x424   :  { %v3643_v18 = vpop.permute.xlu1 %3642 }
 0x425   :  { %v3641_v58 = vpop.permute.xlu0 %3640  ;;  %v5633_v35 = vsel %vm5525_vm6, %v5504_v3, %v3643_v18 }
 0x428   :  { %v8355_v51 = vpop.f32.mrb[16].mxu0  ;;  %v3647_v61 = vpop.permute.xlu1 %3646 }
 0x429   :  { %v6291_v5 = vpop.f32.mrb[17].mxu0  ;;  %v3645_v33 = vpop.permute.xlu0 %3644  ;;  %v6890_v13 = vmul.f32 %v8355_v51, %v8355_v51 }
 0x42a   :  { %v6817_v54 = vadd.f32 %v6816_v11, %v6291_v5  ;;  %v6888_v53 = vmul.f32 %v6291_v5, %v6291_v5  ;;  %v8356_v60 = vpop.f32.mrb[18].mxu0  ;;  %v5502_v11 = vsel %vm5396_vm5, %v5373_v32, %v3321_v42 }
 0x42b   :  { %v8153_v41 = vpack.c.bf16 %v8356_v60, %v8355_v51  ;;  %v6294_v2 = vpop.f32.mrb[19].mxu0  ;;  %v6891_v26 = vmul.f32 %v8356_v60, %v8356_v60  ;;  %v5631_v17 = vsel %vm5525_vm6, %v5502_v11, %v3641_v58 }
 0x42c   :  { %v6951_v45 = vadd.f32 %v6950_v7, %v6888_v53  ;;  %v8148_v1 = vpack.c.bf16 %v6294_v2, %v6291_v5  ;;  %v6818_v8 = vadd.f32 %v6817_v54, %v6294_v2  ;;  %v6889_v50 = vmul.f32 %v6294_v2, %v6294_v2  ;;  %v4411_v37 = vpop.permute.xlu1 %4410  ;;  %v14959_v5 = vld [vmem:[#allocation137_spill] sm:$0xff]  ;;  %v14960_v53 = vld [vmem:[#allocation232_spill] sm:$0xff] }
 0x42d   :  { %8273 = vst [vmem:[%s14335_s2 + $0x48] sm:$0xff] %v8153_v41   ;;  %v4409_v38 = vpop.permute.xlu0 %4408  ;;  %v5250_v7 = vsel %vm5138_vm3, %v5121_v21, %v14958_v4  ;;  %v5762_v44 = vsel %vm5654_vm7, %v5633_v35, %v4411_v37  ;;  %v5248_v54 = vsel %vm5138_vm3, %v5119_v9, %v14959_v5  ;;  %v14961_v2 = vld [vmem:[#allocation233_spill] sm:$0xff]  ;;  %v14963_v21 = vld [vmem:[#allocation11_spill] sm:$0xff]  ;;  %v14964_v35 = vld [vmem:[#allocation130_spill] sm:$0xff] }
 0x42e   :  { %8272 = vst [vmem:[%s14335_s2 + $0x40] sm:$0xff] %v8148_v1   ;;  %v6819_v23 = vadd.f32 %v8355_v51, %v6818_v8  ;;  %v6952_v28 = vadd.f32 %v6951_v45, %v6889_v50  ;;  %v5760_v42 = vsel %vm5654_vm7, %v5631_v17, %v4409_v38  ;;  %v5377_v45 = vsel %vm5267_vm4, %v5248_v54, %v14961_v2  ;;  %v14965_v9 = vld [vmem:[#allocation132_spill] sm:$0xff]  ;;  %v14968_v54 = vld [vmem:[#allocation234_spill] sm:$0xff]  ;;  %v14970_v2 = vld [vmem:[#allocation235_spill] sm:$0xff] }
 0x42f   :  { %v5506_v8 = vsel %vm5396_vm5, %v5377_v45, %v3325_v6  ;;  %v4987_v11 = vsel %vm4816_vm1, %v9028_v55, %v14963_v21  ;;  %v5125_v49 = vsel %vm5009_vm2, %v4990_v10, %v14964_v35 }
 0x430   :  { %v6953_v31 = vadd.f32 %v6952_v28, %v6890_v13  ;;  %v4415_v36 = vpop.permute.xlu1 %4414  ;;  %v6820_v24 = vadd.f32 %v8356_v60, %v6819_v23  ;;  %v5379_v60 = vsel %vm5267_vm4, %v5250_v7, %v14960_v53  ;;  %v5635_v29 = vsel %vm5525_vm6, %v5506_v8, %v3645_v33  ;;  %v14966_v7 = vld [vmem:[#allocation139_spill] sm:$0xff]  ;;  %v14971_v8 = vld [vmem:[#allocation13_spill] sm:$0xff] }
 0x431   :  { %v4413_v16 = vpop.permute.xlu0 %4412  ;;  %v5508_v1 = vsel %vm5396_vm5, %v5379_v60, %v3327_v63  ;;  %v5123_v4 = vsel %vm5009_vm2, %v4987_v11, %v14965_v9  ;;  %v5254_v17 = vsel %vm5138_vm3, %v5125_v49, %v14966_v7 }
 0x432   :  { %v6954_v39 = vadd.f32 %v6953_v31, %v6891_v26  ;;  %v5637_v50 = vsel %vm5525_vm6, %v5508_v1, %v3647_v61  ;;  %v5764_v38 = vsel %vm5654_vm7, %v5635_v29, %v4413_v16  ;;  %v5383_v53 = vsel %vm5267_vm4, %v5254_v17, %v14968_v54 }
 0x433   :  { %v5766_v22 = vsel %vm5654_vm7, %v5637_v50, %v4415_v36 }
 0x434   :  { %v4795_v51 = vpop.permute.xlu1 %4794 }
 0x435   :  { %v5891_v18 = vsel %vm5783_vm8, %v5762_v44, %v4795_v51  ;;  %v4793_v41 = vpop.permute.xlu0 %4792  ;;  %v14967_v51 = vld [vmem:[#allocation141_spill] sm:$0xff] }
 0x436   :  { %v5889_v58 = vsel %vm5783_vm8, %v5760_v42, %v4793_v41  ;;  %v5252_v5 = vsel %vm5138_vm3, %v5123_v4, %v14967_v51  ;;  %v9029_v42 = vld [vmem:[%s14333_s0 + $0x248] sm:$0xf] }
 0x437   :  { %v7936_v37 = vcombine.low %v5889_v58, %v5891_v18  ;;  %v14969_v18 = vld [vmem:[#allocation12_spill] sm:$0xff]  ;;  %v5381_v45 = vsel %vm5267_vm4, %v5252_v5, %v14970_v2  ;;  %v9030_v58 = vld [vmem:[%s14333_s0 + $0x240] sm:$0xf] }
 0x438   :  { %v4799_v20 = vpop.permute.xlu1 %4798  ;;  %v4996_v41 = vsel %vm4816_vm1, %v9029_v42, %v14969_v18  ;;  %v4993_v50 = vsel %vm4816_vm1, %v9030_v58, %v14971_v8  ;;  %v14978_v58 = vld [vmem:[#allocation14_spill] sm:$0xff] }
 0x439   :  { %v5895_v52 = vsel %vm5783_vm8, %v5766_v22, %v4799_v20  ;;  %8389 = vmatprep.mubr.msk.bf16.mxu1 %vm6092_vm9, %v7936_v37  ;;  %v4797_v27 = vpop.permute.xlu0 %4796  ;;  %v14972_v37 = vld [vmem:[#allocation134_spill] sm:$0xff] }
 0x43a   :  { %v5893_v63 = vsel %vm5783_vm8, %v5764_v38, %v4797_v27  ;;  %v5129_v29 = vsel %vm5009_vm2, %v4996_v41, %v14972_v37  ;;  %v14973_v38 = vld [vmem:[#allocation136_spill] sm:$0xff]  ;;  %v14974_v27 = vld [vmem:[#allocation143_spill] sm:$0xff] }
 0x43b   :  { %v7937_v30 = vcombine.low %v5893_v63, %v5895_v52  ;;  %v5127_v52 = vsel %vm5009_vm2, %v4993_v50, %v14973_v38  ;;  %v5258_v63 = vsel %vm5138_vm3, %v5129_v29, %v14974_v27  ;;  %v9032_v37 = vld [vmem:[%s14333_s0 + $0x250] sm:$0xf]  ;;  %v14979_v29 = vld [vmem:[#allocation15_spill] sm:$0xff]  ;;  %v14981_v27 = vld [vmem:[#allocation138_spill] sm:$0xff] }
 0x43c   :  { %v3331_v13 = vpop.permute.xlu1 %3330  ;;  %v14980_v38 = vld [vmem:[#allocation16_spill] sm:$0xff] }
 0x43d   :  { %8390 = vmatmul.mubr.msk.bf16.gmra.mrb[20].mxu1 %vm6092_vm9, %v7937_v30  ;;  %v3329_v6 = vpop.permute.xlu0 %3328  ;;  %v5512_v1 = vsel %vm5396_vm5, %v5383_v53, %v3331_v13 }
 0x43e   :  { %v5510_v22 = vsel %vm5396_vm5, %v5381_v45, %v3329_v6 }
 0x440   :  { %v8359_v61 = vpop.f32.mrb[20].mxu0  ;;  %v3335_v23 = vpop.permute.xlu1 %3334 }
 0x441   :  { %v6307_v33 = vpop.f32.mrb[21].mxu0  ;;  %v3333_v28 = vpop.permute.xlu0 %3332  ;;  %v6894_v57 = vmul.f32 %v8359_v61, %v8359_v61 }
 0x442   :  { %v6821_v12 = vadd.f32 %v6820_v24, %v6307_v33  ;;  %v6892_v25 = vmul.f32 %v6307_v33, %v6307_v33  ;;  %v8360_v19 = vpop.f32.mrb[22].mxu0 }
 0x443   :  { %v8163_v40 = vpack.c.bf16 %v8360_v19, %v8359_v61  ;;  %v6310_v46 = vpop.f32.mrb[23].mxu0  ;;  %v6895_v16 = vmul.f32 %v8360_v19, %v8360_v19 }
 0x444   :  { %v6955_v56 = vadd.f32 %v6954_v39, %v6892_v25  ;;  %v8158_v26 = vpack.c.bf16 %v6310_v46, %v6307_v33  ;;  %v6822_v31 = vadd.f32 %v6821_v12, %v6310_v46  ;;  %v6893_v36 = vmul.f32 %v6310_v46, %v6310_v46  ;;  %v3651_v59 = vpop.permute.xlu1 %3650  ;;  %v14975_v33 = vld [vmem:[#allocation145_spill] sm:$0xff]  ;;  %v14976_v25 = vld [vmem:[#allocation236_spill] sm:$0xff] }
 0x445   :  { %8275 = vst [vmem:[%s14335_s2 + $0x58] sm:$0xff] %v8163_v40   ;;  %v3649_v0 = vpop.permute.xlu0 %3648  ;;  %v5641_v20 = vsel %vm5525_vm6, %v5512_v1, %v3651_v59  ;;  %v5256_v12 = vsel %vm5138_vm3, %v5127_v52, %v14975_v33  ;;  %v9031_v1 = vld [vmem:[%s14333_s0 + $0x258] sm:$0xf]  ;;  %v14983_v33 = vld [vmem:[#allocation140_spill] sm:$0xff] }
 0x446   :  { %8274 = vst [vmem:[%s14335_s2 + $0x50] sm:$0xff] %v8158_v26   ;;  %v6823_v24 = vadd.f32 %v8359_v61, %v6822_v31  ;;  %v6956_v15 = vadd.f32 %v6955_v56, %v6893_v36  ;;  %v5639_v30 = vsel %vm5525_vm6, %v5510_v22, %v3649_v0  ;;  %v14977_v56 = vld [vmem:[#allocation237_spill] sm:$0xff]  ;;  %v5002_v8 = vsel %vm4816_vm1, %v9031_v1, %v14978_v58 }
 0x447   :  { %v5385_v26 = vsel %vm5267_vm4, %v5256_v12, %v14977_v56  ;;  %v4999_v22 = vsel %vm4816_vm1, %v9032_v37, %v14979_v29 }
 0x448   :  { %v6957_v48 = vadd.f32 %v6956_v15, %v6894_v57  ;;  %v3655_v43 = vpop.permute.xlu1 %3654  ;;  %v6824_v47 = vadd.f32 %v8360_v19, %v6823_v24  ;;  %v5387_v19 = vsel %vm5267_vm4, %v5258_v63, %v14976_v25  ;;  %v5514_v59 = vsel %vm5396_vm5, %v5385_v26, %v3333_v28  ;;  %v14984_v25 = vld [vmem:[#allocation142_spill] sm:$0xff]  ;;  %v14987_v26 = vld [vmem:[#allocation149_spill] sm:$0xff] }
 0x449   :  { %v3653_v62 = vpop.permute.xlu0 %3652  ;;  %v5516_v31 = vsel %vm5396_vm5, %v5387_v19, %v3335_v23  ;;  %v5133_v63 = vsel %vm5009_vm2, %v5002_v8, %v14981_v27  ;;  %v5131_v12 = vsel %vm5009_vm2, %v4999_v22, %v14983_v33 }
 0x44a   :  { %v6958_v32 = vadd.f32 %v6957_v48, %v6895_v16  ;;  %v5645_v0 = vsel %vm5525_vm6, %v5516_v31, %v3655_v43  ;;  %v5643_v24 = vsel %vm5525_vm6, %v5514_v59, %v3653_v62  ;;  %v5260_v31 = vsel %vm5138_vm3, %v5131_v12, %v14987_v26 }
 0x44c   :  { %v4419_v3 = vpop.permute.xlu1 %4418 }
 0x44d   :  { %v4417_v39 = vpop.permute.xlu0 %4416  ;;  %v5770_v13 = vsel %vm5654_vm7, %v5641_v20, %v4419_v3  ;;  %v9033_v20 = vld [vmem:[%s14333_s0 + $0x268] sm:$0xf] }
 0x44e   :  { %v5768_v6 = vsel %vm5654_vm7, %v5639_v30, %v4417_v39  ;;  %v5008_v52 = vsel %vm4816_vm1, %v9033_v20, %v14980_v38  ;;  %v9034_v30 = vld [vmem:[%s14333_s0 + $0x260] sm:$0xf] }
 0x44f   :  { %v5137_v19 = vsel %vm5009_vm2, %v5008_v52, %v14984_v25 }
 0x450   :  { %v4423_v44 = vpop.permute.xlu1 %4422 }
 0x451   :  { %v4421_v60 = vpop.permute.xlu0 %4420  ;;  %v5774_v15 = vsel %vm5654_vm7, %v5645_v0, %v4423_v44  ;;  %v14989_v0 = vld [vmem:[#allocation238_spill] sm:$0xff] }
 0x452   :  { %v5772_v3 = vsel %vm5654_vm7, %v5643_v24, %v4421_v60 }
 0x454   :  { %v4803_v61 = vpop.permute.xlu1 %4802 }
 0x455   :  { %v5899_v40 = vsel %vm5783_vm8, %v5770_v13, %v4803_v61  ;;  %v4801_v46 = vpop.permute.xlu0 %4800  ;;  %v14982_v13 = vld [vmem:[#allocation17_spill] sm:$0xff] }
 0x456   :  { %v5897_v36 = vsel %vm5783_vm8, %v5768_v6, %v4801_v46  ;;  %v5005_v61 = vsel %vm4816_vm1, %v9034_v30, %v14982_v13  ;;  %v14985_v6 = vld [vmem:[#allocation147_spill] sm:$0xff]  ;;  %v14986_v46 = vld [vmem:[#allocation144_spill] sm:$0xff] }
 0x457   :  { %v7938_v57 = vcombine.low %v5897_v36, %v5899_v40  ;;  %v5262_v40 = vsel %vm5138_vm3, %v5133_v63, %v14985_v6  ;;  %v5135_v56 = vsel %vm5009_vm2, %v5005_v61, %v14986_v46  ;;  %v14988_v36 = vld [vmem:[#allocation151_spill] sm:$0xff] }
 0x458   :  { %v8363_v16 = vpop.f32.mrb[24].mxu0  ;;  %v4807_v48 = vpop.permute.xlu1 %4806  ;;  %v5266_v59 = vsel %vm5138_vm3, %v5137_v19, %v14988_v36 }
 0x459   :  { %v5903_v39 = vsel %vm5783_vm8, %v5774_v15, %v4807_v48  ;;  %v6323_v34 = vpop.f32.mrb[25].mxu0  ;;  %8393 = vmatprep.mubr.msk.bf16.mxu1 %vm6092_vm9, %v7938_v57  ;;  %v4805_v23 = vpop.permute.xlu0 %4804  ;;  %v5391_v57 = vsel %vm5267_vm4, %v5262_v40, %v14989_v0 }
 0x45a   :  { %v6825_v14 = vadd.f32 %v6824_v47, %v6323_v34  ;;  %v6896_v10 = vmul.f32 %v6323_v34, %v6323_v34  ;;  %v5901_v28 = vsel %vm5783_vm8, %v5772_v3, %v4805_v23  ;;  %v8364_v43 = vpop.f32.mrb[26].mxu0  ;;  %v6898_v47 = vmul.f32 %v8363_v16, %v8363_v16  ;;  %v14991_v3 = vld [vmem:[#allocation239_spill] sm:$0xff] }
 0x45b   :  { %v7939_v55 = vcombine.low %v5901_v28, %v5903_v39  ;;  %v8173_v21 = vpack.c.bf16 %v8364_v43, %v8363_v16  ;;  %v6326_v62 = vpop.f32.mrb[27].mxu0  ;;  %v6899_v51 = vmul.f32 %v8364_v43, %v8364_v43  ;;  %v5389_v39 = vsel %vm5267_vm4, %v5260_v31, %v14991_v3 }
 0x45c   :  { %v6959_v11 = vadd.f32 %v6958_v32, %v6896_v10  ;;  %v8168_v35 = vpack.c.bf16 %v6326_v62, %v6323_v34  ;;  %v6826_v49 = vadd.f32 %v6825_v14, %v6326_v62  ;;  %v6897_v9 = vmul.f32 %v6326_v62, %v6326_v62  ;;  %v3339_v4 = vpop.permute.xlu1 %3338  ;;  %v14992_v34 = vld [vmem:[#allocation240_spill] sm:$0xff] }
 0x45d   :  { %8277 = vst [vmem:[%s14335_s2 + $0x68] sm:$0xff] %v8173_v21   ;;  %8394 = vmatmul.mubr.msk.bf16.gmra.mrb[24].mxu1 %vm6092_vm9, %v7939_v55  ;;  %v3337_v7 = vpop.permute.xlu0 %3336  ;;  %v5395_v23 = vsel %vm5267_vm4, %v5266_v59, %v14992_v34  ;;  %v5520_v14 = vsel %vm5396_vm5, %v5391_v57, %v3339_v4 }
 0x45e   :  { %8276 = vst [vmem:[%s14335_s2 + $0x60] sm:$0xff] %v8168_v35   ;;  %v6827_v17 = vadd.f32 %v8363_v16, %v6826_v49  ;;  %v6960_v44 = vadd.f32 %v6959_v11, %v6897_v9  ;;  %v14990_v16 = vld [vmem:[#allocation192_spill] sm:$0xff]  ;;  %v14993_v35 = vld [vmem:[#allocation241_spill] sm:$0xff] }
 0x45f   :  { %v5264_v48 = vsel %vm5138_vm3, %v5135_v56, %v14990_v16 }
 0x460   :  { %v6961_v32 = vadd.f32 %v6960_v44, %v6898_v47  ;;  %v3343_v5 = vpop.permute.xlu1 %3342  ;;  %v6828_v54 = vadd.f32 %v8364_v43, %v6827_v17  ;;  %v5518_v43 = vsel %vm5396_vm5, %v5389_v39, %v3337_v7  ;;  %v5393_v49 = vsel %vm5267_vm4, %v5264_v48, %v14993_v35 }
 0x461   :  { %v3341_v53 = vpop.permute.xlu0 %3340  ;;  %v5524_v7 = vsel %vm5396_vm5, %v5395_v23, %v3343_v5 }
 0x462   :  { %v6962_v60 = vadd.f32 %v6961_v32, %v6899_v51 }
 0x464   :  { %v3659_v42 = vpop.permute.xlu1 %3658 }
 0x465   :  { %v3657_v18 = vpop.permute.xlu0 %3656  ;;  %v5649_v55 = vsel %vm5525_vm6, %v5520_v14, %v3659_v42 }
 0x466   :  { %v5647_v9 = vsel %vm5525_vm6, %v5518_v43, %v3657_v18 }
 0x468   :  { %v3663_v41 = vpop.permute.xlu1 %3662 }
 0x469   :  { %v3661_v2 = vpop.permute.xlu0 %3660 }
 0x46c   :  { %v4427_v45 = vpop.permute.xlu1 %4426 }
 0x46d   :  { %v4425_v50 = vpop.permute.xlu0 %4424  ;;  %v5778_v47 = vsel %vm5654_vm7, %v5649_v55, %v4427_v45 }
 0x46e   :  { %v5776_v42 = vsel %vm5654_vm7, %v5647_v9, %v4425_v50 }
 0x470   :  { %v8367_v24 = vpop.f32.mrb[28].mxu0  ;;  %v4431_v15 = vpop.permute.xlu1 %4430 }
 0x471   :  { %v6339_v10 = vpop.f32.mrb[29].mxu0  ;;  %v4429_v28 = vpop.permute.xlu0 %4428  ;;  %v6902_v8 = vmul.f32 %v8367_v24, %v8367_v24 }
 0x472   :  { %v6829_v21 = vadd.f32 %v6828_v54, %v6339_v10  ;;  %v6900_v62 = vmul.f32 %v6339_v10, %v6339_v10  ;;  %v8368_v11 = vpop.f32.mrb[30].mxu0  ;;  %v5522_v54 = vsel %vm5396_vm5, %v5393_v49, %v3341_v53  ;;  %v5653_v53 = vsel %vm5525_vm6, %v5524_v7, %v3663_v41 }
 0x473   :  { %v8183_v17 = vpack.c.bf16 %v8368_v11, %v8367_v24  ;;  %v6342_v44 = vpop.f32.mrb[31].mxu0  ;;  %v5651_v50 = vsel %vm5525_vm6, %v5522_v54, %v3661_v2  ;;  %v5782_v22 = vsel %vm5654_vm7, %v5653_v53, %v4431_v15  ;;  %v6903_v20 = vmul.f32 %v8368_v11, %v8368_v11 }
 0x474   :  { %v6963_v51 = vadd.f32 %v6962_v60, %v6900_v62  ;;  %v8178_v4 = vpack.c.bf16 %v6342_v44, %v6339_v10  ;;  %v6830_v32 = vadd.f32 %v6829_v21, %v6342_v44  ;;  %v6901_v1 = vmul.f32 %v6342_v44, %v6342_v44  ;;  %v4811_v58 = vpop.permute.xlu1 %4810 }
 0x475   :  { %8279 = vst [vmem:[%s14335_s2 + $0x78] sm:$0xff] %v8183_v17   ;;  %v5907_v18 = vsel %vm5783_vm8, %v5778_v47, %v4811_v58  ;;  %v4809_v45 = vpop.permute.xlu0 %4808  ;;  %v5780_v63 = vsel %vm5654_vm7, %v5651_v50, %v4429_v28 }
 0x476   :  { %8278 = vst [vmem:[%s14335_s2 + $0x70] sm:$0xff] %v8178_v4   ;;  %v6831_v60 = vadd.f32 %v8367_v24, %v6830_v32  ;;  %v6964_v37 = vadd.f32 %v6963_v51, %v6901_v1  ;;  %v5905_v5 = vsel %vm5783_vm8, %v5776_v42, %v4809_v45 }
 0x477   :  { %v7940_v29 = vcombine.low %v5905_v5, %v5907_v18 }
 0x478   :  { %v6965_v38 = vadd.f32 %v6964_v37, %v6902_v8  ;;  %v4815_v52 = vpop.permute.xlu1 %4814  ;;  %v6832_v27 = vadd.f32 %v8368_v11, %v6831_v60 }
 0x479   :  { %v5911_v30 = vsel %vm5783_vm8, %v5782_v22, %v4815_v52  ;;  %8397 = vmatprep.mubr.msk.bf16.mxu1 %vm6092_vm9, %v7940_v29  ;;  %v4813_v13 = vpop.permute.xlu0 %4812 }
 0x47a   :  { %v5909_v61 = vsel %vm5783_vm8, %v5780_v63, %v4813_v13  ;;  %v6966_v33 = vadd.f32 %v6965_v38, %v6903_v20 }
 0x47b   :  { %v7941_v41 = vcombine.low %v5909_v61, %v5911_v30 }
 0x47d   :  { %8398 = vmatmul.mubr.msk.bf16.gmra.mrb[28].mxu1 %vm6092_vm9, %v7941_v41 }
 0x488   :  { %v8371_v2 = vpop.f32.mrb[0].mxu1 }
 0x489   :  { %v6355_v12 = vpop.f32.mrb[1].mxu1  ;;  %v6906_v59 = vmul.f32 %v8371_v2, %v8371_v2 }
 0x48a   :  { %v6833_v25 = vadd.f32 %v6832_v27, %v6355_v12  ;;  %v6904_v19 = vmul.f32 %v6355_v12, %v6355_v12  ;;  %v8372_v6 = vpop.f32.mrb[2].mxu1 }
 0x48b   :  { %v8193_v40 = vpack.c.bf16 %v8372_v6, %v8371_v2  ;;  %v6358_v46 = vpop.f32.mrb[3].mxu1  ;;  %v6907_v24 = vmul.f32 %v8372_v6, %v8372_v6 }
 0x48c   :  { %v6967_v56 = vadd.f32 %v6966_v33, %v6904_v19  ;;  %v8188_v26 = vpack.c.bf16 %v6358_v46, %v6355_v12  ;;  %v6834_v31 = vadd.f32 %v6833_v25, %v6358_v46  ;;  %v6905_v36 = vmul.f32 %v6358_v46, %v6358_v46 }
 0x48d   :  { %8281 = vst [vmem:[%s14335_s2 + $0x88] sm:$0xff] %v8193_v40  }
 0x48e   :  { %8280 = vst [vmem:[%s14335_s2 + $0x80] sm:$0xff] %v8188_v26   ;;  %v6835_v0 = vadd.f32 %v8371_v2, %v6834_v31  ;;  %v6968_v57 = vadd.f32 %v6967_v56, %v6905_v36 }
 0x490   :  { %v6969_v15 = vadd.f32 %v6968_v57, %v6906_v59  ;;  %v6836_v16 = vadd.f32 %v8372_v6, %v6835_v0 }
 0x492   :  { %v6970_v48 = vadd.f32 %v6969_v15, %v6907_v24 }
 0x4a0   :  { %v8375_v3 = vpop.f32.mrb[4].mxu1 }
 0x4a1   :  { %v6371_v39 = vpop.f32.mrb[5].mxu1  ;;  %v6910_v11 = vmul.f32 %v8375_v3, %v8375_v3 }
 0x4a2   :  { %v6837_v34 = vadd.f32 %v6836_v16, %v6371_v39  ;;  %v6908_v23 = vmul.f32 %v6371_v39, %v6371_v39  ;;  %v8376_v14 = vpop.f32.mrb[6].mxu1 }
 0x4a3   :  { %v8203_v10 = vpack.c.bf16 %v8376_v14, %v8375_v3  ;;  %v6374_v28 = vpop.f32.mrb[7].mxu1  ;;  %v6911_v9 = vmul.f32 %v8376_v14, %v8376_v14 }
 0x4a4   :  { %v6971_v43 = vadd.f32 %v6970_v48, %v6908_v23  ;;  %v8198_v55 = vpack.c.bf16 %v6374_v28, %v6371_v39  ;;  %v6838_v21 = vadd.f32 %v6837_v34, %v6374_v28  ;;  %v6909_v62 = vmul.f32 %v6374_v28, %v6374_v28 }
 0x4a5   :  { %8283 = vst [vmem:[%s14335_s2 + $0x98] sm:$0xff] %v8203_v10  }
 0x4a6   :  { %8282 = vst [vmem:[%s14335_s2 + $0x90] sm:$0xff] %v8198_v55   ;;  %v6839_v35 = vadd.f32 %v8375_v3, %v6838_v21  ;;  %v6972_v49 = vadd.f32 %v6971_v43, %v6909_v62 }
 0x4a8   :  { %v6973_v47 = vadd.f32 %v6972_v49, %v6910_v11  ;;  %v6840_v17 = vadd.f32 %v8376_v14, %v6839_v35 }
 0x4aa   :  { %v6974_v44 = vadd.f32 %v6973_v47, %v6911_v9 }
 0x4b8   :  { %v8379_v51 = vpop.f32.mrb[8].mxu1 }
 0x4b9   :  { %v6387_v4 = vpop.f32.mrb[9].mxu1  ;;  %v6914_v60 = vmul.f32 %v8379_v51, %v8379_v51 }
 0x4ba   :  { %v6841_v32 = vadd.f32 %v6840_v17, %v6387_v4  ;;  %v6912_v1 = vmul.f32 %v6387_v4, %v6387_v4  ;;  %v8380_v58 = vpop.f32.mrb[10].mxu1 }
 0x4bb   :  { %v8213_v7 = vpack.c.bf16 %v8380_v58, %v8379_v51  ;;  %v6390_v54 = vpop.f32.mrb[11].mxu1  ;;  %v6915_v53 = vmul.f32 %v8380_v58, %v8380_v58 }
 0x4bc   :  { %v6975_v42 = vadd.f32 %v6974_v44, %v6912_v1  ;;  %v8208_v18 = vpack.c.bf16 %v6390_v54, %v6387_v4  ;;  %v6842_v45 = vadd.f32 %v6841_v32, %v6390_v54  ;;  %v6913_v8 = vmul.f32 %v6390_v54, %v6390_v54 }
 0x4bd   :  { %8285 = vst [vmem:[%s14335_s2 + $0xa8] sm:$0xff] %v8213_v7  }
 0x4be   :  { %8284 = vst [vmem:[%s14335_s2 + $0xa0] sm:$0xff] %v8208_v18   ;;  %v6843_v37 = vadd.f32 %v8379_v51, %v6842_v45  ;;  %v6976_v5 = vadd.f32 %v6975_v42, %v6913_v8 }
 0x4c0   :  { %v6977_v50 = vadd.f32 %v6976_v5, %v6914_v60  ;;  %v6844_v29 = vadd.f32 %v8380_v58, %v6843_v37 }
 0x4c2   :  { %v6978_v22 = vadd.f32 %v6977_v50, %v6915_v53 }
 0x4d0   :  { %v8383_v20 = vpop.f32.mrb[12].mxu1 }
 0x4d1   :  { %v6403_v38 = vpop.f32.mrb[13].mxu1  ;;  %v6918_v12 = vmul.f32 %v8383_v20, %v8383_v20 }
 0x4d2   :  { %v6845_v52 = vadd.f32 %v6844_v29, %v6403_v38  ;;  %v6916_v27 = vmul.f32 %v6403_v38, %v6403_v38  ;;  %v8384_v63 = vpop.f32.mrb[14].mxu1 }
 0x4d3   :  { %v8223_v30 = vpack.c.bf16 %v8384_v63, %v8383_v20  ;;  %v6406_v13 = vpop.f32.mrb[15].mxu1  ;;  %v6919_v6 = vmul.f32 %v8384_v63, %v8384_v63 }
 0x4d4   :  { %v6979_v61 = vadd.f32 %v6978_v22, %v6916_v27  ;;  %v8218_v33 = vpack.c.bf16 %v6406_v13, %v6403_v38  ;;  %v6846_v41 = vadd.f32 %v6845_v52, %v6406_v13  ;;  %v6917_v2 = vmul.f32 %v6406_v13, %v6406_v13 }
 0x4d5   :  { %8287 = vst [vmem:[%s14335_s2 + $0xb8] sm:$0xff] %v8223_v30  }
 0x4d6   :  { %8286 = vst [vmem:[%s14335_s2 + $0xb0] sm:$0xff] %v8218_v33   ;;  %v6847_v25 = vadd.f32 %v8383_v20, %v6846_v41  ;;  %v6980_v19 = vadd.f32 %v6979_v61, %v6917_v2 }
 0x4d8   :  { %v6981_v40 = vadd.f32 %v6980_v19, %v6918_v12  ;;  %v6848_v46 = vadd.f32 %v8384_v63, %v6847_v25 }
 0x4da   :  { %v6982_v56 = vadd.f32 %v6981_v40, %v6919_v6 }
 0x4f0   :  { %v8387_v26 = vpop.f32.mrb[16].mxu1 }
 0x4f1   :  { %v6419_v31 = vpop.f32.mrb[17].mxu1  ;;  %v6922_v39 = vmul.f32 %v8387_v26, %v8387_v26 }
 0x4f2   :  { %v6849_v36 = vadd.f32 %v6848_v46, %v6419_v31  ;;  %v6920_v59 = vmul.f32 %v6419_v31, %v6419_v31  ;;  %v8388_v0 = vpop.f32.mrb[18].mxu1 }
 0x4f3   :  { %v8233_v57 = vpack.c.bf16 %v8388_v0, %v8387_v26  ;;  %v6422_v24 = vpop.f32.mrb[19].mxu1  ;;  %v6923_v14 = vmul.f32 %v8388_v0, %v8388_v0 }
 0x4f4   :  { %v6983_v15 = vadd.f32 %v6982_v56, %v6920_v59  ;;  %v8228_v16 = vpack.c.bf16 %v6422_v24, %v6419_v31  ;;  %v6850_v48 = vadd.f32 %v6849_v36, %v6422_v24  ;;  %v6921_v3 = vmul.f32 %v6422_v24, %v6422_v24 }
 0x4f5   :  { %8289 = vst [vmem:[%s14335_s2 + $0xc8] sm:$0xff] %v8233_v57  }
 0x4f6   :  { %8288 = vst [vmem:[%s14335_s2 + $0xc0] sm:$0xff] %v8228_v16   ;;  %v6851_v34 = vadd.f32 %v8387_v26, %v6850_v48  ;;  %v6984_v23 = vadd.f32 %v6983_v15, %v6921_v3 }
 0x4f8   :  { %v6985_v10 = vadd.f32 %v6984_v23, %v6922_v39  ;;  %v6852_v28 = vadd.f32 %v8388_v0, %v6851_v34 }
 0x4fa   :  { %v6986_v43 = vadd.f32 %v6985_v10, %v6923_v14 }
 0x510   :  { %v8391_v55 = vpop.f32.mrb[20].mxu1 }
 0x511   :  { %v6435_v21 = vpop.f32.mrb[21].mxu1  ;;  %v6926_v4 = vmul.f32 %v8391_v55, %v8391_v55 }
 0x512   :  { %v6853_v62 = vadd.f32 %v6852_v28, %v6435_v21  ;;  %v6924_v11 = vmul.f32 %v6435_v21, %v6435_v21  ;;  %v8392_v35 = vpop.f32.mrb[22].mxu1 }
 0x513   :  { %v8243_v49 = vpack.c.bf16 %v8392_v35, %v8391_v55  ;;  %v6438_v9 = vpop.f32.mrb[23].mxu1  ;;  %v6927_v58 = vmul.f32 %v8392_v35, %v8392_v35 }
 0x514   :  { %v6987_v47 = vadd.f32 %v6986_v43, %v6924_v11  ;;  %v8238_v17 = vpack.c.bf16 %v6438_v9, %v6435_v21  ;;  %v6854_v44 = vadd.f32 %v6853_v62, %v6438_v9  ;;  %v6925_v51 = vmul.f32 %v6438_v9, %v6438_v9 }
 0x515   :  { %8291 = vst [vmem:[%s14335_s2 + $0xd8] sm:$0xff] %v8243_v49  }
 0x516   :  { %8290 = vst [vmem:[%s14335_s2 + $0xd0] sm:$0xff] %v8238_v17   ;;  %v6855_v32 = vadd.f32 %v8391_v55, %v6854_v44  ;;  %v6988_v1 = vadd.f32 %v6987_v47, %v6925_v51 }
 0x518   :  { %v6989_v7 = vadd.f32 %v6988_v1, %v6926_v4  ;;  %v6856_v54 = vadd.f32 %v8392_v35, %v6855_v32 }
 0x51a   :  { %v6990_v42 = vadd.f32 %v6989_v7, %v6927_v58 }
 0x530   :  { %v8395_v18 = vpop.f32.mrb[24].mxu1 }
 0x531   :  { %v6451_v45 = vpop.f32.mrb[25].mxu1  ;;  %v6930_v38 = vmul.f32 %v8395_v18, %v8395_v18 }
 0x532   :  { %v6857_v8 = vadd.f32 %v6856_v54, %v6451_v45  ;;  %v6928_v60 = vmul.f32 %v6451_v45, %v6451_v45  ;;  %v8396_v37 = vpop.f32.mrb[26].mxu1 }
 0x533   :  { %v8253_v5 = vpack.c.bf16 %v8396_v37, %v8395_v18  ;;  %v6454_v53 = vpop.f32.mrb[27].mxu1  ;;  %v6931_v63 = vmul.f32 %v8396_v37, %v8396_v37 }
 0x534   :  { %v6991_v50 = vadd.f32 %v6990_v42, %v6928_v60  ;;  %v8248_v29 = vpack.c.bf16 %v6454_v53, %v6451_v45  ;;  %v6858_v22 = vadd.f32 %v6857_v8, %v6454_v53  ;;  %v6929_v20 = vmul.f32 %v6454_v53, %v6454_v53 }
 0x535   :  { %8293 = vst [vmem:[%s14335_s2 + $0xe8] sm:$0xff] %v8253_v5  }
 0x536   :  { %8292 = vst [vmem:[%s14335_s2 + $0xe0] sm:$0xff] %v8248_v29   ;;  %v6859_v52 = vadd.f32 %v8395_v18, %v6858_v22  ;;  %v6992_v27 = vadd.f32 %v6991_v50, %v6929_v20 }
 0x538   :  { %v6993_v30 = vadd.f32 %v6992_v27, %v6930_v38  ;;  %v6860_v13 = vadd.f32 %v8396_v37, %v6859_v52 }
 0x53a   :  { %v6994_v61 = vadd.f32 %v6993_v30, %v6931_v63 }
 0x550   :  { %v8399_v33 = vpop.f32.mrb[28].mxu1 }
 0x551   :  { %v6467_v41 = vpop.f32.mrb[29].mxu1  ;;  %v6934_v31 = vmul.f32 %v8399_v33, %v8399_v33 }
 0x552   :  { %v6861_v2 = vadd.f32 %v6860_v13, %v6467_v41  ;;  %v6932_v12 = vmul.f32 %v6467_v41, %v6467_v41  ;;  %v8400_v25 = vpop.f32.mrb[30].mxu1 }
 0x553   :  { %v8263_v19 = vpack.c.bf16 %v8400_v25, %v8399_v33  ;;  %v6470_v6 = vpop.f32.mrb[31].mxu1  ;;  %v6935_v0 = vmul.f32 %v8400_v25, %v8400_v25 }
 0x554   :  { %v6995_v40 = vadd.f32 %v6994_v61, %v6932_v12  ;;  %v8258_v46 = vpack.c.bf16 %v6470_v6, %v6467_v41  ;;  %v6862_v56 = vadd.f32 %v6861_v2, %v6470_v6  ;;  %v6933_v26 = vmul.f32 %v6470_v6, %v6470_v6 }
 0x555   :  { %8295 = vst [vmem:[%s14335_s2 + $0xf8] sm:$0xff] %v8263_v19  }
 0x556   :  { %8294 = vst [vmem:[%s14335_s2 + $0xf0] sm:$0xff] %v8258_v46   ;;  %v6863_v36 = vadd.f32 %v8399_v33, %v6862_v56  ;;  %v6996_v59 = vadd.f32 %v6995_v40, %v6933_v26 }
 0x558   :  { %v6864_v57 = vadd.f32 %v8400_v25, %v6863_v36  ;;  %v6997_v24 = vadd.f32 %v6996_v59, %v6934_v31 }
 0x55a   :  { %v6865_v15 = vrot.slane %v6864_v57, 4  ;;  %v6998_v16 = vadd.f32 %v6997_v24, %v6935_v0 }
 0x55c   :  { %v6866_v48 = vadd.f32 %v6865_v15, %v6864_v57  ;;  %v6999_v3 = vrot.slane %v6998_v16, 4 }
 0x55e   :  { %v6867_v39 = vrot.slane %v6866_v48, 2  ;;  %v7000_v34 = vadd.f32 %v6999_v3, %v6998_v16 }
 0x560   :  { %v6868_v23 = vadd.f32 %v6867_v39, %v6866_v48  ;;  %v7001_v14 = vrot.slane %v7000_v34, 2 }
 0x562   :  { %v6869_v10 = vrot.slane %v6868_v23, 1  ;;  %v7002_v28 = vadd.f32 %v7001_v14, %v7000_v34 }
 0x564   :  { %v6870_v43 = vadd.f32 %v6869_v10, %v6868_v23  ;;  %v7003_v55 = vrot.slane %v7002_v28, 1 }
 0x566   :  { %6871 = vst [vmem:[%s14336_s3] sm:$0x1] %v6870_v43  ;;  %v7004_v21 = vadd.f32 %v7003_v55, %v7002_v28 }
 0x568   :  { %7005 = vst [vmem:[%s14336_s3 + $0x1] sm:$0x1] %v7004_v21 }

</bundles_post_ra>
